<compile_context>
chip_gen: v5e
topology: v5e:2x2
jax: 0.10.0
libtpu: 0.0.40
codegen_flags: <defaults>
</compile_context>

<pallas_src>
import functools
import math

import numpy as np
import jax
import jax.numpy as jnp
from jax.experimental import pallas as pl
from jax.experimental.pallas import tpu as pltpu

MATMUL_PRECISION = jax.lax.Precision.HIGHEST
LN_EPS = 1e-4


# --------------------------- in-kernel helpers ------------------------------

def _mm(a, b):
    """(M,K)@(K,N) matmul on the MXU, f32 accumulate."""
    return jax.lax.dot_general(a, b, (((1,), (0,)), ((), ())),
                               precision=MATMUL_PRECISION,
                               preferred_element_type=jnp.float32)


def _mm_tb(a, b):
    """Contract last dims of both operands: out[i, j] = sum_k a[i,k] b[j,k]."""
    return jax.lax.dot_general(a, b, (((1,), (1,)), ((), ())),
                               precision=MATMUL_PRECISION,
                               preferred_element_type=jnp.float32)


def _eye(n):
    r = jax.lax.broadcasted_iota(jnp.int32, (n, n), 0)
    c = jax.lax.broadcasted_iota(jnp.int32, (n, n), 1)
    return jnp.where(r == c, jnp.float32(1.0), jnp.float32(0.0))


def _swap12(x, tb, rows, cols, use_xlu, eye=None):
    """Per-sample transpose of a flat (tb*rows, cols) slab -> (tb*cols, rows).

    Fast path: one 3-D XLU transpose (probed for support at setup time).
    Fallback : per-sample identity-matmul transpose (proven on all generations),
               with the eye built once per program by the caller.
    """
    if use_xlu:
        return jnp.swapaxes(x.reshape(tb, rows, cols), 1, 2).reshape(tb * cols, rows)
    parts = [_mm_tb(eye, x[b * rows:(b + 1) * rows, :]) for b in range(tb)]
    return parts[0] if tb == 1 else jnp.concatenate(parts, axis=0)


def _tile_rows(m, tb):
    """Tile a (T, H) block tb times along rows -> (tb*T, H)."""
    return m if tb == 1 else jnp.concatenate([m] * tb, axis=0)


def _lru_scan(bx, vec, lam_off, n_levels, tb, T):
    """log2 (Hillis-Steele) complex prefix scan, vectorized over batch & time.

    bx : (tb*T, 2H) with [:, :H] = real driving input, [:, H:] = imag part,
         rows laid out sample-major (row = b*T + t).
    vec: packed per-path vector table; rows [lam_off .. lam_off+L-1] hold Re(lam^(2^k)),
         rows [lam_off+L .. lam_off+2L-1] hold Im(lam^(2^k)).
    Returns Re(prefix scan) of shape (tb*T, H); the lam^t*h0 term is added by the caller.
    """
    H = bx.shape[1] // 2
    hr = bx[:, :H]
    hi = bx[:, H:]
    if n_levels == 0:
        return hr
    # per-row time index within its own sample (so shifts never leak across samples)
    t_idx = jax.lax.broadcasted_iota(jnp.int32, (tb, T, 1), 1).reshape(tb * T, 1)
    for k in range(n_levels):
        s = 1 << k
        lr = vec[lam_off + k: lam_off + k + 1, :]                    # (1, H)
        li = vec[lam_off + n_levels + k: lam_off + n_levels + k + 1, :]
        zpad = jnp.zeros((s, H), jnp.float32)
        sr = jnp.concatenate([zpad, hr[: tb * T - s, :]], axis=0)    # shift down by s
        si = jnp.concatenate([zpad, hi[: tb * T - s, :]], axis=0)
        keep = t_idx >= s
        sr = jnp.where(keep, sr, 0.0)
        si = jnp.where(keep, si, 0.0)
        hr = hr + lr * sr - li * si
        hi = hi + lr * si + li * sr
    return hr


def _layernorm(z, gamma, beta, eps):
    m = jnp.mean(z, axis=-1, keepdims=True)
    v = jnp.mean(jnp.square(z - m), axis=-1, keepdims=True)
    return (z - m) * jax.lax.rsqrt(v + eps) * gamma + beta


# ------------------------------ fused kernel --------------------------------

def _block_fst_kernel(alpha_ref,            # SMEM (2*nblk,): sigmoid(alpha) [seq, fea] / block
                      x_ref,                # (TB, S, INP)  batch tile
                      fin_w1_ref,           # (INP, F)
                      fin_b_ref,            # (2, F)        rows: b1, b2
                      fin_w2_ref,           # (F, F)
                      seq_rnn_w_ref,        # (nblk, S, 2S) [B_real|B_img] * delta
                      seq_w1_ref,           # (nblk, S, S)
                      seq_w2_ref,           # (nblk, S, S)
                      seq_vec_ref,          # (nblk, 4+2L_s, S) rows: b1,b2,ln_g,ln_b,lam pows
                      seq_h0c_ref,          # (nblk, F, S)  Re(lam^t * h0)
                      fea_rnn_w_ref,        # (nblk, F, 2F)
                      fea_w1_ref,           # (nblk, F, F)
                      fea_w2_ref,           # (nblk, F, F)
                      fea_vec_ref,          # (nblk, 4+2L_f, F)
                      fea_h0c_ref,          # (nblk, S, F)
                      fout_w_ref,           # (F, OUT)
                      fout_b_ref,           # (1, OUT)
                      o_ref,                # (TB, S, OUT)
                      *, nblk, eps, tb, n_lev_seq, n_lev_fea, use_xlu_t):
    TB, S, INP = x_ref.shape
    F = fin_w1_ref.shape[1]
    OUT = fout_w_ref.shape[1]

    eye_s = eye_f = None
    if not use_xlu_t:                      # hoisted: built once per program, only if needed
        eye_s = _eye(S)
        eye_f = _eye(F)

    # ---- feature_in MLP on the flattened (TB*S, .) slab ----
    x2 = x_ref[...].reshape(tb * S, INP)
    fb = fin_b_ref[...]                                             # (2, F)
    h = jnp.maximum(_mm(x2, fin_w1_ref[...]) + fb[0:1, :], 0.0)
    h = _mm(h, fin_w2_ref[...]) + fb[1:2, :]                        # (TB*S, F)

    for i in range(nblk):                                           # static unroll over blocks
        # -------- sequence path: per-sample transposed layout, flat (TB*F, S) --------
        sv = seq_vec_ref[i]                                         # (4+2L_s, S)
        h_t = _swap12(h, tb, S, F, use_xlu_t, eye_f)                # (TB*F, S) == per-sample h.T
        bx = _mm(h_t, seq_rnn_w_ref[i])                             # (TB*F, 2S): real|imag
        hs = _lru_scan(bx, sv, 4, n_lev_seq, tb, F) \
            + _tile_rows(seq_h0c_ref[i], tb)                        # (TB*F, S)
        f1 = jnp.maximum(_mm(hs, seq_w1_ref[i]) + sv[0:1, :], 0.0)
        f2 = _mm(f1, seq_w2_ref[i]) + sv[1:2, :]
        a = alpha_ref[2 * i]                                        # scalar from SMEM
        z = a * f2 + (1.0 - a) * h_t
        xs_t = _layernorm(z, sv[2:3, :], sv[3:4, :], eps)           # (TB*F, S)
        xs = _swap12(xs_t, tb, F, S, use_xlu_t, eye_s)              # (TB*S, F)

        # -------- feature path: natural layout, flat (TB*S, F) --------
        fv = fea_vec_ref[i]                                         # (4+2L_f, F)
        bx2 = _mm(xs, fea_rnn_w_ref[i])                             # (TB*S, 2F)
        g = _lru_scan(bx2, fv, 4, n_lev_fea, tb, S) \
            + _tile_rows(fea_h0c_ref[i], tb)                        # (TB*S, F)
        g1 = jnp.maximum(_mm(g, fea_w1_ref[i]) + fv[0:1, :], 0.0)
        g2 = _mm(g1, fea_w2_ref[i]) + fv[1:2, :]
        a2 = alpha_ref[2 * i + 1]
        z2 = a2 * g2 + (1.0 - a2) * xs
        h = _layernorm(z2, fv[2:3, :], fv[3:4, :], eps)             # (TB*S, F)

    # ---- feature_out ----
    o = _mm(h, fout_w_ref[...]) + fout_b_ref[...]                   # (TB*S, OUT)
    o_ref[...] = o.reshape(tb, S, OUT)


# ------------------ XLU-transpose support probe (one-time) -------------------

@functools.lru_cache(maxsize=None)
def _swap_probe(shape):
    """True iff a (b, r, c) -> (b, c, r) in-kernel jnp.swapaxes lowers & runs correctly."""
    b, r, c = shape

    def k(x_ref, o_ref):
        o_ref[...] = jnp.swapaxes(x_ref[...], 1, 2)

    try:
        fn = pl.pallas_call(k, out_shape=jax.ShapeDtypeStruct((b, c, r), jnp.float32))
        x = jnp.arange(b * r * c, dtype=jnp.float32).reshape(shape)
        y = jax.block_until_ready(fn(x))
        return bool(jnp.allclose(y, jnp.swapaxes(x, 1, 2)))
    except Exception:
        return False


# ------------------------------- entry point ---------------------------------

def block_fst_forward(x, packed):
    """Block_FST.forward.  x: (B, S, inp_size) -> (B, S, out_size)."""
    B, S, INP = x.shape
    F = packed["fin_w1"].shape[1]
    OUT = packed["fout_w"].shape[1]
    nblk = packed["seq_rnn_w"].shape[0]
    n_lev_seq = (packed["seq_vec"].shape[1] - 4) // 2
    n_lev_fea = (packed["fea_vec"].shape[1] - 4) // 2

    # Batch tile: fewer, fatter grid steps (single-TC v5e/v6e win); for B>=16 the grid stays
    # >=2 so both v7x TensorCores get work.  VMEM is never the constraint at these shapes.
    TB = B if B <= 8 else 8
    Bp = ((B + TB - 1) // TB) * TB
    xp = x if Bp == B else jnp.concatenate(
        [x, jnp.zeros((Bp - B, S, INP), x.dtype)], axis=0)

    use_xlu_t = _swap_probe((TB, S, F)) and _swap_probe((TB, F, S))

    kernel = functools.partial(_block_fst_kernel, nblk=nblk, eps=LN_EPS, tb=TB,
                               n_lev_seq=n_lev_seq, n_lev_fea=n_lev_fea,
                               use_xlu_t=use_xlu_t)

    def full(arr):                        # whole array resident, same block every grid step
        nd = arr.ndim
        return pl.BlockSpec(arr.shape, lambda b: (0,) * nd)

    weight_names = ["fin_w1", "fin_b", "fin_w2",
                    "seq_rnn_w", "seq_w1", "seq_w2", "seq_vec", "seq_h0c",
                    "fea_rnn_w", "fea_w1", "fea_w2", "fea_vec", "fea_h0c",
                    "fout_w", "fout_b"]
    weights = [packed[k] for k in weight_names]

    in_specs = ([pl.BlockSpec(memory_space=pltpu.MemorySpace.SMEM),       # skip-gate scalars
                 pl.BlockSpec((TB, S, INP), lambda b: (b, 0, 0))]         # batch tile / program
                + [full(w) for w in weights])
    out_specs = pl.BlockSpec((TB, S, OUT), lambda b: (b, 0, 0))

    out = pl.pallas_call(
        kernel,
        grid=(Bp // TB,),
        in_specs=in_specs,
        out_specs=out_specs,
        out_shape=jax.ShapeDtypeStruct((Bp, S, OUT), jnp.float32),
        compiler_params=pltpu.CompilerParams(
            dimension_semantics=("parallel",),      # batch-tile axis -> both TCs on v7x
        ),
    )(packed["alphas"], xp, *weights)
    return out[:B] if Bp != B else out


# ------------------------- parameter init & packing -------------------------

def init_linear(key, fan_in, fan_out):
    kw, kb = jax.random.split(key)
    lim = 1.0 / math.sqrt(fan_in)
    w = jax.random.uniform(kw, (fan_in, fan_out), jnp.float32, -lim, lim)
    b = jax.random.uniform(kb, (fan_out,), jnp.float32, -lim, lim)
    return w, b


def init_lru(key, din, hid):
    k = jax.random.split(key, 6)
    nu = jnp.log(-jnp.log(jax.random.uniform(k[0], (hid,), jnp.float32, 0.999, 0.9999)))
    theta = jax.random.uniform(k[1], (hid,), jnp.float32, 0.0, math.pi / 10)
    delta = jnp.sqrt(1.0 - jnp.exp(-jnp.exp(nu)))
    return dict(
        B_real=jax.random.normal(k[2], (din, hid), jnp.float32) * 0.5,
        B_img=jax.random.normal(k[3], (din, hid), jnp.float32) * 0.5,
        nu=nu, theta=theta, delta=delta,
        h0_real=jax.random.normal(k[4], (hid,), jnp.float32),
        h0_img=jax.random.normal(k[5], (hid,), jnp.float32),
    )


def init_fst(key, S, F):
    ks = jax.random.split(key, 6)
    sw1, sb1 = init_linear(ks[0], S, S)
    sw2, sb2 = init_linear(ks[1], S, S)
    fw1, fb1 = init_linear(ks[2], F, F)
    fw2, fb2 = init_linear(ks[3], F, F)
    return dict(
        seq_rnn=init_lru(ks[4], S, S), fea_rnn=init_lru(ks[5], F, F),
        seq_w1=sw1, seq_b1=sb1, seq_w2=sw2, seq_b2=sb2,
        fea_w1=fw1, fea_b1=fb1, fea_w2=fw2, fea_b2=fb2,
        alpha_seq=jnp.zeros((1,), jnp.float32),
        alpha_fea=jnp.zeros((1,), jnp.float32),
        ln_s_g=jnp.ones((S,), jnp.float32), ln_s_b=jnp.zeros((S,), jnp.float32),
        ln_f_g=jnp.ones((F,), jnp.float32), ln_f_b=jnp.zeros((F,), jnp.float32),
    )


def init_block_fst(key, inp_size, S, F, out_size, n_blocks):
    ks = jax.random.split(key, n_blocks + 3)
    w1, b1 = init_linear(ks[0], inp_size, F)
    w2, b2 = init_linear(ks[1], F, F)
    blocks = [init_fst(ks[2 + i], S, F) for i in range(n_blocks)]
    wo, bo = init_linear(ks[-1], F, out_size)
    return dict(fin_w1=w1, fin_b1=b1, fin_w2=w2, fin_b2=b2,
                blocks=blocks, fout_w=wo, fout_b=bo)


def _pack_lru(p, T):
    """Fold delta into the input projection; precompute lam^(2^k) and Re(lam^t * h0)."""
    H = p["nu"].shape[0]
    mag = jnp.exp(-jnp.exp(p["nu"]))
    lam = jax.lax.complex(mag * jnp.cos(p["theta"]), mag * jnp.sin(p["theta"]))      # (H,)
    W = jnp.concatenate([p["B_real"] * p["delta"][None, :],
                         p["B_img"] * p["delta"][None, :]], axis=1)                  # (D, 2H)
    n_lev = int(math.ceil(math.log2(T))) if T > 1 else 0
    pows, pk = [], lam
    for _ in range(n_lev):
        pows.append(pk)
        pk = pk * pk
    if n_lev:
        lam_r = jnp.stack([jnp.real(q) for q in pows])                               # (L, H)
        lam_i = jnp.stack([jnp.imag(q) for q in pows])
    else:
        lam_r = jnp.zeros((0, H), jnp.float32)
        lam_i = jnp.zeros((0, H), jnp.float32)
    cums, acc = [], lam
    for _ in range(T):
        cums.append(acc)
        acc = acc * lam
    lam_cum = jnp.stack(cums)                                                        # lam^(t+1)
    h0 = jax.lax.complex(p["h0_real"], p["h0_img"])
    h0c = jnp.real(lam_cum * h0[None, :])                                            # (T, H)
    return W, lam_r, lam_i, h0c


def pack_params(params):
    """One-time repack of Block_FST parameters into the fused kernel layout."""
    S = params["blocks"][0]["seq_rnn"]["nu"].shape[0]
    F = params["blocks"][0]["fea_rnn"]["nu"].shape[0]
    seq_rnn_w, seq_w1, seq_w2, seq_vec, seq_h0c = [], [], [], [], []
    fea_rnn_w, fea_w1, fea_w2, fea_vec, fea_h0c = [], [], [], [], []
    alphas = []
    for bp in params["blocks"]:
        w, lr, li, h0c = _pack_lru(bp["seq_rnn"], T=F)    # seq path scans over F steps
        seq_rnn_w.append(w); seq_w1.append(bp["seq_w1"]); seq_w2.append(bp["seq_w2"])
        seq_vec.append(jnp.concatenate(
            [jnp.stack([bp["seq_b1"], bp["seq_b2"], bp["ln_s_g"], bp["ln_s_b"]]), lr, li], 0))
        seq_h0c.append(h0c)
        w, lr, li, h0c = _pack_lru(bp["fea_rnn"], T=S)    # fea path scans over S steps
        fea_rnn_w.append(w); fea_w1.append(bp["fea_w1"]); fea_w2.append(bp["fea_w2"])
        fea_vec.append(jnp.concatenate(
            [jnp.stack([bp["fea_b1"], bp["fea_b2"], bp["ln_f_g"], bp["ln_f_b"]]), lr, li], 0))
        fea_h0c.append(h0c)
        alphas.append(jax.nn.sigmoid(bp["alpha_seq"][0]))
        alphas.append(jax.nn.sigmoid(bp["alpha_fea"][0]))
    return dict(
        alphas=jnp.stack(alphas).astype(jnp.float32),                 # (2*nblk,)
        fin_w1=params["fin_w1"],
        fin_b=jnp.stack([params["fin_b1"], params["fin_b2"]]),        # (2, F)
        fin_w2=params["fin_w2"],
        seq_rnn_w=jnp.stack(seq_rnn_w), seq_w1=jnp.stack(seq_w1), seq_w2=jnp.stack(seq_w2),
        seq_vec=jnp.stack(seq_vec), seq_h0c=jnp.stack(seq_h0c),
        fea_rnn_w=jnp.stack(fea_rnn_w), fea_w1=jnp.stack(fea_w1), fea_w2=jnp.stack(fea_w2),
        fea_vec=jnp.stack(fea_vec), fea_h0c=jnp.stack(fea_h0c),
        fout_w=params["fout_w"], fout_b=params["fout_b"].reshape(1, -1),
    )


# --------------------- pure-JAX reference (torch semantics) -----------------

def _mm_ref(a, w):
    return jnp.matmul(a, w, precision=MATMUL_PRECISION)


def ln_ref(x, g, b, eps=LN_EPS):
    m = jnp.mean(x, axis=-1, keepdims=True)
    v = jnp.mean(jnp.square(x - m), axis=-1, keepdims=True)
    return (x - m) / jnp.sqrt(v + eps) * g + b


def lru_ref(x, p):
    mag = jnp.exp(-jnp.exp(p["nu"]))
    lam = jax.lax.complex(mag * jnp.cos(p["theta"]), mag * jnp.sin(p["theta"]))
    bxr = _mm_ref(x, p["B_real"]) * p["delta"]
    bxi = _mm_ref(x, p["B_img"]) * p["delta"]
    Bx = jax.lax.complex(bxr, bxi)
    B, T, H = Bx.shape
    h = jnp.broadcast_to(jax.lax.complex(p["h0_real"], p["h0_img"]), (B, H))
    outs = []
    for t in range(T):
        h = lam[None, :] * h + Bx[:, t, :]
        outs.append(jnp.real(h))
    return jnp.stack(outs, axis=1)


def fst_ref(x, p):
    ass = jax.nn.sigmoid(p["alpha_seq"][0])
    afs = jax.nn.sigmoid(p["alpha_fea"][0])
    xt = jnp.swapaxes(x, 1, 2)
    y = xt
    h = lru_ref(xt, p["seq_rnn"])
    h = jnp.maximum(_mm_ref(h, p["seq_w1"]) + p["seq_b1"], 0.0)
    h = _mm_ref(h, p["seq_w2"]) + p["seq_b2"]
    h = ass * h + (1.0 - ass) * y
    h = ln_ref(h, p["ln_s_g"], p["ln_s_b"])
    h = jnp.swapaxes(h, 1, 2)
    y = h
    g = lru_ref(h, p["fea_rnn"])
    g = jnp.maximum(_mm_ref(g, p["fea_w1"]) + p["fea_b1"], 0.0)
    g = _mm_ref(g, p["fea_w2"]) + p["fea_b2"]
    g = afs * g + (1.0 - afs) * y
    return ln_ref(g, p["ln_f_g"], p["ln_f_b"])


def block_fst_ref(x, params):
    h = jnp.maximum(_mm_ref(x, params["fin_w1"]) + params["fin_b1"], 0.0)
    h = _mm_ref(h, params["fin_w2"]) + params["fin_b2"]
    for bp in params["blocks"]:
        h = fst_ref(h, bp)
    return _mm_ref(h, params["fout_w"]) + params["fout_b"]


# ----------------------------------- main -----------------------------------

if __name__ == "__main__":
    # Block_FST(inp_size=8, seq_len=16, out_size=4, hid_seq_size=16,
    #           hid_feature_size=32, n_blocks=2, causal=False)
    # NOTE: the FST block structure requires seq_len == hid_seq_size.
    B, S, INP, F, OUT, NBLK = 2, 16, 8, 32, 4, 2

    key = jax.random.PRNGKey(0)
    kx, kp = jax.random.split(key)
    x = jax.random.normal(kx, (B, S, INP), jnp.float32)
    params = init_block_fst(kp, INP, S, F, OUT, NBLK)
    packed = pack_params(params)

    out = jax.block_until_ready(block_fst_forward(x, packed))

    ref = jax.block_until_ready(block_fst_ref(x, params))
    np.testing.assert_allclose(np.asarray(out), np.asarray(ref), rtol=2e-3, atol=2e-3)

    print("KERNEL_OK")
</pallas_src>

<mosaic_0001>
module attributes {stable_mosaic.version = 11 : i64} {
  func.func @k(%arg0: memref<2x16x32xf32, #tpu.memory_space<vmem>>, %arg1: memref<2x32x16xf32, #tpu.memory_space<vmem>>) attributes {dimension_semantics = [], scalar_prefetch = 0 : i64, scratch_operands = 0 : i64, tpu.core_type = #tpu.core_type<tc>} {
    %c0 = arith.constant 0 : index
    %c0_0 = arith.constant 0 : index
    %c0_1 = arith.constant 0 : index
    %0 = vector.load %arg0[%c0, %c0_0, %c0_1] : memref<2x16x32xf32, #tpu.memory_space<vmem>>, vector<2x16x32xf32>
    %1 = tpu.transpose %0, [0, 2, 1] : vector<2x16x32xf32> -> vector<2x32x16xf32>
    %c0_2 = arith.constant 0 : index
    %c0_3 = arith.constant 0 : index
    %c0_4 = arith.constant 0 : index
    %2 = vector.load %arg1[%c0_2, %c0_3, %c0_4] : memref<2x32x16xf32, #tpu.memory_space<vmem>>, vector<2x32x16xf32>
    tpu.vector_store %arg1[%c0_2, %c0_3, %c0_4], %1 {strides = array<i32>} : memref<2x32x16xf32, #tpu.memory_space<vmem>>, vector<2x32x16xf32>,
    return
  }
}

module attributes {stable_mosaic.version = 11 : i64} {
  func.func @_block_fst_kernel(%arg0: i32, %arg1: memref<4xf32, #tpu.memory_space<smem>>, %arg2: memref<2x16x8xf32, #tpu.memory_space<vmem>>, %arg3: memref<8x32xf32, #tpu.memory_space<vmem>>, %arg4: memref<2x32xf32, #tpu.memory_space<vmem>>, %arg5: memref<32x32xf32, #tpu.memory_space<vmem>>, %arg6: memref<2x16x32xf32, #tpu.memory_space<vmem>>, %arg7: memref<2x16x16xf32, #tpu.memory_space<vmem>>, %arg8: memref<2x16x16xf32, #tpu.memory_space<vmem>>, %arg9: memref<2x14x16xf32, #tpu.memory_space<vmem>>, %arg10: memref<2x32x16xf32, #tpu.memory_space<vmem>>, %arg11: memref<2x32x64xf32, #tpu.memory_space<vmem>>, %arg12: memref<2x32x32xf32, #tpu.memory_space<vmem>>, %arg13: memref<2x32x32xf32, #tpu.memory_space<vmem>>, %arg14: memref<2x12x32xf32, #tpu.memory_space<vmem>>, %arg15: memref<2x16x32xf32, #tpu.memory_space<vmem>>, %arg16: memref<32x4xf32, #tpu.memory_space<vmem>>, %arg17: memref<1x4xf32, #tpu.memory_space<vmem>>, %arg18: memref<2x16x4xf32, #tpu.memory_space<vmem>>) attributes {dimension_semantics = [#tpu.dimension_semantics<parallel>], iteration_bounds = array<i64: 1>, scalar_prefetch = 0 : i64, scratch_operands = 0 : i64, tpu.core_type = #tpu.core_type<tc>, window_params = [{transform_indices = @transform_0, window_bounds = array<i64: 4>}, {transform_indices = @transform_1, window_bounds = array<i64: 2, 16, 8>}, {pipeline_mode = #tpu.pipeline_mode<synchronous>, transform_indices = @transform_2, window_bounds = array<i64: 8, 32>}, {pipeline_mode = #tpu.pipeline_mode<synchronous>, transform_indices = @transform_3, window_bounds = array<i64: 2, 32>}, {pipeline_mode = #tpu.pipeline_mode<synchronous>, transform_indices = @transform_4, window_bounds = array<i64: 32, 32>}, {pipeline_mode = #tpu.pipeline_mode<synchronous>, transform_indices = @transform_5, window_bounds = array<i64: 2, 16, 32>}, {pipeline_mode = #tpu.pipeline_mode<synchronous>, transform_indices = @transform_6, window_bounds = array<i64: 2, 16, 16>}, {pipeline_mode = #tpu.pipeline_mode<synchronous>, transform_indices = @transform_7, window_bounds = array<i64: 2, 16, 16>}, {pipeline_mode = #tpu.pipeline_mode<synchronous>, transform_indices = @transform_8, window_bounds = array<i64: 2, 14, 16>}, {pipeline_mode = #tpu.pipeline_mode<synchronous>, transform_indices = @transform_9, window_bounds = array<i64: 2, 32, 16>}, {pipeline_mode = #tpu.pipeline_mode<synchronous>, transform_indices = @transform_10, window_bounds = array<i64: 2, 32, 64>}, {pipeline_mode = #tpu.pipeline_mode<synchronous>, transform_indices = @transform_11, window_bounds = array<i64: 2, 32, 32>}, {pipeline_mode = #tpu.pipeline_mode<synchronous>, transform_indices = @transform_12, window_bounds = array<i64: 2, 32, 32>}, {pipeline_mode = #tpu.pipeline_mode<synchronous>, transform_indices = @transform_13, window_bounds = array<i64: 2, 12, 32>}, {pipeline_mode = #tpu.pipeline_mode<synchronous>, transform_indices = @transform_14, window_bounds = array<i64: 2, 16, 32>}, {pipeline_mode = #tpu.pipeline_mode<synchronous>, transform_indices = @transform_15, window_bounds = array<i64: 32, 4>}, {pipeline_mode = #tpu.pipeline_mode<synchronous>, transform_indices = @transform_16, window_bounds = array<i64: 1, 4>}, {transform_indices = @transform_17, window_bounds = array<i64: 2, 16, 4>}]} {
    %0 = tpu.iota {dimensions = array<i32: 0>} : vector<16x16xi32>
    %1 = tpu.iota {dimensions = array<i32: 1>} : vector<16x16xi32>
    %2 = arith.cmpi eq, %0, %1 : vector<16x16xi32>
    %cst = arith.constant 1.000000e+00 : f32
    %cst_0 = arith.constant 0.000000e+00 : f32
    %3 = vector.broadcast %cst : f32 to vector<16x16xf32>
    %4 = vector.broadcast %cst_0 : f32 to vector<16x16xf32>
    %5 = arith.select %2, %3, %4 : vector<16x16xi1>, vector<16x16xf32>
    %6 = tpu.iota {dimensions = array<i32: 0>} : vector<32x32xi32>
    %7 = tpu.iota {dimensions = array<i32: 1>} : vector<32x32xi32>
    %8 = arith.cmpi eq, %6, %7 : vector<32x32xi32>
    %cst_1 = arith.constant 1.000000e+00 : f32
    %cst_2 = arith.constant 0.000000e+00 : f32
    %9 = vector.broadcast %cst_1 : f32 to vector<32x32xf32>
    %10 = vector.broadcast %cst_2 : f32 to vector<32x32xf32>
    %11 = arith.select %8, %9, %10 : vector<32x32xi1>, vector<32x32xf32>
    %c0 = arith.constant 0 : index
    %c0_3 = arith.constant 0 : index
    %c0_4 = arith.constant 0 : index
    %12 = vector.load %arg2[%c0, %c0_3, %c0_4] : memref<2x16x8xf32, #tpu.memory_space<vmem>>, vector<2x16x8xf32>
    %13 = vector.shape_cast %12 : vector<2x16x8xf32> to vector<32x8xf32>
    %c0_5 = arith.constant 0 : index
    %c0_6 = arith.constant 0 : index
    %14 = vector.load %arg4[%c0_5, %c0_6] : memref<2x32xf32, #tpu.memory_space<vmem>>, vector<2x32xf32>
    %c0_7 = arith.constant 0 : index
    %c0_8 = arith.constant 0 : index
    %15 = vector.load %arg3[%c0_7, %c0_8] : memref<8x32xf32, #tpu.memory_space<vmem>>, vector<8x32xf32>
    %cst_9 = arith.constant dense<0.000000e+00> : vector<32x32xf32>
    %16 = tpu.matmul %13, %15, %cst_9 {dimension_numbers = #tpu.dot_dimension_numbers<[1], [0], [0], [1], [0, 0, 1, 1], [], []>, precision = #tpu.contract_precision<fp32>} : vector<32x8xf32>, vector<8x32xf32>, vector<32x32xf32> -> vector<32x32xf32>
    %17 = vector.extract_strided_slice %14 {offsets = [0, 0], sizes = [1, 32], strides = [1, 1]} : vector<2x32xf32> to vector<1x32xf32>
    %18 = vector.broadcast %17 : vector<1x32xf32> to vector<32x32xf32>
    %19 = arith.addf %16, %18 : vector<32x32xf32>
    %cst_10 = arith.constant 0.000000e+00 : f32
    %20 = vector.broadcast %cst_10 : f32 to vector<32x32xf32>
    %21 = arith.maximumf %19, %20 : vector<32x32xf32>
    %c0_11 = arith.constant 0 : index
    %c0_12 = arith.constant 0 : index
    %22 = vector.load %arg5[%c0_11, %c0_12] : memref<32x32xf32, #tpu.memory_space<vmem>>, vector<32x32xf32>
    %cst_13 = arith.constant dense<0.000000e+00> : vector<32x32xf32>
    %23 = tpu.matmul %21, %22, %cst_13 {dimension_numbers = #tpu.dot_dimension_numbers<[1], [0], [0], [1], [0, 0, 1, 1], [], []>, precision = #tpu.contract_precision<fp32>} : vector<32x32xf32>, vector<32x32xf32>, vector<32x32xf32> -> vector<32x32xf32>
    %24 = vector.extract_strided_slice %14 {offsets = [1, 0], sizes = [1, 32], strides = [1, 1]} : vector<2x32xf32> to vector<1x32xf32>
    %25 = vector.broadcast %24 : vector<1x32xf32> to vector<32x32xf32>
    %26 = arith.addf %23, %25 : vector<32x32xf32>
    %c0_14 = arith.constant 0 : index
    %c0_15 = arith.constant 0 : index
    %c0_16 = arith.constant 0 : index
    %27 = vector.load %arg9[%c0_14, %c0_15, %c0_16] : memref<2x14x16xf32, #tpu.memory_space<vmem>>, vector<1x14x16xf32>
    %28 = vector.shape_cast %27 : vector<1x14x16xf32> to vector<14x16xf32>
    %29 = vector.extract_strided_slice %26 {offsets = [0, 0], sizes = [16, 32], strides = [1, 1]} : vector<32x32xf32> to vector<16x32xf32>
    %cst_17 = arith.constant dense<0.000000e+00> : vector<32x16xf32>
    %30 = tpu.matmul %11, %29, %cst_17 {dimension_numbers = #tpu.dot_dimension_numbers<[1], [1], [0], [0], [0, 0, 1, 0], [], []>, precision = #tpu.contract_precision<fp32>} : vector<32x32xf32>, vector<16x32xf32>, vector<32x16xf32> -> vector<32x16xf32>
    %31 = vector.extract_strided_slice %26 {offsets = [16, 0], sizes = [16, 32], strides = [1, 1]} : vector<32x32xf32> to vector<16x32xf32>
    %cst_18 = arith.constant dense<0.000000e+00> : vector<32x16xf32>
    %32 = tpu.matmul %11, %31, %cst_18 {dimension_numbers = #tpu.dot_dimension_numbers<[1], [1], [0], [0], [0, 0, 1, 0], [], []>, precision = #tpu.contract_precision<fp32>} : vector<32x32xf32>, vector<16x32xf32>, vector<32x16xf32> -> vector<32x16xf32>
    %33 = tpu.concatenate %30, %32 in 0 : vector<32x16xf32>, vector<32x16xf32> -> vector<64x16xf32>
    %c0_19 = arith.constant 0 : index
    %c0_20 = arith.constant 0 : index
    %c0_21 = arith.constant 0 : index
    %34 = vector.load %arg6[%c0_19, %c0_20, %c0_21] : memref<2x16x32xf32, #tpu.memory_space<vmem>>, vector<1x16x32xf32>
    %35 = vector.shape_cast %34 : vector<1x16x32xf32> to vector<16x32xf32>
    %cst_22 = arith.constant dense<0.000000e+00> : vector<64x32xf32>
    %36 = tpu.matmul %33, %35, %cst_22 {dimension_numbers = #tpu.dot_dimension_numbers<[1], [0], [0], [1], [0, 0, 1, 1], [], []>, precision = #tpu.contract_precision<fp32>} : vector<64x16xf32>, vector<16x32xf32>, vector<64x32xf32> -> vector<64x32xf32>
    %37 = vector.extract_strided_slice %36 {offsets = [0, 0], sizes = [64, 16], strides = [1, 1]} : vector<64x32xf32> to vector<64x16xf32>
    %38 = vector.extract_strided_slice %36 {offsets = [0, 16], sizes = [64, 16], strides = [1, 1]} : vector<64x32xf32> to vector<64x16xf32>
    %39 = tpu.iota {dimensions = array<i32: 1>} : vector<2x32x1xi32>
    %40 = vector.shape_cast %39 : vector<2x32x1xi32> to vector<64x1xi32>
    %41 = vector.extract_strided_slice %28 {offsets = [4, 0], sizes = [1, 16], strides = [1, 1]} : vector<14x16xf32> to vector<1x16xf32>
    %42 = vector.extract_strided_slice %28 {offsets = [9, 0], sizes = [1, 16], strides = [1, 1]} : vector<14x16xf32> to vector<1x16xf32>
    %cst_23 = arith.constant 0.000000e+00 : f32
    %43 = vector.broadcast %cst_23 : f32 to vector<1x16xf32>
    %44 = vector.extract_strided_slice %37 {offsets = [0, 0], sizes = [63, 16], strides = [1, 1]} : vector<64x16xf32> to vector<63x16xf32>
    %45 = tpu.concatenate %43, %44 in 0 : vector<1x16xf32>, vector<63x16xf32> -> vector<64x16xf32>
    %46 = vector.extract_strided_slice %38 {offsets = [0, 0], sizes = [63, 16], strides = [1, 1]} : vector<64x16xf32> to vector<63x16xf32>
    %47 = tpu.concatenate %43, %46 in 0 : vector<1x16xf32>, vector<63x16xf32> -> vector<64x16xf32>
    %c1_i32 = arith.constant 1 : i32
    %48 = vector.broadcast %c1_i32 : i32 to vector<64x1xi32>
    %49 = arith.cmpi sge, %40, %48 : vector<64x1xi32>
    %cst_24 = arith.constant 0.000000e+00 : f32
    %50 = vector.shape_cast %49 : vector<64x1xi1> to vector<64x1xi1>
    %51 = vector.broadcast %50 : vector<64x1xi1> to vector<64x16xi1>
    %52 = vector.broadcast %cst_24 : f32 to vector<64x16xf32>
    %53 = arith.select %51, %45, %52 : vector<64x16xi1>, vector<64x16xf32>
    %cst_25 = arith.constant 0.000000e+00 : f32
    %54 = vector.shape_cast %49 : vector<64x1xi1> to vector<64x1xi1>
    %55 = vector.broadcast %54 : vector<64x1xi1> to vector<64x16xi1>
    %56 = vector.broadcast %cst_25 : f32 to vector<64x16xf32>
    %57 = arith.select %55, %47, %56 : vector<64x16xi1>, vector<64x16xf32>
    %58 = vector.broadcast %41 : vector<1x16xf32> to vector<64x16xf32>
    %59 = arith.mulf %58, %53 : vector<64x16xf32>
    %60 = arith.addf %37, %59 : vector<64x16xf32>
    %61 = vector.broadcast %42 : vector<1x16xf32> to vector<64x16xf32>
    %62 = arith.mulf %61, %57 : vector<64x16xf32>
    %63 = arith.subf %60, %62 : vector<64x16xf32>
    %64 = vector.broadcast %41 : vector<1x16xf32> to vector<64x16xf32>
    %65 = arith.mulf %64, %57 : vector<64x16xf32>
    %66 = arith.addf %38, %65 : vector<64x16xf32>
    %67 = vector.broadcast %42 : vector<1x16xf32> to vector<64x16xf32>
    %68 = arith.mulf %67, %53 : vector<64x16xf32>
    %69 = arith.addf %66, %68 : vector<64x16xf32>
    %70 = vector.extract_strided_slice %28 {offsets = [5, 0], sizes = [1, 16], strides = [1, 1]} : vector<14x16xf32> to vector<1x16xf32>
    %71 = vector.extract_strided_slice %28 {offsets = [10, 0], sizes = [1, 16], strides = [1, 1]} : vector<14x16xf32> to vector<1x16xf32>
    %cst_26 = arith.constant 0.000000e+00 : f32
    %72 = vector.broadcast %cst_26 : f32 to vector<2x16xf32>
    %73 = vector.extract_strided_slice %63 {offsets = [0, 0], sizes = [62, 16], strides = [1, 1]} : vector<64x16xf32> to vector<62x16xf32>
    %74 = tpu.concatenate %72, %73 in 0 : vector<2x16xf32>, vector<62x16xf32> -> vector<64x16xf32>
    %75 = vector.extract_strided_slice %69 {offsets = [0, 0], sizes = [62, 16], strides = [1, 1]} : vector<64x16xf32> to vector<62x16xf32>
    %76 = tpu.concatenate %72, %75 in 0 : vector<2x16xf32>, vector<62x16xf32> -> vector<64x16xf32>
    %c2_i32 = arith.constant 2 : i32
    %77 = vector.broadcast %c2_i32 : i32 to vector<64x1xi32>
    %78 = arith.cmpi sge, %40, %77 : vector<64x1xi32>
    %cst_27 = arith.constant 0.000000e+00 : f32
    %79 = vector.shape_cast %78 : vector<64x1xi1> to vector<64x1xi1>
    %80 = vector.broadcast %79 : vector<64x1xi1> to vector<64x16xi1>
    %81 = vector.broadcast %cst_27 : f32 to vector<64x16xf32>
    %82 = arith.select %80, %74, %81 : vector<64x16xi1>, vector<64x16xf32>
    %cst_28 = arith.constant 0.000000e+00 : f32
    %83 = vector.shape_cast %78 : vector<64x1xi1> to vector<64x1xi1>
    %84 = vector.broadcast %83 : vector<64x1xi1> to vector<64x16xi1>
    %85 = vector.broadcast %cst_28 : f32 to vector<64x16xf32>
    %86 = arith.select %84, %76, %85 : vector<64x16xi1>, vector<64x16xf32>
    %87 = vector.broadcast %70 : vector<1x16xf32> to vector<64x16xf32>
    %88 = arith.mulf %87, %82 : vector<64x16xf32>
    %89 = arith.addf %63, %88 : vector<64x16xf32>
    %90 = vector.broadcast %71 : vector<1x16xf32> to vector<64x16xf32>
    %91 = arith.mulf %90, %86 : vector<64x16xf32>
    %92 = arith.subf %89, %91 : vector<64x16xf32>
    %93 = vector.broadcast %70 : vector<1x16xf32> to vector<64x16xf32>
    %94 = arith.mulf %93, %86 : vector<64x16xf32>
    %95 = arith.addf %69, %94 : vector<64x16xf32>
    %96 = vector.broadcast %71 : vector<1x16xf32> to vector<64x16xf32>
    %97 = arith.mulf %96, %82 : vector<64x16xf32>
    %98 = arith.addf %95, %97 : vector<64x16xf32>
    %99 = vector.extract_strided_slice %28 {offsets = [6, 0], sizes = [1, 16], strides = [1, 1]} : vector<14x16xf32> to vector<1x16xf32>
    %100 = vector.extract_strided_slice %28 {offsets = [11, 0], sizes = [1, 16], strides = [1, 1]} : vector<14x16xf32> to vector<1x16xf32>
    %cst_29 = arith.constant 0.000000e+00 : f32
    %101 = vector.broadcast %cst_29 : f32 to vector<4x16xf32>
    %102 = vector.extract_strided_slice %92 {offsets = [0, 0], sizes = [60, 16], strides = [1, 1]} : vector<64x16xf32> to vector<60x16xf32>
    %103 = tpu.concatenate %101, %102 in 0 : vector<4x16xf32>, vector<60x16xf32> -> vector<64x16xf32>
    %104 = vector.extract_strided_slice %98 {offsets = [0, 0], sizes = [60, 16], strides = [1, 1]} : vector<64x16xf32> to vector<60x16xf32>
    %105 = tpu.concatenate %101, %104 in 0 : vector<4x16xf32>, vector<60x16xf32> -> vector<64x16xf32>
    %c4_i32 = arith.constant 4 : i32
    %106 = vector.broadcast %c4_i32 : i32 to vector<64x1xi32>
    %107 = arith.cmpi sge, %40, %106 : vector<64x1xi32>
    %cst_30 = arith.constant 0.000000e+00 : f32
    %108 = vector.shape_cast %107 : vector<64x1xi1> to vector<64x1xi1>
    %109 = vector.broadcast %108 : vector<64x1xi1> to vector<64x16xi1>
    %110 = vector.broadcast %cst_30 : f32 to vector<64x16xf32>
    %111 = arith.select %109, %103, %110 : vector<64x16xi1>, vector<64x16xf32>
    %cst_31 = arith.constant 0.000000e+00 : f32
    %112 = vector.shape_cast %107 : vector<64x1xi1> to vector<64x1xi1>
    %113 = vector.broadcast %112 : vector<64x1xi1> to vector<64x16xi1>
    %114 = vector.broadcast %cst_31 : f32 to vector<64x16xf32>
    %115 = arith.select %113, %105, %114 : vector<64x16xi1>, vector<64x16xf32>
    %116 = vector.broadcast %99 : vector<1x16xf32> to vector<64x16xf32>
    %117 = arith.mulf %116, %111 : vector<64x16xf32>
    %118 = arith.addf %92, %117 : vector<64x16xf32>
    %119 = vector.broadcast %100 : vector<1x16xf32> to vector<64x16xf32>
    %120 = arith.mulf %119, %115 : vector<64x16xf32>
    %121 = arith.subf %118, %120 : vector<64x16xf32>
    %122 = vector.broadcast %99 : vector<1x16xf32> to vector<64x16xf32>
    %123 = arith.mulf %122, %115 : vector<64x16xf32>
    %124 = arith.addf %98, %123 : vector<64x16xf32>
    %125 = vector.broadcast %100 : vector<1x16xf32> to vector<64x16xf32>
    %126 = arith.mulf %125, %111 : vector<64x16xf32>
    %127 = arith.addf %124, %126 : vector<64x16xf32>
    %128 = vector.extract_strided_slice %28 {offsets = [7, 0], sizes = [1, 16], strides = [1, 1]} : vector<14x16xf32> to vector<1x16xf32>
    %129 = vector.extract_strided_slice %28 {offsets = [12, 0], sizes = [1, 16], strides = [1, 1]} : vector<14x16xf32> to vector<1x16xf32>
    %cst_32 = arith.constant 0.000000e+00 : f32
    %130 = vector.broadcast %cst_32 : f32 to vector<8x16xf32>
    %131 = vector.extract_strided_slice %121 {offsets = [0, 0], sizes = [56, 16], strides = [1, 1]} : vector<64x16xf32> to vector<56x16xf32>
    %132 = tpu.concatenate %130, %131 in 0 : vector<8x16xf32>, vector<56x16xf32> -> vector<64x16xf32>
    %133 = vector.extract_strided_slice %127 {offsets = [0, 0], sizes = [56, 16], strides = [1, 1]} : vector<64x16xf32> to vector<56x16xf32>
    %134 = tpu.concatenate %130, %133 in 0 : vector<8x16xf32>, vector<56x16xf32> -> vector<64x16xf32>
    %c8_i32 = arith.constant 8 : i32
    %135 = vector.broadcast %c8_i32 : i32 to vector<64x1xi32>
    %136 = arith.cmpi sge, %40, %135 : vector<64x1xi32>
    %cst_33 = arith.constant 0.000000e+00 : f32
    %137 = vector.shape_cast %136 : vector<64x1xi1> to vector<64x1xi1>
    %138 = vector.broadcast %137 : vector<64x1xi1> to vector<64x16xi1>
    %139 = vector.broadcast %cst_33 : f32 to vector<64x16xf32>
    %140 = arith.select %138, %132, %139 : vector<64x16xi1>, vector<64x16xf32>
    %cst_34 = arith.constant 0.000000e+00 : f32
    %141 = vector.shape_cast %136 : vector<64x1xi1> to vector<64x1xi1>
    %142 = vector.broadcast %141 : vector<64x1xi1> to vector<64x16xi1>
    %143 = vector.broadcast %cst_34 : f32 to vector<64x16xf32>
    %144 = arith.select %142, %134, %143 : vector<64x16xi1>, vector<64x16xf32>
    %145 = vector.broadcast %128 : vector<1x16xf32> to vector<64x16xf32>
    %146 = arith.mulf %145, %140 : vector<64x16xf32>
    %147 = arith.addf %121, %146 : vector<64x16xf32>
    %148 = vector.broadcast %129 : vector<1x16xf32> to vector<64x16xf32>
    %149 = arith.mulf %148, %144 : vector<64x16xf32>
    %150 = arith.subf %147, %149 : vector<64x16xf32>
    %151 = vector.broadcast %128 : vector<1x16xf32> to vector<64x16xf32>
    %152 = arith.mulf %151, %144 : vector<64x16xf32>
    %153 = arith.addf %127, %152 : vector<64x16xf32>
    %154 = vector.broadcast %129 : vector<1x16xf32> to vector<64x16xf32>
    %155 = arith.mulf %154, %140 : vector<64x16xf32>
    %156 = arith.addf %153, %155 : vector<64x16xf32>
    %157 = vector.extract_strided_slice %28 {offsets = [8, 0], sizes = [1, 16], strides = [1, 1]} : vector<14x16xf32> to vector<1x16xf32>
    %158 = vector.extract_strided_slice %28 {offsets = [13, 0], sizes = [1, 16], strides = [1, 1]} : vector<14x16xf32> to vector<1x16xf32>
    %cst_35 = arith.constant 0.000000e+00 : f32
    %159 = vector.broadcast %cst_35 : f32 to vector<16x16xf32>
    %160 = vector.extract_strided_slice %150 {offsets = [0, 0], sizes = [48, 16], strides = [1, 1]} : vector<64x16xf32> to vector<48x16xf32>
    %161 = tpu.concatenate %159, %160 in 0 : vector<16x16xf32>, vector<48x16xf32> -> vector<64x16xf32>
    %162 = vector.extract_strided_slice %156 {offsets = [0, 0], sizes = [48, 16], strides = [1, 1]} : vector<64x16xf32> to vector<48x16xf32>
    %163 = tpu.concatenate %159, %162 in 0 : vector<16x16xf32>, vector<48x16xf32> -> vector<64x16xf32>
    %c16_i32 = arith.constant 16 : i32
    %164 = vector.broadcast %c16_i32 : i32 to vector<64x1xi32>
    %165 = arith.cmpi sge, %40, %164 : vector<64x1xi32>
    %cst_36 = arith.constant 0.000000e+00 : f32
    %166 = vector.shape_cast %165 : vector<64x1xi1> to vector<64x1xi1>
    %167 = vector.broadcast %166 : vector<64x1xi1> to vector<64x16xi1>
    %168 = vector.broadcast %cst_36 : f32 to vector<64x16xf32>
    %169 = arith.select %167, %161, %168 : vector<64x16xi1>, vector<64x16xf32>
    %cst_37 = arith.constant 0.000000e+00 : f32
    %170 = vector.shape_cast %165 : vector<64x1xi1> to vector<64x1xi1>
    %171 = vector.broadcast %170 : vector<64x1xi1> to vector<64x16xi1>
    %172 = vector.broadcast %cst_37 : f32 to vector<64x16xf32>
    %173 = arith.select %171, %163, %172 : vector<64x16xi1>, vector<64x16xf32>
    %174 = vector.broadcast %157 : vector<1x16xf32> to vector<64x16xf32>
    %175 = arith.mulf %174, %169 : vector<64x16xf32>
    %176 = arith.addf %150, %175 : vector<64x16xf32>
    %177 = vector.broadcast %158 : vector<1x16xf32> to vector<64x16xf32>
    %178 = arith.mulf %177, %173 : vector<64x16xf32>
    %179 = arith.subf %176, %178 : vector<64x16xf32>
    %c0_38 = arith.constant 0 : index
    %c0_39 = arith.constant 0 : index
    %c0_40 = arith.constant 0 : index
    %180 = vector.load %arg10[%c0_38, %c0_39, %c0_40] : memref<2x32x16xf32, #tpu.memory_space<vmem>>, vector<1x32x16xf32>
    %181 = vector.shape_cast %180 : vector<1x32x16xf32> to vector<32x16xf32>
    %182 = tpu.concatenate %181, %181 in 0 : vector<32x16xf32>, vector<32x16xf32> -> vector<64x16xf32>
    %183 = arith.addf %179, %182 : vector<64x16xf32>
    %c0_41 = arith.constant 0 : index
    %c0_42 = arith.constant 0 : index
    %c0_43 = arith.constant 0 : index
    %184 = vector.load %arg7[%c0_41, %c0_42, %c0_43] : memref<2x16x16xf32, #tpu.memory_space<vmem>>, vector<1x16x16xf32>
    %185 = vector.shape_cast %184 : vector<1x16x16xf32> to vector<16x16xf32>
    %cst_44 = arith.constant dense<0.000000e+00> : vector<64x16xf32>
    %186 = tpu.matmul %183, %185, %cst_44 {dimension_numbers = #tpu.dot_dimension_numbers<[1], [0], [0], [1], [0, 0, 1, 1], [], []>, precision = #tpu.contract_precision<fp32>} : vector<64x16xf32>, vector<16x16xf32>, vector<64x16xf32> -> vector<64x16xf32>
    %187 = vector.extract_strided_slice %28 {offsets = [0, 0], sizes = [1, 16], strides = [1, 1]} : vector<14x16xf32> to vector<1x16xf32>
    %188 = vector.broadcast %187 : vector<1x16xf32> to vector<64x16xf32>
    %189 = arith.addf %186, %188 : vector<64x16xf32>
    %cst_45 = arith.constant 0.000000e+00 : f32
    %190 = vector.broadcast %cst_45 : f32 to vector<64x16xf32>
    %191 = arith.maximumf %189, %190 : vector<64x16xf32>
    %c0_46 = arith.constant 0 : index
    %c0_47 = arith.constant 0 : index
    %c0_48 = arith.constant 0 : index
    %192 = vector.load %arg8[%c0_46, %c0_47, %c0_48] : memref<2x16x16xf32, #tpu.memory_space<vmem>>, vector<1x16x16xf32>
    %193 = vector.shape_cast %192 : vector<1x16x16xf32> to vector<16x16xf32>
    %cst_49 = arith.constant dense<0.000000e+00> : vector<64x16xf32>
    %194 = tpu.matmul %191, %193, %cst_49 {dimension_numbers = #tpu.dot_dimension_numbers<[1], [0], [0], [1], [0, 0, 1, 1], [], []>, precision = #tpu.contract_precision<fp32>} : vector<64x16xf32>, vector<16x16xf32>, vector<64x16xf32> -> vector<64x16xf32>
    %195 = vector.extract_strided_slice %28 {offsets = [1, 0], sizes = [1, 16], strides = [1, 1]} : vector<14x16xf32> to vector<1x16xf32>
    %196 = vector.broadcast %195 : vector<1x16xf32> to vector<64x16xf32>
    %197 = arith.addf %194, %196 : vector<64x16xf32>
    %c0_50 = arith.constant 0 : index
    %198 = memref.load %arg1[%c0_50] : memref<4xf32, #tpu.memory_space<smem>>
    %199 = vector.broadcast %198 : f32 to vector<64x16xf32>
    %200 = arith.mulf %199, %197 : vector<64x16xf32>
    %cst_51 = arith.constant 1.000000e+00 : f32
    %201 = arith.subf %cst_51, %198 : f32
    %202 = vector.broadcast %201 : f32 to vector<64x16xf32>
    %203 = arith.mulf %202, %33 : vector<64x16xf32>
    %204 = arith.addf %200, %203 : vector<64x16xf32>
    %205 = vector.extract_strided_slice %28 {offsets = [2, 0], sizes = [1, 16], strides = [1, 1]} : vector<14x16xf32> to vector<1x16xf32>
    %206 = vector.extract_strided_slice %28 {offsets = [3, 0], sizes = [1, 16], strides = [1, 1]} : vector<14x16xf32> to vector<1x16xf32>
    %cst_52 = arith.constant dense<0.000000e+00> : vector<64xf32>
    %207 = vector.multi_reduction <add>, %204, %cst_52 [1] : vector<64x16xf32> to vector<64xf32>
    %208 = vector.shape_cast %207 : vector<64xf32> to vector<64x1xf32>
    %cst_53 = arith.constant 1.600000e+01 : f32
    %209 = vector.broadcast %cst_53 : f32 to vector<64x1xf32>
    %210 = arith.divf %208, %209 : vector<64x1xf32>
    %211 = vector.broadcast %210 : vector<64x1xf32> to vector<64x16xf32>
    %212 = arith.subf %204, %211 : vector<64x16xf32>
    %213 = arith.mulf %212, %212 : vector<64x16xf32>
    %cst_54 = arith.constant dense<0.000000e+00> : vector<64xf32>
    %214 = vector.multi_reduction <add>, %213, %cst_54 [1] : vector<64x16xf32> to vector<64xf32>
    %215 = vector.shape_cast %214 : vector<64xf32> to vector<64x1xf32>
    %cst_55 = arith.constant 1.600000e+01 : f32
    %216 = vector.broadcast %cst_55 : f32 to vector<64x1xf32>
    %217 = arith.divf %215, %216 : vector<64x1xf32>
    %218 = vector.broadcast %210 : vector<64x1xf32> to vector<64x16xf32>
    %219 = arith.subf %204, %218 : vector<64x16xf32>
    %cst_56 = arith.constant 9.99999974E-5 : f32
    %220 = vector.broadcast %cst_56 : f32 to vector<64x1xf32>
    %221 = arith.addf %217, %220 : vector<64x1xf32>
    %222 = math.rsqrt %221 : vector<64x1xf32>
    %223 = vector.broadcast %222 : vector<64x1xf32> to vector<64x16xf32>
    %224 = arith.mulf %219, %223 : vector<64x16xf32>
    %225 = vector.broadcast %205 : vector<1x16xf32> to vector<64x16xf32>
    %226 = arith.mulf %224, %225 : vector<64x16xf32>
    %227 = vector.broadcast %206 : vector<1x16xf32> to vector<64x16xf32>
    %228 = arith.addf %226, %227 : vector<64x16xf32>
    %229 = vector.extract_strided_slice %228 {offsets = [0, 0], sizes = [32, 16], strides = [1, 1]} : vector<64x16xf32> to vector<32x16xf32>
    %cst_57 = arith.constant dense<0.000000e+00> : vector<16x32xf32>
    %230 = tpu.matmul %5, %229, %cst_57 {dimension_numbers = #tpu.dot_dimension_numbers<[1], [1], [0], [0], [0, 0, 1, 0], [], []>, precision = #tpu.contract_precision<fp32>} : vector<16x16xf32>, vector<32x16xf32>, vector<16x32xf32> -> vector<16x32xf32>
    %231 = vector.extract_strided_slice %228 {offsets = [32, 0], sizes = [32, 16], strides = [1, 1]} : vector<64x16xf32> to vector<32x16xf32>
    %cst_58 = arith.constant dense<0.000000e+00> : vector<16x32xf32>
    %232 = tpu.matmul %5, %231, %cst_58 {dimension_numbers = #tpu.dot_dimension_numbers<[1], [1], [0], [0], [0, 0, 1, 0], [], []>, precision = #tpu.contract_precision<fp32>} : vector<16x16xf32>, vector<32x16xf32>, vector<16x32xf32> -> vector<16x32xf32>
    %233 = tpu.concatenate %230, %232 in 0 : vector<16x32xf32>, vector<16x32xf32> -> vector<32x32xf32>
    %c0_59 = arith.constant 0 : index
    %c0_60 = arith.constant 0 : index
    %c0_61 = arith.constant 0 : index
    %234 = vector.load %arg14[%c0_59, %c0_60, %c0_61] : memref<2x12x32xf32, #tpu.memory_space<vmem>>, vector<1x12x32xf32>
    %235 = vector.shape_cast %234 : vector<1x12x32xf32> to vector<12x32xf32>
    %c0_62 = arith.constant 0 : index
    %c0_63 = arith.constant 0 : index
    %c0_64 = arith.constant 0 : index
    %236 = vector.load %arg11[%c0_62, %c0_63, %c0_64] : memref<2x32x64xf32, #tpu.memory_space<vmem>>, vector<1x32x64xf32>
    %237 = vector.shape_cast %236 : vector<1x32x64xf32> to vector<32x64xf32>
    %cst_65 = arith.constant dense<0.000000e+00> : vector<32x64xf32>
    %238 = tpu.matmul %233, %237, %cst_65 {dimension_numbers = #tpu.dot_dimension_numbers<[1], [0], [0], [1], [0, 0, 1, 1], [], []>, precision = #tpu.contract_precision<fp32>} : vector<32x32xf32>, vector<32x64xf32>, vector<32x64xf32> -> vector<32x64xf32>
    %239 = vector.extract_strided_slice %238 {offsets = [0, 0], sizes = [32, 32], strides = [1, 1]} : vector<32x64xf32> to vector<32x32xf32>
    %240 = vector.extract_strided_slice %238 {offsets = [0, 32], sizes = [32, 32], strides = [1, 1]} : vector<32x64xf32> to vector<32x32xf32>
    %241 = tpu.iota {dimensions = array<i32: 1>} : vector<2x16x1xi32>
    %242 = vector.shape_cast %241 : vector<2x16x1xi32> to vector<32x1xi32>
    %243 = vector.extract_strided_slice %235 {offsets = [4, 0], sizes = [1, 32], strides = [1, 1]} : vector<12x32xf32> to vector<1x32xf32>
    %244 = vector.extract_strided_slice %235 {offsets = [8, 0], sizes = [1, 32], strides = [1, 1]} : vector<12x32xf32> to vector<1x32xf32>
    %cst_66 = arith.constant 0.000000e+00 : f32
    %245 = vector.broadcast %cst_66 : f32 to vector<1x32xf32>
    %246 = vector.extract_strided_slice %239 {offsets = [0, 0], sizes = [31, 32], strides = [1, 1]} : vector<32x32xf32> to vector<31x32xf32>
    %247 = tpu.concatenate %245, %246 in 0 : vector<1x32xf32>, vector<31x32xf32> -> vector<32x32xf32>
    %248 = vector.extract_strided_slice %240 {offsets = [0, 0], sizes = [31, 32], strides = [1, 1]} : vector<32x32xf32> to vector<31x32xf32>
    %249 = tpu.concatenate %245, %248 in 0 : vector<1x32xf32>, vector<31x32xf32> -> vector<32x32xf32>
    %c1_i32_67 = arith.constant 1 : i32
    %250 = vector.broadcast %c1_i32_67 : i32 to vector<32x1xi32>
    %251 = arith.cmpi sge, %242, %250 : vector<32x1xi32>
    %cst_68 = arith.constant 0.000000e+00 : f32
    %252 = vector.shape_cast %251 : vector<32x1xi1> to vector<32x1xi1>
    %253 = vector.broadcast %252 : vector<32x1xi1> to vector<32x32xi1>
    %254 = vector.broadcast %cst_68 : f32 to vector<32x32xf32>
    %255 = arith.select %253, %247, %254 : vector<32x32xi1>, vector<32x32xf32>
    %cst_69 = arith.constant 0.000000e+00 : f32
    %256 = vector.shape_cast %251 : vector<32x1xi1> to vector<32x1xi1>
    %257 = vector.broadcast %256 : vector<32x1xi1> to vector<32x32xi1>
    %258 = vector.broadcast %cst_69 : f32 to vector<32x32xf32>
    %259 = arith.select %257, %249, %258 : vector<32x32xi1>, vector<32x32xf32>
    %260 = vector.broadcast %243 : vector<1x32xf32> to vector<32x32xf32>
    %261 = arith.mulf %260, %255 : vector<32x32xf32>
    %262 = arith.addf %239, %261 : vector<32x32xf32>
    %263 = vector.broadcast %244 : vector<1x32xf32> to vector<32x32xf32>
    %264 = arith.mulf %263, %259 : vector<32x32xf32>
    %265 = arith.subf %262, %264 : vector<32x32xf32>
    %266 = vector.broadcast %243 : vector<1x32xf32> to vector<32x32xf32>
    %267 = arith.mulf %266, %259 : vector<32x32xf32>
    %268 = arith.addf %240, %267 : vector<32x32xf32>
    %269 = vector.broadcast %244 : vector<1x32xf32> to vector<32x32xf32>
    %270 = arith.mulf %269, %255 : vector<32x32xf32>
    %271 = arith.addf %268, %270 : vector<32x32xf32>
    %272 = vector.extract_strided_slice %235 {offsets = [5, 0], sizes = [1, 32], strides = [1, 1]} : vector<12x32xf32> to vector<1x32xf32>
    %273 = vector.extract_strided_slice %235 {offsets = [9, 0], sizes = [1, 32], strides = [1, 1]} : vector<12x32xf32> to vector<1x32xf32>
    %cst_70 = arith.constant 0.000000e+00 : f32
    %274 = vector.broadcast %cst_70 : f32 to vector<2x32xf32>
    %275 = vector.extract_strided_slice %265 {offsets = [0, 0], sizes = [30, 32], strides = [1, 1]} : vector<32x32xf32> to vector<30x32xf32>
    %276 = tpu.concatenate %274, %275 in 0 : vector<2x32xf32>, vector<30x32xf32> -> vector<32x32xf32>
    %277 = vector.extract_strided_slice %271 {offsets = [0, 0], sizes = [30, 32], strides = [1, 1]} : vector<32x32xf32> to vector<30x32xf32>
    %278 = tpu.concatenate %274, %277 in 0 : vector<2x32xf32>, vector<30x32xf32> -> vector<32x32xf32>
    %c2_i32_71 = arith.constant 2 : i32
    %279 = vector.broadcast %c2_i32_71 : i32 to vector<32x1xi32>
    %280 = arith.cmpi sge, %242, %279 : vector<32x1xi32>
    %cst_72 = arith.constant 0.000000e+00 : f32
    %281 = vector.shape_cast %280 : vector<32x1xi1> to vector<32x1xi1>
    %282 = vector.broadcast %281 : vector<32x1xi1> to vector<32x32xi1>
    %283 = vector.broadcast %cst_72 : f32 to vector<32x32xf32>
    %284 = arith.select %282, %276, %283 : vector<32x32xi1>, vector<32x32xf32>
    %cst_73 = arith.constant 0.000000e+00 : f32
    %285 = vector.shape_cast %280 : vector<32x1xi1> to vector<32x1xi1>
    %286 = vector.broadcast %285 : vector<32x1xi1> to vector<32x32xi1>
    %287 = vector.broadcast %cst_73 : f32 to vector<32x32xf32>
    %288 = arith.select %286, %278, %287 : vector<32x32xi1>, vector<32x32xf32>
    %289 = vector.broadcast %272 : vector<1x32xf32> to vector<32x32xf32>
    %290 = arith.mulf %289, %284 : vector<32x32xf32>
    %291 = arith.addf %265, %290 : vector<32x32xf32>
    %292 = vector.broadcast %273 : vector<1x32xf32> to vector<32x32xf32>
    %293 = arith.mulf %292, %288 : vector<32x32xf32>
    %294 = arith.subf %291, %293 : vector<32x32xf32>
    %295 = vector.broadcast %272 : vector<1x32xf32> to vector<32x32xf32>
    %296 = arith.mulf %295, %288 : vector<32x32xf32>
    %297 = arith.addf %271, %296 : vector<32x32xf32>
    %298 = vector.broadcast %273 : vector<1x32xf32> to vector<32x32xf32>
    %299 = arith.mulf %298, %284 : vector<32x32xf32>
    %300 = arith.addf %297, %299 : vector<32x32xf32>
    %301 = vector.extract_strided_slice %235 {offsets = [6, 0], sizes = [1, 32], strides = [1, 1]} : vector<12x32xf32> to vector<1x32xf32>
    %302 = vector.extract_strided_slice %235 {offsets = [10, 0], sizes = [1, 32], strides = [1, 1]} : vector<12x32xf32> to vector<1x32xf32>
    %cst_74 = arith.constant 0.000000e+00 : f32
    %303 = vector.broadcast %cst_74 : f32 to vector<4x32xf32>
    %304 = vector.extract_strided_slice %294 {offsets = [0, 0], sizes = [28, 32], strides = [1, 1]} : vector<32x32xf32> to vector<28x32xf32>
    %305 = tpu.concatenate %303, %304 in 0 : vector<4x32xf32>, vector<28x32xf32> -> vector<32x32xf32>
    %306 = vector.extract_strided_slice %300 {offsets = [0, 0], sizes = [28, 32], strides = [1, 1]} : vector<32x32xf32> to vector<28x32xf32>
    %307 = tpu.concatenate %303, %306 in 0 : vector<4x32xf32>, vector<28x32xf32> -> vector<32x32xf32>
    %c4_i32_75 = arith.constant 4 : i32
    %308 = vector.broadcast %c4_i32_75 : i32 to vector<32x1xi32>
    %309 = arith.cmpi sge, %242, %308 : vector<32x1xi32>
    %cst_76 = arith.constant 0.000000e+00 : f32
    %310 = vector.shape_cast %309 : vector<32x1xi1> to vector<32x1xi1>
    %311 = vector.broadcast %310 : vector<32x1xi1> to vector<32x32xi1>
    %312 = vector.broadcast %cst_76 : f32 to vector<32x32xf32>
    %313 = arith.select %311, %305, %312 : vector<32x32xi1>, vector<32x32xf32>
    %cst_77 = arith.constant 0.000000e+00 : f32
    %314 = vector.shape_cast %309 : vector<32x1xi1> to vector<32x1xi1>
    %315 = vector.broadcast %314 : vector<32x1xi1> to vector<32x32xi1>
    %316 = vector.broadcast %cst_77 : f32 to vector<32x32xf32>
    %317 = arith.select %315, %307, %316 : vector<32x32xi1>, vector<32x32xf32>
    %318 = vector.broadcast %301 : vector<1x32xf32> to vector<32x32xf32>
    %319 = arith.mulf %318, %313 : vector<32x32xf32>
    %320 = arith.addf %294, %319 : vector<32x32xf32>
    %321 = vector.broadcast %302 : vector<1x32xf32> to vector<32x32xf32>
    %322 = arith.mulf %321, %317 : vector<32x32xf32>
    %323 = arith.subf %320, %322 : vector<32x32xf32>
    %324 = vector.broadcast %301 : vector<1x32xf32> to vector<32x32xf32>
    %325 = arith.mulf %324, %317 : vector<32x32xf32>
    %326 = arith.addf %300, %325 : vector<32x32xf32>
    %327 = vector.broadcast %302 : vector<1x32xf32> to vector<32x32xf32>
    %328 = arith.mulf %327, %313 : vector<32x32xf32>
    %329 = arith.addf %326, %328 : vector<32x32xf32>
    %330 = vector.extract_strided_slice %235 {offsets = [7, 0], sizes = [1, 32], strides = [1, 1]} : vector<12x32xf32> to vector<1x32xf32>
    %331 = vector.extract_strided_slice %235 {offsets = [11, 0], sizes = [1, 32], strides = [1, 1]} : vector<12x32xf32> to vector<1x32xf32>
    %cst_78 = arith.constant 0.000000e+00 : f32
    %332 = vector.broadcast %cst_78 : f32 to vector<8x32xf32>
    %333 = vector.extract_strided_slice %323 {offsets = [0, 0], sizes = [24, 32], strides = [1, 1]} : vector<32x32xf32> to vector<24x32xf32>
    %334 = tpu.concatenate %332, %333 in 0 : vector<8x32xf32>, vector<24x32xf32> -> vector<32x32xf32>
    %335 = vector.extract_strided_slice %329 {offsets = [0, 0], sizes = [24, 32], strides = [1, 1]} : vector<32x32xf32> to vector<24x32xf32>
    %336 = tpu.concatenate %332, %335 in 0 : vector<8x32xf32>, vector<24x32xf32> -> vector<32x32xf32>
    %c8_i32_79 = arith.constant 8 : i32
    %337 = vector.broadcast %c8_i32_79 : i32 to vector<32x1xi32>
    %338 = arith.cmpi sge, %242, %337 : vector<32x1xi32>
    %cst_80 = arith.constant 0.000000e+00 : f32
    %339 = vector.shape_cast %338 : vector<32x1xi1> to vector<32x1xi1>
    %340 = vector.broadcast %339 : vector<32x1xi1> to vector<32x32xi1>
    %341 = vector.broadcast %cst_80 : f32 to vector<32x32xf32>
    %342 = arith.select %340, %334, %341 : vector<32x32xi1>, vector<32x32xf32>
    %cst_81 = arith.constant 0.000000e+00 : f32
    %343 = vector.shape_cast %338 : vector<32x1xi1> to vector<32x1xi1>
    %344 = vector.broadcast %343 : vector<32x1xi1> to vector<32x32xi1>
    %345 = vector.broadcast %cst_81 : f32 to vector<32x32xf32>
    %346 = arith.select %344, %336, %345 : vector<32x32xi1>, vector<32x32xf32>
    %347 = vector.broadcast %330 : vector<1x32xf32> to vector<32x32xf32>
    %348 = arith.mulf %347, %342 : vector<32x32xf32>
    %349 = arith.addf %323, %348 : vector<32x32xf32>
    %350 = vector.broadcast %331 : vector<1x32xf32> to vector<32x32xf32>
    %351 = arith.mulf %350, %346 : vector<32x32xf32>
    %352 = arith.subf %349, %351 : vector<32x32xf32>
    %c0_82 = arith.constant 0 : index
    %c0_83 = arith.constant 0 : index
    %c0_84 = arith.constant 0 : index
    %353 = vector.load %arg15[%c0_82, %c0_83, %c0_84] : memref<2x16x32xf32, #tpu.memory_space<vmem>>, vector<1x16x32xf32>
    %354 = vector.shape_cast %353 : vector<1x16x32xf32> to vector<16x32xf32>
    %355 = tpu.concatenate %354, %354 in 0 : vector<16x32xf32>, vector<16x32xf32> -> vector<32x32xf32>
    %356 = arith.addf %352, %355 : vector<32x32xf32>
    %c0_85 = arith.constant 0 : index
    %c0_86 = arith.constant 0 : index
    %c0_87 = arith.constant 0 : index
    %357 = vector.load %arg12[%c0_85, %c0_86, %c0_87] : memref<2x32x32xf32, #tpu.memory_space<vmem>>, vector<1x32x32xf32>
    %358 = vector.shape_cast %357 : vector<1x32x32xf32> to vector<32x32xf32>
    %cst_88 = arith.constant dense<0.000000e+00> : vector<32x32xf32>
    %359 = tpu.matmul %356, %358, %cst_88 {dimension_numbers = #tpu.dot_dimension_numbers<[1], [0], [0], [1], [0, 0, 1, 1], [], []>, precision = #tpu.contract_precision<fp32>} : vector<32x32xf32>, vector<32x32xf32>, vector<32x32xf32> -> vector<32x32xf32>
    %360 = vector.extract_strided_slice %235 {offsets = [0, 0], sizes = [1, 32], strides = [1, 1]} : vector<12x32xf32> to vector<1x32xf32>
    %361 = vector.broadcast %360 : vector<1x32xf32> to vector<32x32xf32>
    %362 = arith.addf %359, %361 : vector<32x32xf32>
    %cst_89 = arith.constant 0.000000e+00 : f32
    %363 = vector.broadcast %cst_89 : f32 to vector<32x32xf32>
    %364 = arith.maximumf %362, %363 : vector<32x32xf32>
    %c0_90 = arith.constant 0 : index
    %c0_91 = arith.constant 0 : index
    %c0_92 = arith.constant 0 : index
    %365 = vector.load %arg13[%c0_90, %c0_91, %c0_92] : memref<2x32x32xf32, #tpu.memory_space<vmem>>, vector<1x32x32xf32>
    %366 = vector.shape_cast %365 : vector<1x32x32xf32> to vector<32x32xf32>
    %cst_93 = arith.constant dense<0.000000e+00> : vector<32x32xf32>
    %367 = tpu.matmul %364, %366, %cst_93 {dimension_numbers = #tpu.dot_dimension_numbers<[1], [0], [0], [1], [0, 0, 1, 1], [], []>, precision = #tpu.contract_precision<fp32>} : vector<32x32xf32>, vector<32x32xf32>, vector<32x32xf32> -> vector<32x32xf32>
    %368 = vector.extract_strided_slice %235 {offsets = [1, 0], sizes = [1, 32], strides = [1, 1]} : vector<12x32xf32> to vector<1x32xf32>
    %369 = vector.broadcast %368 : vector<1x32xf32> to vector<32x32xf32>
    %370 = arith.addf %367, %369 : vector<32x32xf32>
    %c1 = arith.constant 1 : index
    %371 = memref.load %arg1[%c1] : memref<4xf32, #tpu.memory_space<smem>>
    %372 = vector.broadcast %371 : f32 to vector<32x32xf32>
    %373 = arith.mulf %372, %370 : vector<32x32xf32>
    %cst_94 = arith.constant 1.000000e+00 : f32
    %374 = arith.subf %cst_94, %371 : f32
    %375 = vector.broadcast %374 : f32 to vector<32x32xf32>
    %376 = arith.mulf %375, %233 : vector<32x32xf32>
    %377 = arith.addf %373, %376 : vector<32x32xf32>
    %378 = vector.extract_strided_slice %235 {offsets = [2, 0], sizes = [1, 32], strides = [1, 1]} : vector<12x32xf32> to vector<1x32xf32>
    %379 = vector.extract_strided_slice %235 {offsets = [3, 0], sizes = [1, 32], strides = [1, 1]} : vector<12x32xf32> to vector<1x32xf32>
    %cst_95 = arith.constant dense<0.000000e+00> : vector<32xf32>
    %380 = vector.multi_reduction <add>, %377, %cst_95 [1] : vector<32x32xf32> to vector<32xf32>
    %381 = vector.shape_cast %380 : vector<32xf32> to vector<32x1xf32>
    %cst_96 = arith.constant 3.200000e+01 : f32
    %382 = vector.broadcast %cst_96 : f32 to vector<32x1xf32>
    %383 = arith.divf %381, %382 : vector<32x1xf32>
    %384 = vector.broadcast %383 : vector<32x1xf32> to vector<32x32xf32>
    %385 = arith.subf %377, %384 : vector<32x32xf32>
    %386 = arith.mulf %385, %385 : vector<32x32xf32>
    %cst_97 = arith.constant dense<0.000000e+00> : vector<32xf32>
    %387 = vector.multi_reduction <add>, %386, %cst_97 [1] : vector<32x32xf32> to vector<32xf32>
    %388 = vector.shape_cast %387 : vector<32xf32> to vector<32x1xf32>
    %cst_98 = arith.constant 3.200000e+01 : f32
    %389 = vector.broadcast %cst_98 : f32 to vector<32x1xf32>
    %390 = arith.divf %388, %389 : vector<32x1xf32>
    %391 = vector.broadcast %383 : vector<32x1xf32> to vector<32x32xf32>
    %392 = arith.subf %377, %391 : vector<32x32xf32>
    %cst_99 = arith.constant 9.99999974E-5 : f32
    %393 = vector.broadcast %cst_99 : f32 to vector<32x1xf32>
    %394 = arith.addf %390, %393 : vector<32x1xf32>
    %395 = math.rsqrt %394 : vector<32x1xf32>
    %396 = vector.broadcast %395 : vector<32x1xf32> to vector<32x32xf32>
    %397 = arith.mulf %392, %396 : vector<32x32xf32>
    %398 = vector.broadcast %378 : vector<1x32xf32> to vector<32x32xf32>
    %399 = arith.mulf %397, %398 : vector<32x32xf32>
    %400 = vector.broadcast %379 : vector<1x32xf32> to vector<32x32xf32>
    %401 = arith.addf %399, %400 : vector<32x32xf32>
    %c1_100 = arith.constant 1 : index
    %c0_101 = arith.constant 0 : index
    %c0_102 = arith.constant 0 : index
    %402 = vector.load %arg9[%c1_100, %c0_101, %c0_102] : memref<2x14x16xf32, #tpu.memory_space<vmem>>, vector<1x14x16xf32>
    %403 = vector.shape_cast %402 : vector<1x14x16xf32> to vector<14x16xf32>
    %404 = vector.extract_strided_slice %401 {offsets = [0, 0], sizes = [16, 32], strides = [1, 1]} : vector<32x32xf32> to vector<16x32xf32>
    %cst_103 = arith.constant dense<0.000000e+00> : vector<32x16xf32>
    %405 = tpu.matmul %11, %404, %cst_103 {dimension_numbers = #tpu.dot_dimension_numbers<[1], [1], [0], [0], [0, 0, 1, 0], [], []>, precision = #tpu.contract_precision<fp32>} : vector<32x32xf32>, vector<16x32xf32>, vector<32x16xf32> -> vector<32x16xf32>
    %406 = vector.extract_strided_slice %401 {offsets = [16, 0], sizes = [16, 32], strides = [1, 1]} : vector<32x32xf32> to vector<16x32xf32>
    %cst_104 = arith.constant dense<0.000000e+00> : vector<32x16xf32>
    %407 = tpu.matmul %11, %406, %cst_104 {dimension_numbers = #tpu.dot_dimension_numbers<[1], [1], [0], [0], [0, 0, 1, 0], [], []>, precision = #tpu.contract_precision<fp32>} : vector<32x32xf32>, vector<16x32xf32>, vector<32x16xf32> -> vector<32x16xf32>
    %408 = tpu.concatenate %405, %407 in 0 : vector<32x16xf32>, vector<32x16xf32> -> vector<64x16xf32>
    %c1_105 = arith.constant 1 : index
    %c0_106 = arith.constant 0 : index
    %c0_107 = arith.constant 0 : index
    %409 = vector.load %arg6[%c1_105, %c0_106, %c0_107] : memref<2x16x32xf32, #tpu.memory_space<vmem>>, vector<1x16x32xf32>
    %410 = vector.shape_cast %409 : vector<1x16x32xf32> to vector<16x32xf32>
    %cst_108 = arith.constant dense<0.000000e+00> : vector<64x32xf32>
    %411 = tpu.matmul %408, %410, %cst_108 {dimension_numbers = #tpu.dot_dimension_numbers<[1], [0], [0], [1], [0, 0, 1, 1], [], []>, precision = #tpu.contract_precision<fp32>} : vector<64x16xf32>, vector<16x32xf32>, vector<64x32xf32> -> vector<64x32xf32>
    %412 = vector.extract_strided_slice %411 {offsets = [0, 0], sizes = [64, 16], strides = [1, 1]} : vector<64x32xf32> to vector<64x16xf32>
    %413 = vector.extract_strided_slice %411 {offsets = [0, 16], sizes = [64, 16], strides = [1, 1]} : vector<64x32xf32> to vector<64x16xf32>
    %414 = tpu.iota {dimensions = array<i32: 1>} : vector<2x32x1xi32>
    %415 = vector.shape_cast %414 : vector<2x32x1xi32> to vector<64x1xi32>
    %416 = vector.extract_strided_slice %403 {offsets = [4, 0], sizes = [1, 16], strides = [1, 1]} : vector<14x16xf32> to vector<1x16xf32>
    %417 = vector.extract_strided_slice %403 {offsets = [9, 0], sizes = [1, 16], strides = [1, 1]} : vector<14x16xf32> to vector<1x16xf32>
    %cst_109 = arith.constant 0.000000e+00 : f32
    %418 = vector.broadcast %cst_109 : f32 to vector<1x16xf32>
    %419 = vector.extract_strided_slice %412 {offsets = [0, 0], sizes = [63, 16], strides = [1, 1]} : vector<64x16xf32> to vector<63x16xf32>
    %420 = tpu.concatenate %418, %419 in 0 : vector<1x16xf32>, vector<63x16xf32> -> vector<64x16xf32>
    %421 = vector.extract_strided_slice %413 {offsets = [0, 0], sizes = [63, 16], strides = [1, 1]} : vector<64x16xf32> to vector<63x16xf32>
    %422 = tpu.concatenate %418, %421 in 0 : vector<1x16xf32>, vector<63x16xf32> -> vector<64x16xf32>
    %c1_i32_110 = arith.constant 1 : i32
    %423 = vector.broadcast %c1_i32_110 : i32 to vector<64x1xi32>
    %424 = arith.cmpi sge, %415, %423 : vector<64x1xi32>
    %cst_111 = arith.constant 0.000000e+00 : f32
    %425 = vector.shape_cast %424 : vector<64x1xi1> to vector<64x1xi1>
    %426 = vector.broadcast %425 : vector<64x1xi1> to vector<64x16xi1>
    %427 = vector.broadcast %cst_111 : f32 to vector<64x16xf32>
    %428 = arith.select %426, %420, %427 : vector<64x16xi1>, vector<64x16xf32>
    %cst_112 = arith.constant 0.000000e+00 : f32
    %429 = vector.shape_cast %424 : vector<64x1xi1> to vector<64x1xi1>
    %430 = vector.broadcast %429 : vector<64x1xi1> to vector<64x16xi1>
    %431 = vector.broadcast %cst_112 : f32 to vector<64x16xf32>
    %432 = arith.select %430, %422, %431 : vector<64x16xi1>, vector<64x16xf32>
    %433 = vector.broadcast %416 : vector<1x16xf32> to vector<64x16xf32>
    %434 = arith.mulf %433, %428 : vector<64x16xf32>
    %435 = arith.addf %412, %434 : vector<64x16xf32>
    %436 = vector.broadcast %417 : vector<1x16xf32> to vector<64x16xf32>
    %437 = arith.mulf %436, %432 : vector<64x16xf32>
    %438 = arith.subf %435, %437 : vector<64x16xf32>
    %439 = vector.broadcast %416 : vector<1x16xf32> to vector<64x16xf32>
    %440 = arith.mulf %439, %432 : vector<64x16xf32>
    %441 = arith.addf %413, %440 : vector<64x16xf32>
    %442 = vector.broadcast %417 : vector<1x16xf32> to vector<64x16xf32>
    %443 = arith.mulf %442, %428 : vector<64x16xf32>
    %444 = arith.addf %441, %443 : vector<64x16xf32>
    %445 = vector.extract_strided_slice %403 {offsets = [5, 0], sizes = [1, 16], strides = [1, 1]} : vector<14x16xf32> to vector<1x16xf32>
    %446 = vector.extract_strided_slice %403 {offsets = [10, 0], sizes = [1, 16], strides = [1, 1]} : vector<14x16xf32> to vector<1x16xf32>
    %cst_113 = arith.constant 0.000000e+00 : f32
    %447 = vector.broadcast %cst_113 : f32 to vector<2x16xf32>
    %448 = vector.extract_strided_slice %438 {offsets = [0, 0], sizes = [62, 16], strides = [1, 1]} : vector<64x16xf32> to vector<62x16xf32>
    %449 = tpu.concatenate %447, %448 in 0 : vector<2x16xf32>, vector<62x16xf32> -> vector<64x16xf32>
    %450 = vector.extract_strided_slice %444 {offsets = [0, 0], sizes = [62, 16], strides = [1, 1]} : vector<64x16xf32> to vector<62x16xf32>
    %451 = tpu.concatenate %447, %450 in 0 : vector<2x16xf32>, vector<62x16xf32> -> vector<64x16xf32>
    %c2_i32_114 = arith.constant 2 : i32
    %452 = vector.broadcast %c2_i32_114 : i32 to vector<64x1xi32>
    %453 = arith.cmpi sge, %415, %452 : vector<64x1xi32>
    %cst_115 = arith.constant 0.000000e+00 : f32
    %454 = vector.shape_cast %453 : vector<64x1xi1> to vector<64x1xi1>
    %455 = vector.broadcast %454 : vector<64x1xi1> to vector<64x16xi1>
    %456 = vector.broadcast %cst_115 : f32 to vector<64x16xf32>
    %457 = arith.select %455, %449, %456 : vector<64x16xi1>, vector<64x16xf32>
    %cst_116 = arith.constant 0.000000e+00 : f32
    %458 = vector.shape_cast %453 : vector<64x1xi1> to vector<64x1xi1>
    %459 = vector.broadcast %458 : vector<64x1xi1> to vector<64x16xi1>
    %460 = vector.broadcast %cst_116 : f32 to vector<64x16xf32>
    %461 = arith.select %459, %451, %460 : vector<64x16xi1>, vector<64x16xf32>
    %462 = vector.broadcast %445 : vector<1x16xf32> to vector<64x16xf32>
    %463 = arith.mulf %462, %457 : vector<64x16xf32>
    %464 = arith.addf %438, %463 : vector<64x16xf32>
    %465 = vector.broadcast %446 : vector<1x16xf32> to vector<64x16xf32>
    %466 = arith.mulf %465, %461 : vector<64x16xf32>
    %467 = arith.subf %464, %466 : vector<64x16xf32>
    %468 = vector.broadcast %445 : vector<1x16xf32> to vector<64x16xf32>
    %469 = arith.mulf %468, %461 : vector<64x16xf32>
    %470 = arith.addf %444, %469 : vector<64x16xf32>
    %471 = vector.broadcast %446 : vector<1x16xf32> to vector<64x16xf32>
    %472 = arith.mulf %471, %457 : vector<64x16xf32>
    %473 = arith.addf %470, %472 : vector<64x16xf32>
    %474 = vector.extract_strided_slice %403 {offsets = [6, 0], sizes = [1, 16], strides = [1, 1]} : vector<14x16xf32> to vector<1x16xf32>
    %475 = vector.extract_strided_slice %403 {offsets = [11, 0], sizes = [1, 16], strides = [1, 1]} : vector<14x16xf32> to vector<1x16xf32>
    %cst_117 = arith.constant 0.000000e+00 : f32
    %476 = vector.broadcast %cst_117 : f32 to vector<4x16xf32>
    %477 = vector.extract_strided_slice %467 {offsets = [0, 0], sizes = [60, 16], strides = [1, 1]} : vector<64x16xf32> to vector<60x16xf32>
    %478 = tpu.concatenate %476, %477 in 0 : vector<4x16xf32>, vector<60x16xf32> -> vector<64x16xf32>
    %479 = vector.extract_strided_slice %473 {offsets = [0, 0], sizes = [60, 16], strides = [1, 1]} : vector<64x16xf32> to vector<60x16xf32>
    %480 = tpu.concatenate %476, %479 in 0 : vector<4x16xf32>, vector<60x16xf32> -> vector<64x16xf32>
    %c4_i32_118 = arith.constant 4 : i32
    %481 = vector.broadcast %c4_i32_118 : i32 to vector<64x1xi32>
    %482 = arith.cmpi sge, %415, %481 : vector<64x1xi32>
    %cst_119 = arith.constant 0.000000e+00 : f32
    %483 = vector.shape_cast %482 : vector<64x1xi1> to vector<64x1xi1>
    %484 = vector.broadcast %483 : vector<64x1xi1> to vector<64x16xi1>
    %485 = vector.broadcast %cst_119 : f32 to vector<64x16xf32>
    %486 = arith.select %484, %478, %485 : vector<64x16xi1>, vector<64x16xf32>
    %cst_120 = arith.constant 0.000000e+00 : f32
    %487 = vector.shape_cast %482 : vector<64x1xi1> to vector<64x1xi1>
    %488 = vector.broadcast %487 : vector<64x1xi1> to vector<64x16xi1>
    %489 = vector.broadcast %cst_120 : f32 to vector<64x16xf32>
    %490 = arith.select %488, %480, %489 : vector<64x16xi1>, vector<64x16xf32>
    %491 = vector.broadcast %474 : vector<1x16xf32> to vector<64x16xf32>
    %492 = arith.mulf %491, %486 : vector<64x16xf32>
    %493 = arith.addf %467, %492 : vector<64x16xf32>
    %494 = vector.broadcast %475 : vector<1x16xf32> to vector<64x16xf32>
    %495 = arith.mulf %494, %490 : vector<64x16xf32>
    %496 = arith.subf %493, %495 : vector<64x16xf32>
    %497 = vector.broadcast %474 : vector<1x16xf32> to vector<64x16xf32>
    %498 = arith.mulf %497, %490 : vector<64x16xf32>
    %499 = arith.addf %473, %498 : vector<64x16xf32>
    %500 = vector.broadcast %475 : vector<1x16xf32> to vector<64x16xf32>
    %501 = arith.mulf %500, %486 : vector<64x16xf32>
    %502 = arith.addf %499, %501 : vector<64x16xf32>
    %503 = vector.extract_strided_slice %403 {offsets = [7, 0], sizes = [1, 16], strides = [1, 1]} : vector<14x16xf32> to vector<1x16xf32>
    %504 = vector.extract_strided_slice %403 {offsets = [12, 0], sizes = [1, 16], strides = [1, 1]} : vector<14x16xf32> to vector<1x16xf32>
    %cst_121 = arith.constant 0.000000e+00 : f32
    %505 = vector.broadcast %cst_121 : f32 to vector<8x16xf32>
    %506 = vector.extract_strided_slice %496 {offsets = [0, 0], sizes = [56, 16], strides = [1, 1]} : vector<64x16xf32> to vector<56x16xf32>
    %507 = tpu.concatenate %505, %506 in 0 : vector<8x16xf32>, vector<56x16xf32> -> vector<64x16xf32>
    %508 = vector.extract_strided_slice %502 {offsets = [0, 0], sizes = [56, 16], strides = [1, 1]} : vector<64x16xf32> to vector<56x16xf32>
    %509 = tpu.concatenate %505, %508 in 0 : vector<8x16xf32>, vector<56x16xf32> -> vector<64x16xf32>
    %c8_i32_122 = arith.constant 8 : i32
    %510 = vector.broadcast %c8_i32_122 : i32 to vector<64x1xi32>
    %511 = arith.cmpi sge, %415, %510 : vector<64x1xi32>
    %cst_123 = arith.constant 0.000000e+00 : f32
    %512 = vector.shape_cast %511 : vector<64x1xi1> to vector<64x1xi1>
    %513 = vector.broadcast %512 : vector<64x1xi1> to vector<64x16xi1>
    %514 = vector.broadcast %cst_123 : f32 to vector<64x16xf32>
    %515 = arith.select %513, %507, %514 : vector<64x16xi1>, vector<64x16xf32>
    %cst_124 = arith.constant 0.000000e+00 : f32
    %516 = vector.shape_cast %511 : vector<64x1xi1> to vector<64x1xi1>
    %517 = vector.broadcast %516 : vector<64x1xi1> to vector<64x16xi1>
    %518 = vector.broadcast %cst_124 : f32 to vector<64x16xf32>
    %519 = arith.select %517, %509, %518 : vector<64x16xi1>, vector<64x16xf32>
    %520 = vector.broadcast %503 : vector<1x16xf32> to vector<64x16xf32>
    %521 = arith.mulf %520, %515 : vector<64x16xf32>
    %522 = arith.addf %496, %521 : vector<64x16xf32>
    %523 = vector.broadcast %504 : vector<1x16xf32> to vector<64x16xf32>
    %524 = arith.mulf %523, %519 : vector<64x16xf32>
    %525 = arith.subf %522, %524 : vector<64x16xf32>
    %526 = vector.broadcast %503 : vector<1x16xf32> to vector<64x16xf32>
    %527 = arith.mulf %526, %519 : vector<64x16xf32>
    %528 = arith.addf %502, %527 : vector<64x16xf32>
    %529 = vector.broadcast %504 : vector<1x16xf32> to vector<64x16xf32>
    %530 = arith.mulf %529, %515 : vector<64x16xf32>
    %531 = arith.addf %528, %530 : vector<64x16xf32>
    %532 = vector.extract_strided_slice %403 {offsets = [8, 0], sizes = [1, 16], strides = [1, 1]} : vector<14x16xf32> to vector<1x16xf32>
    %533 = vector.extract_strided_slice %403 {offsets = [13, 0], sizes = [1, 16], strides = [1, 1]} : vector<14x16xf32> to vector<1x16xf32>
    %cst_125 = arith.constant 0.000000e+00 : f32
    %534 = vector.broadcast %cst_125 : f32 to vector<16x16xf32>
    %535 = vector.extract_strided_slice %525 {offsets = [0, 0], sizes = [48, 16], strides = [1, 1]} : vector<64x16xf32> to vector<48x16xf32>
    %536 = tpu.concatenate %534, %535 in 0 : vector<16x16xf32>, vector<48x16xf32> -> vector<64x16xf32>
    %537 = vector.extract_strided_slice %531 {offsets = [0, 0], sizes = [48, 16], strides = [1, 1]} : vector<64x16xf32> to vector<48x16xf32>
    %538 = tpu.concatenate %534, %537 in 0 : vector<16x16xf32>, vector<48x16xf32> -> vector<64x16xf32>
    %c16_i32_126 = arith.constant 16 : i32
    %539 = vector.broadcast %c16_i32_126 : i32 to vector<64x1xi32>
    %540 = arith.cmpi sge, %415, %539 : vector<64x1xi32>
    %cst_127 = arith.constant 0.000000e+00 : f32
    %541 = vector.shape_cast %540 : vector<64x1xi1> to vector<64x1xi1>
    %542 = vector.broadcast %541 : vector<64x1xi1> to vector<64x16xi1>
    %543 = vector.broadcast %cst_127 : f32 to vector<64x16xf32>
    %544 = arith.select %542, %536, %543 : vector<64x16xi1>, vector<64x16xf32>
    %cst_128 = arith.constant 0.000000e+00 : f32
    %545 = vector.shape_cast %540 : vector<64x1xi1> to vector<64x1xi1>
    %546 = vector.broadcast %545 : vector<64x1xi1> to vector<64x16xi1>
    %547 = vector.broadcast %cst_128 : f32 to vector<64x16xf32>
    %548 = arith.select %546, %538, %547 : vector<64x16xi1>, vector<64x16xf32>
    %549 = vector.broadcast %532 : vector<1x16xf32> to vector<64x16xf32>
    %550 = arith.mulf %549, %544 : vector<64x16xf32>
    %551 = arith.addf %525, %550 : vector<64x16xf32>
    %552 = vector.broadcast %533 : vector<1x16xf32> to vector<64x16xf32>
    %553 = arith.mulf %552, %548 : vector<64x16xf32>
    %554 = arith.subf %551, %553 : vector<64x16xf32>
    %c1_129 = arith.constant 1 : index
    %c0_130 = arith.constant 0 : index
    %c0_131 = arith.constant 0 : index
    %555 = vector.load %arg10[%c1_129, %c0_130, %c0_131] : memref<2x32x16xf32, #tpu.memory_space<vmem>>, vector<1x32x16xf32>
    %556 = vector.shape_cast %555 : vector<1x32x16xf32> to vector<32x16xf32>
    %557 = tpu.concatenate %556, %556 in 0 : vector<32x16xf32>, vector<32x16xf32> -> vector<64x16xf32>
    %558 = arith.addf %554, %557 : vector<64x16xf32>
    %c1_132 = arith.constant 1 : index
    %c0_133 = arith.constant 0 : index
    %c0_134 = arith.constant 0 : index
    %559 = vector.load %arg7[%c1_132, %c0_133, %c0_134] : memref<2x16x16xf32, #tpu.memory_space<vmem>>, vector<1x16x16xf32>
    %560 = vector.shape_cast %559 : vector<1x16x16xf32> to vector<16x16xf32>
    %cst_135 = arith.constant dense<0.000000e+00> : vector<64x16xf32>
    %561 = tpu.matmul %558, %560, %cst_135 {dimension_numbers = #tpu.dot_dimension_numbers<[1], [0], [0], [1], [0, 0, 1, 1], [], []>, precision = #tpu.contract_precision<fp32>} : vector<64x16xf32>, vector<16x16xf32>, vector<64x16xf32> -> vector<64x16xf32>
    %562 = vector.extract_strided_slice %403 {offsets = [0, 0], sizes = [1, 16], strides = [1, 1]} : vector<14x16xf32> to vector<1x16xf32>
    %563 = vector.broadcast %562 : vector<1x16xf32> to vector<64x16xf32>
    %564 = arith.addf %561, %563 : vector<64x16xf32>
    %cst_136 = arith.constant 0.000000e+00 : f32
    %565 = vector.broadcast %cst_136 : f32 to vector<64x16xf32>
    %566 = arith.maximumf %564, %565 : vector<64x16xf32>
    %c1_137 = arith.constant 1 : index
    %c0_138 = arith.constant 0 : index
    %c0_139 = arith.constant 0 : index
    %567 = vector.load %arg8[%c1_137, %c0_138, %c0_139] : memref<2x16x16xf32, #tpu.memory_space<vmem>>, vector<1x16x16xf32>
    %568 = vector.shape_cast %567 : vector<1x16x16xf32> to vector<16x16xf32>
    %cst_140 = arith.constant dense<0.000000e+00> : vector<64x16xf32>
    %569 = tpu.matmul %566, %568, %cst_140 {dimension_numbers = #tpu.dot_dimension_numbers<[1], [0], [0], [1], [0, 0, 1, 1], [], []>, precision = #tpu.contract_precision<fp32>} : vector<64x16xf32>, vector<16x16xf32>, vector<64x16xf32> -> vector<64x16xf32>
    %570 = vector.extract_strided_slice %403 {offsets = [1, 0], sizes = [1, 16], strides = [1, 1]} : vector<14x16xf32> to vector<1x16xf32>
    %571 = vector.broadcast %570 : vector<1x16xf32> to vector<64x16xf32>
    %572 = arith.addf %569, %571 : vector<64x16xf32>
    %c2 = arith.constant 2 : index
    %573 = memref.load %arg1[%c2] : memref<4xf32, #tpu.memory_space<smem>>
    %574 = vector.broadcast %573 : f32 to vector<64x16xf32>
    %575 = arith.mulf %574, %572 : vector<64x16xf32>
    %cst_141 = arith.constant 1.000000e+00 : f32
    %576 = arith.subf %cst_141, %573 : f32
    %577 = vector.broadcast %576 : f32 to vector<64x16xf32>
    %578 = arith.mulf %577, %408 : vector<64x16xf32>
    %579 = arith.addf %575, %578 : vector<64x16xf32>
    %580 = vector.extract_strided_slice %403 {offsets = [2, 0], sizes = [1, 16], strides = [1, 1]} : vector<14x16xf32> to vector<1x16xf32>
    %581 = vector.extract_strided_slice %403 {offsets = [3, 0], sizes = [1, 16], strides = [1, 1]} : vector<14x16xf32> to vector<1x16xf32>
    %cst_142 = arith.constant dense<0.000000e+00> : vector<64xf32>
    %582 = vector.multi_reduction <add>, %579, %cst_142 [1] : vector<64x16xf32> to vector<64xf32>
    %583 = vector.shape_cast %582 : vector<64xf32> to vector<64x1xf32>
    %cst_143 = arith.constant 1.600000e+01 : f32
    %584 = vector.broadcast %cst_143 : f32 to vector<64x1xf32>
    %585 = arith.divf %583, %584 : vector<64x1xf32>
    %586 = vector.broadcast %585 : vector<64x1xf32> to vector<64x16xf32>
    %587 = arith.subf %579, %586 : vector<64x16xf32>
    %588 = arith.mulf %587, %587 : vector<64x16xf32>
    %cst_144 = arith.constant dense<0.000000e+00> : vector<64xf32>
    %589 = vector.multi_reduction <add>, %588, %cst_144 [1] : vector<64x16xf32> to vector<64xf32>
    %590 = vector.shape_cast %589 : vector<64xf32> to vector<64x1xf32>
    %cst_145 = arith.constant 1.600000e+01 : f32
    %591 = vector.broadcast %cst_145 : f32 to vector<64x1xf32>
    %592 = arith.divf %590, %591 : vector<64x1xf32>
    %593 = vector.broadcast %585 : vector<64x1xf32> to vector<64x16xf32>
    %594 = arith.subf %579, %593 : vector<64x16xf32>
    %cst_146 = arith.constant 9.99999974E-5 : f32
    %595 = vector.broadcast %cst_146 : f32 to vector<64x1xf32>
    %596 = arith.addf %592, %595 : vector<64x1xf32>
    %597 = math.rsqrt %596 : vector<64x1xf32>
    %598 = vector.broadcast %597 : vector<64x1xf32> to vector<64x16xf32>
    %599 = arith.mulf %594, %598 : vector<64x16xf32>
    %600 = vector.broadcast %580 : vector<1x16xf32> to vector<64x16xf32>
    %601 = arith.mulf %599, %600 : vector<64x16xf32>
    %602 = vector.broadcast %581 : vector<1x16xf32> to vector<64x16xf32>
    %603 = arith.addf %601, %602 : vector<64x16xf32>
    %604 = vector.extract_strided_slice %603 {offsets = [0, 0], sizes = [32, 16], strides = [1, 1]} : vector<64x16xf32> to vector<32x16xf32>
    %cst_147 = arith.constant dense<0.000000e+00> : vector<16x32xf32>
    %605 = tpu.matmul %5, %604, %cst_147 {dimension_numbers = #tpu.dot_dimension_numbers<[1], [1], [0], [0], [0, 0, 1, 0], [], []>, precision = #tpu.contract_precision<fp32>} : vector<16x16xf32>, vector<32x16xf32>, vector<16x32xf32> -> vector<16x32xf32>
    %606 = vector.extract_strided_slice %603 {offsets = [32, 0], sizes = [32, 16], strides = [1, 1]} : vector<64x16xf32> to vector<32x16xf32>
    %cst_148 = arith.constant dense<0.000000e+00> : vector<16x32xf32>
    %607 = tpu.matmul %5, %606, %cst_148 {dimension_numbers = #tpu.dot_dimension_numbers<[1], [1], [0], [0], [0, 0, 1, 0], [], []>, precision = #tpu.contract_precision<fp32>} : vector<16x16xf32>, vector<32x16xf32>, vector<16x32xf32> -> vector<16x32xf32>
    %608 = tpu.concatenate %605, %607 in 0 : vector<16x32xf32>, vector<16x32xf32> -> vector<32x32xf32>
    %c1_149 = arith.constant 1 : index
    %c0_150 = arith.constant 0 : index
    %c0_151 = arith.constant 0 : index
    %609 = vector.load %arg14[%c1_149, %c0_150, %c0_151] : memref<2x12x32xf32, #tpu.memory_space<vmem>>, vector<1x12x32xf32>
    %610 = vector.shape_cast %609 : vector<1x12x32xf32> to vector<12x32xf32>
    %c1_152 = arith.constant 1 : index
    %c0_153 = arith.constant 0 : index
    %c0_154 = arith.constant 0 : index
    %611 = vector.load %arg11[%c1_152, %c0_153, %c0_154] : memref<2x32x64xf32, #tpu.memory_space<vmem>>, vector<1x32x64xf32>
    %612 = vector.shape_cast %611 : vector<1x32x64xf32> to vector<32x64xf32>
    %cst_155 = arith.constant dense<0.000000e+00> : vector<32x64xf32>
    %613 = tpu.matmul %608, %612, %cst_155 {dimension_numbers = #tpu.dot_dimension_numbers<[1], [0], [0], [1], [0, 0, 1, 1], [], []>, precision = #tpu.contract_precision<fp32>} : vector<32x32xf32>, vector<32x64xf32>, vector<32x64xf32> -> vector<32x64xf32>
    %614 = vector.extract_strided_slice %613 {offsets = [0, 0], sizes = [32, 32], strides = [1, 1]} : vector<32x64xf32> to vector<32x32xf32>
    %615 = vector.extract_strided_slice %613 {offsets = [0, 32], sizes = [32, 32], strides = [1, 1]} : vector<32x64xf32> to vector<32x32xf32>
    %616 = tpu.iota {dimensions = array<i32: 1>} : vector<2x16x1xi32>
    %617 = vector.shape_cast %616 : vector<2x16x1xi32> to vector<32x1xi32>
    %618 = vector.extract_strided_slice %610 {offsets = [4, 0], sizes = [1, 32], strides = [1, 1]} : vector<12x32xf32> to vector<1x32xf32>
    %619 = vector.extract_strided_slice %610 {offsets = [8, 0], sizes = [1, 32], strides = [1, 1]} : vector<12x32xf32> to vector<1x32xf32>
    %cst_156 = arith.constant 0.000000e+00 : f32
    %620 = vector.broadcast %cst_156 : f32 to vector<1x32xf32>
    %621 = vector.extract_strided_slice %614 {offsets = [0, 0], sizes = [31, 32], strides = [1, 1]} : vector<32x32xf32> to vector<31x32xf32>
    %622 = tpu.concatenate %620, %621 in 0 : vector<1x32xf32>, vector<31x32xf32> -> vector<32x32xf32>
    %623 = vector.extract_strided_slice %615 {offsets = [0, 0], sizes = [31, 32], strides = [1, 1]} : vector<32x32xf32> to vector<31x32xf32>
    %624 = tpu.concatenate %620, %623 in 0 : vector<1x32xf32>, vector<31x32xf32> -> vector<32x32xf32>
    %c1_i32_157 = arith.constant 1 : i32
    %625 = vector.broadcast %c1_i32_157 : i32 to vector<32x1xi32>
    %626 = arith.cmpi sge, %617, %625 : vector<32x1xi32>
    %cst_158 = arith.constant 0.000000e+00 : f32
    %627 = vector.shape_cast %626 : vector<32x1xi1> to vector<32x1xi1>
    %628 = vector.broadcast %627 : vector<32x1xi1> to vector<32x32xi1>
    %629 = vector.broadcast %cst_158 : f32 to vector<32x32xf32>
    %630 = arith.select %628, %622, %629 : vector<32x32xi1>, vector<32x32xf32>
    %cst_159 = arith.constant 0.000000e+00 : f32
    %631 = vector.shape_cast %626 : vector<32x1xi1> to vector<32x1xi1>
    %632 = vector.broadcast %631 : vector<32x1xi1> to vector<32x32xi1>
    %633 = vector.broadcast %cst_159 : f32 to vector<32x32xf32>
    %634 = arith.select %632, %624, %633 : vector<32x32xi1>, vector<32x32xf32>
    %635 = vector.broadcast %618 : vector<1x32xf32> to vector<32x32xf32>
    %636 = arith.mulf %635, %630 : vector<32x32xf32>
    %637 = arith.addf %614, %636 : vector<32x32xf32>
    %638 = vector.broadcast %619 : vector<1x32xf32> to vector<32x32xf32>
    %639 = arith.mulf %638, %634 : vector<32x32xf32>
    %640 = arith.subf %637, %639 : vector<32x32xf32>
    %641 = vector.broadcast %618 : vector<1x32xf32> to vector<32x32xf32>
    %642 = arith.mulf %641, %634 : vector<32x32xf32>
    %643 = arith.addf %615, %642 : vector<32x32xf32>
    %644 = vector.broadcast %619 : vector<1x32xf32> to vector<32x32xf32>
    %645 = arith.mulf %644, %630 : vector<32x32xf32>
    %646 = arith.addf %643, %645 : vector<32x32xf32>
    %647 = vector.extract_strided_slice %610 {offsets = [5, 0], sizes = [1, 32], strides = [1, 1]} : vector<12x32xf32> to vector<1x32xf32>
    %648 = vector.extract_strided_slice %610 {offsets = [9, 0], sizes = [1, 32], strides = [1, 1]} : vector<12x32xf32> to vector<1x32xf32>
    %cst_160 = arith.constant 0.000000e+00 : f32
    %649 = vector.broadcast %cst_160 : f32 to vector<2x32xf32>
    %650 = vector.extract_strided_slice %640 {offsets = [0, 0], sizes = [30, 32], strides = [1, 1]} : vector<32x32xf32> to vector<30x32xf32>
    %651 = tpu.concatenate %649, %650 in 0 : vector<2x32xf32>, vector<30x32xf32> -> vector<32x32xf32>
    %652 = vector.extract_strided_slice %646 {offsets = [0, 0], sizes = [30, 32], strides = [1, 1]} : vector<32x32xf32> to vector<30x32xf32>
    %653 = tpu.concatenate %649, %652 in 0 : vector<2x32xf32>, vector<30x32xf32> -> vector<32x32xf32>
    %c2_i32_161 = arith.constant 2 : i32
    %654 = vector.broadcast %c2_i32_161 : i32 to vector<32x1xi32>
    %655 = arith.cmpi sge, %617, %654 : vector<32x1xi32>
    %cst_162 = arith.constant 0.000000e+00 : f32
    %656 = vector.shape_cast %655 : vector<32x1xi1> to vector<32x1xi1>
    %657 = vector.broadcast %656 : vector<32x1xi1> to vector<32x32xi1>
    %658 = vector.broadcast %cst_162 : f32 to vector<32x32xf32>
    %659 = arith.select %657, %651, %658 : vector<32x32xi1>, vector<32x32xf32>
    %cst_163 = arith.constant 0.000000e+00 : f32
    %660 = vector.shape_cast %655 : vector<32x1xi1> to vector<32x1xi1>
    %661 = vector.broadcast %660 : vector<32x1xi1> to vector<32x32xi1>
    %662 = vector.broadcast %cst_163 : f32 to vector<32x32xf32>
    %663 = arith.select %661, %653, %662 : vector<32x32xi1>, vector<32x32xf32>
    %664 = vector.broadcast %647 : vector<1x32xf32> to vector<32x32xf32>
    %665 = arith.mulf %664, %659 : vector<32x32xf32>
    %666 = arith.addf %640, %665 : vector<32x32xf32>
    %667 = vector.broadcast %648 : vector<1x32xf32> to vector<32x32xf32>
    %668 = arith.mulf %667, %663 : vector<32x32xf32>
    %669 = arith.subf %666, %668 : vector<32x32xf32>
    %670 = vector.broadcast %647 : vector<1x32xf32> to vector<32x32xf32>
    %671 = arith.mulf %670, %663 : vector<32x32xf32>
    %672 = arith.addf %646, %671 : vector<32x32xf32>
    %673 = vector.broadcast %648 : vector<1x32xf32> to vector<32x32xf32>
    %674 = arith.mulf %673, %659 : vector<32x32xf32>
    %675 = arith.addf %672, %674 : vector<32x32xf32>
    %676 = vector.extract_strided_slice %610 {offsets = [6, 0], sizes = [1, 32], strides = [1, 1]} : vector<12x32xf32> to vector<1x32xf32>
    %677 = vector.extract_strided_slice %610 {offsets = [10, 0], sizes = [1, 32], strides = [1, 1]} : vector<12x32xf32> to vector<1x32xf32>
    %cst_164 = arith.constant 0.000000e+00 : f32
    %678 = vector.broadcast %cst_164 : f32 to vector<4x32xf32>
    %679 = vector.extract_strided_slice %669 {offsets = [0, 0], sizes = [28, 32], strides = [1, 1]} : vector<32x32xf32> to vector<28x32xf32>
    %680 = tpu.concatenate %678, %679 in 0 : vector<4x32xf32>, vector<28x32xf32> -> vector<32x32xf32>
    %681 = vector.extract_strided_slice %675 {offsets = [0, 0], sizes = [28, 32], strides = [1, 1]} : vector<32x32xf32> to vector<28x32xf32>
    %682 = tpu.concatenate %678, %681 in 0 : vector<4x32xf32>, vector<28x32xf32> -> vector<32x32xf32>
    %c4_i32_165 = arith.constant 4 : i32
    %683 = vector.broadcast %c4_i32_165 : i32 to vector<32x1xi32>
    %684 = arith.cmpi sge, %617, %683 : vector<32x1xi32>
    %cst_166 = arith.constant 0.000000e+00 : f32
    %685 = vector.shape_cast %684 : vector<32x1xi1> to vector<32x1xi1>
    %686 = vector.broadcast %685 : vector<32x1xi1> to vector<32x32xi1>
    %687 = vector.broadcast %cst_166 : f32 to vector<32x32xf32>
    %688 = arith.select %686, %680, %687 : vector<32x32xi1>, vector<32x32xf32>
    %cst_167 = arith.constant 0.000000e+00 : f32
    %689 = vector.shape_cast %684 : vector<32x1xi1> to vector<32x1xi1>
    %690 = vector.broadcast %689 : vector<32x1xi1> to vector<32x32xi1>
    %691 = vector.broadcast %cst_167 : f32 to vector<32x32xf32>
    %692 = arith.select %690, %682, %691 : vector<32x32xi1>, vector<32x32xf32>
    %693 = vector.broadcast %676 : vector<1x32xf32> to vector<32x32xf32>
    %694 = arith.mulf %693, %688 : vector<32x32xf32>
    %695 = arith.addf %669, %694 : vector<32x32xf32>
    %696 = vector.broadcast %677 : vector<1x32xf32> to vector<32x32xf32>
    %697 = arith.mulf %696, %692 : vector<32x32xf32>
    %698 = arith.subf %695, %697 : vector<32x32xf32>
    %699 = vector.broadcast %676 : vector<1x32xf32> to vector<32x32xf32>
    %700 = arith.mulf %699, %692 : vector<32x32xf32>
    %701 = arith.addf %675, %700 : vector<32x32xf32>
    %702 = vector.broadcast %677 : vector<1x32xf32> to vector<32x32xf32>
    %703 = arith.mulf %702, %688 : vector<32x32xf32>
    %704 = arith.addf %701, %703 : vector<32x32xf32>
    %705 = vector.extract_strided_slice %610 {offsets = [7, 0], sizes = [1, 32], strides = [1, 1]} : vector<12x32xf32> to vector<1x32xf32>
    %706 = vector.extract_strided_slice %610 {offsets = [11, 0], sizes = [1, 32], strides = [1, 1]} : vector<12x32xf32> to vector<1x32xf32>
    %cst_168 = arith.constant 0.000000e+00 : f32
    %707 = vector.broadcast %cst_168 : f32 to vector<8x32xf32>
    %708 = vector.extract_strided_slice %698 {offsets = [0, 0], sizes = [24, 32], strides = [1, 1]} : vector<32x32xf32> to vector<24x32xf32>
    %709 = tpu.concatenate %707, %708 in 0 : vector<8x32xf32>, vector<24x32xf32> -> vector<32x32xf32>
    %710 = vector.extract_strided_slice %704 {offsets = [0, 0], sizes = [24, 32], strides = [1, 1]} : vector<32x32xf32> to vector<24x32xf32>
    %711 = tpu.concatenate %707, %710 in 0 : vector<8x32xf32>, vector<24x32xf32> -> vector<32x32xf32>
    %c8_i32_169 = arith.constant 8 : i32
    %712 = vector.broadcast %c8_i32_169 : i32 to vector<32x1xi32>
    %713 = arith.cmpi sge, %617, %712 : vector<32x1xi32>
    %cst_170 = arith.constant 0.000000e+00 : f32
    %714 = vector.shape_cast %713 : vector<32x1xi1> to vector<32x1xi1>
    %715 = vector.broadcast %714 : vector<32x1xi1> to vector<32x32xi1>
    %716 = vector.broadcast %cst_170 : f32 to vector<32x32xf32>
    %717 = arith.select %715, %709, %716 : vector<32x32xi1>, vector<32x32xf32>
    %cst_171 = arith.constant 0.000000e+00 : f32
    %718 = vector.shape_cast %713 : vector<32x1xi1> to vector<32x1xi1>
    %719 = vector.broadcast %718 : vector<32x1xi1> to vector<32x32xi1>
    %720 = vector.broadcast %cst_171 : f32 to vector<32x32xf32>
    %721 = arith.select %719, %711, %720 : vector<32x32xi1>, vector<32x32xf32>
    %722 = vector.broadcast %705 : vector<1x32xf32> to vector<32x32xf32>
    %723 = arith.mulf %722, %717 : vector<32x32xf32>
    %724 = arith.addf %698, %723 : vector<32x32xf32>
    %725 = vector.broadcast %706 : vector<1x32xf32> to vector<32x32xf32>
    %726 = arith.mulf %725, %721 : vector<32x32xf32>
    %727 = arith.subf %724, %726 : vector<32x32xf32>
    %c1_172 = arith.constant 1 : index
    %c0_173 = arith.constant 0 : index
    %c0_174 = arith.constant 0 : index
    %728 = vector.load %arg15[%c1_172, %c0_173, %c0_174] : memref<2x16x32xf32, #tpu.memory_space<vmem>>, vector<1x16x32xf32>
    %729 = vector.shape_cast %728 : vector<1x16x32xf32> to vector<16x32xf32>
    %730 = tpu.concatenate %729, %729 in 0 : vector<16x32xf32>, vector<16x32xf32> -> vector<32x32xf32>
    %731 = arith.addf %727, %730 : vector<32x32xf32>
    %c1_175 = arith.constant 1 : index
    %c0_176 = arith.constant 0 : index
    %c0_177 = arith.constant 0 : index
    %732 = vector.load %arg12[%c1_175, %c0_176, %c0_177] : memref<2x32x32xf32, #tpu.memory_space<vmem>>, vector<1x32x32xf32>
    %733 = vector.shape_cast %732 : vector<1x32x32xf32> to vector<32x32xf32>
    %cst_178 = arith.constant dense<0.000000e+00> : vector<32x32xf32>
    %734 = tpu.matmul %731, %733, %cst_178 {dimension_numbers = #tpu.dot_dimension_numbers<[1], [0], [0], [1], [0, 0, 1, 1], [], []>, precision = #tpu.contract_precision<fp32>} : vector<32x32xf32>, vector<32x32xf32>, vector<32x32xf32> -> vector<32x32xf32>
    %735 = vector.extract_strided_slice %610 {offsets = [0, 0], sizes = [1, 32], strides = [1, 1]} : vector<12x32xf32> to vector<1x32xf32>
    %736 = vector.broadcast %735 : vector<1x32xf32> to vector<32x32xf32>
    %737 = arith.addf %734, %736 : vector<32x32xf32>
    %cst_179 = arith.constant 0.000000e+00 : f32
    %738 = vector.broadcast %cst_179 : f32 to vector<32x32xf32>
    %739 = arith.maximumf %737, %738 : vector<32x32xf32>
    %c1_180 = arith.constant 1 : index
    %c0_181 = arith.constant 0 : index
    %c0_182 = arith.constant 0 : index
    %740 = vector.load %arg13[%c1_180, %c0_181, %c0_182] : memref<2x32x32xf32, #tpu.memory_space<vmem>>, vector<1x32x32xf32>
    %741 = vector.shape_cast %740 : vector<1x32x32xf32> to vector<32x32xf32>
    %cst_183 = arith.constant dense<0.000000e+00> : vector<32x32xf32>
    %742 = tpu.matmul %739, %741, %cst_183 {dimension_numbers = #tpu.dot_dimension_numbers<[1], [0], [0], [1], [0, 0, 1, 1], [], []>, precision = #tpu.contract_precision<fp32>} : vector<32x32xf32>, vector<32x32xf32>, vector<32x32xf32> -> vector<32x32xf32>
    %743 = vector.extract_strided_slice %610 {offsets = [1, 0], sizes = [1, 32], strides = [1, 1]} : vector<12x32xf32> to vector<1x32xf32>
    %744 = vector.broadcast %743 : vector<1x32xf32> to vector<32x32xf32>
    %745 = arith.addf %742, %744 : vector<32x32xf32>
    %c3 = arith.constant 3 : index
    %746 = memref.load %arg1[%c3] : memref<4xf32, #tpu.memory_space<smem>>
    %747 = vector.broadcast %746 : f32 to vector<32x32xf32>
    %748 = arith.mulf %747, %745 : vector<32x32xf32>
    %cst_184 = arith.constant 1.000000e+00 : f32
    %749 = arith.subf %cst_184, %746 : f32
    %750 = vector.broadcast %749 : f32 to vector<32x32xf32>
    %751 = arith.mulf %750, %608 : vector<32x32xf32>
    %752 = arith.addf %748, %751 : vector<32x32xf32>
    %753 = vector.extract_strided_slice %610 {offsets = [2, 0], sizes = [1, 32], strides = [1, 1]} : vector<12x32xf32> to vector<1x32xf32>
    %754 = vector.extract_strided_slice %610 {offsets = [3, 0], sizes = [1, 32], strides = [1, 1]} : vector<12x32xf32> to vector<1x32xf32>
    %cst_185 = arith.constant dense<0.000000e+00> : vector<32xf32>
    %755 = vector.multi_reduction <add>, %752, %cst_185 [1] : vector<32x32xf32> to vector<32xf32>
    %756 = vector.shape_cast %755 : vector<32xf32> to vector<32x1xf32>
    %cst_186 = arith.constant 3.200000e+01 : f32
    %757 = vector.broadcast %cst_186 : f32 to vector<32x1xf32>
    %758 = arith.divf %756, %757 : vector<32x1xf32>
    %759 = vector.broadcast %758 : vector<32x1xf32> to vector<32x32xf32>
    %760 = arith.subf %752, %759 : vector<32x32xf32>
    %761 = arith.mulf %760, %760 : vector<32x32xf32>
    %cst_187 = arith.constant dense<0.000000e+00> : vector<32xf32>
    %762 = vector.multi_reduction <add>, %761, %cst_187 [1] : vector<32x32xf32> to vector<32xf32>
    %763 = vector.shape_cast %762 : vector<32xf32> to vector<32x1xf32>
    %cst_188 = arith.constant 3.200000e+01 : f32
    %764 = vector.broadcast %cst_188 : f32 to vector<32x1xf32>
    %765 = arith.divf %763, %764 : vector<32x1xf32>
    %766 = vector.broadcast %758 : vector<32x1xf32> to vector<32x32xf32>
    %767 = arith.subf %752, %766 : vector<32x32xf32>
    %cst_189 = arith.constant 9.99999974E-5 : f32
    %768 = vector.broadcast %cst_189 : f32 to vector<32x1xf32>
    %769 = arith.addf %765, %768 : vector<32x1xf32>
    %770 = math.rsqrt %769 : vector<32x1xf32>
    %771 = vector.broadcast %770 : vector<32x1xf32> to vector<32x32xf32>
    %772 = arith.mulf %767, %771 : vector<32x32xf32>
    %773 = vector.broadcast %753 : vector<1x32xf32> to vector<32x32xf32>
    %774 = arith.mulf %772, %773 : vector<32x32xf32>
    %775 = vector.broadcast %754 : vector<1x32xf32> to vector<32x32xf32>
    %776 = arith.addf %774, %775 : vector<32x32xf32>
    %c0_190 = arith.constant 0 : index
    %c0_191 = arith.constant 0 : index
    %777 = vector.load %arg16[%c0_190, %c0_191] : memref<32x4xf32, #tpu.memory_space<vmem>>, vector<32x4xf32>
    %cst_192 = arith.constant dense<0.000000e+00> : vector<32x4xf32>
    %778 = tpu.matmul %776, %777, %cst_192 {dimension_numbers = #tpu.dot_dimension_numbers<[1], [0], [0], [1], [0, 0, 1, 1], [], []>, precision = #tpu.contract_precision<fp32>} : vector<32x32xf32>, vector<32x4xf32>, vector<32x4xf32> -> vector<32x4xf32>
    %c0_193 = arith.constant 0 : index
    %c0_194 = arith.constant 0 : index
    %779 = vector.load %arg17[%c0_193, %c0_194] : memref<1x4xf32, #tpu.memory_space<vmem>>, vector<1x4xf32>
    %780 = vector.broadcast %779 : vector<1x4xf32> to vector<32x4xf32>
    %781 = arith.addf %778, %780 : vector<32x4xf32>
    %782 = vector.shape_cast %781 : vector<32x4xf32> to vector<2x16x4xf32>
    %c0_195 = arith.constant 0 : index
    %c0_196 = arith.constant 0 : index
    %c0_197 = arith.constant 0 : index
    %783 = vector.load %arg18[%c0_195, %c0_196, %c0_197] : memref<2x16x4xf32, #tpu.memory_space<vmem>>, vector<2x16x4xf32>
    tpu.vector_store %arg18[%c0_195, %c0_196, %c0_197], %782 {strides = array<i32>} : memref<2x16x4xf32, #tpu.memory_space<vmem>>, vector<2x16x4xf32>,
    return
  }
  func.func @transform_0(%arg0: i32) -> i32 {
    %c0_i32 = arith.constant 0 : i32
    %c0_i32_0 = arith.constant 0 : i32
    return %c0_i32 : i32
  }
  func.func @transform_1(%arg0: i32) -> (i32, i32, i32) {
    %c0_i32 = arith.constant 0 : i32
    %c0_i32_0 = arith.constant 0 : i32
    %c0_i32_1 = arith.constant 0 : i32
    return %arg0, %c0_i32, %c0_i32_0 : i32, i32, i32
  }
  func.func @transform_2(%arg0: i32) -> (i32, i32) {
    %c0_i32 = arith.constant 0 : i32
    %c0_i32_0 = arith.constant 0 : i32
    %c0_i32_1 = arith.constant 0 : i32
    return %c0_i32, %c0_i32_0 : i32, i32
  }
  func.func @transform_3(%arg0: i32) -> (i32, i32) {
    %c0_i32 = arith.constant 0 : i32
    %c0_i32_0 = arith.constant 0 : i32
    %c0_i32_1 = arith.constant 0 : i32
    return %c0_i32, %c0_i32_0 : i32, i32
  }
  func.func @transform_4(%arg0: i32) -> (i32, i32) {
    %c0_i32 = arith.constant 0 : i32
    %c0_i32_0 = arith.constant 0 : i32
    %c0_i32_1 = arith.constant 0 : i32
    return %c0_i32, %c0_i32_0 : i32, i32
  }
  func.func @transform_5(%arg0: i32) -> (i32, i32, i32) {
    %c0_i32 = arith.constant 0 : i32
    %c0_i32_0 = arith.constant 0 : i32
    %c0_i32_1 = arith.constant 0 : i32
    %c0_i32_2 = arith.constant 0 : i32
    return %c0_i32, %c0_i32_0, %c0_i32_1 : i32, i32, i32
  }
  func.func @transform_6(%arg0: i32) -> (i32, i32, i32) {
    %c0_i32 = arith.constant 0 : i32
    %c0_i32_0 = arith.constant 0 : i32
    %c0_i32_1 = arith.constant 0 : i32
    %c0_i32_2 = arith.constant 0 : i32
    return %c0_i32, %c0_i32_0, %c0_i32_1 : i32, i32, i32
  }
  func.func @transform_7(%arg0: i32) -> (i32, i32, i32) {
    %c0_i32 = arith.constant 0 : i32
    %c0_i32_0 = arith.constant 0 : i32
    %c0_i32_1 = arith.constant 0 : i32
    %c0_i32_2 = arith.constant 0 : i32
    return %c0_i32, %c0_i32_0, %c0_i32_1 : i32, i32, i32
  }
  func.func @transform_8(%arg0: i32) -> (i32, i32, i32) {
    %c0_i32 = arith.constant 0 : i32
    %c0_i32_0 = arith.constant 0 : i32
    %c0_i32_1 = arith.constant 0 : i32
    %c0_i32_2 = arith.constant 0 : i32
    return %c0_i32, %c0_i32_0, %c0_i32_1 : i32, i32, i32
  }
  func.func @transform_9(%arg0: i32) -> (i32, i32, i32) {
    %c0_i32 = arith.constant 0 : i32
    %c0_i32_0 = arith.constant 0 : i32
    %c0_i32_1 = arith.constant 0 : i32
    %c0_i32_2 = arith.constant 0 : i32
    return %c0_i32, %c0_i32_0, %c0_i32_1 : i32, i32, i32
  }
  func.func @transform_10(%arg0: i32) -> (i32, i32, i32) {
    %c0_i32 = arith.constant 0 : i32
    %c0_i32_0 = arith.constant 0 : i32
    %c0_i32_1 = arith.constant 0 : i32
    %c0_i32_2 = arith.constant 0 : i32
    return %c0_i32, %c0_i32_0, %c0_i32_1 : i32, i32, i32
  }
  func.func @transform_11(%arg0: i32) -> (i32, i32, i32) {
    %c0_i32 = arith.constant 0 : i32
    %c0_i32_0 = arith.constant 0 : i32
    %c0_i32_1 = arith.constant 0 : i32
    %c0_i32_2 = arith.constant 0 : i32
    return %c0_i32, %c0_i32_0, %c0_i32_1 : i32, i32, i32
  }
  func.func @transform_12(%arg0: i32) -> (i32, i32, i32) {
    %c0_i32 = arith.constant 0 : i32
    %c0_i32_0 = arith.constant 0 : i32
    %c0_i32_1 = arith.constant 0 : i32
    %c0_i32_2 = arith.constant 0 : i32
    return %c0_i32, %c0_i32_0, %c0_i32_1 : i32, i32, i32
  }
  func.func @transform_13(%arg0: i32) -> (i32, i32, i32) {
    %c0_i32 = arith.constant 0 : i32
    %c0_i32_0 = arith.constant 0 : i32
    %c0_i32_1 = arith.constant 0 : i32
    %c0_i32_2 = arith.constant 0 : i32
    return %c0_i32, %c0_i32_0, %c0_i32_1 : i32, i32, i32
  }
  func.func @transform_14(%arg0: i32) -> (i32, i32, i32) {
    %c0_i32 = arith.constant 0 : i32
    %c0_i32_0 = arith.constant 0 : i32
    %c0_i32_1 = arith.constant 0 : i32
    %c0_i32_2 = arith.constant 0 : i32
    return %c0_i32, %c0_i32_0, %c0_i32_1 : i32, i32, i32
  }
  func.func @transform_15(%arg0: i32) -> (i32, i32) {
    %c0_i32 = arith.constant 0 : i32
    %c0_i32_0 = arith.constant 0 : i32
    %c0_i32_1 = arith.constant 0 : i32
    return %c0_i32, %c0_i32_0 : i32, i32
  }
  func.func @transform_16(%arg0: i32) -> (i32, i32) {
    %c0_i32 = arith.constant 0 : i32
    %c0_i32_0 = arith.constant 0 : i32
    %c0_i32_1 = arith.constant 0 : i32
    return %c0_i32, %c0_i32_0 : i32, i32
  }
  func.func @transform_17(%arg0: i32) -> (i32, i32, i32) {
    %c0_i32 = arith.constant 0 : i32
    %c0_i32_0 = arith.constant 0 : i32
    %c0_i32_1 = arith.constant 0 : i32
    return %arg0, %c0_i32, %c0_i32_0 : i32, i32, i32
  }
}

</mosaic_0001>

<bundles_post_ra>
// kernel: tpu_custom_call.1
= control target key start
LH: loop header
LB: loop body
LE: loop exit
PB: predicated region body
PF: predicated region fallthrough
CT: control target
= control target key end

     0   :  { %6 = vsyncpa [#allocation3], 0  ;;  %s136_s9 = smov [#allocation2]   ;;  %s137_s11 = smov 128   ;;  %s184_s0 = inlined_call_operand.hbm [shape: f32[2,16,32], index: 0, kind: input, shape index: {}]   ;;  %s185_s1 = inlined_call_operand.vmem [shape: f32[2,32,16], index: 1, kind: output, shape index: {}]  }
   0x1   :  { %s11_s8 = sshll.u32 %s184_s0, 4  ;;  %s13_s10 = sshll.u32 %s136_s9, 4  ;;  %s12_s8 = int_to_ptr.hbm [resolvable:$true] %s11_s8  ;;  %s14_s10 = int_to_ptr.vmem [resolvable:$true] %s13_s10 }
   0x2   :  { %s138_s12 = smov 8  }
   0x3   :  { %19 = dma.hbm_to_vmem [thread:$0]  %s12_s8, 512, %s14_s10, [#allocation3], %s137_s11, %s137_s11, %s138_s12  }
   0x4   :  { %134 = dma.done.wait [#allocation3], 512  }
   0x5   :  { %135 = vsyncadd [#allocation3], 4294966784  ;;  %v26_v0 = vld [vmem:[#allocation2 + $0x10] sm:$0xff]  ;;  %v24_v1 = vld [vmem:[#allocation2] sm:$0xff]  ;;  %vm92_vm0 = vcmask 130048  }
   0x6   :  { %60 = vxpose.xlu1.b32.start [1/2] (short) (narrow) %v26_v0, 32  ;;  %28 = vxpose.xlu0.b32.start [1/2] (short) (narrow) %v24_v1, 32  ;;  %v27_v2 = vld [vmem:[#allocation2 + $0x18] sm:$0xff]  ;;  %v25_v3 = vld [vmem:[#allocation2 + $0x8] sm:$0xff] }
   0xe   :  { %61 = vxpose.xlu1.b32.end [2/2] (short) (narrow) %v27_v2, 32  ;;  %29 = vxpose.xlu0.b32.end [2/2] (short) (narrow) %v25_v3, 32 }
  0xaa   :  { %v76_v4 = vpop.trf.xlu1  ;;  %v44_v5 = vpop.trf.xlu0 }
  0xab   :  { %97 = vst.msk [vmem:[%s185_s1 + $0x20] sm:$0xff] %vm92_vm0, %v76_v4 }
  0xac   :  { %93 = vst.msk [vmem:[%s185_s1] sm:$0xff] %vm92_vm0, %v44_v5 }
  0xb2   :  { %v77_v6 = vpop.trf.xlu1  ;;  %v45_v7 = vpop.trf.xlu0 }
  0xb3   :  { %98 = vst.msk [vmem:[%s185_s1 + $0x28] sm:$0xff] %vm92_vm0, %v77_v6 }
  0xb4   :  { %94 = vst.msk [vmem:[%s185_s1 + $0x8] sm:$0xff] %vm92_vm0, %v45_v7 }
  0xba   :  { %v78_v8 = vpop.trf.xlu1  ;;  %v46_v9 = vpop.trf.xlu0 }
  0xbb   :  { %99 = vst.msk [vmem:[%s185_s1 + $0x30] sm:$0xff] %vm92_vm0, %v78_v8 }
  0xbc   :  { %95 = vst.msk [vmem:[%s185_s1 + $0x10] sm:$0xff] %vm92_vm0, %v46_v9 }
  0xc2   :  { %v79_v10 = vpop.trf.xlu1  ;;  %v47_v11 = vpop.trf.xlu0 }
  0xc3   :  { %100 = vst.msk [vmem:[%s185_s1 + $0x38] sm:$0xff] %vm92_vm0, %v79_v10 }
  0xc4   :  { %96 = vst.msk [vmem:[%s185_s1 + $0x18] sm:$0xff] %vm92_vm0, %v47_v11 }
  0xc5   :  { %105 = vsyncpa [#allocation3], 1 }

// kernel: tpu_custom_call.1
= control target key start
LH: loop header
LB: loop body
LE: loop exit
PB: predicated region body
PF: predicated region fallthrough
CT: control target
= control target key end

     0   :  { %s14369_s0 = inlined_call_operand.vmem [shape: f32[4], index: 0, kind: input, shape index: {}]   ;;  %s14370_s1 = inlined_call_operand.vmem [shape: f32[2,16,8], index: 1, kind: input, shape index: {}]   ;;  %s14371_s2 = inlined_call_operand.vmem [shape: f32[8,32], index: 2, kind: input, shape index: {}]   ;;  %s14372_s3 = inlined_call_operand.vmem [shape: f32[2,32], index: 3, kind: input, shape index: {}]   ;;  %s14373_s4 = inlined_call_operand.vmem [shape: f32[32,32], index: 4, kind: input, shape index: {}]   ;;  %s14374_s5 = inlined_call_operand.vmem [shape: f32[2,16,32], index: 5, kind: input, shape index: {}]   ;;  %s14375_s6 = inlined_call_operand.hbm [shape: f32[2,16,16], index: 6, kind: input, shape index: {}]   ;;  %s14376_s7 = inlined_call_operand.hbm [shape: f32[2,16,16], index: 7, kind: input, shape index: {}]   ;;  %s14377_s8 = inlined_call_operand.vmem [shape: f32[2,14,16], index: 8, kind: input, shape index: {}]   ;;  %s14378_s9 = inlined_call_operand.vmem [shape: f32[2,32,16], index: 9, kind: input, shape index: {}]   ;;  %s14379_s10 = inlined_call_operand.vmem [shape: f32[2,32,64], index: 10, kind: input, shape index: {}]   ;;  %s14380_s11 = inlined_call_operand.vmem [shape: f32[2,32,32], index: 11, kind: input, shape index: {}]   ;;  %s14381_s12 = inlined_call_operand.hbm [shape: f32[2,32,32], index: 12, kind: input, shape index: {}]   ;;  %s14382_s13 = inlined_call_operand.vmem [shape: f32[2,12,32], index: 13, kind: input, shape index: {}]   ;;  %s14383_s14 = inlined_call_operand.hbm [shape: f32[2,16,32], index: 14, kind: input, shape index: {}]   ;;  %s14384_s15 = inlined_call_operand.vmem [shape: f32[32,4], index: 15, kind: input, shape index: {}]   ;;  %s14385_s16 = inlined_call_operand.vmem [shape: f32[1,4], index: 16, kind: input, shape index: {}]   ;;  %s14386_s17 = inlined_call_operand.vmem [shape: f32[2,16,4], index: 17, kind: output, shape index: {}]  }
   0x1   :  { %14459 = sst [smem:[#allocation36_spill]] %s14369_s0 }
   0x2   :  { %14460 = sst [smem:[#allocation37_spill]] %s14370_s1 }
   0x3   :  { %14461 = sst [smem:[#allocation38_spill]] %s14386_s17 }
   0x4   :  { %22 = vsyncpa [#allocation4], 0 }
   0x5   :  { %23 = vsyncpa [#allocation3], 0 }
   0x6   :  { %24 = vsyncpa [#allocation7], 0 }
   0x7   :  { %25 = vsyncpa [#allocation10], 0  ;;  %s62_s26 = sshll.u32 %s14376_s7, 4  ;;  %s10693_s27 = smov [#allocation6]   ;;  %s63_s26 = int_to_ptr.hbm [resolvable:$true] %s62_s26 }
   0x8   :  { %s64_s28 = sshll.u32 %s10693_s27, 4  ;;  %s14462_s30 = sld [smem:[#allocation36_spill]]  ;;  %s65_s28 = int_to_ptr.vmem [resolvable:$true] %s64_s28 }
   0x9   :  { %s10694_s19 = smov 128   ;;  %s10695_s1 = smov 8  }
   0xa   :  { %70 = dma.hbm_to_vmem [thread:$0]  %s63_s26, 512, %s65_s28, [#allocation7], %s10694_s19, %s10694_s19, %s10695_s1  }
   0xb   :  { %s10696_s20 = smov [#allocation2]   ;;  %s49_s23 = sshll.u32 %s14375_s6, 4  ;;  %s50_s23 = int_to_ptr.hbm [resolvable:$true] %s49_s23 }
   0xc   :  { %s10697_s7 = smov [#allocation5]   ;;  %s83_s17 = sshll.u32 %s14381_s12, 4  ;;  %s84_s17 = int_to_ptr.hbm [resolvable:$true] %s83_s17 }
   0xd   :  { %s51_s24 = sshll.u32 %s10697_s7, 4  ;;  %s10698_s29 = smov [#allocation8]   ;;  %s52_s24 = int_to_ptr.vmem [resolvable:$true] %s51_s24 }
   0xe   :  { %s31_s18 = sshll.u32 %s14462_s30, 4  ;;  %s85_s0 = sshll.u32 %s10698_s29, 4  ;;  %s32_s18 = int_to_ptr.vmem [resolvable:$true] %s31_s18  ;;  %s86_s0 = int_to_ptr.vmem [resolvable:$true] %s85_s0 }
   0xf   :  { %34 = dma.vmem_to_smem %s32_s18, 16, %s10696_s20, [#allocation4]  }
  0x10   :  { %57 = dma.hbm_to_vmem [thread:$0]  %s50_s23, 512, %s52_s24, [#allocation3], %s10694_s19, %s10694_s19, %s10695_s1  }
  0x11   :  { %s98_s30 = sshll.u32 %s14383_s14, 4  ;;  %s10699_s6 = smov [#allocation9]   ;;  %s99_s30 = int_to_ptr.hbm [resolvable:$true] %s98_s30 }
  0x12   :  { %91 = dma.hbm_to_vmem [thread:$0]  %s84_s17, 1024, %s86_s0, [#allocation7], %s10694_s19, %s10694_s19, %s10695_s1  }
  0x13   :  { %s100_s18 = sshll.u32 %s10699_s6, 4  ;;  %s101_s18 = int_to_ptr.vmem [resolvable:$true] %s100_s18 }
  0x14   :  { %106 = dma.hbm_to_vmem [thread:$0]  %s99_s30, 512, %s101_s18, [#allocation10], %s10694_s19, %s10694_s19, %s10695_s1  }
  0x15   :  { %10685 = dma.done.wait [#allocation4], 16  }
  0x16   :  { %10686 = vsyncadd [#allocation4], 4294967280 }
  0x17   :  { %10687 = dma.done.wait [#allocation3], 512  }
  0x18   :  { %10688 = vsyncadd [#allocation3], 4294966784 }
  0x19   :  { %10689 = dma.done.wait [#allocation7], 1536  }
  0x1a   :  { %10690 = vsyncadd [#allocation7], 4294965760 }
  0x1b   :  { %10691 = dma.done.wait [#allocation10], 512  }
  0x1c   :  { %10692 = vsyncadd [#allocation10], 4294966784 }
  0x1d   :  { %131 = sfence }
  0x1e   :  { %v152_v0 = vld [vmem:[%s14371_s2] sm:$0xff]  ;;  %s14463_s21 = sld [smem:[#allocation37_spill]]  ;;  %vm154_vm0 = vcmask 64512   ;;  %v413_v34 = vld [vmem:[%s14373_s4 + $0x18] sm:$0xff]  ;;  %v412_v36 = vld [vmem:[%s14373_s4 + $0x10] sm:$0xff]  ;;  %vm415_vm1 = vcmask 261120  }
  0x1f   :  { %v182_v3 = vand.u32 4294901760, %v152_v0  ;;  %v440_v35 = vand.u32 4294901760, %v413_v34  ;;  %v442_v38 = vand.u32 4294901760, %v412_v36  ;;  %v411_v39 = vld [vmem:[%s14373_s4 + $0x8] sm:$0xff]  ;;  %v410_v43 = vld [vmem:[%s14373_s4] sm:$0xff]  ;;  %vm1238_vm6 = vcmask 130048  }
  0x20   :  { %v444_v42 = vand.u32 4294901760, %v411_v39  ;;  %v446_v47 = vand.u32 4294901760, %v410_v43  ;;  %v10846_v62 = vld [vmem:[%s14372_s3] sm:$0x3]  ;;  %s11044_s14 = sld [smem:[#allocation2]]  ;;  %vm1647_vm7 = vcmask 1040384  }
  0x21   :  { %v233_v9 = vsub.f32 %v152_v0, %v182_v3  ;;  %183 = vmatpush.msra.mxu0 %v182_v3  ;;  %310 = vmatpush.msra.mxu3 %v182_v3  ;;  %v494_v37 = vsub.f32 %v413_v34, %v440_v35  ;;  %v500_v41 = vsub.f32 %v412_v36, %v442_v38  ;;  %v153_v63 = vperm.slane %v10846_v62, 0  ;;  %s10702_s2 = smov 16   ;;  %s10704_s23 = smov 96  }
  0x22   :  { %v506_v46 = vsub.f32 %v411_v39, %v444_v42  ;;  %v512_v53 = vsub.f32 %v410_v43, %v446_v47  ;;  %vm1863_vm9 = vcmask 1041408   ;;  %vm2102_vm11 = vcmask 1043456   ;;  %s10705_s7 = smov 32   ;;  %s10449_s3 = sld [smem:[#allocation2 + $0x1]] }
  0x23   :  { %272 = vmatpush.msra.mxu2 %v233_v9  ;;  %v234_v12 = vand.u32 4294901760, %v233_v9  ;;  %v495_v40 = vand.u32 4294901760, %v494_v37  ;;  %v501_v45 = vand.u32 4294901760, %v500_v41 }
  0x24   :  { %v147_v1 = vld [vmem:[%s14463_s21] sm:$0xff]  ;;  %v148_v2 = vld [vmem:[%s14463_s21 + $0x8] sm:$0xff]  ;;  %v149_v8 = vld [vmem:[%s14463_s21 + $0x10] sm:$0xff]  ;;  %v507_v52 = vand.u32 4294901760, %v506_v46  ;;  %v513_v56 = vand.u32 4294901760, %v512_v53 }
  0x25   :  { %v156_v4 = vsel %vm154_vm0, %v147_v1, 0  ;;  %v159_v5 = vsel %vm154_vm0, %v148_v2, 0  ;;  %v162_v13 = vsel %vm154_vm0, %v149_v8, 0  ;;  %v235_v15 = vsub.f32 %v233_v9, %v234_v12  ;;  %354 = vmatpush.msrb.mxu0 %v234_v12  ;;  %v150_v21 = vld [vmem:[%s14463_s21 + $0x18] sm:$0xff]  ;;  %441 = vmatpush.msrb.mxu2 %v440_v35  ;;  %s10701_s21 = smov 112  }
  0x26   :  { %v184_v6 = vand.u32 4294901760, %v156_v4  ;;  %v192_v7 = vand.u32 4294901760, %v159_v5  ;;  %v200_v18 = vand.u32 4294901760, %v162_v13  ;;  %v165_v24 = vsel %vm154_vm0, %v150_v21, 0  ;;  %s3395_s17 = ssub.f32 1.0, %s11044_s14 }
  0x27   :  { %v236_v19 = vand.u32 4294901760, %v235_v15  ;;  %v208_v27 = vand.u32 4294901760, %v165_v24  ;;  %443 = vmatpush.msrb.mxu2 %v442_v38  ;;  %v496_v44 = vsub.f32 %v494_v37, %v495_v40  ;;  %v502_v51 = vsub.f32 %v500_v41, %v501_v45 }
  0x28   :  { %v185_v10 = vsub.f32 %v156_v4, %v184_v6  ;;  %v193_v11 = vsub.f32 %v159_v5, %v192_v7  ;;  %v201_v23 = vsub.f32 %v162_v13, %v200_v18  ;;  %v508_v55 = vsub.f32 %v506_v46, %v507_v52  ;;  %s5331_s18 = ssub.f32 1.0, %s10449_s3 }
  0x29   :  { %237 = vmatpush.msra.mxu1 %v236_v19  ;;  %v209_v29 = vsub.f32 %v165_v24, %v208_v27  ;;  %445 = vmatpush.msrb.mxu2 %v444_v42  ;;  %v497_v50 = vand.u32 4294901760, %v496_v44  ;;  %v503_v54 = vand.u32 4294901760, %v502_v51  ;;  %v514_v58 = vsub.f32 %v512_v53, %v513_v56 }
  0x2a   :  { %275 = vmatmul.f32.vlgmr.msra.gmra.mxu2 %v185_v10  ;;  %v186_v14 = vand.u32 4294901760, %v185_v10  ;;  %v194_v17 = vand.u32 4294901760, %v193_v11  ;;  %239 = vmatmul.f32.vlgmr.msra.gmra.mxu1 %v184_v6  ;;  %v202_v26 = vand.u32 4294901760, %v201_v23  ;;  %v509_v57 = vand.u32 4294901760, %v508_v55 }
  0x2b   :  { %388 = vmatpush.msrb.mxu1 %v182_v3  ;;  %v210_v31 = vand.u32 4294901760, %v209_v29  ;;  %447 = vmatpush.msrb.mxu2 %v446_v47  ;;  %v515_v61 = vand.u32 4294901760, %v514_v58 }
  0x2c   :  { %v187_v16 = vsub.f32 %v185_v10, %v186_v14  ;;  %314 = vmatmul.f32.vlgmr.msra.gmra.mxu3 %v186_v14  ;;  %v195_v22 = vsub.f32 %v193_v11, %v194_v17  ;;  %v203_v28 = vsub.f32 %v201_v23, %v202_v26 }
  0x2d   :  { %v211_v32 = vsub.f32 %v209_v29, %v210_v31  ;;  %592 = vmatpush.msra.mxu1 %v440_v35  ;;  %498 = vmatpush.msrb.mxu3 %v497_v50 }
  0x2e   :  { %v188_v20 = vand.u32 4294901760, %v187_v16  ;;  %v196_v25 = vand.u32 4294901760, %v195_v22  ;;  %v204_v30 = vand.u32 4294901760, %v203_v28  ;;  %639 = vmatpush.msra.mxu2 %v495_v40 }
  0x2f   :  { %v212_v33 = vand.u32 4294901760, %v211_v32  ;;  %594 = vmatpush.msra.mxu1 %v442_v38  ;;  %504 = vmatpush.msrb.mxu3 %v503_v54 }
  0x30   :  { %189 = vmatmul.f32.vlgmr.msra.gmra.mxu0 %v188_v20  ;;  %643 = vmatpush.msra.mxu2 %v501_v45 }
  0x31   :  { %548 = vmatpush.msra.mxu0 %v494_v37  ;;  %596 = vmatpush.msra.mxu1 %v444_v42 }
  0x32   :  { %280 = vmatmul.f32.gmra.mxu2 %v193_v11  ;;  %243 = vmatmul.f32.gmra.mxu1 %v192_v7 }
  0x33   :  { %551 = vmatpush.msra.mxu0 %v500_v41  ;;  %598 = vmatpush.msra.mxu1 %v446_v47 }
  0x34   :  { %320 = vmatmul.f32.gmra.mxu3 %v194_v17  ;;  %647 = vmatpush.msra.mxu2 %v507_v52 }
  0x35   :  { %554 = vmatpush.msra.mxu0 %v506_v46  ;;  %510 = vmatpush.msrb.mxu3 %v509_v57 }
  0x36   :  { %651 = vmatpush.msra.mxu2 %v513_v56 }
  0x37   :  { %557 = vmatpush.msra.mxu0 %v512_v53  ;;  %516 = vmatpush.msrb.mxu3 %v515_v61 }
  0x38   :  { %197 = vmatmul.f32.gmra.mxu0 %v196_v25 }
  0x39   :  { %682 = vmatpush.msra.mxu3 %v440_v35 }
  0x3a   :  { %285 = vmatmul.f32.gmra.mxu2 %v201_v23  ;;  %247 = vmatmul.f32.gmra.mxu1 %v200_v18 }
  0x3b   :  { %684 = vmatpush.msra.mxu3 %v442_v38 }
  0x3c   :  { %326 = vmatmul.f32.gmra.mxu3 %v202_v26 }
  0x3d   :  { %686 = vmatpush.msra.mxu3 %v444_v42 }
  0x3f   :  { %688 = vmatpush.msra.mxu3 %v446_v47 }
  0x40   :  { %205 = vmatmul.f32.gmra.mxu0 %v204_v30 }
  0x42   :  { %290 = vmatmul.f32.gmra.mxu2 %v209_v29  ;;  %251 = vmatmul.f32.gmra.mxu1 %v208_v27 }
  0x44   :  { %332 = vmatmul.f32.gmra.mxu3 %v210_v31 }
  0x48   :  { %213 = vmatmul.f32.gmra.mxu0 %v212_v33 }
  0x4a   :  { %390 = vmatmul.f32.vlgmr.msrb.gmra.mxu1 %v184_v6 }
  0x50   :  { %356 = vmatmul.f32.vlgmr.msrb.gmra.mxu0 %v184_v6 }
  0x52   :  { %394 = vmatmul.f32.gmra.mxu1 %v192_v7 }
  0x58   :  { %360 = vmatmul.f32.gmra.mxu0 %v192_v7 }
  0x5a   :  { %398 = vmatmul.f32.gmra.mxu1 %v200_v18 }
  0x60   :  { %364 = vmatmul.f32.gmra.mxu0 %v200_v18 }
  0x62   :  { %402 = vmatmul.f32.gmra.mxu1 %v208_v27 }
  0x68   :  { %368 = vmatmul.f32.gmra.mxu0 %v208_v27 }
  0xa7   :  { %v240_v49 = vpop.f32.mrf.mxu1 }
  0xad   :  { %v190_v48 = vpop.f32.mrf.mxu0  ;;  %v276_v2 = vpop.f32.mrf.mxu2 }
  0xae   :  { %v191_v3 = vadd.f32 %v190_v48, %v153_v63 }
  0xaf   :  { %v244_v60 = vpop.f32.mrf.mxu1  ;;  %v315_v4 = vpop.f32.mrf.mxu3 }
  0xb0   :  { %v241_v5 = vadd.f32 %v240_v49, %v191_v3 }
  0xb2   :  { %v277_v8 = vadd.f32 %v276_v2, %v241_v5 }
  0xb4   :  { %v316_v11 = vadd.f32 %v315_v4, %v277_v8 }
  0xb5   :  { %v198_v59 = vpop.f32.mrf.mxu0  ;;  %v281_v10 = vpop.f32.mrf.mxu2 }
  0xb6   :  { %v199_v9 = vadd.f32 %v198_v59, %v153_v63 }
  0xb7   :  { %v248_v1 = vpop.f32.mrf.mxu1  ;;  %v321_v13 = vpop.f32.mrf.mxu3 }
  0xb8   :  { %v245_v12 = vadd.f32 %v244_v60, %v199_v9 }
  0xba   :  { %v282_v17 = vadd.f32 %v281_v10, %v245_v12 }
  0xbc   :  { %v322_v22 = vadd.f32 %v321_v13, %v282_v17 }
  0xbd   :  { %v206_v0 = vpop.f32.mrf.mxu0  ;;  %v286_v20 = vpop.f32.mrf.mxu2 }
  0xbe   :  { %v207_v18 = vadd.f32 %v206_v0, %v153_v63 }
  0xbf   :  { %v252_v7 = vpop.f32.mrf.mxu1  ;;  %v327_v29 = vpop.f32.mrf.mxu3 }
  0xc0   :  { %v249_v23 = vadd.f32 %v248_v1, %v207_v18 }
  0xc2   :  { %v287_v31 = vadd.f32 %v286_v20, %v249_v23 }
  0xc4   :  { %v328_v37 = vadd.f32 %v327_v29, %v287_v31 }
  0xc5   :  { %v214_v6 = vpop.f32.mrf.mxu0  ;;  %v291_v39 = vpop.f32.mrf.mxu2 }
  0xc6   :  { %v215_v32 = vadd.f32 %v214_v6, %v153_v63 }
  0xc7   :  { %v391_v15 = vpop.f32.mrf.mxu1  ;;  %v333_v49 = vpop.f32.mrf.mxu3 }
  0xc8   :  { %v253_v38 = vadd.f32 %v252_v7, %v215_v32  ;;  %v10700_v32 = vmov 0.0  }
  0xca   :  { %v292_v47 = vadd.f32 %v291_v39, %v253_v38 }
  0xcc   :  { %v334_v53 = vadd.f32 %v333_v49, %v292_v47 }
  0xcd   :  { %v357_v14 = vpop.f32.mrf.mxu0 }
  0xce   :  { %v358_v16 = vadd.f32 %v357_v14, %v316_v11  ;;  %v414_v14 = vperm.slane %v10846_v62, 1 }
  0xcf   :  { %v395_v27 = vpop.f32.mrf.mxu1 }
  0xd0   :  { %v392_v19 = vadd.f32 %v391_v15, %v358_v16 }
  0xd2   :  { %v406_v21 = vmax.f32 %v392_v19, 0.0  ;;  %v132_v19 = vlaneseq }
  0xd4   :  { %v417_v24 = vsel %vm415_vm1, %v406_v21, 0  ;;  %v10860_v23 = vshrl.u32 %v132_v19, 7 }
  0xd5   :  { %v10850_v25 = vand.u32 4294901760, %v417_v24  ;;  %v361_v26 = vpop.f32.mrf.mxu0 }
  0xd6   :  { %v362_v28 = vadd.f32 %v361_v26, %v322_v22  ;;  %vm1697_vm8 = vcmp.ge.s32.totalorder %v10860_v23, 1  ;;  %vm1936_vm10 = vcmp.ge.s32.totalorder %v10860_v23, 2  ;;  %vm2175_vm12 = vcmp.ge.s32.totalorder %v10860_v23, 4 }
  0xd7   :  { %v449_v30 = vsub.f32 %v417_v24, %v10850_v25  ;;  %518 = vmatmul.f32.vlgmr.msrb.gmra.mxu3 %v10850_v25  ;;  %v399_v43 = vpop.f32.mrf.mxu1  ;;  %v10862_v24 = vand.u32 127, %v132_v19 }
  0xd8   :  { %v396_v33 = vadd.f32 %v395_v27, %v362_v28 }
  0xd9   :  { %560 = vmatmul.f32.vlgmr.msra.gmra.mxu0 %v449_v30  ;;  %v450_v34 = vand.u32 4294901760, %v449_v30  ;;  %vm137_vm2 = vcmp.eq.s32.totalorder %v10860_v23, %v10862_v24 }
  0xda   :  { %v407_v35 = vmax.f32 %v396_v33, 0.0  ;;  %v10867_v33 = vsel %vm137_vm2, 1.0, %v10700_v32 }
  0xdb   :  { %602 = vmatmul.f32.vlgmr.msra.gmra.mxu1 %v450_v34  ;;  %v451_v36 = vsub.f32 %v449_v30, %v450_v34  ;;  %v709_v39 = vsel %vm415_vm1, %v10867_v33, 0 }
  0xdc   :  { %v420_v40 = vsel %vm415_vm1, %v407_v35, 0  ;;  %v134_v35 = vadd.s32 8, %v10860_v23 }
  0xdd   :  { %v456_v41 = vand.u32 4294901760, %v420_v40  ;;  %v365_v42 = vpop.f32.mrf.mxu0  ;;  %v452_v44 = vand.u32 4294901760, %v451_v36 }
  0xde   :  { %v366_v45 = vadd.f32 %v365_v42, %v328_v37  ;;  %vm138_vm3 = vcmp.eq.s32.totalorder %v134_v35, %v10862_v24 }
  0xdf   :  { %453 = vmatmul.f32.vlgmr.msrb.gmra.mxu2 %v452_v44  ;;  %522 = vmatmul.f32.gmra.mxu3 %v456_v41  ;;  %v457_v46 = vsub.f32 %v420_v40, %v456_v41  ;;  %v403_v57 = vpop.f32.mrf.mxu1  ;;  %v10874_v44 = vsub.f32 %v709_v39, %v709_v39 }
  0xe0   :  { %v400_v48 = vadd.f32 %v399_v43, %v366_v45 }
  0xe1   :  { %565 = vmatmul.f32.gmra.mxu0 %v457_v46  ;;  %v458_v50 = vand.u32 4294901760, %v457_v46  ;;  %14464 = vst [vmem:[#allocation15_spill] sm:$0xff] %v10874_v44 }
  0xe2   :  { %v408_v51 = vmax.f32 %v400_v48, 0.0  ;;  %v10877_v48 = vsel %vm138_vm3, 1.0, %v10700_v32 }
  0xe3   :  { %608 = vmatmul.f32.gmra.mxu1 %v458_v50  ;;  %v459_v52 = vsub.f32 %v457_v46, %v458_v50  ;;  %14465 = vst [vmem:[#allocation16_spill] sm:$0xff] %v10877_v48  ;;  %v141_v50 = vadd.s32 16, %v10860_v23 }
  0xe4   :  { %v423_v54 = vsel %vm415_vm1, %v408_v51, 0 }
  0xe5   :  { %v464_v55 = vand.u32 4294901760, %v423_v54  ;;  %v369_v56 = vpop.f32.mrf.mxu0  ;;  %v460_v58 = vand.u32 4294901760, %v459_v52  ;;  %vm143_vm4 = vcmp.eq.s32.totalorder %v141_v50, %v10862_v24 }
  0xe6   :  { %v370_v59 = vadd.f32 %v369_v56, %v334_v53  ;;  %v712_v56 = vsel %vm415_vm1, %v10877_v48, 0 }
  0xe7   :  { %461 = vmatmul.f32.gmra.mxu2 %v460_v58  ;;  %526 = vmatmul.f32.gmra.mxu3 %v464_v55  ;;  %v465_v60 = vsub.f32 %v423_v54, %v464_v55  ;;  %v10883_v54 = vand.u32 4294901760, %v10874_v44 }
  0xe8   :  { %v404_v61 = vadd.f32 %v403_v57, %v370_v59 }
  0xe9   :  { %570 = vmatmul.f32.gmra.mxu0 %v465_v60  ;;  %v466_v63 = vand.u32 4294901760, %v465_v60  ;;  %14466 = vst [vmem:[#allocation17_spill] sm:$0xff] %v10883_v54 }
  0xea   :  { %v409_v0 = vmax.f32 %v404_v61, 0.0 }
  0xeb   :  { %614 = vmatmul.f32.gmra.mxu1 %v466_v63  ;;  %v467_v1 = vsub.f32 %v465_v60, %v466_v63  ;;  %v747_v63 = vsub.f32 %v10874_v44, %v10883_v54 }
  0xec   :  { %v426_v2 = vsel %vm415_vm1, %v409_v0, 0  ;;  %v10892_v0 = vsub.f32 %v712_v56, %v712_v56  ;;  %v1236_v56 = vld [vmem:[%s14374_s5] sm:$0xff] }
  0xed   :  { %v472_v3 = vand.u32 4294901760, %v426_v2  ;;  %v468_v4 = vand.u32 4294901760, %v467_v1 }
  0xee   :  { %14467 = vst [vmem:[#allocation18_spill] sm:$0xff] %v10892_v0 }
  0xef   :  { %469 = vmatmul.f32.gmra.mxu2 %v468_v4  ;;  %530 = vmatmul.f32.gmra.mxu3 %v472_v3  ;;  %v473_v5 = vsub.f32 %v426_v2, %v472_v3 }
  0xf1   :  { %575 = vmatmul.f32.gmra.mxu0 %v473_v5  ;;  %v474_v6 = vand.u32 4294901760, %v473_v5 }
  0xf3   :  { %620 = vmatmul.f32.gmra.mxu1 %v474_v6  ;;  %v475_v7 = vsub.f32 %v473_v5, %v474_v6  ;;  %v10895_v5 = vsel %vm143_vm4, 1.0, %v10700_v32 }
  0xf4   :  { %14468 = vst [vmem:[#allocation19_spill] sm:$0xff] %v10895_v5 }
  0xf5   :  { %v476_v8 = vand.u32 4294901760, %v475_v7 }
  0xf7   :  { %477 = vmatmul.f32.gmra.mxu2 %v476_v8  ;;  %690 = vmatmul.f32.vlgmr.msra.gmra.mxu3 %v10850_v25 }
  0xff   :  { %653 = vmatmul.f32.vlgmr.msra.gmra.mxu2 %v10850_v25  ;;  %694 = vmatmul.f32.gmra.mxu3 %v456_v41 }
 0x107   :  { %657 = vmatmul.f32.gmra.mxu2 %v456_v41  ;;  %698 = vmatmul.f32.gmra.mxu3 %v464_v55 }
 0x10f   :  { %661 = vmatmul.f32.gmra.mxu2 %v464_v55  ;;  %702 = vmatmul.f32.gmra.mxu3 %v472_v3 }
 0x117   :  { %665 = vmatmul.f32.gmra.mxu2 %v472_v3 }
 0x156   :  { %v561_v18 = vpop.f32.mrf.mxu0 }
 0x158   :  { %v603_v21 = vpop.f32.mrf.mxu1 }
 0x15a   :  { %v519_v9 = vpop.f32.mrf.mxu3 }
 0x15e   :  { %v566_v28 = vpop.f32.mrf.mxu0 }
 0x160   :  { %v609_v34 = vpop.f32.mrf.mxu1 }
 0x162   :  { %v454_v10 = vpop.f32.mrf.mxu2  ;;  %v523_v11 = vpop.f32.mrf.mxu3 }
 0x163   :  { %v455_v17 = vadd.f32 %v454_v10, %v414_v14 }
 0x165   :  { %v520_v20 = vadd.f32 %v519_v9, %v455_v17  ;;  %v142_v9 = vadd.s32 24, %v10860_v23 }
 0x166   :  { %v571_v45 = vpop.f32.mrf.mxu0 }
 0x167   :  { %v562_v26 = vadd.f32 %v561_v18, %v520_v20  ;;  %vm144_vm5 = vcmp.eq.s32.totalorder %v142_v9, %v10862_v24 }
 0x168   :  { %v615_v55 = vpop.f32.mrf.mxu1  ;;  %v10917_v24 = vsel %vm144_vm5, 1.0, %v10700_v32 }
 0x169   :  { %v604_v29 = vadd.f32 %v603_v21, %v562_v26  ;;  %14472 = vst [vmem:[#allocation23_spill] sm:$0xff] %v10917_v24 }
 0x16a   :  { %v462_v12 = vpop.f32.mrf.mxu2  ;;  %v527_v13 = vpop.f32.mrf.mxu3 }
 0x16b   :  { %v463_v25 = vadd.f32 %v462_v12, %v414_v14 }
 0x16d   :  { %v524_v62 = vadd.f32 %v523_v11, %v463_v25  ;;  %v10898_v11 = vand.u32 4294901760, %v747_v63 }
 0x16e   :  { %v576_v6 = vpop.f32.mrf.mxu0 }
 0x16f   :  { %v567_v38 = vadd.f32 %v566_v28, %v524_v62  ;;  %14469 = vst [vmem:[#allocation20_spill] sm:$0xff] %v10898_v11 }
 0x171   :  { %v610_v43 = vadd.f32 %v609_v34, %v567_v38  ;;  %v718_v34 = vsel %vm415_vm1, %v10917_v24, 0 }
 0x172   :  { %v470_v15 = vpop.f32.mrf.mxu2  ;;  %v531_v16 = vpop.f32.mrf.mxu3  ;;  %v10932_v38 = vsub.f32 %v718_v34, %v718_v34 }
 0x173   :  { %v471_v36 = vadd.f32 %v470_v15, %v414_v14  ;;  %v715_v15 = vsel %vm415_vm1, %v10895_v5, 0 }
 0x174   :  { %14475 = vst [vmem:[#allocation26_spill] sm:$0xff] %v10932_v38 }
 0x175   :  { %v528_v41 = vadd.f32 %v527_v13, %v471_v36  ;;  %v10901_v13 = vand.u32 4294901760, %v10892_v0 }
 0x177   :  { %v572_v53 = vadd.f32 %v571_v45, %v528_v41  ;;  %14470 = vst [vmem:[#allocation21_spill] sm:$0xff] %v10901_v13  ;;  %v755_v21 = vsub.f32 %v10892_v0, %v10901_v13 }
 0x179   :  { %v616_v61 = vadd.f32 %v615_v55, %v572_v53  ;;  %v1237_v53 = vld [vmem:[%s14374_s5 + $0x8] sm:$0xff] }
 0x17a   :  { %v478_v22 = vpop.f32.mrf.mxu2  ;;  %v691_v27 = vpop.f32.mrf.mxu3  ;;  %v1277_v55 = vand.u32 4294901760, %v1237_v53 }
 0x17b   :  { %v479_v51 = vadd.f32 %v478_v22, %v414_v14  ;;  %v10913_v22 = vsub.f32 %v715_v15, %v715_v15 }
 0x17d   :  { %v532_v60 = vadd.f32 %v531_v16, %v479_v51  ;;  %v621_v16 = vpop.f32.mrf.mxu1  ;;  %14471 = vst [vmem:[#allocation22_spill] sm:$0xff] %v10913_v22 }
 0x17f   :  { %v577_v12 = vadd.f32 %v576_v6, %v532_v60 }
 0x181   :  { %v622_v20 = vadd.f32 %v621_v16, %v577_v12 }
 0x182   :  { %v654_v30 = vpop.f32.mrf.mxu2  ;;  %v695_v40 = vpop.f32.mrf.mxu3 }
 0x183   :  { %v655_v31 = vadd.f32 %v654_v30, %v604_v29  ;;  %v10919_v30 = vand.u32 4294901760, %v755_v21 }
 0x185   :  { %v692_v37 = vadd.f32 %v691_v27, %v655_v31  ;;  %14473 = vst [vmem:[#allocation24_spill] sm:$0xff] %v10919_v30  ;;  %v10922_v31 = vand.u32 4294901760, %v10913_v22 }
 0x187   :  { %v721_v42 = vsel %vm415_vm1, %v692_v37, 0  ;;  %14474 = vst [vmem:[#allocation25_spill] sm:$0xff] %v10922_v31  ;;  %v763_v32 = vsub.f32 %v10913_v22, %v10922_v31 }
 0x188   :  { %v10879_v49 = vand.u32 4294901760, %v721_v42 }
 0x18a   :  { %v658_v46 = vpop.f32.mrf.mxu2  ;;  %v798_v59 = vsub.f32 %v721_v42, %v10879_v49  ;;  %v699_v2 = vpop.f32.mrf.mxu3  ;;  %v10937_v42 = vand.u32 4294901760, %v763_v32 }
 0x18b   :  { %v659_v47 = vadd.f32 %v658_v46, %v610_v43  ;;  %v10940_v43 = vand.u32 4294901760, %v10932_v38 }
 0x18c   :  { %v799_v8 = vand.u32 4294901760, %v798_v59  ;;  %14476 = vst [vmem:[#allocation27_spill] sm:$0xff] %v10937_v42 }
 0x18d   :  { %v696_v52 = vadd.f32 %v695_v40, %v659_v47  ;;  %14477 = vst [vmem:[#allocation28_spill] sm:$0xff] %v10940_v43 }
 0x18e   :  { %v800_v18 = vsub.f32 %v798_v59, %v799_v8 }
 0x18f   :  { %v724_v57 = vsel %vm415_vm1, %v696_v52, 0 }
 0x190   :  { %v740_v58 = vand.u32 4294901760, %v724_v57  ;;  %v801_v62 = vand.u32 4294901760, %v800_v18 }
 0x192   :  { %v792_v1 = vsub.f32 %v724_v57, %v740_v58  ;;  %v662_v3 = vpop.f32.mrf.mxu2  ;;  %741 = vmatpush.xpose.msrb.mxu0 %v740_v58  ;;  %876 = vmatpush.xpose.msrb.mxu3 %v740_v58  ;;  %v703_v28 = vpop.f32.mrf.mxu3  ;;  %v1361_v57 = vsub.f32 %v1237_v53, %v1277_v55 }
 0x193   :  { %v663_v4 = vadd.f32 %v662_v3, %v616_v61 }
 0x194   :  { %836 = vmatpush.xpose.msrb.mxu2 %v792_v1  ;;  %v793_v7 = vand.u32 4294901760, %v792_v1 }
 0x195   :  { %v700_v10 = vadd.f32 %v699_v2, %v663_v4 }
 0x196   :  { %743 = vmatpush.xpose.msrb.mxu0 %v10879_v49  ;;  %878 = vmatpush.xpose.msrb.mxu3 %v10879_v49  ;;  %v794_v14 = vsub.f32 %v792_v1, %v793_v7 }
 0x197   :  { %v979_v19 = vsel %vm415_vm1, %v700_v10, 0 }
 0x198   :  { %839 = vmatpush.xpose.msrb.mxu2 %v798_v59  ;;  %v795_v17 = vand.u32 4294901760, %v794_v14  ;;  %v1000_v27 = vand.u32 4294901760, %v979_v19  ;;  %v1362_v59 = vand.u32 4294901760, %v1361_v57 }
 0x199   :  { %749 = vmatmul.f32.vlgmr.msrb.gmra.mxu0 %v10898_v11  ;;  %882 = vmatmul.f32.vlgmr.msrb.gmra.mxu3 %v10883_v54 }
 0x19a   :  { %921 = vmatpush.xpose.msra.mxu0 %v793_v7  ;;  %v666_v25 = vpop.f32.mrf.mxu2  ;;  %796 = vmatpush.xpose.msrb.mxu1 %v795_v17  ;;  %v1056_v37 = vsub.f32 %v979_v19, %v1000_v27  ;;  %v1363_v63 = vsub.f32 %v1361_v57, %v1362_v59 }
 0x19b   :  { %v667_v26 = vadd.f32 %v666_v25, %v622_v20  ;;  %842 = vmatmul.f32.vlgmr.msrb.gmra.mxu2 %v10874_v44 }
 0x19c   :  { %v1057_v41 = vand.u32 4294901760, %v1056_v37  ;;  %v1364_v6 = vand.u32 4294901760, %v1363_v63 }
 0x19d   :  { %v704_v29 = vadd.f32 %v703_v28, %v667_v26 }
 0x19e   :  { %925 = vmatpush.xpose.msra.mxu0 %v799_v8  ;;  %802 = vmatpush.xpose.msrb.mxu1 %v801_v62  ;;  %v1058_v47 = vsub.f32 %v1056_v37, %v1057_v41 }
 0x19f   :  { %v982_v35 = vsel %vm415_vm1, %v704_v29, 0 }
 0x1a0   :  { %v998_v36 = vand.u32 4294901760, %v982_v35  ;;  %v1059_v50 = vand.u32 4294901760, %v1058_v47 }
 0x1a1   :  { %757 = vmatmul.f32.gmra.mxu0 %v10919_v30  ;;  %10413 = vmatmul.msk.f32.vlgmr.msrb.gmra.mxu1 %vm415_vm1, %v10867_v33 }
 0x1a2   :  { %958 = vmatpush.xpose.msra.mxu1 %v740_v58  ;;  %v1050_v39 = vsub.f32 %v982_v35, %v998_v36  ;;  %999 = vmatpush.xpose.msra.mxu2 %v998_v36  ;;  %v1279_v58 = vand.u32 4294901760, %v1236_v56 }
 0x1a3   :  { %888 = vmatmul.f32.gmra.mxu3 %v10901_v13  ;;  %847 = vmatmul.f32.gmra.mxu2 %v10892_v0 }
 0x1a4   :  { %1094 = vmatpush.xpose.msrb.mxu0 %v1050_v39  ;;  %v1051_v40 = vand.u32 4294901760, %v1050_v39  ;;  %v1367_v60 = vsub.f32 %v1236_v56, %v1279_v58 }
 0x1a6   :  { %960 = vmatpush.xpose.msra.mxu1 %v10879_v49  ;;  %1001 = vmatpush.xpose.msra.mxu2 %v1000_v27  ;;  %v1052_v45 = vsub.f32 %v1050_v39, %v1051_v40  ;;  %v771_v49 = vsub.f32 %v10932_v38, %v10940_v43  ;;  %v1368_v1 = vand.u32 4294901760, %v1367_v60 }
 0x1a8   :  { %1097 = vmatpush.xpose.msrb.mxu0 %v1056_v37  ;;  %v1053_v46 = vand.u32 4294901760, %v1052_v45  ;;  %v10949_v51 = vand.u32 4294901760, %v771_v49  ;;  %v1369_v7 = vsub.f32 %v1367_v60, %v1368_v1 }
 0x1a9   :  { %765 = vmatmul.f32.gmra.mxu0 %v10937_v42  ;;  %10414 = vmatmul.msk.f32.gmra.mxu1 %vm415_vm1, %v10877_v48 }
 0x1aa   :  { %1134 = vmatpush.xpose.msrb.mxu1 %v998_v36  ;;  %1179 = vmatpush.xpose.msrb.mxu2 %v1051_v40  ;;  %14478 = vst [vmem:[#allocation29_spill] sm:$0xff] %v10949_v51  ;;  %v1370_v8 = vand.u32 4294901760, %v1369_v7 }
 0x1ab   :  { %1054 = vmatpush.xpose.msra.mxu3 %v1053_v46  ;;  %852 = vmatmul.f32.gmra.mxu2 %v10913_v22 }
 0x1ac   :  { %894 = vmatmul.f32.gmra.mxu3 %v10922_v31 }
 0x1ae   :  { %1136 = vmatpush.xpose.msrb.mxu1 %v1000_v27  ;;  %1183 = vmatpush.xpose.msrb.mxu2 %v1057_v41 }
 0x1af   :  { %1060 = vmatpush.xpose.msra.mxu3 %v1059_v50 }
 0x1b1   :  { %773 = vmatmul.f32.gmra.mxu0 %v10949_v51  ;;  %10415 = vmatmul.msk.f32.gmra.mxu1 %vm415_vm1, %v10895_v5 }
 0x1b3   :  { %1216 = vmatpush.xpose.msrb.mxu3 %v998_v36  ;;  %857 = vmatmul.f32.gmra.mxu2 %v10932_v38 }
 0x1b4   :  { %900 = vmatmul.f32.gmra.mxu3 %v10940_v43 }
 0x1b7   :  { %1218 = vmatpush.xpose.msrb.mxu3 %v1000_v27 }
 0x1b9   :  { %10416 = vmatmul.msk.f32.gmra.mxu1 %vm415_vm1, %v10917_v24  ;;  %10417 = vmatmul.msk.f32.vlgmr.msra.gmra.mxu0 %vm415_vm1, %v10867_v33 }
 0x1ba   :  { %1278 = vmatpush.msra.mxu0 %v1277_v55 }
 0x1bb   :  { %1007 = vmatmul.f32.vlgmr.msra.gmra.mxu2 %v10898_v11 }
 0x1bc   :  { %10425 = vmatmul.msk.f32.vlgmr.msra.gmra.mxu3 %vm415_vm1, %v10867_v33  ;;  %1421 = vmatpush.msra.mxu2 %v1361_v57 }
 0x1bd   :  { %1481 = vmatpush.msra.mxu3 %v1277_v55  ;;  %1280 = vmatpush.msra.mxu0 %v1279_v58 }
 0x1be   :  { %1424 = vmatpush.msra.mxu2 %v1367_v60 }
 0x1bf   :  { %1483 = vmatpush.msra.mxu3 %v1279_v58 }
 0x1c1   :  { %10418 = vmatmul.msk.f32.gmra.mxu0 %vm415_vm1, %v10877_v48  ;;  %10421 = vmatmul.msk.f32.vlgmr.msra.gmra.mxu1 %vm415_vm1, %v10867_v33 }
 0x1c2   :  { %1365 = vmatpush.msra.mxu1 %v1364_v6 }
 0x1c3   :  { %1015 = vmatmul.f32.gmra.mxu2 %v10919_v30 }
 0x1c4   :  { %10426 = vmatmul.msk.f32.gmra.mxu3 %vm415_vm1, %v10877_v48  ;;  %1371 = vmatpush.msra.mxu1 %v1370_v8 }
 0x1c9   :  { %10419 = vmatmul.msk.f32.gmra.mxu0 %vm415_vm1, %v10895_v5  ;;  %10422 = vmatmul.msk.f32.gmra.mxu1 %vm415_vm1, %v10877_v48 }
 0x1cb   :  { %1023 = vmatmul.f32.gmra.mxu2 %v10937_v42 }
 0x1cc   :  { %10427 = vmatmul.msk.f32.gmra.mxu3 %vm415_vm1, %v10895_v5 }
 0x1d1   :  { %10420 = vmatmul.msk.f32.gmra.mxu0 %vm415_vm1, %v10917_v24  ;;  %10423 = vmatmul.msk.f32.gmra.mxu1 %vm415_vm1, %v10895_v5 }
 0x1d3   :  { %1031 = vmatmul.f32.gmra.mxu2 %v10949_v51 }
 0x1d4   :  { %10428 = vmatmul.msk.f32.gmra.mxu3 %vm415_vm1, %v10917_v24 }
 0x1d9   :  { %10424 = vmatmul.msk.f32.gmra.mxu1 %vm415_vm1, %v10917_v24  ;;  %1100 = vmatmul.f32.vlgmr.msrb.gmra.mxu0 %v10874_v44 }
 0x1da   :  { %1550 = vmatpush.msrb.mxu0 %v1362_v59 }
 0x1db   :  { %10429 = vmatmul.msk.f32.vlgmr.msrb.gmra.mxu2 %vm415_vm1, %v10867_v33 }
 0x1dc   :  { %10433 = vmatmul.msk.f32.vlgmr.msrb.gmra.mxu3 %vm415_vm1, %v10867_v33  ;;  %1554 = vmatpush.msrb.mxu0 %v1368_v1 }
 0x1e1   :  { %1105 = vmatmul.f32.gmra.mxu0 %v10892_v0  ;;  %1140 = vmatmul.f32.vlgmr.msrb.gmra.mxu1 %v10883_v54 }
 0x1e2   :  { %1603 = vmatpush.msrb.mxu1 %v1277_v55 }
 0x1e3   :  { %10430 = vmatmul.msk.f32.gmra.mxu2 %vm415_vm1, %v10877_v48 }
 0x1e4   :  { %10434 = vmatmul.msk.f32.gmra.mxu3 %vm415_vm1, %v10877_v48  ;;  %1605 = vmatpush.msrb.mxu1 %v1279_v58 }
 0x1e9   :  { %1110 = vmatmul.f32.gmra.mxu0 %v10913_v22  ;;  %1146 = vmatmul.f32.gmra.mxu1 %v10901_v13 }
 0x1eb   :  { %10431 = vmatmul.msk.f32.gmra.mxu2 %vm415_vm1, %v10895_v5 }
 0x1ec   :  { %10435 = vmatmul.msk.f32.gmra.mxu3 %vm415_vm1, %v10895_v5 }
 0x1f1   :  { %1115 = vmatmul.f32.gmra.mxu0 %v10932_v38  ;;  %1152 = vmatmul.f32.gmra.mxu1 %v10922_v31 }
 0x1f3   :  { %10432 = vmatmul.msk.f32.gmra.mxu2 %vm415_vm1, %v10917_v24 }
 0x1f4   :  { %10436 = vmatmul.msk.f32.gmra.mxu3 %vm415_vm1, %v10917_v24 }
 0x1f9   :  { %1158 = vmatmul.f32.gmra.mxu1 %v10940_v43 }
 0x216   :  { %v750_v52 = vpop.f32.mrf.mxu0 }
 0x21c   :  { %v883_v61 = vpop.f32.mrf.mxu3 }
 0x21e   :  { %v758_v2 = vpop.f32.mrf.mxu0  ;;  %v805_v3 = vpop.f32.mrf.mxu1 }
 0x21f   :  { %v843_v4 = vpop.f32.mrf.mxu2  ;;  %v806_v19 = vadd.f32 %v805_v3, %v750_v52 }
 0x221   :  { %v844_v25 = vadd.f32 %v843_v4, %v806_v19 }
 0x223   :  { %v884_v28 = vadd.f32 %v883_v61, %v844_v25 }
 0x226   :  { %v889_v9 = vpop.f32.mrf.mxu3  ;;  %v766_v10 = vpop.f32.mrf.mxu0 }
 0x227   :  { %v809_v12 = vpop.f32.mrf.mxu1  ;;  %v848_v14 = vpop.f32.mrf.mxu2 }
 0x228   :  { %v810_v62 = vadd.f32 %v809_v12, %v758_v2 }
 0x22a   :  { %v849_v36 = vadd.f32 %v848_v14, %v810_v62 }
 0x22c   :  { %v890_v45 = vadd.f32 %v889_v9, %v849_v36 }
 0x22e   :  { %v774_v15 = vpop.f32.mrf.mxu0 }
 0x22f   :  { %v813_v16 = vpop.f32.mrf.mxu1  ;;  %v853_v17 = vpop.f32.mrf.mxu2 }
 0x230   :  { %v895_v18 = vpop.f32.mrf.mxu3  ;;  %v814_v46 = vadd.f32 %v813_v16, %v766_v10 }
 0x232   :  { %v854_v55 = vadd.f32 %v853_v17, %v814_v46 }
 0x234   :  { %v896_v1 = vadd.f32 %v895_v18, %v854_v55 }
 0x236   :  { %v928_v21 = vpop.f32.mrf.mxu0 }
 0x237   :  { %v817_v20 = vpop.f32.mrf.mxu1  ;;  %v858_v26 = vpop.f32.mrf.mxu2  ;;  %v929_v29 = vadd.f32 %v928_v21, %v884_v28 }
 0x238   :  { %v901_v27 = vpop.f32.mrf.mxu3  ;;  %v818_v2 = vadd.f32 %v817_v20, %v774_v15 }
 0x23a   :  { %v859_v9 = vadd.f32 %v858_v26, %v818_v2 }
 0x23c   :  { %v902_v19 = vadd.f32 %v901_v27, %v859_v9 }
 0x23e   :  { %v932_v34 = vpop.f32.mrf.mxu0 }
 0x23f   :  { %v963_v35 = vpop.f32.mrf.mxu1  ;;  %v1008_v32 = vpop.f32.mrf.mxu2  ;;  %v933_v49 = vadd.f32 %v932_v34, %v890_v45 }
 0x240   :  { %v11016_v37 = vadd.f32 %v963_v35, %v929_v29  ;;  %v1063_v39 = vpop.f32.mrf.mxu3 }
 0x241   :  { %v1064_v45 = vadd.f32 %v1063_v39, %v1008_v32  ;;  %v11053_v39 = vstv %s3395_s17  ;;  %s14534_s17 = sld [smem:[#allocation38_spill]] }
 0x242   :  { %v1240_v40 = vsel %vm1238_vm6, %v11016_v37, 0 }
 0x243   :  { %v11020_v41 = vand.u32 4294901760, %v1240_v40 }
 0x245   :  { %v1282_v47 = vsub.f32 %v1240_v40, %v11020_v41  ;;  %1373 = vmatmul.f32.vlgmr.msra.gmra.mxu1 %v11020_v41 }
 0x246   :  { %v936_v52 = vpop.f32.mrf.mxu0 }
 0x247   :  { %v1283_v50 = vand.u32 4294901760, %v1282_v47  ;;  %v967_v53 = vpop.f32.mrf.mxu1  ;;  %1427 = vmatmul.f32.vlgmr.msra.gmra.mxu2 %v1282_v47  ;;  %v1016_v57 = vpop.f32.mrf.mxu2  ;;  %v937_v4 = vadd.f32 %v936_v52, %v896_v1 }
 0x248   :  { %v11024_v56 = vadd.f32 %v967_v53, %v933_v49  ;;  %v1067_v58 = vpop.f32.mrf.mxu3 }
 0x249   :  { %v1284_v59 = vsub.f32 %v1282_v47, %v1283_v50  ;;  %1487 = vmatmul.f32.vlgmr.msra.gmra.mxu3 %v1283_v50  ;;  %v1068_v2 = vadd.f32 %v1067_v58, %v1016_v57 }
 0x24a   :  { %v1243_v60 = vsel %vm1238_vm6, %v11024_v56, 0 }
 0x24b   :  { %v1285_v61 = vand.u32 4294901760, %v1284_v59  ;;  %v11028_v63 = vand.u32 4294901760, %v1243_v60 }
 0x24d   :  { %1286 = vmatmul.f32.vlgmr.msra.gmra.mxu0 %v1285_v61  ;;  %1377 = vmatmul.f32.gmra.mxu1 %v11028_v63  ;;  %v1290_v3 = vsub.f32 %v1243_v60, %v11028_v63 }
 0x24e   :  { %v940_v6 = vpop.f32.mrf.mxu0 }
 0x24f   :  { %v971_v7 = vpop.f32.mrf.mxu1  ;;  %1432 = vmatmul.f32.gmra.mxu2 %v1290_v3  ;;  %v1291_v8 = vand.u32 4294901760, %v1290_v3  ;;  %v1024_v12 = vpop.f32.mrf.mxu2  ;;  %v941_v21 = vadd.f32 %v940_v6, %v902_v19 }
 0x250   :  { %v11032_v10 = vadd.f32 %v971_v7, %v937_v4  ;;  %v1071_v14 = vpop.f32.mrf.mxu3 }
 0x251   :  { %1493 = vmatmul.f32.gmra.mxu3 %v1291_v8  ;;  %v1292_v16 = vsub.f32 %v1290_v3, %v1291_v8 }
 0x252   :  { %v1246_v15 = vsel %vm1238_vm6, %v11032_v10, 0 }
 0x253   :  { %v11036_v17 = vand.u32 4294901760, %v1246_v15  ;;  %v1293_v18 = vand.u32 4294901760, %v1292_v16 }
 0x255   :  { %1294 = vmatmul.f32.gmra.mxu0 %v1293_v18  ;;  %1381 = vmatmul.f32.gmra.mxu1 %v11036_v17  ;;  %v1298_v20 = vsub.f32 %v1246_v15, %v11036_v17 }
 0x256   :  { %v1101_v26 = vpop.f32.mrf.mxu0 }
 0x257   :  { %v975_v25 = vpop.f32.mrf.mxu1  ;;  %1437 = vmatmul.f32.gmra.mxu2 %v1298_v20  ;;  %v1299_v28 = vand.u32 4294901760, %v1298_v20  ;;  %v11042_v29 = vpop.f32.mrf.mxu2  ;;  %v1102_v47 = vadd.f32 %v1101_v26, %v1064_v45 }
 0x258   :  { %v11040_v62 = vadd.f32 %v975_v25, %v941_v21  ;;  %v1075_v34 = vpop.f32.mrf.mxu3 }
 0x259   :  { %1499 = vmatmul.f32.gmra.mxu3 %v1299_v28  ;;  %v1300_v35 = vsub.f32 %v1298_v20, %v1299_v28  ;;  %v1072_v20 = vadd.f32 %v1071_v14, %v1024_v12 }
 0x25a   :  { %v1249_v27 = vsel %vm1238_vm6, %v11040_v62, 0 }
 0x25b   :  { %v11048_v36 = vand.u32 4294901760, %v1249_v27  ;;  %v1301_v40 = vand.u32 4294901760, %v1300_v35 }
 0x25d   :  { %1302 = vmatmul.f32.gmra.mxu0 %v1301_v40  ;;  %1385 = vmatmul.f32.gmra.mxu1 %v11048_v36  ;;  %v1306_v46 = vsub.f32 %v1249_v27, %v11048_v36 }
 0x25e   :  { %v1106_v49 = vpop.f32.mrf.mxu0 }
 0x25f   :  { %v1141_v50 = vpop.f32.mrf.mxu1  ;;  %1442 = vmatmul.f32.gmra.mxu2 %v1306_v46  ;;  %v1307_v52 = vand.u32 4294901760, %v1306_v46  ;;  %v1186_v55 = vpop.f32.mrf.mxu2  ;;  %v1107_v3 = vadd.f32 %v1106_v49, %v1068_v2 }
 0x260   :  { %v1142_v53 = vadd.f32 %v1141_v50, %v1102_v47  ;;  %v1221_v59 = vpop.f32.mrf.mxu3 }
 0x261   :  { %1505 = vmatmul.f32.gmra.mxu3 %v1307_v52  ;;  %v1308_v60 = vsub.f32 %v1306_v46, %v1307_v52 }
 0x262   :  { %v1187_v61 = vadd.f32 %v1186_v55, %v1142_v53  ;;  %v1076_v53 = vadd.f32 %v1075_v34, %v11042_v29 }
 0x263   :  { %v1309_v1 = vand.u32 4294901760, %v1308_v60 }
 0x264   :  { %v1222_v32 = vadd.f32 %v1221_v59, %v1187_v61 }
 0x265   :  { %1310 = vmatmul.f32.gmra.mxu0 %v1309_v1 }
 0x266   :  { %v1252_v4 = vsel %vm1238_vm6, %v1222_v32, 0  ;;  %v11057_v6 = vmul.f32 %v11053_v39, %v1222_v32  ;;  %v1111_v18 = vpop.f32.mrf.mxu0 }
 0x267   :  { %v11059_v7 = vand.u32 4294901760, %v1252_v4  ;;  %v1147_v8 = vpop.f32.mrf.mxu1  ;;  %v1190_v16 = vpop.f32.mrf.mxu2  ;;  %v1112_v26 = vadd.f32 %v1111_v18, %v1072_v20 }
 0x268   :  { %v1148_v9 = vadd.f32 %v1147_v8, %v1107_v3  ;;  %v1225_v15 = vpop.f32.mrf.mxu3 }
 0x269   :  { %1389 = vmatmul.f32.gmra.mxu1 %v11059_v7  ;;  %v1314_v57 = vsub.f32 %v1252_v4, %v11059_v7 }
 0x26a   :  { %v1191_v58 = vadd.f32 %v1190_v16, %v1148_v9 }
 0x26b   :  { %1447 = vmatmul.f32.gmra.mxu2 %v1314_v57  ;;  %v1315_v19 = vand.u32 4294901760, %v1314_v57 }
 0x26c   :  { %v1226_v21 = vadd.f32 %v1225_v15, %v1191_v58 }
 0x26d   :  { %1511 = vmatmul.f32.gmra.mxu3 %v1315_v19  ;;  %v1316_v25 = vsub.f32 %v1314_v57, %v1315_v19 }
 0x26e   :  { %v1255_v28 = vsel %vm1238_vm6, %v1226_v21, 0  ;;  %v11065_v35 = vmul.f32 %v11053_v39, %v1226_v21  ;;  %v1116_v12 = vpop.f32.mrf.mxu0 }
 0x26f   :  { %v1321_v27 = vand.u32 4294901760, %v1255_v28  ;;  %v1153_v40 = vpop.f32.mrf.mxu1  ;;  %v1317_v45 = vand.u32 4294901760, %v1316_v25  ;;  %v1194_v47 = vpop.f32.mrf.mxu2  ;;  %v1117_v60 = vadd.f32 %v1116_v12, %v1076_v53 }
 0x270   :  { %v1154_v46 = vadd.f32 %v1153_v40, %v1112_v26  ;;  %v1229_v49 = vpop.f32.mrf.mxu3 }
 0x271   :  { %1318 = vmatmul.f32.gmra.mxu0 %v1317_v45  ;;  %1393 = vmatmul.f32.gmra.mxu1 %v1321_v27  ;;  %v1322_v50 = vsub.f32 %v1255_v28, %v1321_v27 }
 0x272   :  { %v1195_v52 = vadd.f32 %v1194_v47, %v1154_v46 }
 0x273   :  { %1452 = vmatmul.f32.gmra.mxu2 %v1322_v50  ;;  %v1323_v14 = vand.u32 4294901760, %v1322_v50 }
 0x274   :  { %v1230_v55 = vadd.f32 %v1229_v49, %v1195_v52 }
 0x275   :  { %1517 = vmatmul.f32.gmra.mxu3 %v1323_v14  ;;  %v1324_v59 = vsub.f32 %v1322_v50, %v1323_v14 }
 0x276   :  { %v1258_v61 = vsel %vm1238_vm6, %v1230_v55, 0  ;;  %v11070_v1 = vmul.f32 %v11053_v39, %v1230_v55 }
 0x277   :  { %v1329_v2 = vand.u32 4294901760, %v1258_v61  ;;  %v1159_v32 = vpop.f32.mrf.mxu1  ;;  %v1325_v3 = vand.u32 4294901760, %v1324_v59  ;;  %v1198_v8 = vpop.f32.mrf.mxu2 }
 0x278   :  { %v1160_v4 = vadd.f32 %v1159_v32, %v1117_v60  ;;  %v1233_v9 = vpop.f32.mrf.mxu3 }
 0x279   :  { %1326 = vmatmul.f32.gmra.mxu0 %v1325_v3  ;;  %1397 = vmatmul.f32.gmra.mxu1 %v1329_v2  ;;  %v1330_v16 = vsub.f32 %v1258_v61, %v1329_v2 }
 0x27a   :  { %v1199_v15 = vadd.f32 %v1198_v8, %v1160_v4 }
 0x27b   :  { %1457 = vmatmul.f32.gmra.mxu2 %v1330_v16  ;;  %v1331_v29 = vand.u32 4294901760, %v1330_v16 }
 0x27c   :  { %v11072_v34 = vadd.f32 %v1233_v9, %v1199_v15 }
 0x27d   :  { %1523 = vmatmul.f32.gmra.mxu3 %v1331_v29  ;;  %v1332_v18 = vsub.f32 %v1330_v16, %v1331_v29 }
 0x27e   :  { %v1261_v57 = vsel %vm1238_vm6, %v11072_v34, 0 }
 0x27f   :  { %v1337_v58 = vand.u32 4294901760, %v1261_v57  ;;  %v1333_v19 = vand.u32 4294901760, %v1332_v18 }
 0x281   :  { %1334 = vmatmul.f32.gmra.mxu0 %v1333_v19  ;;  %1401 = vmatmul.f32.gmra.mxu1 %v1337_v58  ;;  %v1338_v20 = vsub.f32 %v1261_v57, %v1337_v58 }
 0x283   :  { %1462 = vmatmul.f32.gmra.mxu2 %v1338_v20  ;;  %v1339_v21 = vand.u32 4294901760, %v1338_v20 }
 0x285   :  { %1529 = vmatmul.f32.gmra.mxu3 %v1339_v21  ;;  %v1340_v25 = vsub.f32 %v1338_v20, %v1339_v21 }
 0x287   :  { %v1341_v26 = vand.u32 4294901760, %v1340_v25 }
 0x289   :  { %1342 = vmatmul.f32.gmra.mxu0 %v1341_v26  ;;  %1607 = vmatmul.f32.vlgmr.msrb.gmra.mxu1 %v11020_v41 }
 0x291   :  { %1556 = vmatmul.f32.vlgmr.msrb.gmra.mxu0 %v11020_v41  ;;  %1611 = vmatmul.f32.gmra.mxu1 %v11028_v63 }
 0x299   :  { %1560 = vmatmul.f32.gmra.mxu0 %v11028_v63  ;;  %1615 = vmatmul.f32.gmra.mxu1 %v11036_v17 }
 0x2a1   :  { %1564 = vmatmul.f32.gmra.mxu0 %v11036_v17  ;;  %1619 = vmatmul.f32.gmra.mxu1 %v11048_v36 }
 0x2a9   :  { %1568 = vmatmul.f32.gmra.mxu0 %v11048_v36  ;;  %1623 = vmatmul.f32.gmra.mxu1 %v11059_v7 }
 0x2b1   :  { %1572 = vmatmul.f32.gmra.mxu0 %v11059_v7  ;;  %1627 = vmatmul.f32.gmra.mxu1 %v1321_v27 }
 0x2b9   :  { %1576 = vmatmul.f32.gmra.mxu0 %v1321_v27  ;;  %1631 = vmatmul.f32.gmra.mxu1 %v1329_v2 }
 0x2c1   :  { %1580 = vmatmul.f32.gmra.mxu0 %v1329_v2  ;;  %1635 = vmatmul.f32.gmra.mxu1 %v1337_v58 }
 0x2c2   :  { %v1374_v41 = vpop.f32.mrf.mxu1 }
 0x2c9   :  { %1584 = vmatmul.f32.gmra.mxu0 %v1337_v58 }
 0x2ca   :  { %v1287_v63 = vpop.f32.mrf.mxu0  ;;  %v1378_v28 = vpop.f32.mrf.mxu1 }
 0x2cb   :  { %v1428_v14 = vpop.f32.mrf.mxu2  ;;  %v1375_v53 = vadd.f32 %v1374_v41, %v1287_v63 }
 0x2cc   :  { %v1488_v55 = vpop.f32.mrf.mxu3 }
 0x2cd   :  { %v1429_v61 = vadd.f32 %v1428_v14, %v1375_v53 }
 0x2cf   :  { %v1489_v32 = vadd.f32 %v1488_v55, %v1429_v61 }
 0x2d2   :  { %v1295_v40 = vpop.f32.mrf.mxu0  ;;  %v1382_v45 = vpop.f32.mrf.mxu1 }
 0x2d3   :  { %v1433_v2 = vpop.f32.mrf.mxu2  ;;  %v1379_v3 = vadd.f32 %v1378_v28, %v1295_v40 }
 0x2d4   :  { %v1494_v9 = vpop.f32.mrf.mxu3 }
 0x2d5   :  { %v1434_v16 = vadd.f32 %v1433_v2, %v1379_v3 }
 0x2d7   :  { %v1495_v57 = vadd.f32 %v1494_v9, %v1434_v16 }
 0x2da   :  { %v1303_v17 = vpop.f32.mrf.mxu0  ;;  %v1386_v46 = vpop.f32.mrf.mxu1 }
 0x2db   :  { %v1438_v58 = vpop.f32.mrf.mxu2  ;;  %v1383_v21 = vadd.f32 %v1382_v45, %v1303_v17 }
 0x2dc   :  { %v1500_v26 = vpop.f32.mrf.mxu3 }
 0x2dd   :  { %v1439_v28 = vadd.f32 %v1438_v58, %v1383_v21 }
 0x2e2   :  { %v1311_v47 = vpop.f32.mrf.mxu0 }
 0x2e3   :  { %v1387_v40 = vadd.f32 %v1386_v46, %v1311_v47  ;;  %v1443_v55 = vpop.f32.mrf.mxu2 }
 0x2e5   :  { %v1444_v61 = vadd.f32 %v1443_v55, %v1387_v40 }
 0x2e6   :  { %v1390_v49 = vpop.f32.mrf.mxu1 }
 0x2ee   :  { %v1319_v36 = vpop.f32.mrf.mxu0  ;;  %v11086_v50 = vpop.f32.mrf.mxu1 }
 0x2ef   :  { %v1391_v45 = vadd.f32 %v1390_v49, %v1319_v36  ;;  %v1448_v16 = vpop.f32.mrf.mxu2 }
 0x2f6   :  { %v11088_v52 = vpop.f32.mrf.mxu0  ;;  %v11090_v7 = vpop.f32.mrf.mxu1 }
 0x2fe   :  { %v11092_v27 = vpop.f32.mrf.mxu0  ;;  %v11094_v12 = vpop.f32.mrf.mxu1 }
 0x306   :  { %v11096_v59 = vpop.f32.mrf.mxu0  ;;  %v1608_v60 = vpop.f32.mrf.mxu1 }
 0x30e   :  { %v1557_v4 = vpop.f32.mrf.mxu0  ;;  %v1612_v29 = vpop.f32.mrf.mxu1 }
 0x30f   :  { %v1558_v8 = vadd.f32 %v1557_v4, %v1489_v32  ;;  %v1506_v32 = vpop.f32.mrf.mxu3 }
 0x310   :  { %v1507_v3 = vadd.f32 %v1506_v32, %v1444_v61  ;;  %v11146_v61 = vld [vmem:[%s14377_s8 + $0x8] sm:$0x3f] }
 0x311   :  { %v11098_v15 = vadd.f32 %v1608_v60, %v1558_v8  ;;  %v1501_v60 = vadd.f32 %v1500_v26, %v1439_v28  ;;  %v11523_v13 = vperm.slane %v11146_v61, 0 }
 0x313   :  { %v1648_v18 = vrot.slane %v11098_v15, 7 }
 0x315   :  { %1672 = vrot.lane.b32.xlu0 %v1648_v18, %s10701_s21  ;;  %v1671_v55 = vsel %vm1647_vm7, 0.0, %v1648_v18 }
 0x316   :  { %v1561_v19 = vpop.f32.mrf.mxu0  ;;  %v1616_v63 = vpop.f32.mrf.mxu1 }
 0x317   :  { %v1562_v20 = vadd.f32 %v1561_v19, %v1495_v57  ;;  %v1512_v58 = vpop.f32.mrf.mxu3 }
 0x319   :  { %v11102_v25 = vadd.f32 %v1612_v29, %v1562_v20  ;;  %v1449_v29 = vadd.f32 %v1448_v16, %v1391_v45 }
 0x31b   :  { %v1649_v41 = vrot.slane %v11102_v25, 7  ;;  %v1513_v19 = vadd.f32 %v1512_v58, %v1449_v29 }
 0x31d   :  { %v11106_v14 = vsel %vm1647_vm7, %v1648_v18, %v1649_v41 }
 0x31e   :  { %v1565_v53 = vpop.f32.mrf.mxu0  ;;  %v1620_v17 = vpop.f32.mrf.mxu1 }
 0x31f   :  { %v1566_v2 = vadd.f32 %v1565_v53, %v1501_v60  ;;  %v11134_v53 = vld [vmem:[%s14377_s8] sm:$0xff]  ;;  %v1709_v60 = vsel %vm1697_vm8, %v1671_v55, 0.0  ;;  %v1453_v55 = vpop.f32.mrf.mxu2 }
 0x321   :  { %v11108_v8 = vadd.f32 %v1616_v63, %v1566_v2 }
 0x323   :  { %v1651_v46 = vrot.slane %v11108_v8, 7 }
 0x325   :  { %v11123_v28 = vsel %vm1647_vm7, %v1649_v41, %v1651_v46  ;;  %v11139_v41 = vperm.slane %v11134_v53, 4 }
 0x326   :  { %v1569_v4 = vpop.f32.mrf.mxu0  ;;  %v1624_v36 = vpop.f32.mrf.mxu1 }
 0x327   :  { %v1570_v9 = vadd.f32 %v1569_v4, %v1507_v3  ;;  %v1726_v2 = vmul.f32 %v11139_v41, %v1709_v60  ;;  %v11150_v3 = vperm.slane %v11146_v61, 1 }
 0x329   :  { %v11110_v57 = vadd.f32 %v1620_v17, %v1570_v9  ;;  %v1734_v9 = vadd.f32 %v1726_v2, %v11098_v15  ;;  %v1809_v43 = vmul.f32 %v11150_v3, %v11123_v28 }
 0x32b   :  { %v1653_v47 = vrot.slane %v11110_v57, 7 }
 0x32d   :  { %v11115_v20 = vsel %vm1647_vm7, %v1651_v46, %v1653_v47  ;;  %v11164_v46 = vperm.slane %v11134_v53, 5 }
 0x32e   :  { %v1573_v21 = vpop.f32.mrf.mxu0  ;;  %1678 = vrot.lane.b32.xlu1 %v11115_v20, %s10701_s21 }
 0x32f   :  { %v1574_v49 = vadd.f32 %v1573_v21, %v1513_v19  ;;  %v1807_v19 = vmul.f32 %v11150_v3, %v1709_v60 }
 0x331   :  { %v11119_v26 = vadd.f32 %v1624_v36, %v1574_v49  ;;  %v1395_v36 = vadd.f32 %v11086_v50, %v11088_v52  ;;  %v1728_v52 = vmul.f32 %v11139_v41, %v11123_v28 }
 0x333   :  { %v14390_v63 = vrot.slane %v11119_v26, 7  ;;  %v1454_v2 = vadd.f32 %v1453_v55, %v1395_v36 }
 0x335   :  { %v1656_v40 = vsel %vm1647_vm7, %v1653_v47, %v14390_v63 }
 0x336   :  { %1676 = vrot.lane.b32.xlu1 %v11123_v28, %s10701_s21  ;;  %1680 = vrot.lane.b32.xlu0 %v1656_v40, %s10701_s21 }
 0x387   :  { %v1673_v32 = vpop.permute.xlu0 %1672 }
 0x388   :  { %v1696_v45 = vsel %vm1647_vm7, 0.0, %v1673_v32  ;;  %v1518_v32 = vpop.f32.mrf.mxu3 }
 0x389   :  { %v1717_v18 = vsel %vm1697_vm8, %v1696_v45, 0.0  ;;  %v1577_v45 = vpop.f32.mrf.mxu0 }
 0x38a   :  { %v1759_v17 = vmul.f32 %v11139_v41, %v1717_v18  ;;  %v1743_v4 = vmul.f32 %v11150_v3, %v1717_v18  ;;  %v1519_v18 = vadd.f32 %v1518_v32, %v1454_v2  ;;  %v1736_v2 = vadd.f32 %v1728_v52, %v11108_v8 }
 0x38b   :  { %v14479_v52 = vrot.slane %v11119_v26, 7 }
 0x38c   :  { %1775 = vrot.lane.b32.xlu2 %v1759_v17, %s10702_s2  ;;  %v11159_v16 = vsub.f32 %v1734_v9, %v1743_v4  ;;  %v1578_v60 = vadd.f32 %v1577_v45, %v1519_v18  ;;  %v1713_v17 = vsel %vm1697_vm8, %v1656_v40, 0.0  ;;  %v1628_v9 = vpop.f32.mrf.mxu1 }
 0x38d   :  { %v1730_v36 = vmul.f32 %v11139_v41, %v1713_v17 }
 0x38e   :  { %v14389_v29 = vrot.slane %v11159_v16, 6  ;;  %v11189_v50 = vadd.f32 %v1628_v9, %v1578_v60 }
 0x390   :  { %v1887_v47 = vsel %vm1863_vm9, 0.0, %v14389_v29  ;;  %v1657_v55 = vrot.slane %v11189_v50, 7  ;;  %v1738_v29 = vadd.f32 %v1730_v36, %v11119_v26 }
 0x391   :  { %v11171_v58 = vsel %vm1936_vm10, %v1887_v47, 0.0  ;;  %v1811_v47 = vmul.f32 %v11150_v3, %v1713_v17  ;;  %v1581_v24 = vpop.f32.mrf.mxu0 }
 0x392   :  { %v1965_v21 = vmul.f32 %v11164_v46, %v11171_v58 }
 0x394   :  { %1823 = vrot.lane.b32.xlu2 %v1807_v19, %s10702_s2  ;;  %v11178_v49 = vadd.f32 %v1965_v21, %v11159_v16  ;;  %v1729_v19 = vmul.f32 %v11139_v41, %v11115_v20 }
 0x396   :  { %v1737_v40 = vadd.f32 %v1729_v19, %v11110_v57 }
 0x39c   :  { %1674 = vrot.lane.b32.xlu2 %v11106_v14, %s10701_s21 }
 0x3a0   :  { %v1679_v4 = vpop.permute.xlu1 %1678 }
 0x3a1   :  { %v1746_v21 = vmul.f32 %v11150_v3, %v1679_v4 }
 0x3a3   :  { %v1754_v18 = vsub.f32 %v1737_v40, %v1746_v21  ;;  %v11212_v21 = vsel %vm1647_vm7, %v14479_v52, %v1657_v55  ;;  %v1399_v40 = vadd.f32 %v11090_v7, %v11092_v27  ;;  %v1808_v52 = vmul.f32 %v11150_v3, %v11106_v14 }
 0x3a4   :  { %1831 = vrot.lane.b32.xlu2 %v1811_v47, %s10702_s2 }
 0x3a5   :  { %v1869_v36 = vrot.slane %v1754_v18, 6 }
 0x3a8   :  { %v1677_v32 = vpop.permute.xlu1 %1676  ;;  %v1681_v45 = vpop.permute.xlu0 %1680 }
 0x3a9   :  { %v1745_v60 = vmul.f32 %v11150_v3, %v1677_v32  ;;  %v1761_v9 = vmul.f32 %v11139_v41, %v1677_v32  ;;  %v1721_v47 = vsel %vm1697_vm8, %v1681_v45, 0.0 }
 0x3aa   :  { %v1747_v17 = vmul.f32 %v11150_v3, %v1721_v47  ;;  %v1763_v19 = vmul.f32 %v11139_v41, %v1721_v47 }
 0x3ab   :  { %v11206_v63 = vsub.f32 %v1736_v2, %v1745_v60  ;;  %1779 = vrot.lane.b32.xlu0 %v1761_v9, %s10702_s2  ;;  %v1458_v60 = vpop.f32.mrf.mxu2 }
 0x3ac   :  { %v1755_v32 = vsub.f32 %v1738_v29, %v1747_v17  ;;  %1783 = vrot.lane.b32.xlu1 %v1763_v19, %s10702_s2  ;;  %1682 = vrot.lane.b32.xlu2 %v11212_v21, %s10701_s21  ;;  %v1459_v47 = vadd.f32 %v1458_v60, %v1399_v40  ;;  %v1762_v29 = vmul.f32 %v11139_v41, %v1679_v4 }
 0x3ad   :  { %v14391_v2 = vrot.slane %v11206_v63, 6  ;;  %v1810_v19 = vmul.f32 %v11150_v3, %v11115_v20 }
 0x3ae   :  { %v1871_v45 = vrot.slane %v1755_v32, 6 }
 0x3af   :  { %v11223_v9 = vsel %vm1863_vm9, %v14391_v2, %v1869_v36  ;;  %v1524_v2 = vpop.f32.mrf.mxu3 }
 0x3b0   :  { %v1968_v7 = vmul.f32 %v11164_v46, %v11223_v9  ;;  %v1872_v27 = vsel %vm1863_vm9, %v1869_v36, %v1871_v45  ;;  %v1525_v4 = vadd.f32 %v1524_v2, %v1459_v47 }
 0x3b1   :  { %v11231_v17 = vsel %vm1936_vm10, %v1872_v27, 0.0  ;;  %v1632_v27 = vpop.f32.mrf.mxu1 }
 0x3b2   :  { %v1969_v40 = vmul.f32 %v11164_v46, %v11231_v17  ;;  %v11239_v60 = vadd.f32 %v1968_v7, %v1754_v18  ;;  %v1582_v20 = vadd.f32 %v1581_v24, %v1525_v4 }
 0x3b3   :  { %1781 = vrot.lane.b32.xlu0 %v1762_v29, %s10702_s2 }
 0x3b4   :  { %1829 = vrot.lane.b32.xlu1 %v1810_v19, %s10702_s2  ;;  %1825 = vrot.lane.b32.xlu2 %v1808_v52, %s10702_s2  ;;  %v11244_v36 = vadd.f32 %v1969_v40, %v1755_v32  ;;  %v11248_v38 = vadd.f32 %v1632_v27, %v1582_v20 }
 0x3b6   :  { %v14399_v18 = vrot.slane %v11248_v38, 7 }
 0x3b8   :  { %v11255_v2 = vsel %vm1647_vm7, %v1657_v55, %v14399_v18 }
 0x3bb   :  { %1827 = vrot.lane.b32.xlu0 %v1809_v43, %s10702_s2  ;;  %v1727_v43 = vmul.f32 %v11139_v41, %v11106_v14  ;;  %v14480_v14 = vrot.slane %v11159_v16, 6 }
 0x3bd   :  { %v1735_v29 = vadd.f32 %v1727_v43, %v11102_v25 }
 0x3c3   :  { %1684 = vrot.lane.b32.xlu0 %v11255_v2, %s10701_s21 }
 0x3e6   :  { %v1776_v32 = vpop.permute.xlu2 %1775 }
 0x3e7   :  { %v1799_v24 = vadd.f32 %v1776_v32, %v11098_v15 }
 0x3ee   :  { %v1824_v47 = vpop.permute.xlu2 %1823 }
 0x3ef   :  { %v11260_v7 = vadd.f32 %v1824_v47, %v1799_v24  ;;  %v1731_v24 = vmul.f32 %v11139_v41, %v11212_v21 }
 0x3f1   :  { %v14400_v28 = vrot.slane %v11260_v7, 6  ;;  %v1739_v43 = vadd.f32 %v1731_v24, %v11189_v50 }
 0x3f3   :  { %1911 = vrot.lane.b32.xlu1 %v14400_v28, %s10701_s21 }
 0x3f6   :  { %v1675_v55 = vpop.permute.xlu2 %1674 }
 0x3f7   :  { %v1744_v19 = vmul.f32 %v11150_v3, %v1675_v55  ;;  %v1760_v15 = vmul.f32 %v11139_v41, %v1675_v55 }
 0x3f9   :  { %v11270_v52 = vsub.f32 %v1735_v29, %v1744_v19 }
 0x3fb   :  { %v14398_v40 = vrot.slane %v11270_v52, 6  ;;  %1777 = vrot.lane.b32.xlu1 %v1760_v15, %s10702_s2 }
 0x3fd   :  { %v11280_v4 = vsel %vm1863_vm9, %v14480_v14, %v14398_v40 }
 0x3fe   :  { %v1832_v20 = vpop.permute.xlu2 %1831  ;;  %v1966_v27 = vmul.f32 %v11164_v46, %v11280_v4 }
 0x400   :  { %v11285_v32 = vadd.f32 %v1966_v27, %v11270_v52 }
 0x406   :  { %v1683_v47 = vpop.permute.xlu2 %1682 }
 0x407   :  { %v1748_v55 = vmul.f32 %v11150_v3, %v1683_v47 }
 0x409   :  { %v1756_v29 = vsub.f32 %v1739_v43, %v1748_v55 }
 0x40b   :  { %v1873_v16 = vrot.slane %v1756_v29, 6 }
 0x40d   :  { %v11292_v19 = vsel %vm1863_vm9, %v1871_v45, %v1873_v16 }
 0x40e   :  { %v1970_v15 = vmul.f32 %v11164_v46, %v11292_v19 }
 0x410   :  { %v11296_v14 = vadd.f32 %v1970_v15, %v1756_v29 }
 0x41d   :  { %v1780_v27 = vpop.permute.xlu0 %1779 }
 0x41e   :  { %v1784_v40 = vpop.permute.xlu1 %1783  ;;  %v1801_v22 = vadd.f32 %v1780_v27, %v11108_v8 }
 0x41f   :  { %v1803_v18 = vadd.f32 %v1784_v40, %v11119_v26 }
 0x421   :  { %v11299_v5 = vadd.f32 %v1832_v20, %v1803_v18  ;;  %v1732_v18 = vmul.f32 %v11139_v41, %v11255_v2 }
 0x423   :  { %v1903_v45 = vrot.slane %v11299_v5, 6 }
 0x425   :  { %v1782_v28 = vpop.permute.xlu0 %1781 }
 0x426   :  { %v1802_v24 = vadd.f32 %v1782_v28, %v11110_v57  ;;  %v1830_v51 = vpop.permute.xlu1 %1829  ;;  %v11314_v57 = vperm.slane %v11146_v61, 2 }
 0x428   :  { %v11302_v43 = vadd.f32 %v1830_v51, %v1802_v24  ;;  %v2046_v8 = vmul.f32 %v11314_v57, %v11171_v58  ;;  %v1764_v24 = vmul.f32 %v11139_v41, %v1683_v47  ;;  %v1813_v47 = vmul.f32 %v11150_v3, %v11255_v2 }
 0x42a   :  { %v1901_v55 = vrot.slane %v11302_v43, 6 }
 0x42c   :  { %v1904_v29 = vsel %vm1863_vm9, %v1901_v55, %v1903_v45 }
 0x42d   :  { %v1828_v15 = vpop.permute.xlu0 %1827  ;;  %1919 = vrot.lane.b32.xlu0 %v1904_v29, %s10701_s21 }
 0x42e   :  { %v11311_v26 = vadd.f32 %v1828_v15, %v1801_v22  ;;  %v1740_v22 = vadd.f32 %v1732_v18, %v11248_v38 }
 0x430   :  { %v1899_v51 = vrot.slane %v11311_v26, 6 }
 0x432   :  { %v1902_v28 = vsel %vm1863_vm9, %v1899_v51, %v1901_v55 }
 0x433   :  { %1917 = vrot.lane.b32.xlu1 %v1902_v28, %s10701_s21 }
 0x435   :  { %v1685_v40 = vpop.permute.xlu0 %1684  ;;  %2062 = vrot.lane.b32.xlu0 %v2046_v8, %s10702_s2 }
 0x436   :  { %v1749_v20 = vmul.f32 %v11150_v3, %v1685_v40  ;;  %v1765_v55 = vmul.f32 %v11139_v41, %v1685_v40 }
 0x438   :  { %v11326_v27 = vsub.f32 %v1740_v22, %v1749_v20 }
 0x43a   :  { %v14409_v29 = vrot.slane %v11326_v27, 6 }
 0x43b   :  { %1785 = vrot.lane.b32.xlu1 %v1764_v24, %s10702_s2 }
 0x43c   :  { %v11335_v58 = vsel %vm1863_vm9, %v1873_v16, %v14409_v29 }
 0x43d   :  { %1787 = vrot.lane.b32.xlu0 %v1765_v55, %s10702_s2  ;;  %v1971_v15 = vmul.f32 %v11164_v46, %v11335_v58  ;;  %v1826_v55 = vpop.permute.xlu2 %1825 }
 0x43f   :  { %v11341_v18 = vadd.f32 %v1971_v15, %v11326_v27  ;;  %v1812_v15 = vmul.f32 %v11150_v3, %v11212_v21  ;;  %v1463_v21 = vpop.f32.mrf.mxu2 }
 0x443   :  { %1835 = vrot.lane.b32.xlu1 %v1813_v47, %s10702_s2 }
 0x465   :  { %v1912_v28 = vpop.permute.xlu1 %1911 }
 0x466   :  { %v1935_v8 = vsel %vm1863_vm9, 0.0, %v1912_v28 }
 0x467   :  { %v1956_v16 = vsel %vm1936_vm10, %v1935_v8, 0.0  ;;  %v14481_v8 = vrot.slane %v11260_v7, 6 }
 0x468   :  { %v1982_v40 = vmul.f32 %v11314_v57, %v1956_v16  ;;  %v1998_v22 = vmul.f32 %v11164_v46, %v1956_v16  ;;  %v2049_v16 = vmul.f32 %v11314_v57, %v11223_v9 }
 0x46a   :  { %v11352_v20 = vsub.f32 %v11178_v49, %v1982_v40  ;;  %2014 = vrot.lane.b32.xlu2 %v1998_v22, %s10702_s2 }
 0x46d   :  { %v1778_v24 = vpop.permute.xlu1 %1777 }
 0x46e   :  { %v1800_v2 = vadd.f32 %v1778_v24, %v11102_v25  ;;  %v1403_v25 = vadd.f32 %v11094_v12, %v11096_v59 }
 0x470   :  { %v11358_v47 = vadd.f32 %v1826_v55, %v1800_v2  ;;  %v1464_v22 = vadd.f32 %v1463_v21, %v1403_v25 }
 0x472   :  { %1833 = vrot.lane.b32.xlu2 %v1812_v15, %s10702_s2  ;;  %v1897_v28 = vrot.slane %v11358_v47, 6  ;;  %v1530_v15 = vpop.f32.mrf.mxu3 }
 0x473   :  { %v1531_v9 = vadd.f32 %v1530_v15, %v1464_v22 }
 0x474   :  { %v1898_v49 = vsel %vm1863_vm9, %v14481_v8, %v1897_v28  ;;  %v1585_v8 = vpop.f32.mrf.mxu0  ;;  %v1900_v22 = vsel %vm1863_vm9, %v1897_v28, %v1899_v51  ;;  %v2050_v51 = vmul.f32 %v11314_v57, %v11231_v17  ;;  %v2047_v17 = vmul.f32 %v11314_v57, %v11280_v4 }
 0x475   :  { %v1586_v12 = vadd.f32 %v1585_v8, %v1531_v9 }
 0x47a   :  { %1913 = vrot.lane.b32.xlu2 %v1898_v49, %s10701_s21 }
 0x482   :  { %2068 = vrot.lane.b32.xlu2 %v2049_v16, %s10702_s2 }
 0x49f   :  { %v1920_v40 = vpop.permute.xlu0 %1919 }
 0x4a0   :  { %v1960_v24 = vsel %vm1936_vm10, %v1920_v40, 0.0  ;;  %v1636_v40 = vpop.f32.mrf.mxu1 }
 0x4a1   :  { %v1986_v2 = vmul.f32 %v11314_v57, %v1960_v24  ;;  %v2002_v55 = vmul.f32 %v11164_v46, %v1960_v24  ;;  %v11385_v24 = vadd.f32 %v1636_v40, %v1586_v12  ;;  %v14483_v40 = vrot.slane %v11206_v63, 6 }
 0x4a3   :  { %v11376_v49 = vsub.f32 %v11244_v36, %v1986_v2  ;;  %2022 = vrot.lane.b32.xlu1 %v2002_v55, %s10702_s2  ;;  %v11393_v55 = vperm.slane %v11134_v53, 6  ;;  %v1661_v28 = vrot.slane %v11385_v24, 7 }
 0x4a5   :  { %v1918_v16 = vpop.permute.xlu1 %1917  ;;  %v14408_v36 = vrot.slane %v11376_v49, 4 }
 0x4a6   :  { %v1985_v59 = vmul.f32 %v11314_v57, %v1918_v16  ;;  %v2001_v25 = vmul.f32 %v11164_v46, %v1918_v16  ;;  %v14482_v16 = vrot.slane %v11248_v38, 7 }
 0x4a8   :  { %v11382_v21 = vsub.f32 %v11239_v60, %v1985_v59  ;;  %2020 = vrot.lane.b32.xlu0 %v2001_v25, %s10702_s2  ;;  %v11416_v12 = vsel %vm1647_vm7, %v14482_v16, %v1661_v28  ;;  %v2063_v59 = vpop.permute.xlu0 %2062 }
 0x4aa   :  { %v14407_v2 = vrot.slane %v11382_v21, 4 }
 0x4ab   :  { %1915 = vrot.lane.b32.xlu1 %v1900_v22, %s10701_s21  ;;  %v14484_v22 = vrot.slane %v11270_v52, 6 }
 0x4ac   :  { %v2111_v60 = vsel %vm2102_vm11, %v14407_v2, %v14408_v36 }
 0x4ad   :  { %v11402_v15 = vsel %vm2175_vm12, %v2111_v60, 0.0  ;;  %v1786_v25 = vpop.permute.xlu1 %1785  ;;  %v1868_v60 = vsel %vm1863_vm9, %v14484_v22, %v14483_v40 }
 0x4ae   :  { %v2208_v8 = vmul.f32 %v11393_v55, %v11402_v15  ;;  %v1804_v29 = vadd.f32 %v1786_v25, %v11189_v50 }
 0x4b0   :  { %2070 = vrot.lane.b32.xlu0 %v2050_v51, %s10702_s2  ;;  %v11411_v9 = vadd.f32 %v2208_v8, %v11376_v49  ;;  %v2048_v51 = vmul.f32 %v11314_v57, %v1868_v60  ;;  %v1788_v16 = vpop.permute.xlu0 %1787 }
 0x4b3   :  { %1686 = vrot.lane.b32.xlu1 %v11416_v12, %s10701_s21 }
 0x4b5   :  { %v1836_v4 = vpop.permute.xlu1 %1835 }
 0x4bb   :  { %2064 = vrot.lane.b32.xlu1 %v2047_v17, %s10702_s2  ;;  %v1805_v17 = vadd.f32 %v1788_v16, %v11248_v38 }
 0x4bd   :  { %v11436_v52 = vadd.f32 %v1836_v4, %v1805_v17 }
 0x4c3   :  { %2066 = vrot.lane.b32.xlu1 %v2048_v51, %s10702_s2  ;;  %v2572_v51 = vld [vmem:[#allocation5 + $0x8] sm:$0xff] }
 0x4c4   :  { %v2015_v28 = vpop.permute.xlu2 %2014 }
 0x4c5   :  { %v2038_v8 = vadd.f32 %v2015_v28, %v11260_v7  ;;  %v14410_v7 = vrot.slane %v11436_v52, 6  ;;  %v2612_v28 = vand.u32 4294901760, %v2572_v51 }
 0x4c7   :  { %v11431_v2 = vadd.f32 %v2063_v59, %v2038_v8  ;;  %v2571_v8 = vld [vmem:[#allocation5] sm:$0xff]  ;;  %v2696_v16 = vsub.f32 %v2572_v51, %v2612_v28  ;;  %2816 = vmatpush.msra.mxu1 %v2612_v28  ;;  %2613 = vmatpush.msrb.mxu2 %v2612_v28  ;;  %v14417_v51 = vrot.slane %v11352_v20, 4 }
 0x4c8   :  { %v2614_v4 = vand.u32 4294901760, %v2571_v8 }
 0x4c9   :  { %v14411_v36 = vrot.slane %v11431_v2, 4  ;;  %2756 = vmatpush.msra.mxu0 %v2696_v16 }
 0x4ca   :  { %v2702_v17 = vsub.f32 %v2571_v8, %v2614_v4  ;;  %2818 = vmatpush.msra.mxu1 %v2614_v4  ;;  %2615 = vmatpush.msrb.mxu2 %v2614_v4 }
 0x4cb   :  { %2150 = vrot.lane.b32.xlu2 %v14411_v36, %s10701_s21  ;;  %v1967_v36 = vmul.f32 %v11164_v46, %v1868_v60 }
 0x4cc   :  { %v1834_v40 = vpop.permute.xlu2 %1833  ;;  %2759 = vmatpush.msra.mxu0 %v2702_v17 }
 0x4cd   :  { %v11441_v22 = vadd.f32 %v1834_v40, %v1804_v29 }
 0x4cf   :  { %v1905_v59 = vrot.slane %v11441_v22, 6 }
 0x4d1   :  { %v1906_v38 = vsel %vm1863_vm9, %v1903_v45, %v1905_v59  ;;  %v1908_v50 = vsel %vm1863_vm9, %v1905_v59, %v14410_v7  ;;  %v2697_v45 = vand.u32 4294901760, %v2696_v16  ;;  %v2703_v59 = vand.u32 4294901760, %v2702_v17 }
 0x4d2   :  { %1921 = vrot.lane.b32.xlu0 %v1906_v38, %s10701_s21 }
 0x4d3   :  { %1923 = vrot.lane.b32.xlu2 %v1908_v50, %s10701_s21  ;;  %v2698_v40 = vsub.f32 %v2696_v16, %v2697_v45  ;;  %2885 = vmatpush.msra.mxu2 %v2697_v45  ;;  %v2704_v7 = vsub.f32 %v2702_v17, %v2703_v59  ;;  %v2126_v17 = vsel %vm2102_vm11, 0.0, %v14417_v51 }
 0x4d4   :  { %v1914_v25 = vpop.permute.xlu2 %1913 }
 0x4d5   :  { %v1999_v29 = vmul.f32 %v11164_v46, %v1914_v25  ;;  %v2699_v50 = vand.u32 4294901760, %v2698_v40  ;;  %2889 = vmatpush.msra.mxu2 %v2703_v59  ;;  %v1983_v8 = vmul.f32 %v11314_v57, %v1914_v25  ;;  %v1975_v40 = vadd.f32 %v1967_v36, %v11206_v63 }
 0x4d7   :  { %2700 = vmatpush.msrb.mxu3 %v2699_v50  ;;  %v11481_v50 = vperm.slane %v11146_v61, 3 }
 0x4da   :  { %2016 = vrot.lane.b32.xlu0 %v1999_v29, %s10702_s2  ;;  %v2705_v29 = vand.u32 4294901760, %v2704_v7  ;;  %v11463_v7 = vsub.f32 %v11285_v32, %v1983_v8 }
 0x4dc   :  { %2706 = vmatpush.msrb.mxu3 %v2705_v29  ;;  %v2069_v16 = vpop.permute.xlu2 %2068  ;;  %v14418_v63 = vrot.slane %v11463_v7, 4 }
 0x4de   :  { %2938 = vmatpush.msra.mxu3 %v2612_v28 }
 0x4e0   :  { %2940 = vmatpush.msra.mxu3 %v2614_v4 }
 0x515   :  { %v2023_v38 = vpop.permute.xlu1 %2022 }
 0x516   :  { %v2042_v28 = vadd.f32 %v2023_v38, %v11299_v5 }
 0x51a   :  { %v2021_v31 = vpop.permute.xlu0 %2020 }
 0x51b   :  { %v2041_v42 = vadd.f32 %v2021_v31, %v11302_v43  ;;  %v2187_v31 = vsel %vm2175_vm12, %v2126_v17, 0.0  ;;  %v1733_v43 = vmul.f32 %v11139_v41, %v11416_v12 }
 0x51c   :  { %v2204_v8 = vmul.f32 %v11393_v55, %v2187_v31 }
 0x51d   :  { %v1916_v45 = vpop.permute.xlu1 %1915  ;;  %v11476_v32 = vadd.f32 %v2069_v16, %v2041_v42  ;;  %v1741_v42 = vadd.f32 %v1733_v43, %v11385_v24 }
 0x51e   :  { %v1984_v60 = vmul.f32 %v11314_v57, %v1916_v45  ;;  %v2000_v25 = vmul.f32 %v11164_v46, %v1916_v45  ;;  %v11487_v45 = vperm.slane %v11134_v53, 7 }
 0x51f   :  { %v14423_v38 = vrot.slane %v11476_v32, 4 }
 0x520   :  { %v11468_v59 = vsub.f32 %v1975_v40, %v1984_v60  ;;  %2018 = vrot.lane.b32.xlu0 %v2000_v25, %s10702_s2  ;;  %v11520_v0 = vmul.f32 0.0, %v11487_v45 }
 0x522   :  { %v14416_v36 = vrot.slane %v11468_v59, 4  ;;  %v2071_v4 = vpop.permute.xlu0 %2070 }
 0x523   :  { %v11483_v29 = vadd.f32 %v2071_v4, %v2042_v28  ;;  %v2279_v28 = vmul.f32 %v11481_v50, %v2187_v31  ;;  %v11505_v4 = vperm.slane %v11146_v61, 4 }
 0x524   :  { %v11494_v5 = vsel %vm2102_vm11, %v14418_v63, %v14416_v36  ;;  %v2212_v36 = vadd.f32 %v2204_v8, %v11352_v20 }
 0x525   :  { %v14424_v16 = vrot.slane %v11483_v29, 4  ;;  %v2151_v17 = vpop.permute.xlu2 %2150  ;;  %v1687_v40 = vpop.permute.xlu1 %1686  ;;  %v2206_v60 = vmul.f32 %v11393_v55, %v11494_v5  ;;  %v14488_v11 = vrot.slane %v11483_v29, 4 }
 0x526   :  { %v2174_v53 = vsel %vm2102_vm11, 0.0, %v2151_v17  ;;  %v1750_v25 = vmul.f32 %v11150_v3, %v1687_v40 }
 0x527   :  { %v2195_v43 = vsel %vm2175_vm12, %v2174_v53, 0.0  ;;  %v2143_v51 = vsel %vm2102_vm11, %v14423_v38, %v14424_v16  ;;  %v11516_v17 = vadd.f32 %v2206_v60, %v11468_v59  ;;  %v11528_v53 = vmul.f32 0.0, %v11505_v4 }
 0x528   :  { %v2221_v63 = vmul.f32 %v11481_v50, %v2195_v43  ;;  %v1758_v31 = vsub.f32 %v1741_v42, %v1750_v25  ;;  %2293 = vrot.lane.b32.xlu0 %v2279_v28, %s10702_s2  ;;  %2158 = vrot.lane.b32.xlu2 %v2143_v51, %s10701_s21  ;;  %v11533_v60 = vperm.slane %v11146_v61, 5  ;;  %v11536_v42 = vmul.f32 0.0, %v11523_v13 }
 0x529   :  { %v14485_v16 = vrot.slane %v11326_v27, 6  ;;  %v2051_v61 = vmul.f32 %v11314_v57, %v11292_v19 }
 0x52a   :  { %v1877_v8 = vrot.slane %v1758_v31, 6  ;;  %v11530_v38 = vsub.f32 %v2212_v36, %v2221_v63  ;;  %v2237_v63 = vmul.f32 %v11393_v55, %v2195_v43  ;;  %v11554_v30 = vmul.f32 0.0, %v11533_v60 }
 0x52c   :  { %v2384_v25 = vadd.f32 %v11520_v0, %v11530_v38  ;;  %v11543_v28 = vsel %vm1863_vm9, %v14485_v16, %v1877_v8  ;;  %v11565_v16 = vld [vmem:[%s14378_s9] sm:$0xff]  ;;  %v1766_v8 = vmul.f32 %v11139_v41, %v1687_v40 }
 0x52d   :  { %v1972_v51 = vmul.f32 %v11164_v46, %v11543_v28 }
 0x52e   :  { %v11549_v36 = vsub.f32 %v2384_v25, %v11528_v53 }
 0x52f   :  { %v11556_v44 = vadd.f32 %v1972_v51, %v1758_v31  ;;  %v2052_v31 = vmul.f32 %v11314_v57, %v11335_v58  ;;  %v2283_v58 = vmul.f32 %v11481_v50, %v11402_v15 }
 0x530   :  { %v2535_v27 = vadd.f32 %v11536_v42, %v11549_v36  ;;  %2072 = vrot.lane.b32.xlu0 %v2051_v61, %s10702_s2  ;;  %2251 = vrot.lane.b32.xlu2 %v2237_v63, %s10702_s2  ;;  %v1924_v61 = vpop.permute.xlu2 %1923 }
 0x531   :  { %v2004_v40 = vmul.f32 %v11164_v46, %v1924_v61 }
 0x532   :  { %v2551_v43 = vsub.f32 %v2535_v27, %v11554_v30 }
 0x534   :  { %v2563_v19 = vadd.f32 %v11565_v16, %v2551_v43 }
 0x536   :  { %v2575_v25 = vsel %vm1238_vm6, %v2563_v19, 0  ;;  %v1988_v19 = vmul.f32 %v11314_v57, %v1924_v61 }
 0x537   :  { %v11573_v51 = vand.u32 4294901760, %v2575_v25 }
 0x538   :  { %2074 = vrot.lane.b32.xlu0 %v2052_v31, %s10702_s2  ;;  %1789 = vrot.lane.b32.xlu2 %v1766_v8, %s10702_s2  ;;  %v11586_v31 = vsub.f32 %v11341_v18, %v1988_v19 }
 0x539   :  { %2708 = vmatmul.f32.vlgmr.msrb.gmra.mxu3 %v11573_v51  ;;  %v2617_v63 = vsub.f32 %v2575_v25, %v11573_v51 }
 0x53b   :  { %2762 = vmatmul.f32.vlgmr.msra.gmra.mxu0 %v2617_v63  ;;  %v2618_v27 = vand.u32 4294901760, %v2617_v63 }
 0x53d   :  { %2822 = vmatmul.f32.vlgmr.msra.gmra.mxu1 %v2618_v27  ;;  %v2619_v41 = vsub.f32 %v2617_v63, %v2618_v27 }
 0x53f   :  { %v2620_v43 = vand.u32 4294901760, %v2619_v41  ;;  %v14429_v41 = vrot.slane %v11586_v31, 4 }
 0x540   :  { %2301 = vrot.lane.b32.xlu0 %v2283_v58, %s10702_s2  ;;  %2026 = vrot.lane.b32.xlu2 %v2004_v40, %s10702_s2  ;;  %v14486_v40 = vrot.slane %v11376_v49, 4  ;;  %v1814_v49 = vmul.f32 %v11150_v3, %v11416_v12 }
 0x541   :  { %2621 = vmatmul.f32.vlgmr.msrb.gmra.mxu2 %v2620_v43 }
 0x544   :  { %v1922_v8 = vpop.permute.xlu0 %1921 }
 0x545   :  { %v1987_v25 = vmul.f32 %v11314_v57, %v1922_v8  ;;  %v2003_v63 = vmul.f32 %v11164_v46, %v1922_v8  ;;  %v2065_v8 = vpop.permute.xlu1 %2064 }
 0x547   :  { %v1995_v27 = vsub.f32 %v11296_v14, %v1987_v25  ;;  %2024 = vrot.lane.b32.xlu1 %v2003_v63, %s10702_s2 }
 0x549   :  { %v2112_v15 = vrot.slane %v1995_v27, 4 }
 0x54b   :  { %v11596_v61 = vsel %vm2102_vm11, %v14486_v40, %v2112_v15  ;;  %v11601_v18 = vsel %vm2102_vm11, %v2112_v15, %v14429_v41  ;;  %v14487_v41 = vrot.slane %v11431_v2, 4 }
 0x54c   :  { %v2017_v58 = vpop.permute.xlu0 %2016  ;;  %v2209_v43 = vmul.f32 %v11393_v55, %v11596_v61  ;;  %v2210_v14 = vmul.f32 %v11393_v55, %v11601_v18 }
 0x54d   :  { %v2039_v19 = vadd.f32 %v2017_v58, %v11358_v47 }
 0x54e   :  { %v11610_v25 = vadd.f32 %v2209_v43, %v1995_v27  ;;  %v11613_v63 = vadd.f32 %v2210_v14, %v11586_v31 }
 0x54f   :  { %v11615_v15 = vadd.f32 %v2065_v8, %v2039_v19  ;;  %1837 = vrot.lane.b32.xlu1 %v1814_v49, %s10702_s2  ;;  %v2067_v19 = vpop.permute.xlu1 %2066 }
 0x551   :  { %v2136_v40 = vrot.slane %v11615_v15, 4 }
 0x553   :  { %v2137_v54 = vsel %vm2102_vm11, %v14487_v41, %v2136_v40 }
 0x557   :  { %2152 = vrot.lane.b32.xlu1 %v2137_v54, %s10701_s21 }
 0x582   :  { %v2159_v47 = vpop.permute.xlu2 %2158 }
 0x583   :  { %v2199_v3 = vsel %vm2175_vm12, %v2159_v47, 0.0 }
 0x584   :  { %v2225_v12 = vmul.f32 %v11481_v50, %v2199_v3  ;;  %v2241_v27 = vmul.f32 %v11393_v55, %v2199_v3 }
 0x586   :  { %v11628_v58 = vsub.f32 %v11411_v9, %v2225_v12  ;;  %2259 = vrot.lane.b32.xlu2 %v2241_v27, %s10702_s2 }
 0x58a   :  { %v2252_v54 = vpop.permute.xlu2 %2251 }
 0x58b   :  { %v2272_v8 = vadd.f32 %v2252_v54, %v11431_v2 }
 0x592   :  { %v2019_v43 = vpop.permute.xlu0 %2018 }
 0x593   :  { %v2040_v14 = vadd.f32 %v2019_v43, %v11311_v26  ;;  %v1790_v26 = vpop.permute.xlu2 %1789 }
 0x595   :  { %v11632_v41 = vadd.f32 %v2067_v19, %v2040_v14 }
 0x597   :  { %v14432_v49 = vrot.slane %v11632_v41, 4 }
 0x599   :  { %v2139_v47 = vsel %vm2102_vm11, %v2136_v40, %v14432_v49 }
 0x59a   :  { %v2294_v3 = vpop.permute.xlu0 %2293  ;;  %2154 = vrot.lane.b32.xlu1 %v2139_v47, %s10701_s21 }
 0x59b   :  { %v11640_v9 = vadd.f32 %v2294_v3, %v2272_v8  ;;  %v2027_v27 = vpop.permute.xlu2 %2026  ;;  %v1806_v3 = vadd.f32 %v1790_v26, %v11385_v24 }
 0x59c   :  { %v2044_v14 = vadd.f32 %v2027_v27, %v11436_v52 }
 0x59d   :  { %2328 = vrot.lane.b32.xlu2 %v11640_v9, %s10701_s21 }
 0x5a2   :  { %v2073_v12 = vpop.permute.xlu0 %2072 }
 0x5aa   :  { %v2075_v43 = vpop.permute.xlu0 %2074 }
 0x5ab   :  { %v11645_v2 = vadd.f32 %v2075_v43, %v2044_v14  ;;  %v14489_v43 = vrot.slane %v11463_v7, 4  ;;  %v14490_v14 = vrot.slane %v11352_v20, 4  ;;  %v2377_v20 = vmul.f32 %v11487_v45, %v11530_v38 }
 0x5ad   :  { %v2146_v47 = vrot.slane %v11645_v2, 4  ;;  %v2105_v24 = vsel %vm2102_vm11, %v14490_v14, %v14489_v43 }
 0x5b9   :  { %v2025_v19 = vpop.permute.xlu1 %2024 }
 0x5ba   :  { %v2043_v54 = vadd.f32 %v2025_v19, %v11441_v22  ;;  %v14491_v19 = vrot.slane %v11436_v52, 6  ;;  %v2280_v52 = vmul.f32 %v11481_v50, %v2105_v24 }
 0x5bc   :  { %v11648_v40 = vadd.f32 %v2073_v12, %v2043_v54 }
 0x5be   :  { %v2144_v8 = vrot.slane %v11648_v40, 4 }
 0x5c0   :  { %v2147_v49 = vsel %vm2102_vm11, %v2144_v8, %v2146_v47  ;;  %v2145_v27 = vsel %vm2102_vm11, %v14488_v11, %v2144_v8  ;;  %v2205_v11 = vmul.f32 %v11393_v55, %v2105_v24 }
 0x5c1   :  { %2162 = vrot.lane.b32.xlu2 %v2147_v49, %s10701_s21  ;;  %2160 = vrot.lane.b32.xlu0 %v2145_v27, %s10701_s21  ;;  %v1838_v22 = vpop.permute.xlu1 %1837 }
 0x5c2   :  { %v11661_v12 = vadd.f32 %v1838_v22, %v1806_v3  ;;  %v2213_v27 = vadd.f32 %v2205_v11, %v11463_v7  ;;  %v2281_v7 = vmul.f32 %v11481_v50, %v11494_v5 }
 0x5c4   :  { %v1909_v26 = vrot.slane %v11661_v12, 6 }
 0x5c6   :  { %v1910_v54 = vsel %vm1863_vm9, %v14491_v19, %v1909_v26  ;;  %v2302_v19 = vpop.permute.xlu0 %2301 }
 0x5c7   :  { %1925 = vrot.lane.b32.xlu1 %v1910_v54, %s10701_s21 }
 0x5c9   :  { %v2153_v49 = vpop.permute.xlu1 %2152 }
 0x5ca   :  { %v2222_v8 = vmul.f32 %v11481_v50, %v2153_v49  ;;  %v2238_v3 = vmul.f32 %v11393_v55, %v2153_v49 }
 0x5cc   :  { %2253 = vrot.lane.b32.xlu0 %v2238_v3, %s10702_s2  ;;  %v2230_v22 = vsub.f32 %v2213_v27, %v2222_v8 }
 0x5ce   :  { %v2385_v43 = vadd.f32 %v2377_v20, %v2230_v22 }
 0x5cf   :  { %2295 = vrot.lane.b32.xlu1 %v2280_v52, %s10702_s2 }
 0x5d4   :  { %2420 = vrot.lane.b32.xlu0 %v11520_v0, %s10702_s2 }
 0x5d7   :  { %2455 = vrot.lane.b32.xlu1 %v11528_v53, %s10702_s2 }
 0x5dc   :  { %2297 = vrot.lane.b32.xlu0 %v2281_v7, %s10702_s2 }
 0x5e0   :  { %v2260_v14 = vpop.permute.xlu2 %2259 }
 0x5e1   :  { %v2276_v26 = vadd.f32 %v2260_v14, %v11483_v29  ;;  %v11704_v29 = vld [vmem:[%s14378_s9 + $0x8] sm:$0xff] }
 0x5e3   :  { %v11690_v54 = vadd.f32 %v2302_v19, %v2276_v26 }
 0x5e5   :  { %2336 = vrot.lane.b32.xlu2 %v11690_v54, %s10701_s21 }
 0x5f7   :  { %v2329_v24 = vpop.permute.xlu2 %2328 }
 0x5f8   :  { %v2394_v11 = vmul.f32 %v11505_v4, %v2329_v24  ;;  %v2409_v49 = vmul.f32 %v11487_v45, %v2329_v24 }
 0x5fa   :  { %v11696_v8 = vsub.f32 %v2385_v43, %v2394_v11  ;;  %2422 = vrot.lane.b32.xlu1 %v2409_v49, %s10702_s2 }
 0x5fc   :  { %v2536_v5 = vadd.f32 %v11536_v42, %v11696_v8 }
 0x5fe   :  { %v2552_v3 = vsub.f32 %v2536_v5, %v11554_v30  ;;  %v2378_v5 = vmul.f32 %v11487_v45, %v2230_v22 }
 0x600   :  { %v2564_v27 = vadd.f32 %v11704_v29, %v2552_v3 }
 0x602   :  { %v2578_v20 = vsel %vm1238_vm6, %v2564_v27, 0  ;;  %v2444_v27 = vmul.f32 %v11505_v4, %v11530_v38  ;;  %v2381_v38 = vmul.f32 %v11487_v45, %v11628_v58 }
 0x603   :  { %v11709_v52 = vand.u32 4294901760, %v2578_v20 }
 0x605   :  { %2712 = vmatmul.f32.gmra.mxu3 %v11709_v52  ;;  %v2625_v43 = vsub.f32 %v2578_v20, %v11709_v52  ;;  %v2284_v20 = vmul.f32 %v11481_v50, %v11596_v61 }
 0x607   :  { %2767 = vmatmul.f32.gmra.mxu0 %v2625_v43  ;;  %v2626_v7 = vand.u32 4294901760, %v2625_v43 }
 0x609   :  { %2828 = vmatmul.f32.gmra.mxu1 %v2626_v7  ;;  %v2627_v14 = vsub.f32 %v2625_v43, %v2626_v7 }
 0x60b   :  { %v2628_v26 = vand.u32 4294901760, %v2627_v14 }
 0x60c   :  { %v2155_v19 = vpop.permute.xlu1 %2154 }
 0x60d   :  { %v2223_v24 = vmul.f32 %v11481_v50, %v2155_v19  ;;  %v2239_v11 = vmul.f32 %v11393_v55, %v2155_v19  ;;  %2629 = vmatmul.f32.gmra.mxu2 %v2628_v26 }
 0x60f   :  { %v11716_v49 = vsub.f32 %v11516_v17, %v2223_v24  ;;  %2255 = vrot.lane.b32.xlu2 %v2239_v11, %s10702_s2 }
 0x611   :  { %v11721_v3 = vadd.f32 %v2378_v5, %v11716_v49 }
 0x617   :  { %2457 = vrot.lane.b32.xlu2 %v2444_v27, %s10702_s2 }
 0x61b   :  { %v2163_v17 = vpop.permute.xlu2 %2162 }
 0x61c   :  { %v2227_v22 = vmul.f32 %v11481_v50, %v2163_v17 }
 0x61e   :  { %v11742_v24 = vsub.f32 %v11613_v63, %v2227_v22 }
 0x61f   :  { %2303 = vrot.lane.b32.xlu2 %v2284_v20, %s10702_s2 }
 0x627   :  { %2463 = vrot.lane.b32.xlu2 %v11528_v53, %s10702_s2 }
 0x633   :  { %v2161_v43 = vpop.permute.xlu0 %2160 }
 0x634   :  { %v2226_v7 = vmul.f32 %v11481_v50, %v2161_v43  ;;  %v2242_v14 = vmul.f32 %v11393_v55, %v2161_v43 }
 0x636   :  { %v2234_v26 = vsub.f32 %v11610_v25, %v2226_v7  ;;  %2261 = vrot.lane.b32.xlu0 %v2242_v14, %s10702_s2  ;;  %v2053_v25 = vmul.f32 %v11314_v57, %v11543_v28  ;;  %v2243_v7 = vmul.f32 %v11393_v55, %v2163_v17  ;;  %v2285_v28 = vmul.f32 %v11481_v50, %v11601_v18 }
 0x637   :  { %v14492_v14 = vrot.slane %v11476_v32, 4  ;;  %v2448_v32 = vmul.f32 %v11505_v4, %v11628_v58 }
 0x638   :  { %v2382_v61 = vmul.f32 %v11487_v45, %v2234_v26  ;;  %v11739_v19 = vadd.f32 %v2381_v38, %v2234_v26 }
 0x639   :  { %v11744_v11 = vpop.permute.xlu1 %1925 }
 0x63a   :  { %v2005_v5 = vmul.f32 %v11164_v46, %v11744_v11  ;;  %v11749_v27 = vadd.f32 %v2382_v61, %v11742_v24 }
 0x63c   :  { %2028 = vrot.lane.b32.xlu1 %v2005_v5, %s10702_s2 }
 0x63e   :  { %v2254_v20 = vpop.permute.xlu0 %2253  ;;  %2076 = vrot.lane.b32.xlu0 %v2053_v25, %s10702_s2 }
 0x63f   :  { %v2273_v43 = vadd.f32 %v2254_v20, %v11615_v15  ;;  %v11761_v46 = vpop.permute.xlu2 %2336  ;;  %v14493_v15 = vrot.slane %v11632_v41, 4 }
 0x640   :  { %v2413_v17 = vmul.f32 %v11487_v45, %v11761_v46 }
 0x641   :  { %v2296_v63 = vpop.permute.xlu1 %2295  ;;  %v2141_v38 = vsel %vm2102_vm11, %v14493_v15, %v14492_v14 }
 0x642   :  { %v2315_v22 = vadd.f32 %v2296_v63, %v2273_v43 }
 0x644   :  { %2428 = vrot.lane.b32.xlu1 %v11520_v0, %s10702_s2  ;;  %2330 = vrot.lane.b32.xlu2 %v2315_v22, %s10701_s21 }
 0x646   :  { %2263 = vrot.lane.b32.xlu0 %v2243_v7, %s10702_s2  ;;  %v2421_v26 = vpop.permute.xlu0 %2420 }
 0x647   :  { %v2438_v61 = vadd.f32 %v2421_v26, %v11640_v9 }
 0x649   :  { %v2456_v5 = vpop.permute.xlu1 %2455 }
 0x64a   :  { %v2473_v18 = vadd.f32 %v2456_v5, %v2438_v61  ;;  %v14494_v61 = vrot.slane %v11382_v21, 4  ;;  %v14495_v5 = vrot.slane %v11468_v59, 4 }
 0x64c   :  { %2305 = vrot.lane.b32.xlu1 %v2285_v28, %s10702_s2  ;;  %2156 = vrot.lane.b32.xlu2 %v2141_v38, %s10701_s21 }
 0x64e   :  { %2430 = vrot.lane.b32.xlu0 %v2413_v17, %s10702_s2  ;;  %v2298_v43 = vpop.permute.xlu0 %2297 }
 0x654   :  { %2465 = vrot.lane.b32.xlu1 %v2448_v32, %s10702_s2 }
 0x656   :  { %2485 = vrot.lane.b32.xlu0 %v2473_v18, %s10701_s21 }
 0x669   :  { %v2256_v25 = vpop.permute.xlu2 %2255 }
 0x66a   :  { %v2274_v20 = vadd.f32 %v2256_v25, %v11632_v41  ;;  %v2109_v41 = vsel %vm2102_vm11, %v14495_v5, %v14494_v61 }
 0x66b   :  { %v2207_v18 = vmul.f32 %v11393_v55, %v2109_v41 }
 0x66c   :  { %v2316_v63 = vadd.f32 %v2298_v43, %v2274_v20  ;;  %v2423_v7 = vpop.permute.xlu1 %2422 }
 0x66d   :  { %v2439_v28 = vadd.f32 %v2423_v7, %v2315_v22  ;;  %v2529_v22 = vmul.f32 %v11523_v13, %v11549_v36  ;;  %v2215_v43 = vadd.f32 %v2207_v18, %v11382_v21 }
 0x66e   :  { %2332 = vrot.lane.b32.xlu1 %v2316_v63, %s10701_s21 }
 0x671   :  { %v2458_v14 = vpop.permute.xlu2 %2457 }
 0x672   :  { %v2474_v9 = vadd.f32 %v2458_v14, %v2439_v28  ;;  %v2379_v28 = vmul.f32 %v11487_v45, %v11716_v49 }
 0x674   :  { %2487 = vrot.lane.b32.xlu2 %v2474_v9, %s10701_s21 }
 0x679   :  { %v2304_v15 = vpop.permute.xlu2 %2303 }
 0x681   :  { %v2464_v38 = vpop.permute.xlu2 %2463 }
 0x69e   :  { %v2331_v17 = vpop.permute.xlu2 %2330 }
 0x69f   :  { %v2395_v26 = vmul.f32 %v11505_v4, %v2331_v17 }
 0x6a1   :  { %v2403_v32 = vsub.f32 %v11721_v3, %v2395_v26 }
 0x6a3   :  { %v2537_v25 = vadd.f32 %v2529_v22, %v2403_v32 }
 0x6a6   :  { %v2157_v20 = vpop.permute.xlu2 %2156 }
 0x6a7   :  { %v2224_v63 = vmul.f32 %v11481_v50, %v2157_v20 }
 0x6a8   :  { %v2262_v7 = vpop.permute.xlu0 %2261 }
 0x6a9   :  { %v2232_v59 = vsub.f32 %v2215_v43, %v2224_v63  ;;  %v2277_v14 = vadd.f32 %v2262_v7, %v11648_v40 }
 0x6ab   :  { %v2319_v9 = vadd.f32 %v2304_v15, %v2277_v14  ;;  %v2387_v3 = vadd.f32 %v2379_v28, %v2232_v59 }
 0x6ad   :  { %2338 = vrot.lane.b32.xlu0 %v2319_v9, %s10701_s21 }
 0x6ae   :  { %v2029_v36 = vpop.permute.xlu1 %2028 }
 0x6af   :  { %v2045_v17 = vadd.f32 %v2029_v36, %v11661_v12  ;;  %v2388_v36 = vadd.f32 %v11520_v0, %v11628_v58  ;;  %v2530_v58 = vmul.f32 %v11523_v13, %v11696_v8 }
 0x6b0   :  { %v2077_v26 = vpop.permute.xlu0 %2076 }
 0x6b1   :  { %v2093_v61 = vadd.f32 %v2077_v26, %v2045_v17 }
 0x6b3   :  { %v2148_v5 = vrot.slane %v2093_v61, 4 }
 0x6b5   :  { %v2149_v21 = vsel %vm2102_vm11, %v2146_v47, %v2148_v5  ;;  %v2398_v5 = vmul.f32 %v11505_v4, %v11761_v46 }
 0x6b6   :  { %v2429_v41 = vpop.permute.xlu1 %2428  ;;  %2164 = vrot.lane.b32.xlu1 %v2149_v21, %s10701_s21 }
 0x6b7   :  { %v2442_v49 = vadd.f32 %v2429_v41, %v11690_v54  ;;  %v11813_v54 = vld [vmem:[%s14378_s9 + $0x10] sm:$0xff]  ;;  %v11828_v41 = vsub.f32 %v11739_v19, %v2398_v5  ;;  %v11841_v19 = vld [vmem:[%s14378_s9 + $0x18] sm:$0xff]  ;;  %v1989_v5 = vmul.f32 %v11314_v57, %v11744_v11 }
 0x6b8   :  { %v2264_v40 = vpop.permute.xlu0 %2263 }
 0x6b9   :  { %v2477_v15 = vadd.f32 %v2464_v38, %v2442_v49  ;;  %v2278_v32 = vadd.f32 %v2264_v40, %v11645_v2 }
 0x6bb   :  { %2493 = vrot.lane.b32.xlu2 %v2477_v15, %s10701_s21 }
 0x6be   :  { %v2306_v22 = vpop.permute.xlu1 %2305 }
 0x6bf   :  { %v2320_v12 = vadd.f32 %v2306_v22, %v2278_v32 }
 0x6c0   :  { %v2431_v18 = vpop.permute.xlu0 %2430 }
 0x6c1   :  { %2340 = vrot.lane.b32.xlu0 %v2320_v12, %s10701_s21  ;;  %v2443_v20 = vadd.f32 %v2431_v18, %v2319_v9 }
 0x6c6   :  { %v2466_v43 = vpop.permute.xlu1 %2465 }
 0x6c7   :  { %v2478_v63 = vadd.f32 %v2466_v43, %v2443_v20 }
 0x6c8   :  { %v2486_v47 = vpop.permute.xlu0 %2485 }
 0x6c9   :  { %v2545_v7 = vmul.f32 %v11533_v60, %v2486_v47  ;;  %2495 = vrot.lane.b32.xlu1 %v2478_v63, %s10701_s21 }
 0x6cb   :  { %v2553_v38 = vsub.f32 %v2537_v25, %v2545_v7  ;;  %v2405_v25 = vsub.f32 %v2388_v36, %v11528_v53  ;;  %v2540_v53 = vadd.f32 %v11536_v42, %v11828_v41 }
 0x6cd   :  { %v2565_v2 = vadd.f32 %v11813_v54, %v2553_v38  ;;  %v2539_v61 = vadd.f32 %v11536_v42, %v2405_v25  ;;  %v2556_v18 = vsub.f32 %v2540_v53, %v11554_v30 }
 0x6ce   :  { %v2488_v0 = vpop.permute.xlu2 %2487 }
 0x6cf   :  { %v2581_v28 = vsel %vm1238_vm6, %v2565_v2, 0  ;;  %v2555_v40 = vsub.f32 %v2539_v61, %v11554_v30  ;;  %v2546_v32 = vmul.f32 %v11533_v60, %v2488_v0 }
 0x6d0   :  { %v11817_v59 = vand.u32 4294901760, %v2581_v28 }
 0x6d1   :  { %v2567_v46 = vadd.f32 %v11565_v16, %v2555_v40  ;;  %v2568_v16 = vadd.f32 %v11704_v29, %v2556_v18 }
 0x6d2   :  { %2716 = vmatmul.f32.gmra.mxu3 %v11817_v59  ;;  %v2633_v14 = vsub.f32 %v2581_v28, %v11817_v59 }
 0x6d3   :  { %v2587_v8 = vsel %vm1238_vm6, %v2567_v46, 0  ;;  %v2590_v7 = vsel %vm1238_vm6, %v2568_v16, 0 }
 0x6d4   :  { %2772 = vmatmul.f32.gmra.mxu0 %v2633_v14  ;;  %v2634_v9 = vand.u32 4294901760, %v2633_v14  ;;  %v11849_v43 = vand.u32 4294901760, %v2587_v8 }
 0x6d6   :  { %2834 = vmatmul.f32.gmra.mxu1 %v2634_v9  ;;  %v2635_v17 = vsub.f32 %v2633_v14, %v2634_v9  ;;  %v2649_v30 = vsub.f32 %v2587_v8, %v11849_v43  ;;  %v11856_v14 = vand.u32 4294901760, %v2590_v7 }
 0x6d8   :  { %v2636_v26 = vand.u32 4294901760, %v2635_v17  ;;  %v2650_v28 = vand.u32 4294901760, %v2649_v30  ;;  %v2657_v9 = vsub.f32 %v2590_v7, %v11856_v14 }
 0x6da   :  { %2637 = vmatmul.f32.gmra.mxu2 %v2636_v26  ;;  %v2651_v29 = vsub.f32 %v2649_v30, %v2650_v28  ;;  %v2658_v17 = vand.u32 4294901760, %v2657_v9 }
 0x6dc   :  { %v2652_v36 = vand.u32 4294901760, %v2651_v29  ;;  %v2659_v26 = vsub.f32 %v2657_v9, %v2658_v17 }
 0x6de   :  { %v2660_v61 = vand.u32 4294901760, %v2659_v26 }
 0x6e0   :  { %v2333_v21 = vpop.permute.xlu1 %2332 }
 0x6e1   :  { %v2396_v49 = vmul.f32 %v11505_v4, %v2333_v21  ;;  %v1997_v21 = vsub.f32 %v11556_v44, %v1989_v5 }
 0x6e3   :  { %v2404_v15 = vsub.f32 %v2387_v3, %v2396_v49  ;;  %v2116_v49 = vrot.slane %v1997_v21, 4 }
 0x6e5   :  { %v2538_v22 = vadd.f32 %v2530_v58, %v2404_v15  ;;  %v2533_v15 = vmul.f32 %v11523_v13, %v2405_v25 }
 0x6e7   :  { %v2554_v12 = vsub.f32 %v2538_v22, %v2546_v32  ;;  %v14496_v32 = vrot.slane %v11586_v31, 4  ;;  %v2383_v31 = vmul.f32 %v11487_v45, %v11742_v24 }
 0x6e9   :  { %v2566_v20 = vadd.f32 %v11841_v19, %v2554_v12  ;;  %v2117_v22 = vsel %vm2102_vm11, %v14496_v32, %v2116_v49  ;;  %v2982_v49 = vld [vmem:[#allocation6] sm:$0xff] }
 0x6ea   :  { %v2211_v57 = vmul.f32 %v11393_v55, %v2117_v22 }
 0x6eb   :  { %v2584_v3 = vsel %vm1238_vm6, %v2566_v20, 0 }
 0x6ec   :  { %v11847_v42 = vand.u32 4294901760, %v2584_v3  ;;  %v2219_v20 = vadd.f32 %v2211_v57, %v1997_v21 }
 0x6ee   :  { %2720 = vmatmul.f32.gmra.mxu3 %v11847_v42  ;;  %v2641_v63 = vsub.f32 %v2584_v3, %v11847_v42 }
 0x6f0   :  { %2777 = vmatmul.f32.gmra.mxu0 %v2641_v63  ;;  %v2642_v47 = vand.u32 4294901760, %v2641_v63 }
 0x6f2   :  { %2840 = vmatmul.f32.gmra.mxu1 %v2642_v47  ;;  %v2643_v38 = vsub.f32 %v2641_v63, %v2642_v47 }
 0x6f4   :  { %v2644_v2 = vand.u32 4294901760, %v2643_v38 }
 0x6f6   :  { %2645 = vmatmul.f32.gmra.mxu2 %v2644_v2  ;;  %2724 = vmatmul.f32.gmra.mxu3 %v11849_v43 }
 0x6f8   :  { %2782 = vmatmul.f32.gmra.mxu0 %v2649_v30 }
 0x6fa   :  { %2846 = vmatmul.f32.gmra.mxu1 %v2650_v28 }
 0x6fe   :  { %2653 = vmatmul.f32.gmra.mxu2 %v2652_v36  ;;  %2728 = vmatmul.f32.gmra.mxu3 %v11856_v14 }
 0x700   :  { %2787 = vmatmul.f32.gmra.mxu0 %v2657_v9 }
 0x702   :  { %2852 = vmatmul.f32.gmra.mxu1 %v2658_v17 }
 0x706   :  { %2661 = vmatmul.f32.gmra.mxu2 %v2660_v61 }
 0x715   :  { %v2494_v58 = vpop.permute.xlu2 %2493 }
 0x716   :  { %v2549_v46 = vmul.f32 %v11533_v60, %v2494_v58  ;;  %v3025_v58 = vand.u32 4294901760, %v2982_v49 }
 0x71f   :  { %v2339_v40 = vpop.permute.xlu0 %2338 }
 0x720   :  { %v2399_v0 = vmul.f32 %v11505_v4, %v2339_v40 }
 0x722   :  { %v2407_v53 = vsub.f32 %v11749_v27, %v2399_v0 }
 0x724   :  { %v2541_v12 = vadd.f32 %v2533_v15, %v2407_v53  ;;  %v3113_v53 = vsub.f32 %v2982_v49, %v3025_v58 }
 0x726   :  { %v2557_v11 = vsub.f32 %v2541_v12, %v2549_v46  ;;  %v3114_v22 = vand.u32 4294901760, %v3113_v53 }
 0x728   :  { %v2569_v44 = vadd.f32 %v11813_v54, %v2557_v11  ;;  %v2165_v18 = vpop.permute.xlu1 %2164  ;;  %v3115_v12 = vsub.f32 %v3113_v53, %v3114_v22 }
 0x729   :  { %v2228_v8 = vmul.f32 %v11481_v50, %v2165_v18  ;;  %v2534_v50 = vmul.f32 %v11523_v13, %v11828_v41  ;;  %v2709_v13 = vpop.f32.mrf.mxu3  ;;  %v11912_v18 = vld [vmem:[%s14377_s8] sm:$0xff] }
 0x72a   :  { %v2593_v25 = vsel %vm1238_vm6, %v2569_v44, 0  ;;  %v3116_v44 = vand.u32 4294901760, %v3115_v12 }
 0x72b   :  { %v2236_v3 = vsub.f32 %v2219_v20, %v2228_v8  ;;  %v2664_v27 = vand.u32 4294901760, %v2593_v25  ;;  %v11915_v20 = vperm.slane %v11912_v18, 0 }
 0x72d   :  { %2732 = vmatmul.f32.gmra.mxu3 %v2664_v27  ;;  %v2665_v16 = vsub.f32 %v2593_v25, %v2664_v27  ;;  %v2391_v63 = vadd.f32 %v2383_v31, %v2236_v3 }
 0x72f   :  { %2792 = vmatmul.f32.gmra.mxu0 %v2665_v16  ;;  %v2666_v47 = vand.u32 4294901760, %v2665_v16 }
 0x731   :  { %2858 = vmatmul.f32.gmra.mxu1 %v2666_v47  ;;  %v2667_v55 = vsub.f32 %v2665_v16, %v2666_v47  ;;  %v2823_v47 = vpop.f32.mrf.mxu1 }
 0x733   :  { %v2341_v30 = vpop.permute.xlu0 %2340  ;;  %v2668_v54 = vand.u32 4294901760, %v2667_v55 }
 0x734   :  { %v2400_v7 = vmul.f32 %v11505_v4, %v2341_v30 }
 0x735   :  { %2669 = vmatmul.f32.gmra.mxu2 %v2668_v54 }
 0x736   :  { %v2408_v38 = vsub.f32 %v2391_v63, %v2400_v7 }
 0x738   :  { %v2542_v2 = vadd.f32 %v2534_v50, %v2408_v38 }
 0x73b   :  { %v2496_v28 = vpop.permute.xlu1 %2495 }
 0x73c   :  { %v2550_v45 = vmul.f32 %v11533_v60, %v2496_v28  ;;  %v2622_v60 = vpop.f32.mrf.mxu2 }
 0x73d   :  { %v2623_v3 = vadd.f32 %v2622_v60, %v11915_v20 }
 0x73e   :  { %v2558_v24 = vsub.f32 %v2542_v2, %v2550_v45  ;;  %v2829_v45 = vpop.f32.mrf.mxu1 }
 0x73f   :  { %v2710_v31 = vadd.f32 %v2709_v13, %v2623_v3 }
 0x740   :  { %v2570_v29 = vadd.f32 %v11841_v19, %v2558_v24 }
 0x742   :  { %v2596_v9 = vsel %vm1238_vm6, %v2570_v29, 0 }
 0x743   :  { %v2672_v36 = vand.u32 4294901760, %v2596_v9 }
 0x745   :  { %2736 = vmatmul.f32.gmra.mxu3 %v2672_v36  ;;  %v2673_v17 = vsub.f32 %v2596_v9, %v2672_v36 }
 0x747   :  { %2797 = vmatmul.f32.gmra.mxu0 %v2673_v17  ;;  %v2674_v26 = vand.u32 4294901760, %v2673_v17 }
 0x749   :  { %2864 = vmatmul.f32.gmra.mxu1 %v2674_v26  ;;  %v2675_v4 = vsub.f32 %v2673_v17, %v2674_v26 }
 0x74b   :  { %v2676_v61 = vand.u32 4294901760, %v2675_v4 }
 0x74d   :  { %2677 = vmatmul.f32.gmra.mxu2 %v2676_v61  ;;  %2942 = vmatmul.f32.vlgmr.msra.gmra.mxu3 %v11573_v51 }
 0x755   :  { %2891 = vmatmul.f32.vlgmr.msra.gmra.mxu2 %v11573_v51  ;;  %2946 = vmatmul.f32.gmra.mxu3 %v11709_v52  ;;  %v2713_v51 = vpop.f32.mrf.mxu3 }
 0x75d   :  { %2895 = vmatmul.f32.gmra.mxu2 %v11709_v52  ;;  %2950 = vmatmul.f32.gmra.mxu3 %v11817_v59  ;;  %v2630_v52 = vpop.f32.mrf.mxu2 }
 0x75e   :  { %v2631_v55 = vadd.f32 %v2630_v52, %v11915_v20 }
 0x760   :  { %v2714_v7 = vadd.f32 %v2713_v51, %v2631_v55 }
 0x765   :  { %2899 = vmatmul.f32.gmra.mxu2 %v11817_v59  ;;  %2954 = vmatmul.f32.gmra.mxu3 %v11847_v42  ;;  %v2717_v59 = vpop.f32.mrf.mxu3  ;;  %v2638_v41 = vpop.f32.mrf.mxu2 }
 0x766   :  { %v2639_v24 = vadd.f32 %v2638_v41, %v11915_v20 }
 0x768   :  { %v2718_v26 = vadd.f32 %v2717_v59, %v2639_v24 }
 0x76d   :  { %2903 = vmatmul.f32.gmra.mxu2 %v11847_v42  ;;  %2958 = vmatmul.f32.gmra.mxu3 %v11849_v43 }
 0x771   :  { %v11895_v19 = vpop.f32.mrf.mxu3 }
 0x775   :  { %2907 = vmatmul.f32.gmra.mxu2 %v11849_v43  ;;  %2962 = vmatmul.f32.gmra.mxu3 %v11856_v14  ;;  %v2983_v43 = vld [vmem:[#allocation6 + $0x8] sm:$0xff] }
 0x779   :  { %v11897_v42 = vpop.f32.mrf.mxu2  ;;  %v11899_v5 = vpop.f32.mrf.mxu3 }
 0x77a   :  { %v2647_v41 = vadd.f32 %v11897_v42, %v11915_v20 }
 0x77d   :  { %2911 = vmatmul.f32.gmra.mxu2 %v11856_v14  ;;  %2966 = vmatmul.f32.gmra.mxu3 %v2664_v27  ;;  %v3023_v14 = vand.u32 4294901760, %v2983_v43 }
 0x77f   :  { %3024 = vmatpush.msrb.mxu0 %v3023_v14  ;;  %v3107_v0 = vsub.f32 %v2983_v43, %v3023_v14  ;;  %3227 = vmatpush.msrb.mxu3 %v3023_v14  ;;  %v2835_v43 = vpop.f32.mrf.mxu1 }
 0x781   :  { %v11901_v21 = vpop.f32.mrf.mxu2  ;;  %v11903_v40 = vpop.f32.mrf.mxu3  ;;  %v3108_v15 = vand.u32 4294901760, %v3107_v0  ;;  %3167 = vmatpush.msrb.mxu2 %v3107_v0  ;;  %3229 = vmatpush.msrb.mxu3 %v3025_v58 }
 0x782   :  { %3026 = vmatpush.msrb.mxu0 %v3025_v58 }
 0x783   :  { %v3109_v32 = vsub.f32 %v3107_v0, %v3108_v15  ;;  %3170 = vmatpush.msrb.mxu2 %v3113_v53 }
 0x784   :  { %3296 = vmatpush.msra.mxu0 %v3108_v15 }
 0x785   :  { %2915 = vmatmul.f32.gmra.mxu2 %v2664_v27  ;;  %2970 = vmatmul.f32.gmra.mxu3 %v2672_v36  ;;  %v3110_v46 = vand.u32 4294901760, %v3109_v32  ;;  %v2763_v27 = vpop.f32.mrf.mxu0  ;;  %v2722_v32 = vadd.f32 %v11895_v19, %v2647_v41 }
 0x786   :  { %3300 = vmatpush.msra.mxu0 %v3114_v22  ;;  %v2764_v30 = vadd.f32 %v2763_v27, %v2710_v31 }
 0x787   :  { %3111 = vmatpush.msrb.mxu1 %v3110_v46  ;;  %v2841_v31 = vpop.f32.mrf.mxu1 }
 0x788   :  { %v2824_v50 = vadd.f32 %v2823_v47, %v2764_v30  ;;  %v2655_v47 = vadd.f32 %v11901_v21, %v11915_v20 }
 0x789   :  { %v11905_v57 = vpop.f32.mrf.mxu2  ;;  %3117 = vmatpush.msrb.mxu1 %v3116_v44 }
 0x78b   :  { %3349 = vmatpush.msra.mxu1 %v3023_v14 }
 0x78d   :  { %2919 = vmatmul.f32.gmra.mxu2 %v2672_v36  ;;  %3351 = vmatpush.msra.mxu1 %v3025_v58  ;;  %v2768_v54 = vpop.f32.mrf.mxu0 }
 0x78e   :  { %v2769_v9 = vadd.f32 %v2768_v54, %v2714_v7 }
 0x790   :  { %v2830_v61 = vadd.f32 %v2829_v45, %v2769_v9 }
 0x795   :  { %v2773_v17 = vpop.f32.mrf.mxu0 }
 0x796   :  { %v2774_v0 = vadd.f32 %v2773_v17, %v2718_v26 }
 0x798   :  { %v2836_v46 = vadd.f32 %v2835_v43, %v2774_v0 }
 0x79d   :  { %v2778_v15 = vpop.f32.mrf.mxu0 }
 0x79e   :  { %v2779_v19 = vadd.f32 %v2778_v15, %v2722_v32 }
 0x7b0   :  { %v11907_v11 = vpop.f32.mrf.mxu3 }
 0x7b8   :  { %v11917_v8 = vpop.f32.mrf.mxu2 }
 0x7b9   :  { %v2671_v15 = vadd.f32 %v11917_v8, %v11915_v20 }
 0x7c8   :  { %v11919_v25 = vpop.f32.mrf.mxu3 }
 0x7d0   :  { %v11922_v16 = vpop.f32.mrf.mxu2  ;;  %v2943_v63 = vpop.f32.mrf.mxu3 }
 0x7d8   :  { %v2892_v38 = vpop.f32.mrf.mxu2  ;;  %v2947_v2 = vpop.f32.mrf.mxu3 }
 0x7d9   :  { %v2893_v28 = vadd.f32 %v2892_v38, %v2824_v50  ;;  %v2726_v50 = vadd.f32 %v11899_v5, %v2655_v47  ;;  %v2847_v5 = vpop.f32.mrf.mxu1 }
 0x7db   :  { %v2944_v29 = vadd.f32 %v2943_v63, %v2893_v28  ;;  %v2783_v28 = vpop.f32.mrf.mxu0 }
 0x7dc   :  { %v2784_v26 = vadd.f32 %v2783_v28, %v2726_v50 }
 0x7dd   :  { %v2974_v36 = vmax.f32 %v2944_v29, 0.0 }
 0x7df   :  { %v2986_v4 = vsel %vm1238_vm6, %v2974_v36, 0  ;;  %v2663_v36 = vadd.f32 %v11905_v57, %v11915_v20 }
 0x7e0   :  { %v11927_v13 = vand.u32 4294901760, %v2986_v4  ;;  %v2896_v60 = vpop.f32.mrf.mxu2  ;;  %v2951_v52 = vpop.f32.mrf.mxu3 }
 0x7e1   :  { %v2897_v51 = vadd.f32 %v2896_v60, %v2830_v61 }
 0x7e2   :  { %v3028_v14 = vsub.f32 %v2986_v4, %v11927_v13  ;;  %3119 = vmatmul.f32.vlgmr.msrb.gmra.mxu1 %v11927_v13 }
 0x7e3   :  { %v2948_v49 = vadd.f32 %v2947_v2, %v2897_v51  ;;  %v2842_v2 = vadd.f32 %v2841_v31, %v2779_v19  ;;  %v2730_v51 = vadd.f32 %v11903_v40, %v2663_v36  ;;  %v2788_v57 = vpop.f32.mrf.mxu0 }
 0x7e4   :  { %v3029_v58 = vand.u32 4294901760, %v3028_v14  ;;  %3173 = vmatmul.f32.vlgmr.msrb.gmra.mxu2 %v3028_v14 }
 0x7e5   :  { %v2975_v59 = vmax.f32 %v2948_v49, 0.0  ;;  %v2789_v32 = vadd.f32 %v2788_v57, %v2730_v51 }
 0x7e6   :  { %v3030_v53 = vsub.f32 %v3028_v14, %v3029_v58  ;;  %3233 = vmatmul.f32.vlgmr.msrb.gmra.mxu3 %v3029_v58  ;;  %v2848_v14 = vadd.f32 %v2847_v5, %v2784_v26 }
 0x7e7   :  { %v2989_v22 = vsel %vm1238_vm6, %v2975_v59, 0 }
 0x7e8   :  { %v11935_v12 = vand.u32 4294901760, %v2989_v22  ;;  %v2900_v44 = vpop.f32.mrf.mxu2  ;;  %v3031_v3 = vand.u32 4294901760, %v3030_v53  ;;  %v2955_v42 = vpop.f32.mrf.mxu3 }
 0x7e9   :  { %v2901_v27 = vadd.f32 %v2900_v44, %v2836_v46  ;;  %v2853_v46 = vpop.f32.mrf.mxu1 }
 0x7ea   :  { %3032 = vmatmul.f32.vlgmr.msrb.gmra.mxu0 %v3031_v3  ;;  %3123 = vmatmul.f32.gmra.mxu1 %v11935_v12  ;;  %v3036_v63 = vsub.f32 %v2989_v22, %v11935_v12 }
 0x7eb   :  { %v2952_v55 = vadd.f32 %v2951_v52, %v2901_v27  ;;  %v2734_v27 = vadd.f32 %v11907_v11, %v2671_v15  ;;  %v2793_v8 = vpop.f32.mrf.mxu0 }
 0x7ec   :  { %3178 = vmatmul.f32.gmra.mxu2 %v3036_v63  ;;  %v3037_v30 = vand.u32 4294901760, %v3036_v63 }
 0x7ed   :  { %v2976_v54 = vmax.f32 %v2952_v55, 0.0  ;;  %v2794_v50 = vadd.f32 %v2793_v8, %v2734_v27 }
 0x7ee   :  { %3239 = vmatmul.f32.gmra.mxu3 %v3037_v30  ;;  %v3038_v7 = vsub.f32 %v3036_v63, %v3037_v30 }
 0x7ef   :  { %v2992_v38 = vsel %vm1238_vm6, %v2976_v54, 0  ;;  %v2679_v54 = vadd.f32 %v11922_v16, %v11915_v20 }
 0x7f0   :  { %v11943_v45 = vand.u32 4294901760, %v2992_v38  ;;  %v2904_v24 = vpop.f32.mrf.mxu2  ;;  %v3039_v29 = vand.u32 4294901760, %v3038_v7  ;;  %v2959_v4 = vpop.f32.mrf.mxu3 }
 0x7f1   :  { %v2905_v9 = vadd.f32 %v2904_v24, %v2842_v2  ;;  %v2859_v2 = vpop.f32.mrf.mxu1  ;;  %v2738_v24 = vadd.f32 %v11919_v25, %v2679_v54 }
 0x7f2   :  { %3040 = vmatmul.f32.gmra.mxu0 %v3039_v29  ;;  %3127 = vmatmul.f32.gmra.mxu1 %v11943_v45  ;;  %v3044_v21 = vsub.f32 %v2992_v38, %v11943_v45 }
 0x7f3   :  { %v2956_v17 = vadd.f32 %v2955_v42, %v2905_v9  ;;  %v2854_v42 = vadd.f32 %v2853_v46, %v2789_v32  ;;  %v2860_v9 = vadd.f32 %v2859_v2, %v2794_v50 }
 0x7f4   :  { %3183 = vmatmul.f32.gmra.mxu2 %v3044_v21  ;;  %v3045_v61 = vand.u32 4294901760, %v3044_v21 }
 0x7f5   :  { %v2977_v60 = vmax.f32 %v2956_v17, 0.0 }
 0x7f6   :  { %3245 = vmatmul.f32.gmra.mxu3 %v3045_v61  ;;  %v3046_v52 = vsub.f32 %v3044_v21, %v3045_v61 }
 0x7f7   :  { %v2995_v43 = vsel %vm1238_vm6, %v2977_v60, 0 }
 0x7f8   :  { %v11951_v41 = vand.u32 4294901760, %v2995_v43  ;;  %v2908_v49 = vpop.f32.mrf.mxu2  ;;  %v3047_v0 = vand.u32 4294901760, %v3046_v52  ;;  %v2963_v44 = vpop.f32.mrf.mxu3 }
 0x7f9   :  { %v2909_v58 = vadd.f32 %v2908_v49, %v2848_v14  ;;  %v2865_v51 = vpop.f32.mrf.mxu1 }
 0x7fa   :  { %3048 = vmatmul.f32.gmra.mxu0 %v3047_v0  ;;  %3131 = vmatmul.f32.gmra.mxu1 %v11951_v41  ;;  %v3052_v59 = vsub.f32 %v2995_v43, %v11951_v41 }
 0x7fb   :  { %v2960_v53 = vadd.f32 %v2959_v4, %v2909_v58  ;;  %v2798_v4 = vpop.f32.mrf.mxu0 }
 0x7fc   :  { %3188 = vmatmul.f32.gmra.mxu2 %v3052_v59  ;;  %v3053_v40 = vand.u32 4294901760, %v3052_v59  ;;  %v2799_v61 = vadd.f32 %v2798_v4, %v2738_v24 }
 0x7fd   :  { %v2978_v22 = vmax.f32 %v2960_v53, 0.0 }
 0x7fe   :  { %3251 = vmatmul.f32.gmra.mxu3 %v3053_v40  ;;  %v3054_v3 = vsub.f32 %v3052_v59, %v3053_v40  ;;  %v2866_v14 = vadd.f32 %v2865_v51, %v2799_v61 }
 0x7ff   :  { %v2998_v31 = vsel %vm1238_vm6, %v2978_v22, 0 }
 0x800   :  { %v11959_v63 = vand.u32 4294901760, %v2998_v31  ;;  %v2912_v47 = vpop.f32.mrf.mxu2  ;;  %v3055_v55 = vand.u32 4294901760, %v3054_v3  ;;  %v2967_v36 = vpop.f32.mrf.mxu3 }
 0x801   :  { %v2913_v19 = vadd.f32 %v2912_v47, %v2854_v42 }
 0x802   :  { %3056 = vmatmul.f32.gmra.mxu0 %v3055_v55  ;;  %3135 = vmatmul.f32.gmra.mxu1 %v11959_v63  ;;  %v3060_v30 = vsub.f32 %v2998_v31, %v11959_v63 }
 0x803   :  { %v2964_v7 = vadd.f32 %v2963_v44, %v2913_v19 }
 0x804   :  { %3193 = vmatmul.f32.gmra.mxu2 %v3060_v30  ;;  %v3061_v11 = vand.u32 4294901760, %v3060_v30 }
 0x805   :  { %v2979_v38 = vmax.f32 %v2964_v7, 0.0 }
 0x806   :  { %3257 = vmatmul.f32.gmra.mxu3 %v3061_v11  ;;  %v3062_v28 = vsub.f32 %v3060_v30, %v3061_v11 }
 0x807   :  { %v3001_v29 = vsel %vm1238_vm6, %v2979_v38, 0 }
 0x808   :  { %v3067_v21 = vand.u32 4294901760, %v3001_v29  ;;  %v2916_v17 = vpop.f32.mrf.mxu2  ;;  %v3063_v26 = vand.u32 4294901760, %v3062_v28  ;;  %v2971_v59 = vpop.f32.mrf.mxu3 }
 0x809   :  { %v2917_v5 = vadd.f32 %v2916_v17, %v2860_v9 }
 0x80a   :  { %3064 = vmatmul.f32.gmra.mxu0 %v3063_v26  ;;  %3139 = vmatmul.f32.gmra.mxu1 %v3067_v21  ;;  %v3068_v20 = vsub.f32 %v3001_v29, %v3067_v21 }
 0x80b   :  { %v2968_v16 = vadd.f32 %v2967_v36, %v2917_v5  ;;  %v11990_v36 = vperm.slane %v11912_v18, 1 }
 0x80c   :  { %3198 = vmatmul.f32.gmra.mxu2 %v3068_v20  ;;  %v3069_v60 = vand.u32 4294901760, %v3068_v20 }
 0x80d   :  { %v2980_v52 = vmax.f32 %v2968_v16, 0.0 }
 0x80e   :  { %3263 = vmatmul.f32.gmra.mxu3 %v3069_v60  ;;  %v3070_v25 = vsub.f32 %v3068_v20, %v3069_v60 }
 0x80f   :  { %v3004_v43 = vsel %vm1238_vm6, %v2980_v52, 0 }
 0x810   :  { %v3075_v49 = vand.u32 4294901760, %v3004_v43  ;;  %v2920_v0 = vpop.f32.mrf.mxu2  ;;  %v3071_v58 = vand.u32 4294901760, %v3070_v25 }
 0x811   :  { %v2921_v57 = vadd.f32 %v2920_v0, %v2866_v14 }
 0x812   :  { %3072 = vmatmul.f32.gmra.mxu0 %v3071_v58  ;;  %3143 = vmatmul.f32.gmra.mxu1 %v3075_v49  ;;  %v3076_v15 = vsub.f32 %v3004_v43, %v3075_v49 }
 0x813   :  { %v2972_v53 = vadd.f32 %v2971_v59, %v2921_v57 }
 0x814   :  { %3203 = vmatmul.f32.gmra.mxu2 %v3076_v15  ;;  %v3077_v32 = vand.u32 4294901760, %v3076_v15 }
 0x815   :  { %v2981_v40 = vmax.f32 %v2972_v53, 0.0  ;;  %v11997_v53 = vstv %s11044_s14 }
 0x816   :  { %3269 = vmatmul.f32.gmra.mxu3 %v3077_v32  ;;  %v3078_v22 = vsub.f32 %v3076_v15, %v3077_v32  ;;  %v3398_v32 = vmul.f32 %v11053_v39, %v11024_v56 }
 0x817   :  { %v3007_v46 = vsel %vm1238_vm6, %v2981_v40, 0 }
 0x818   :  { %v3083_v44 = vand.u32 4294901760, %v3007_v46  ;;  %v3079_v3 = vand.u32 4294901760, %v3078_v22 }
 0x81a   :  { %3080 = vmatmul.f32.gmra.mxu0 %v3079_v3  ;;  %3147 = vmatmul.f32.gmra.mxu1 %v3083_v44  ;;  %v3084_v27 = vsub.f32 %v3007_v46, %v3083_v44 }
 0x81c   :  { %3208 = vmatmul.f32.gmra.mxu2 %v3084_v27  ;;  %v3085_v31 = vand.u32 4294901760, %v3084_v27 }
 0x81e   :  { %3275 = vmatmul.f32.gmra.mxu3 %v3085_v31  ;;  %v3086_v42 = vsub.f32 %v3084_v27, %v3085_v31 }
 0x820   :  { %v3087_v47 = vand.u32 4294901760, %v3086_v42 }
 0x822   :  { %3088 = vmatmul.f32.gmra.mxu0 %v3087_v47  ;;  %3353 = vmatmul.f32.vlgmr.msra.gmra.mxu1 %v11927_v13 }
 0x82a   :  { %3302 = vmatmul.f32.vlgmr.msra.gmra.mxu0 %v11927_v13  ;;  %3357 = vmatmul.f32.gmra.mxu1 %v11935_v12 }
 0x832   :  { %3306 = vmatmul.f32.gmra.mxu0 %v11935_v12  ;;  %3361 = vmatmul.f32.gmra.mxu1 %v11943_v45 }
 0x83a   :  { %3310 = vmatmul.f32.gmra.mxu0 %v11943_v45  ;;  %3365 = vmatmul.f32.gmra.mxu1 %v11951_v41 }
 0x842   :  { %3314 = vmatmul.f32.gmra.mxu0 %v11951_v41  ;;  %3369 = vmatmul.f32.gmra.mxu1 %v11959_v63 }
 0x84a   :  { %3318 = vmatmul.f32.gmra.mxu0 %v11959_v63  ;;  %3373 = vmatmul.f32.gmra.mxu1 %v3067_v21 }
 0x852   :  { %3322 = vmatmul.f32.gmra.mxu0 %v3067_v21  ;;  %3377 = vmatmul.f32.gmra.mxu1 %v3075_v49 }
 0x85a   :  { %3326 = vmatmul.f32.gmra.mxu0 %v3075_v49  ;;  %3381 = vmatmul.f32.gmra.mxu1 %v3083_v44 }
 0x85f   :  { %v3120_v13 = vpop.f32.mrf.mxu1 }
 0x862   :  { %3330 = vmatmul.f32.gmra.mxu0 %v3083_v44 }
 0x867   :  { %v3033_v12 = vpop.f32.mrf.mxu0  ;;  %v3124_v55 = vpop.f32.mrf.mxu1 }
 0x868   :  { %v3174_v38 = vpop.f32.mrf.mxu2  ;;  %v3034_v58 = vadd.f32 %v3033_v12, %v11990_v36 }
 0x869   :  { %v3234_v2 = vpop.f32.mrf.mxu3 }
 0x86a   :  { %v3121_v46 = vadd.f32 %v3120_v13, %v3034_v58  ;;  %v3399_v13 = vmul.f32 %v11053_v39, %v11032_v10 }
 0x86f   :  { %v3041_v19 = vpop.f32.mrf.mxu0  ;;  %v3128_v8 = vpop.f32.mrf.mxu1 }
 0x870   :  { %v3179_v29 = vpop.f32.mrf.mxu2  ;;  %v3042_v26 = vadd.f32 %v3041_v19, %v11990_v36 }
 0x871   :  { %v3240_v17 = vpop.f32.mrf.mxu3 }
 0x872   :  { %v3125_v5 = vadd.f32 %v3124_v55, %v3042_v26  ;;  %v3175_v55 = vadd.f32 %v3174_v38, %v3121_v46 }
 0x874   :  { %v3180_v61 = vadd.f32 %v3179_v29, %v3125_v5 }
 0x876   :  { %v3241_v51 = vadd.f32 %v3240_v17, %v3180_v61 }
 0x877   :  { %v3049_v45 = vpop.f32.mrf.mxu0  ;;  %v3132_v30 = vpop.f32.mrf.mxu1 }
 0x878   :  { %v3184_v4 = vpop.f32.mrf.mxu2  ;;  %v3050_v60 = vadd.f32 %v3049_v45, %v11990_v36 }
 0x879   :  { %v3246_v52 = vpop.f32.mrf.mxu3 }
 0x87a   :  { %v3129_v25 = vadd.f32 %v3128_v8, %v3050_v60 }
 0x87c   :  { %v3185_v57 = vadd.f32 %v3184_v4, %v3129_v25 }
 0x87e   :  { %v3247_v44 = vadd.f32 %v3246_v52, %v3185_v57 }
 0x87f   :  { %v3057_v54 = vpop.f32.mrf.mxu0  ;;  %v3136_v7 = vpop.f32.mrf.mxu1 }
 0x880   :  { %v3189_v0 = vpop.f32.mrf.mxu2  ;;  %v3058_v59 = vadd.f32 %v3057_v54, %v11990_v36  ;;  %v3235_v54 = vadd.f32 %v3234_v2, %v3175_v55  ;;  %v3400_v2 = vmul.f32 %v11053_v39, %v11040_v62  ;;  %v3397_v62 = vmul.f32 %v11053_v39, %v11016_v37 }
 0x881   :  { %v3252_v22 = vpop.f32.mrf.mxu3 }
 0x882   :  { %v3133_v3 = vadd.f32 %v3132_v30, %v3058_v59 }
 0x884   :  { %v3190_v19 = vadd.f32 %v3189_v0, %v3133_v3 }
 0x886   :  { %v3253_v29 = vadd.f32 %v3252_v22, %v3190_v19 }
 0x887   :  { %v3065_v41 = vpop.f32.mrf.mxu0  ;;  %v11979_v50 = vpop.f32.mrf.mxu1 }
 0x888   :  { %v3066_v8 = vadd.f32 %v3065_v41, %v11990_v36  ;;  %v3194_v45 = vpop.f32.mrf.mxu2 }
 0x889   :  { %v3258_v5 = vpop.f32.mrf.mxu3 }
 0x88a   :  { %v3137_v17 = vadd.f32 %v3136_v7, %v3066_v8 }
 0x88c   :  { %v3195_v41 = vadd.f32 %v3194_v45, %v3137_v17 }
 0x88f   :  { %v3073_v11 = vpop.f32.mrf.mxu0  ;;  %v11981_v63 = vpop.f32.mrf.mxu1 }
 0x890   :  { %v3074_v60 = vadd.f32 %v3073_v11, %v11990_v36  ;;  %v3199_v25 = vpop.f32.mrf.mxu2 }
 0x891   :  { %v3264_v57 = vpop.f32.mrf.mxu3 }
 0x897   :  { %v11983_v28 = vpop.f32.mrf.mxu0  ;;  %v11985_v24 = vpop.f32.mrf.mxu1 }
 0x898   :  { %v3082_v59 = vadd.f32 %v11983_v28, %v11990_v36  ;;  %v3204_v3 = vpop.f32.mrf.mxu2 }
 0x899   :  { %v3270_v55 = vpop.f32.mrf.mxu3 }
 0x89a   :  { %v3145_v46 = vadd.f32 %v11981_v63, %v3082_v59 }
 0x89c   :  { %v3205_v28 = vadd.f32 %v3204_v3, %v3145_v46 }
 0x89e   :  { %v3271_v8 = vadd.f32 %v3270_v55, %v3205_v28 }
 0x89f   :  { %v11987_v9 = vpop.f32.mrf.mxu0  ;;  %v3354_v21 = vpop.f32.mrf.mxu1 }
 0x8a7   :  { %v3303_v20 = vpop.f32.mrf.mxu0  ;;  %v3358_v16 = vpop.f32.mrf.mxu1 }
 0x8af   :  { %v3307_v43 = vpop.f32.mrf.mxu0  ;;  %v3362_v14 = vpop.f32.mrf.mxu1 }
 0x8b0   :  { %v3308_v49 = vadd.f32 %v3307_v43, %v3241_v51  ;;  %v3259_v43 = vadd.f32 %v3258_v5, %v3195_v41  ;;  %v3276_v5 = vpop.f32.mrf.mxu3 }
 0x8b2   :  { %v3359_v15 = vadd.f32 %v3358_v16, %v3308_v49  ;;  %v3304_v16 = vadd.f32 %v3303_v20, %v3235_v54  ;;  %v3141_v20 = vadd.f32 %v11979_v50, %v3074_v60 }
 0x8b4   :  { %v3388_v40 = vmul.f32 %v11997_v53, %v3359_v15  ;;  %v3355_v51 = vadd.f32 %v3354_v21, %v3304_v16  ;;  %v3200_v21 = vadd.f32 %v3199_v25, %v3141_v20 }
 0x8b6   :  { %v12002_v27 = vadd.f32 %v3398_v32, %v3388_v40  ;;  %v3387_v11 = vmul.f32 %v11997_v53, %v3355_v51  ;;  %v3265_v22 = vadd.f32 %v3264_v57, %v3200_v21 }
 0x8b7   :  { %v3311_v31 = vpop.f32.mrf.mxu0  ;;  %v3366_v12 = vpop.f32.mrf.mxu1 }
 0x8b8   :  { %v3312_v42 = vadd.f32 %v3311_v31, %v3247_v44  ;;  %v3416_v47 = vsel %vm1238_vm6, %v12002_v27, 0.0  ;;  %v12028_v50 = vadd.f32 %v3397_v62, %v3387_v11 }
 0x8b9   :  { %3417 = vadd.xlane.f32.xlu1 %v3416_v47  ;;  %v3090_v47 = vadd.f32 %v11987_v9, %v11990_v36 }
 0x8ba   :  { %v3363_v56 = vadd.f32 %v3362_v14, %v3312_v42  ;;  %v3413_v37 = vsel %vm1238_vm6, %v12028_v50, 0.0 }
 0x8bb   :  { %v3149_v63 = vadd.f32 %v11985_v24, %v3090_v47 }
 0x8bc   :  { %v3389_v30 = vmul.f32 %v11997_v53, %v3363_v56 }
 0x8be   :  { %v12010_v26 = vadd.f32 %v3399_v13, %v3389_v30  ;;  %v3209_v30 = vpop.f32.mrf.mxu2 }
 0x8bf   :  { %v3315_v4 = vpop.f32.mrf.mxu0  ;;  %v3370_v10 = vpop.f32.mrf.mxu1  ;;  %v3210_v54 = vadd.f32 %v3209_v30, %v3149_v63 }
 0x8c0   :  { %v3316_v61 = vadd.f32 %v3315_v4, %v3253_v29  ;;  %v3419_v38 = vsel %vm1238_vm6, %v12010_v26, 0.0 }
 0x8c1   :  { %3420 = vadd.xlane.f32.xlu0 %v3419_v38  ;;  %v3277_v9 = vadd.f32 %v3276_v5, %v3210_v54 }
 0x8c2   :  { %v3367_v52 = vadd.f32 %v3366_v12, %v3316_v61 }
 0x8c4   :  { %v3390_v7 = vmul.f32 %v11997_v53, %v3367_v52  ;;  %v10703_v52 = vmov 16.0  }
 0x8c5   :  { %10521 = vrcp.f32 %v10703_v52 }
 0x8c6   :  { %v12019_v14 = vadd.f32 %v3400_v2, %v3390_v7 }
 0x8c7   :  { %v3319_v49 = vpop.f32.mrf.mxu0  ;;  %v3374_v40 = vpop.f32.mrf.mxu1 }
 0x8c8   :  { %v3320_v0 = vadd.f32 %v3319_v49, %v3259_v43  ;;  %v3422_v58 = vsel %vm1238_vm6, %v12019_v14, 0.0 }
 0x8c9   :  { %3423 = vadd.xlane.f32.xlu2 %v3422_v58 }
 0x8ca   :  { %v3371_v15 = vadd.f32 %v3370_v10, %v3320_v0 }
 0x8cb   :  { %v10522_v10 = vpop.eup %10521 }
 0x8cc   :  { %v3391_v32 = vmul.f32 %v11997_v53, %v3371_v15  ;;  %v3438_v2 = vmul.f32 16.0, %v10522_v10  ;;  %vm3442_vm13 = vweird.f32 %v10522_v10 }
 0x8ce   :  { %v12033_v44 = vadd.f32 %v11057_v6, %v3391_v32  ;;  %v3439_v51 = vsub.f32 1.0, %v3438_v2 }
 0x8cf   :  { %v3323_v31 = vpop.f32.mrf.mxu0  ;;  %v3378_v56 = vpop.f32.mrf.mxu1 }
 0x8d0   :  { %v3324_v42 = vadd.f32 %v3323_v31, %v3265_v22 }
 0x8d1   :  { %3414 = vadd.xlane.f32.xlu2 %v3413_v37 }
 0x8d2   :  { %v3375_v12 = vadd.f32 %v3374_v40, %v3324_v42 }
 0x8d4   :  { %v3392_v19 = vmul.f32 %v11997_v53, %v3375_v12 }
 0x8d6   :  { %v12042_v6 = vadd.f32 %v11065_v35, %v3392_v19  ;;  %v3404_v35 = vmul.f32 %v11053_v39, %v11072_v34 }
 0x8d7   :  { %v3327_v45 = vpop.f32.mrf.mxu0  ;;  %v3382_v61 = vpop.f32.mrf.mxu1 }
 0x8d8   :  { %v3328_v13 = vadd.f32 %v3327_v45, %v3271_v8  ;;  %v3428_v15 = vsel %vm1238_vm6, %v12042_v6, 0.0 }
 0x8da   :  { %v3379_v29 = vadd.f32 %v3378_v56, %v3328_v13 }
 0x8dc   :  { %v3393_v17 = vmul.f32 %v11997_v53, %v3379_v29 }
 0x8de   :  { %v12046_v36 = vadd.f32 %v11070_v1, %v3393_v17  ;;  %v3440_v1 = vmul.f32 %v10522_v10, %v3439_v51 }
 0x8df   :  { %v3331_v4 = vpop.f32.mrf.mxu0 }
 0x8e0   :  { %v3332_v16 = vadd.f32 %v3331_v4, %v3277_v9  ;;  %v3441_v7 = vadd.f32 %v10522_v10, %v3440_v1 }
 0x8e2   :  { %v3383_v24 = vadd.f32 %v3382_v61, %v3332_v16  ;;  %v12052_v25 = vsel %vm3442_vm13, %v10522_v10, %v3441_v7 }
 0x8e4   :  { %v3394_v38 = vmul.f32 %v11997_v53, %v3383_v24 }
 0x8e6   :  { %v3412_v41 = vadd.f32 %v3404_v35, %v3394_v38 }
 0x8e8   :  { %v3434_v60 = vsel %vm1238_vm6, %v3412_v41, 0.0 }
 0x8e9   :  { %3435 = vadd.xlane.f32.xlu0 %v3434_v60 }
 0x92c   :  { %v3418_v43 = vpop.xlane.xlu1 %3417 }
 0x92d   :  { %v3445_v20 = vmul.f32 %v12052_v25, %v3418_v43 }
 0x92f   :  { %v12056_v39 = vsub.f32 %v12002_v27, %v3445_v20  ;;  %v3425_v27 = vsel %vm1238_vm6, %v12033_v44, 0.0 }
 0x931   :  { %v3461_v34 = vmul.f32 %v12056_v39, %v12056_v39 }
 0x933   :  { %v3471_v53 = vsel %vm1238_vm6, %v3461_v34, 0.0 }
 0x934   :  { %v3421_v49 = vpop.xlane.xlu0 %3420  ;;  %3472 = vadd.xlane.f32.xlu0 %v3471_v53 }
 0x935   :  { %v3446_v0 = vmul.f32 %v12052_v25, %v3421_v49 }
 0x937   :  { %v12063_v58 = vsub.f32 %v12010_v26, %v3446_v0 }
 0x939   :  { %v3462_v11 = vmul.f32 %v12063_v58, %v12063_v58 }
 0x93b   :  { %v3474_v57 = vsel %vm1238_vm6, %v3462_v11, 0.0 }
 0x93c   :  { %v3424_v62 = vpop.xlane.xlu2 %3423  ;;  %3475 = vadd.xlane.f32.xlu1 %v3474_v57  ;;  %3426 = vadd.xlane.f32.xlu0 %v3425_v27 }
 0x93d   :  { %v3447_v21 = vmul.f32 %v12052_v25, %v3424_v62 }
 0x93f   :  { %v12072_v59 = vsub.f32 %v12019_v14, %v3447_v21  ;;  %v3431_v14 = vsel %vm1238_vm6, %v12046_v36, 0.0 }
 0x941   :  { %v3463_v26 = vmul.f32 %v12072_v59, %v12072_v59 }
 0x943   :  { %v3477_v32 = vsel %vm1238_vm6, %v3463_v26, 0.0  ;;  %v12119_v26 = vperm.slane %v11912_v18, 2 }
 0x944   :  { %3429 = vadd.xlane.f32.xlu1 %v3428_v15  ;;  %3478 = vadd.xlane.f32.xlu2 %v3477_v32  ;;  %v3415_v40 = vpop.xlane.xlu2 %3414 }
 0x945   :  { %v3444_v22 = vmul.f32 %v12052_v25, %v3415_v40 }
 0x947   :  { %v12081_v46 = vsub.f32 %v12028_v50, %v3444_v22 }
 0x949   :  { %v3460_v3 = vmul.f32 %v12081_v46, %v12081_v46 }
 0x94b   :  { %v3468_v31 = vsel %vm1238_vm6, %v3460_v3, 0.0 }
 0x94c   :  { %3432 = vadd.xlane.f32.xlu2 %v3431_v14  ;;  %v12125_v14 = vperm.slane %v11912_v18, 3 }
 0x954   :  { %3469 = vadd.xlane.f32.xlu2 %v3468_v31 }
 0x95c   :  { %v3436_v42 = vpop.xlane.xlu0 %3435 }
 0x95d   :  { %v3451_v37 = vmul.f32 %v12052_v25, %v3436_v42 }
 0x95f   :  { %v12089_v28 = vsub.f32 %v3412_v41, %v3451_v37 }
 0x961   :  { %v3467_v47 = vmul.f32 %v12089_v28, %v12089_v28 }
 0x963   :  { %v3489_v50 = vsel %vm1238_vm6, %v3467_v47, 0.0 }
 0x964   :  { %3490 = vadd.xlane.f32.xlu1 %v3489_v50 }
 0x9a7   :  { %v3473_v12 = vpop.xlane.xlu0 %3472 }
 0x9a8   :  { %v3493_v55 = vmul.f32 %v3473_v12, %v12052_v25 }
 0x9aa   :  { %v3501_v19 = vadd.f32 0.0001, %v3493_v55 }
 0x9ac   :  { %10523 = vrsqrt.f32 %v3501_v19  ;;  %vm3524_vm15 = vweird.f32 %v3501_v19 }
 0x9af   :  { %v3476_v8 = vpop.xlane.xlu1 %3475  ;;  %v3427_v63 = vpop.xlane.xlu0 %3426 }
 0x9b0   :  { %v3494_v56 = vmul.f32 %v3476_v8, %v12052_v25  ;;  %v3448_v45 = vmul.f32 %v12052_v25, %v3427_v63 }
 0x9b2   :  { %v10524_v13 = vpop.eup %10523  ;;  %v3502_v30 = vadd.f32 0.0001, %v3494_v56  ;;  %v12098_v54 = vsub.f32 %v12033_v44, %v3448_v45 }
 0x9b3   :  { %v3519_v29 = vmul.f32 %v10524_v13, %v3501_v19  ;;  %vm3525_vm14 = vweird.f32 %v10524_v13 }
 0x9b4   :  { %10525 = vrsqrt.f32 %v3502_v30  ;;  %v3464_v17 = vmul.f32 %v12098_v54, %v12098_v54  ;;  %vm3526_vm0 = vmor %vm3524_vm15, %vm3525_vm14  ;;  %vm3534_vm3 = vweird.f32 %v3502_v30 }
 0x9b5   :  { %v3520_v5 = vmul.f32 %v10524_v13, %v3519_v29 }
 0x9b6   :  { %v3480_v9 = vsel %vm1238_vm6, %v3464_v17, 0.0 }
 0x9b7   :  { %v3521_v4 = vmul.f32 0.5, %v3520_v5  ;;  %v3430_v16 = vpop.xlane.xlu1 %3429  ;;  %v3479_v61 = vpop.xlane.xlu2 %3478  ;;  %3481 = vadd.xlane.f32.xlu1 %v3480_v9 }
 0x9b8   :  { %v3449_v24 = vmul.f32 %v12052_v25, %v3430_v16  ;;  %v3495_v35 = vmul.f32 %v3479_v61, %v12052_v25  ;;  %v3614_v16 = vsel %vm1238_vm6, %v10867_v33, 0 }
 0x9b9   :  { %v3522_v41 = vsub.f32 1.5, %v3521_v4 }
 0x9ba   :  { %v10526_v38 = vpop.eup %10525  ;;  %v12106_v44 = vsub.f32 %v12042_v6, %v3449_v24  ;;  %v3503_v60 = vadd.f32 0.0001, %v3495_v35 }
 0x9bb   :  { %v3529_v52 = vmul.f32 %v10526_v38, %v3502_v30  ;;  %v3523_v51 = vmul.f32 %v10524_v13, %v3522_v41  ;;  %vm3535_vm2 = vweird.f32 %v10526_v38 }
 0x9bc   :  { %10527 = vrsqrt.f32 %v3503_v60  ;;  %v3465_v10 = vmul.f32 %v12106_v44, %v12106_v44  ;;  %vm3536_vm4 = vmor %vm3534_vm3, %vm3535_vm2  ;;  %vm3544_vm13 = vweird.f32 %v3503_v60 }
 0x9bd   :  { %v3530_v2 = vmul.f32 %v10526_v38, %v3529_v52  ;;  %v3527_v53 = vsel %vm3526_vm0, %v10524_v13, %v3523_v51  ;;  %v12158_v52 = vsub.f32 %v3614_v16, %v3614_v16 }
 0x9be   :  { %v3483_v1 = vsel %vm1238_vm6, %v3465_v10, 0.0  ;;  %v3589_v27 = vmul.f32 %v3527_v53, %v12056_v39 }
 0x9bf   :  { %v3531_v7 = vmul.f32 0.5, %v3530_v2  ;;  %v3433_v43 = vpop.xlane.xlu2 %3432  ;;  %3484 = vadd.xlane.f32.xlu0 %v3483_v1  ;;  %14497 = vst [vmem:[#allocation30_spill] sm:$0xff] %v12158_v52 }
 0x9c0   :  { %v3450_v20 = vmul.f32 %v12052_v25, %v3433_v43  ;;  %v3598_v31 = vmul.f32 %v12119_v26, %v3589_v27 }
 0x9c1   :  { %v3532_v6 = vsub.f32 1.5, %v3531_v7 }
 0x9c2   :  { %v10528_v34 = vpop.eup %10527  ;;  %v12113_v49 = vsub.f32 %v12046_v36, %v3450_v20  ;;  %v3607_v50 = vadd.f32 %v12125_v14, %v3598_v31 }
 0x9c3   :  { %v3533_v0 = vmul.f32 %v10526_v38, %v3532_v6  ;;  %v3539_v11 = vmul.f32 %v10528_v34, %v3503_v60  ;;  %vm3545_vm5 = vweird.f32 %v10528_v34  ;;  %v12170_v6 = vand.u32 4294901760, %v12158_v52 }
 0x9c4   :  { %v3466_v57 = vmul.f32 %v12113_v49, %v12113_v49  ;;  %vm3546_vm14 = vmor %vm3544_vm13, %vm3545_vm5  ;;  %v3622_v8 = vsel %vm1238_vm6, %v3607_v50, 0 }
 0x9c5   :  { %v3537_v62 = vsel %vm3536_vm4, %v10526_v38, %v3533_v0  ;;  %v3540_v21 = vmul.f32 %v10528_v34, %v3539_v11  ;;  %v12139_v30 = vand.u32 4294901760, %v3622_v8  ;;  %14498 = vst [vmem:[#allocation31_spill] sm:$0xff] %v12170_v6 }
 0x9c6   :  { %v3590_v15 = vmul.f32 %v3537_v62, %v12063_v58  ;;  %v3486_v32 = vsel %vm1238_vm6, %v3466_v57, 0.0 }
 0x9c7   :  { %v3541_v36 = vmul.f32 0.5, %v3540_v21  ;;  %3487 = vadd.xlane.f32.xlu2 %v3486_v32  ;;  %v3470_v40 = vpop.xlane.xlu2 %3469  ;;  %v12154_v24 = vsub.f32 %v3622_v8, %v12139_v30 }
 0x9c8   :  { %v3492_v22 = vmul.f32 %v3470_v40, %v12052_v25  ;;  %v3599_v3 = vmul.f32 %v12119_v26, %v3590_v15 }
 0x9c9   :  { %v3542_v39 = vsub.f32 1.5, %v3541_v36  ;;  %v3693_v43 = vand.u32 4294901760, %v12154_v24 }
 0x9ca   :  { %v3500_v42 = vadd.f32 0.0001, %v3492_v22  ;;  %v3608_v37 = vadd.f32 %v12125_v14, %v3599_v3 }
 0x9cb   :  { %v3543_v58 = vmul.f32 %v10528_v34, %v3542_v39  ;;  %v3694_v11 = vsub.f32 %v12154_v24, %v3693_v43 }
 0x9cc   :  { %10529 = vrsqrt.f32 %v3500_v42  ;;  %v3625_v18 = vsel %vm1238_vm6, %v3608_v37, 0  ;;  %vm3514_vm0 = vweird.f32 %v3500_v42 }
 0x9cd   :  { %v3547_v47 = vsel %vm3546_vm14, %v10528_v34, %v3543_v58  ;;  %v12134_v19 = vand.u32 4294901760, %v3625_v18  ;;  %v3616_v34 = vsel %vm1238_vm6, %v10877_v48, 0  ;;  %v3695_v40 = vand.u32 4294901760, %v3694_v11 }
 0x9ce   :  { %v3591_v12 = vmul.f32 %v3547_v47, %v12072_v59  ;;  %v12180_v62 = vsub.f32 %v3616_v34, %v3616_v34 }
 0x9cf   :  { %v12144_v59 = vsub.f32 %v3625_v18, %v12134_v19 }
 0x9d0   :  { %v3600_v55 = vmul.f32 %v12119_v26, %v3591_v12  ;;  %14499 = vst [vmem:[#allocation32_spill] sm:$0xff] %v12180_v62  ;;  %v12186_v3 = vand.u32 4294901760, %v12180_v62 }
 0x9d1   :  { %v3687_v41 = vand.u32 4294901760, %v12144_v59 }
 0x9d2   :  { %v10530_v63 = vpop.eup %10529  ;;  %v3609_v56 = vadd.f32 %v12125_v14, %v3600_v55  ;;  %14500 = vst [vmem:[#allocation33_spill] sm:$0xff] %v12186_v3  ;;  %v3661_v58 = vsub.f32 %v12180_v62, %v12186_v3 }
 0x9d3   :  { %v3509_v45 = vmul.f32 %v10530_v63, %v3500_v42  ;;  %vm3515_vm15 = vweird.f32 %v10530_v63  ;;  %v3688_v7 = vsub.f32 %v12144_v59, %v3687_v41 }
 0x9d4   :  { %v3628_v13 = vsel %vm1238_vm6, %v3609_v56, 0  ;;  %vm3516_vm2 = vmor %vm3514_vm0, %vm3515_vm15  ;;  %v12194_v8 = vand.u32 4294901760, %v3661_v58 }
 0x9d5   :  { %v3510_v29 = vmul.f32 %v10530_v63, %v3509_v45  ;;  %v12141_v17 = vand.u32 4294901760, %v3628_v13  ;;  %v3689_v0 = vand.u32 4294901760, %v3688_v7 }
 0x9d6   :  { %14501 = vst [vmem:[#allocation34_spill] sm:$0xff] %v12194_v8 }
 0x9d7   :  { %v3511_v5 = vmul.f32 0.5, %v3510_v29  ;;  %3643 = vmatpush.xpose.msra.mxu2 %v12141_v17  ;;  %v12148_v9 = vsub.f32 %v3628_v13, %v12141_v17  ;;  %v3491_v4 = vpop.xlane.xlu1 %3490 }
 0x9d8   :  { %v3499_v61 = vmul.f32 %v3491_v4, %v12052_v25 }
 0x9d9   :  { %v3512_v35 = vsub.f32 1.5, %v3511_v5  ;;  %v3681_v38 = vand.u32 4294901760, %v12148_v9 }
 0x9da   :  { %v3507_v60 = vadd.f32 0.0001, %v3499_v61 }
 0x9db   :  { %v3513_v10 = vmul.f32 %v10530_v63, %v3512_v35  ;;  %3645 = vmatpush.xpose.msra.mxu2 %v12134_v19  ;;  %v3682_v2 = vsub.f32 %v12148_v9, %v3681_v38 }
 0x9dc   :  { %10531 = vrsqrt.f32 %v3507_v60  ;;  %vm3584_vm4 = vweird.f32 %v3507_v60 }
 0x9dd   :  { %v3517_v51 = vsel %vm3516_vm2, %v10530_v63, %v3513_v10  ;;  %v3683_v1 = vand.u32 4294901760, %v3682_v2 }
 0x9de   :  { %v3588_v20 = vmul.f32 %v3517_v51, %v12081_v46  ;;  %v3653_v46 = vsub.f32 %v12158_v52, %v12170_v6 }
 0x9df   :  { %3647 = vmatpush.xpose.msra.mxu2 %v12139_v30  ;;  %3684 = vmatpush.xpose.msra.mxu3 %v3683_v1 }
 0x9e0   :  { %v3597_v53 = vmul.f32 %v12119_v26, %v3588_v20  ;;  %v12183_v22 = vand.u32 4294901760, %v3653_v46 }
 0x9e2   :  { %v10532_v57 = vpop.eup %10531  ;;  %v3606_v27 = vadd.f32 %v12125_v14, %v3597_v53 }
 0x9e3   :  { %v3579_v21 = vmul.f32 %v10532_v57, %v3507_v60  ;;  %3690 = vmatpush.xpose.msra.mxu3 %v3689_v0  ;;  %vm3585_vm3 = vweird.f32 %v10532_v57 }
 0x9e4   :  { %v3619_v15 = vsel %vm1238_vm6, %v3606_v27, 0  ;;  %vm3586_vm5 = vmor %vm3584_vm4, %vm3585_vm3 }
 0x9e5   :  { %v3580_v32 = vmul.f32 %v10532_v57, %v3579_v21  ;;  %v3648_v36 = vand.u32 4294901760, %v3619_v15 }
 0x9e7   :  { %v3581_v39 = vmul.f32 0.5, %v3580_v32  ;;  %3649 = vmatpush.xpose.msra.mxu2 %v3648_v36  ;;  %3696 = vmatpush.xpose.msra.mxu3 %v3695_v40  ;;  %v3698_v31 = vsub.f32 %v3619_v15, %v3648_v36 }
 0x9e9   :  { %v3582_v42 = vsub.f32 1.5, %v3581_v39  ;;  %v3699_v37 = vand.u32 4294901760, %v3698_v31 }
 0x9ea   :  { %3655 = vmatmul.f32.vlgmr.msra.gmra.mxu2 %v12183_v22 }
 0x9eb   :  { %3726 = vmatpush.xpose.msrb.mxu2 %v12148_v9  ;;  %v3583_v47 = vmul.f32 %v10532_v57, %v3582_v42  ;;  %v3700_v50 = vsub.f32 %v3698_v31, %v3699_v37 }
 0x9ed   :  { %v3587_v12 = vsel %vm3586_vm5, %v10532_v57, %v3583_v47  ;;  %v3701_v18 = vand.u32 4294901760, %v3700_v50 }
 0x9ee   :  { %v3595_v55 = vmul.f32 %v3587_v12, %v12089_v28 }
 0x9ef   :  { %3729 = vmatpush.xpose.msrb.mxu2 %v12144_v59  ;;  %3702 = vmatpush.xpose.msra.mxu3 %v3701_v18 }
 0x9f0   :  { %v3604_v63 = vmul.f32 %v12119_v26, %v3595_v55 }
 0x9f2   :  { %v3613_v56 = vadd.f32 %v12125_v14, %v3604_v63  ;;  %3663 = vmatmul.f32.gmra.mxu2 %v12194_v8  ;;  %10437 = vmatmul.msk.f32.vlgmr.msra.gmra.mxu3 %vm1238_vm6, %v10867_v33 }
 0x9f3   :  { %3732 = vmatpush.xpose.msrb.mxu2 %v12154_v24  ;;  %3760 = vmatpush.xpose.msrb.mxu3 %v12141_v17 }
 0x9f4   :  { %v3856_v28 = vsel %vm1238_vm6, %v3613_v56, 0 }
 0x9f5   :  { %v12207_v45 = vand.u32 4294901760, %v3856_v28 }
 0x9f7   :  { %3735 = vmatpush.xpose.msrb.mxu2 %v3698_v31  ;;  %3762 = vmatpush.xpose.msrb.mxu3 %v12134_v19  ;;  %v12211_v13 = vsub.f32 %v3856_v28, %v12207_v45 }
 0x9f8   :  { %3988 = vmatpush.xpose.msrb.mxu1 %v12207_v45 }
 0x9f9   :  { %3954 = vmatpush.xpose.msrb.mxu0 %v12211_v13  ;;  %v3909_v29 = vand.u32 4294901760, %v12211_v13 }
 0x9fa   :  { %10438 = vmatmul.msk.f32.gmra.mxu3 %vm1238_vm6, %v10877_v48  ;;  %3738 = vmatmul.f32.vlgmr.msrb.gmra.mxu2 %v12158_v52 }
 0x9fb   :  { %3795 = vmatpush.xpose.msra.mxu2 %v3681_v38  ;;  %3764 = vmatpush.xpose.msrb.mxu3 %v12139_v30  ;;  %v3910_v59 = vsub.f32 %v12211_v13, %v3909_v29 }
 0x9fd   :  { %v3911_v5 = vand.u32 4294901760, %v3910_v59 }
 0x9ff   :  { %3799 = vmatpush.xpose.msra.mxu2 %v3687_v41  ;;  %3766 = vmatpush.xpose.msrb.mxu3 %v3648_v36 }
 0xa02   :  { %3770 = vmatmul.f32.vlgmr.msrb.gmra.mxu3 %v12170_v6  ;;  %3743 = vmatmul.f32.gmra.mxu2 %v12180_v62 }
 0xa03   :  { %3803 = vmatpush.xpose.msra.mxu2 %v3693_v43  ;;  %3830 = vmatpush.xpose.msra.mxu3 %v12141_v17 }
 0xa07   :  { %3807 = vmatpush.xpose.msra.mxu2 %v3699_v37  ;;  %3832 = vmatpush.xpose.msra.mxu3 %v12134_v19 }
 0xa0a   :  { %3776 = vmatmul.f32.gmra.mxu3 %v12186_v3  ;;  %10439 = vmatmul.msk.f32.vlgmr.msra.gmra.mxu2 %vm1238_vm6, %v10867_v33 }
 0xa0b   :  { %3871 = vmatpush.xpose.msrb.mxu2 %v12207_v45  ;;  %3834 = vmatpush.xpose.msra.mxu3 %v12139_v30 }
 0xa0f   :  { %3836 = vmatpush.xpose.msra.mxu3 %v3648_v36 }
 0xa12   :  { %10441 = vmatmul.msk.f32.vlgmr.msra.gmra.mxu3 %vm1238_vm6, %v10867_v33  ;;  %10440 = vmatmul.msk.f32.gmra.mxu2 %vm1238_vm6, %v10877_v48 }
 0xa13   :  { %3912 = vmatpush.xpose.msrb.mxu3 %v3911_v5 }
 0xa1a   :  { %10442 = vmatmul.msk.f32.gmra.mxu3 %vm1238_vm6, %v10877_v48 }
 0xa2a   :  { %v3482_v19 = vpop.xlane.xlu1 %3481 }
 0xa2b   :  { %v3496_v30 = vmul.f32 %v3482_v19, %v12052_v25 }
 0xa2d   :  { %v3504_v17 = vadd.f32 0.0001, %v3496_v30 }
 0xa2f   :  { %10533 = vrsqrt.f32 %v3504_v17  ;;  %vm3554_vm14 = vweird.f32 %v3504_v17 }
 0xa32   :  { %v3485_v9 = vpop.xlane.xlu0 %3484 }
 0xa33   :  { %v3497_v4 = vmul.f32 %v3485_v9, %v12052_v25 }
 0xa35   :  { %v10534_v16 = vpop.eup %10533  ;;  %v3505_v61 = vadd.f32 0.0001, %v3497_v4 }
 0xa36   :  { %v3549_v24 = vmul.f32 %v10534_v16, %v3504_v17  ;;  %vm3555_vm13 = vweird.f32 %v10534_v16 }
 0xa37   :  { %10535 = vrsqrt.f32 %v3505_v61  ;;  %vm3556_vm0 = vmor %vm3554_vm14, %vm3555_vm13  ;;  %vm3564_vm2 = vweird.f32 %v3505_v61 }
 0xa38   :  { %v3550_v35 = vmul.f32 %v10534_v16, %v3549_v24 }
 0xa3a   :  { %v3551_v38 = vmul.f32 0.5, %v3550_v35  ;;  %v3488_v41 = vpop.xlane.xlu2 %3487  ;;  %v4079_v35 = vld [vmem:[%s14379_s10 + $0x18] sm:$0xff] }
 0xa3b   :  { %v3498_v60 = vmul.f32 %v3488_v41, %v12052_v25  ;;  %v4077_v41 = vld [vmem:[%s14379_s10 + $0x8] sm:$0xff] }
 0xa3c   :  { %v3552_v51 = vsub.f32 1.5, %v3551_v38  ;;  %v4078_v38 = vld [vmem:[%s14379_s10 + $0x10] sm:$0xff] }
 0xa3d   :  { %v10536_v10 = vpop.eup %10535  ;;  %v3506_v2 = vadd.f32 0.0001, %v3498_v60  ;;  %v4104_v60 = vand.u32 4294901760, %v4079_v35 }
 0xa3e   :  { %v3559_v1 = vmul.f32 %v10536_v10, %v3505_v61  ;;  %v3553_v43 = vmul.f32 %v10534_v16, %v3552_v51  ;;  %vm3565_vm15 = vweird.f32 %v10536_v10  ;;  %v4076_v51 = vld [vmem:[%s14379_s10] sm:$0xff] }
 0xa3f   :  { %10537 = vrsqrt.f32 %v3506_v2  ;;  %vm3566_vm3 = vmor %vm3564_vm2, %vm3565_vm15  ;;  %vm3574_vm5 = vweird.f32 %v3506_v2 }
 0xa40   :  { %v3560_v7 = vmul.f32 %v10536_v10, %v3559_v1  ;;  %v3557_v0 = vsel %vm3556_vm0, %v10534_v16, %v3553_v43  ;;  %v4110_v1 = vand.u32 4294901760, %v4076_v51  ;;  %v4158_v43 = vsub.f32 %v4079_v35, %v4104_v60 }
 0xa41   :  { %v3592_v21 = vmul.f32 %v3557_v0, %v12098_v54 }
 0xa42   :  { %v3561_v20 = vmul.f32 0.5, %v3560_v7  ;;  %v4176_v0 = vsub.f32 %v4076_v51, %v4110_v1 }
 0xa43   :  { %v3601_v31 = vmul.f32 %v12119_v26, %v3592_v21 }
 0xa44   :  { %v3562_v34 = vsub.f32 1.5, %v3561_v20  ;;  %v4177_v21 = vand.u32 4294901760, %v4176_v0 }
 0xa45   :  { %v10538_v53 = vpop.eup %10537  ;;  %v3610_v54 = vadd.f32 %v12125_v14, %v3601_v31 }
 0xa46   :  { %v3563_v11 = vmul.f32 %v10536_v10, %v3562_v34  ;;  %v3569_v57 = vmul.f32 %v10538_v53, %v3506_v2  ;;  %vm3575_vm4 = vweird.f32 %v10538_v53  ;;  %v4108_v2 = vand.u32 4294901760, %v4077_v41 }
 0xa47   :  { %vm3576_vm13 = vmor %vm3574_vm5, %vm3575_vm4  ;;  %v3847_v18 = vsel %vm1238_vm6, %v3610_v54, 0 }
 0xa48   :  { %v3567_v27 = vsel %vm3566_vm3, %v10536_v10, %v3563_v11  ;;  %v3570_v46 = vmul.f32 %v10538_v53, %v3569_v57  ;;  %v3876_v28 = vand.u32 4294901760, %v3847_v18  ;;  %v4106_v10 = vand.u32 4294901760, %v4078_v38 }
 0xa49   :  { %v3593_v15 = vmul.f32 %v3567_v27, %v12106_v44  ;;  %v4170_v34 = vsub.f32 %v4077_v41, %v4108_v2  ;;  %v4159_v57 = vand.u32 4294901760, %v4158_v43 }
 0xa4a   :  { %v3571_v32 = vmul.f32 0.5, %v3570_v46  ;;  %v3926_v5 = vsub.f32 %v3847_v18, %v3876_v28  ;;  %v4164_v20 = vsub.f32 %v4078_v38, %v4106_v10 }
 0xa4b   :  { %v3602_v36 = vmul.f32 %v12119_v26, %v3593_v15  ;;  %v4171_v46 = vand.u32 4294901760, %v4170_v34  ;;  %v4160_v15 = vsub.f32 %v4158_v43, %v4159_v57 }
 0xa4c   :  { %v3572_v40 = vsub.f32 1.5, %v3571_v32  ;;  %v3927_v17 = vand.u32 4294901760, %v3926_v5  ;;  %v4165_v27 = vand.u32 4294901760, %v4164_v20 }
 0xa4d   :  { %v3611_v39 = vadd.f32 %v12125_v14, %v3602_v36  ;;  %v4172_v36 = vsub.f32 %v4170_v34, %v4171_v46 }
 0xa4e   :  { %v3573_v42 = vmul.f32 %v10538_v53, %v3572_v40  ;;  %v3928_v4 = vsub.f32 %v3926_v5, %v3927_v17  ;;  %v4166_v32 = vsub.f32 %v4164_v20, %v4165_v27 }
 0xa4f   :  { %v3850_v47 = vsel %vm1238_vm6, %v3611_v39, 0  ;;  %v4161_v39 = vand.u32 4294901760, %v4160_v15 }
 0xa50   :  { %v3577_v37 = vsel %vm3576_vm13, %v10538_v53, %v3573_v42  ;;  %v3874_v50 = vand.u32 4294901760, %v3850_v47  ;;  %v3929_v16 = vand.u32 4294901760, %v3928_v4  ;;  %v4167_v31 = vand.u32 4294901760, %v4166_v32 }
 0xa51   :  { %v3594_v58 = vmul.f32 %v3577_v37, %v12113_v49  ;;  %v4178_v42 = vsub.f32 %v4176_v0, %v4177_v21  ;;  %v4173_v37 = vand.u32 4294901760, %v4172_v36 }
 0xa52   :  { %v3920_v56 = vsub.f32 %v3850_v47, %v3874_v50 }
 0xa53   :  { %v3603_v44 = vmul.f32 %v12119_v26, %v3594_v58 }
 0xa54   :  { %v3921_v19 = vand.u32 4294901760, %v3920_v56 }
 0xa55   :  { %v3612_v12 = vadd.f32 %v12125_v14, %v3603_v44 }
 0xa56   :  { %v3922_v14 = vsub.f32 %v3920_v56, %v3921_v19 }
 0xa57   :  { %v3853_v55 = vsel %vm1238_vm6, %v3612_v12, 0 }
 0xa58   :  { %v3872_v63 = vand.u32 4294901760, %v3853_v55  ;;  %v3923_v9 = vand.u32 4294901760, %v3922_v14 }
 0xa5a   :  { %3873 = vmatpush.xpose.msrb.mxu2 %v3872_v63  ;;  %3990 = vmatpush.xpose.msrb.mxu1 %v3872_v63  ;;  %v3914_v59 = vsub.f32 %v3853_v55, %v3872_v63 }
 0xa5c   :  { %3957 = vmatpush.xpose.msrb.mxu0 %v3914_v59  ;;  %v3915_v49 = vand.u32 4294901760, %v3914_v59 }
 0xa5e   :  { %3875 = vmatpush.xpose.msrb.mxu2 %v3874_v50  ;;  %3992 = vmatpush.xpose.msrb.mxu1 %v3874_v50  ;;  %v3916_v26 = vsub.f32 %v3914_v59, %v3915_v49 }
 0xa60   :  { %3960 = vmatpush.xpose.msrb.mxu0 %v3920_v56  ;;  %v3917_v30 = vand.u32 4294901760, %v3916_v26 }
 0xa62   :  { %3877 = vmatpush.xpose.msrb.mxu2 %v3876_v28  ;;  %3918 = vmatpush.xpose.msrb.mxu3 %v3917_v30 }
 0xa63   :  { %3994 = vmatpush.xpose.msrb.mxu1 %v3876_v28 }
 0xa64   :  { %3963 = vmatpush.xpose.msrb.mxu0 %v3926_v5 }
 0xa65   :  { %3883 = vmatmul.f32.vlgmr.msrb.gmra.mxu2 %v12183_v22 }
 0xa66   :  { %4023 = vmatpush.xpose.msra.mxu2 %v3909_v29  ;;  %3924 = vmatpush.xpose.msrb.mxu3 %v3923_v9 }
 0xa67   :  { %3998 = vmatmul.f32.vlgmr.msrb.gmra.mxu1 %v12170_v6  ;;  %3966 = vmatmul.f32.vlgmr.msrb.gmra.mxu0 %v12158_v52 }
 0xa68   :  { %4105 = vmatpush.msra.mxu0 %v4104_v60  ;;  %4162 = vmatpush.msra.mxu1 %v4161_v39 }
 0xa6a   :  { %4027 = vmatpush.xpose.msra.mxu2 %v3915_v49  ;;  %3930 = vmatpush.xpose.msrb.mxu3 %v3929_v16 }
 0xa6b   :  { %4107 = vmatpush.msra.mxu0 %v4106_v10  ;;  %4168 = vmatpush.msra.mxu1 %v4167_v31 }
 0xa6d   :  { %3891 = vmatmul.f32.gmra.mxu2 %v12194_v8  ;;  %10443 = vmatmul.msk.f32.vlgmr.msrb.gmra.mxu3 %vm1238_vm6, %v10867_v33  ;;  %v3656_v13 = vpop.f32.mrf.mxu2 }
 0xa6e   :  { %4031 = vmatpush.xpose.msra.mxu2 %v3921_v19  ;;  %4058 = vmatpush.xpose.msra.mxu3 %v12207_v45 }
 0xa6f   :  { %4004 = vmatmul.f32.gmra.mxu1 %v12186_v3  ;;  %3971 = vmatmul.f32.gmra.mxu0 %v12180_v62 }
 0xa70   :  { %4109 = vmatpush.msra.mxu0 %v4108_v2  ;;  %4174 = vmatpush.msra.mxu1 %v4173_v37 }
 0xa72   :  { %4035 = vmatpush.xpose.msra.mxu2 %v3927_v17  ;;  %4060 = vmatpush.xpose.msra.mxu3 %v3872_v63 }
 0xa73   :  { %4111 = vmatpush.msra.mxu0 %v4110_v1 }
 0xa75   :  { %10444 = vmatmul.msk.f32.gmra.mxu3 %vm1238_vm6, %v10877_v48  ;;  %10445 = vmatmul.msk.f32.vlgmr.msra.gmra.mxu2 %vm1238_vm6, %v10867_v33  ;;  %v3705_v45 = vpop.f32.mrf.mxu3  ;;  %v3664_v29 = vpop.f32.mrf.mxu2 }
 0xa76   :  { %4062 = vmatpush.xpose.msra.mxu3 %v3874_v50  ;;  %v3706_v11 = vadd.f32 %v3705_v45, %v3656_v13  ;;  %4212 = vmatpush.msrb.mxu2 %v4158_v43  ;;  %v4179_v50 = vand.u32 4294901760, %v4178_v42 }
 0xa77   :  { %4303 = vmatpush.msrb.mxu0 %v4159_v57 }
 0xa78   :  { %4215 = vmatpush.msrb.mxu2 %v4164_v20  ;;  %4180 = vmatpush.msra.mxu1 %v4179_v50 }
 0xa79   :  { %4307 = vmatpush.msrb.mxu0 %v4165_v27 }
 0xa7a   :  { %4064 = vmatpush.xpose.msra.mxu3 %v3876_v28  ;;  %4218 = vmatpush.msrb.mxu2 %v4170_v34 }
 0xa7b   :  { %4311 = vmatpush.msrb.mxu0 %v4171_v46  ;;  %4346 = vmatpush.msrb.mxu1 %v4104_v60 }
 0xa7c   :  { %4221 = vmatpush.msrb.mxu2 %v4176_v0 }
 0xa7d   :  { %10446 = vmatmul.msk.f32.gmra.mxu2 %vm1238_vm6, %v10877_v48  ;;  %10447 = vmatmul.msk.f32.vlgmr.msra.gmra.mxu3 %vm1238_vm6, %v10867_v33  ;;  %v3709_v61 = vpop.f32.mrf.mxu3  ;;  %v3739_v24 = vpop.f32.mrf.mxu2 }
 0xa7e   :  { %4256 = vmatpush.msrb.mxu3 %v4104_v60  ;;  %v3740_v40 = vadd.f32 %v3739_v24, %v3706_v11  ;;  %v3710_v54 = vadd.f32 %v3709_v61, %v3664_v29  ;;  %4315 = vmatpush.msrb.mxu0 %v4177_v21 }
 0xa7f   :  { %4348 = vmatpush.msrb.mxu1 %v4106_v10 }
 0xa80   :  { %4258 = vmatpush.msrb.mxu3 %v4106_v10 }
 0xa81   :  { %4350 = vmatpush.msrb.mxu1 %v4108_v2 }
 0xa82   :  { %4260 = vmatpush.msrb.mxu3 %v4108_v2 }
 0xa83   :  { %4352 = vmatpush.msrb.mxu1 %v4110_v1 }
 0xa84   :  { %4262 = vmatpush.msrb.mxu3 %v4110_v1 }
 0xa85   :  { %10448 = vmatmul.msk.f32.gmra.mxu3 %vm1238_vm6, %v10877_v48  ;;  %v3771_v7 = vpop.f32.mrf.mxu3  ;;  %v3744_v53 = vpop.f32.mrf.mxu2 }
 0xa86   :  { %v3772_v44 = vadd.f32 %v3771_v7, %v3740_v40  ;;  %v3745_v12 = vadd.f32 %v3744_v53, %v3710_v54 }
 0xa8d   :  { %v3777_v58 = vpop.f32.mrf.mxu3  ;;  %v3810_v47 = vpop.f32.mrf.mxu2 }
 0xa8e   :  { %v3811_v18 = vadd.f32 %v3810_v47, %v3772_v44  ;;  %v3778_v63 = vadd.f32 %v3777_v58, %v3745_v12 }
 0xa95   :  { %v3839_v55 = vpop.f32.mrf.mxu3  ;;  %v3814_v28 = vpop.f32.mrf.mxu2 }
 0xa96   :  { %v12287_v56 = vadd.f32 %v3839_v55, %v3811_v18  ;;  %v3815_v5 = vadd.f32 %v3814_v28, %v3778_v63 }
 0xa98   :  { %v4081_v59 = vsel %vm415_vm1, %v12287_v56, 0 }
 0xa99   :  { %v12291_v49 = vand.u32 4294901760, %v4081_v59 }
 0xa9b   :  { %v4113_v19 = vsub.f32 %v4081_v59, %v12291_v49  ;;  %4182 = vmatmul.f32.vlgmr.msra.gmra.mxu1 %v12291_v49 }
 0xa9d   :  { %v4114_v26 = vand.u32 4294901760, %v4113_v19  ;;  %v3843_v30 = vpop.f32.mrf.mxu3  ;;  %4224 = vmatmul.f32.vlgmr.msrb.gmra.mxu2 %v4113_v19 }
 0xa9e   :  { %v12295_v14 = vadd.f32 %v3843_v30, %v3815_v5 }
 0xa9f   :  { %v4115_v17 = vsub.f32 %v4113_v19, %v4114_v26  ;;  %4266 = vmatmul.f32.vlgmr.msrb.gmra.mxu3 %v4114_v26 }
 0xaa0   :  { %v4084_v9 = vsel %vm415_vm1, %v12295_v14, 0 }
 0xaa1   :  { %v4116_v4 = vand.u32 4294901760, %v4115_v17  ;;  %v4120_v16 = vand.u32 4294901760, %v4084_v9 }
 0xaa3   :  { %4117 = vmatmul.f32.vlgmr.msra.gmra.mxu0 %v4116_v4  ;;  %v4121_v13 = vsub.f32 %v4084_v9, %v4120_v16  ;;  %4186 = vmatmul.f32.gmra.mxu1 %v4120_v16 }
 0xaa5   :  { %4229 = vmatmul.f32.gmra.mxu2 %v4121_v13  ;;  %v4122_v45 = vand.u32 4294901760, %v4121_v13 }
 0xaa7   :  { %4272 = vmatmul.f32.gmra.mxu3 %v4122_v45  ;;  %v4123_v29 = vsub.f32 %v4121_v13, %v4122_v45 }
 0xaa9   :  { %v4124_v61 = vand.u32 4294901760, %v4123_v29 }
 0xaab   :  { %4125 = vmatmul.f32.gmra.mxu0 %v4124_v61 }
 0xae4   :  { %v3967_v41 = vpop.f32.mrf.mxu0  ;;  %v3999_v10 = vpop.f32.mrf.mxu1 }
 0xae8   :  { %v3884_v24 = vpop.f32.mrf.mxu2 }
 0xaec   :  { %v3972_v20 = vpop.f32.mrf.mxu0  ;;  %v4005_v57 = vpop.f32.mrf.mxu1 }
 0xaf0   :  { %v3892_v35 = vpop.f32.mrf.mxu2  ;;  %v3933_v38 = vpop.f32.mrf.mxu3 }
 0xaf1   :  { %v3934_v60 = vadd.f32 %v3933_v38, %v3884_v24 }
 0xaf3   :  { %v3968_v51 = vadd.f32 %v3967_v41, %v3934_v60 }
 0xaf5   :  { %v4000_v7 = vadd.f32 %v3999_v10, %v3968_v51  ;;  %v12315_v10 = vld [vmem:[%s14382_s13 + $0x8] sm:$0xf] }
 0xaf8   :  { %v3937_v2 = vpop.f32.mrf.mxu3  ;;  %v4038_v1 = vpop.f32.mrf.mxu2 }
 0xaf9   :  { %v3938_v43 = vadd.f32 %v3937_v2, %v3892_v35  ;;  %v4039_v34 = vadd.f32 %v4038_v1, %v4000_v7 }
 0xafb   :  { %v3973_v0 = vadd.f32 %v3972_v20, %v3938_v43 }
 0xafd   :  { %v4006_v15 = vadd.f32 %v4005_v57, %v3973_v0 }
 0xb00   :  { %v4067_v53 = vpop.f32.mrf.mxu3  ;;  %v4042_v46 = vpop.f32.mrf.mxu2 }
 0xb01   :  { %v12299_v11 = vadd.f32 %v4067_v53, %v4039_v34  ;;  %v4043_v36 = vadd.f32 %v4042_v46, %v4006_v15  ;;  %v12320_v34 = vperm.slane %v12315_v10, 0 }
 0xb03   :  { %v4087_v27 = vsel %vm415_vm1, %v12299_v11, 0 }
 0xb04   :  { %v4128_v21 = vand.u32 4294901760, %v4087_v27 }
 0xb06   :  { %4190 = vmatmul.f32.gmra.mxu1 %v4128_v21  ;;  %v4129_v32 = vsub.f32 %v4087_v27, %v4128_v21 }
 0xb08   :  { %v4071_v40 = vpop.f32.mrf.mxu3  ;;  %4234 = vmatmul.f32.gmra.mxu2 %v4129_v32  ;;  %v4130_v39 = vand.u32 4294901760, %v4129_v32 }
 0xb09   :  { %v12303_v31 = vadd.f32 %v4071_v40, %v4043_v36 }
 0xb0a   :  { %4278 = vmatmul.f32.gmra.mxu3 %v4130_v39  ;;  %v4131_v42 = vsub.f32 %v4129_v32, %v4130_v39 }
 0xb0b   :  { %v4090_v37 = vsel %vm415_vm1, %v12303_v31, 0 }
 0xb0c   :  { %v4136_v58 = vand.u32 4294901760, %v4090_v37  ;;  %v4132_v47 = vand.u32 4294901760, %v4131_v42 }
 0xb0e   :  { %4133 = vmatmul.f32.gmra.mxu0 %v4132_v47  ;;  %4194 = vmatmul.f32.gmra.mxu1 %v4136_v58  ;;  %v4137_v54 = vsub.f32 %v4090_v37, %v4136_v58 }
 0xb10   :  { %4239 = vmatmul.f32.gmra.mxu2 %v4137_v54  ;;  %v4138_v44 = vand.u32 4294901760, %v4137_v54 }
 0xb12   :  { %4284 = vmatmul.f32.gmra.mxu3 %v4138_v44  ;;  %v4139_v50 = vsub.f32 %v4137_v54, %v4138_v44 }
 0xb14   :  { %v4140_v12 = vand.u32 4294901760, %v4139_v50 }
 0xb16   :  { %4141 = vmatmul.f32.gmra.mxu0 %v4140_v12  ;;  %4354 = vmatmul.f32.vlgmr.msrb.gmra.mxu1 %v12291_v49 }
 0xb18   :  { %v4183_v18 = vpop.f32.mrf.mxu1 }
 0xb1e   :  { %4317 = vmatmul.f32.vlgmr.msrb.gmra.mxu0 %v12291_v49  ;;  %4358 = vmatmul.f32.gmra.mxu1 %v4120_v16 }
 0xb20   :  { %v4118_v55 = vpop.f32.mrf.mxu0  ;;  %v4187_v63 = vpop.f32.mrf.mxu1 }
 0xb21   :  { %v4225_v26 = vpop.f32.mrf.mxu2  ;;  %v4184_v30 = vadd.f32 %v4183_v18, %v4118_v55 }
 0xb22   :  { %v4267_v9 = vpop.f32.mrf.mxu3 }
 0xb23   :  { %v4226_v4 = vadd.f32 %v4225_v26, %v4184_v30  ;;  %v12349_v26 = vld [vmem:[%s14382_s13] sm:$0xff] }
 0xb24   :  { %v12352_v30 = vperm.slane %v12349_v26, 4 }
 0xb25   :  { %v4268_v49 = vadd.f32 %v4267_v9, %v4226_v4 }
 0xb26   :  { %4321 = vmatmul.f32.gmra.mxu0 %v4120_v16  ;;  %4362 = vmatmul.f32.gmra.mxu1 %v4128_v21 }
 0xb28   :  { %v4126_v28 = vpop.f32.mrf.mxu0 }
 0xb29   :  { %v4188_v45 = vadd.f32 %v4187_v63, %v4126_v28  ;;  %v4230_v16 = vpop.f32.mrf.mxu2 }
 0xb2a   :  { %v4273_v38 = vpop.f32.mrf.mxu3 }
 0xb2b   :  { %v4231_v24 = vadd.f32 %v4230_v16, %v4188_v45 }
 0xb2d   :  { %v4274_v2 = vadd.f32 %v4273_v38, %v4231_v24  ;;  %v12363_v24 = vperm.slane %v12349_v26, 5 }
 0xb2e   :  { %4325 = vmatmul.f32.gmra.mxu0 %v4128_v21  ;;  %4366 = vmatmul.f32.gmra.mxu1 %v4136_v58 }
 0xb36   :  { %4329 = vmatmul.f32.gmra.mxu0 %v4136_v58 }
 0xb83   :  { %v4191_v59 = vpop.f32.mrf.mxu1 }
 0xb8b   :  { %v4134_v5 = vpop.f32.mrf.mxu0  ;;  %v4195_v19 = vpop.f32.mrf.mxu1 }
 0xb8c   :  { %v4192_v51 = vadd.f32 %v4191_v59, %v4134_v5  ;;  %v4235_v7 = vpop.f32.mrf.mxu2 }
 0xb8d   :  { %v4279_v27 = vpop.f32.mrf.mxu3 }
 0xb8e   :  { %v4236_v0 = vadd.f32 %v4235_v7, %v4192_v51 }
 0xb90   :  { %v4280_v15 = vadd.f32 %v4279_v27, %v4236_v0 }
 0xb93   :  { %v4142_v17 = vpop.f32.mrf.mxu0  ;;  %v4355_v13 = vpop.f32.mrf.mxu1 }
 0xb94   :  { %v4196_v32 = vadd.f32 %v4195_v19, %v4142_v17  ;;  %v4240_v37 = vpop.f32.mrf.mxu2 }
 0xb95   :  { %v4285_v50 = vpop.f32.mrf.mxu3 }
 0xb96   :  { %v4241_v58 = vadd.f32 %v4240_v37, %v4196_v32 }
 0xb98   :  { %v4286_v12 = vadd.f32 %v4285_v50, %v4241_v58 }
 0xb9b   :  { %v4318_v29 = vpop.f32.mrf.mxu0  ;;  %v4359_v60 = vpop.f32.mrf.mxu1 }
 0xb9c   :  { %v4319_v61 = vadd.f32 %v4318_v29, %v4268_v49 }
 0xb9e   :  { %v12309_v35 = vadd.f32 %v4355_v13, %v4319_v61 }
 0xba0   :  { %v4374_v41 = vrot.slane %v12309_v35, 7 }
 0xba2   :  { %4386 = vrot.lane.b32.xlu2 %v4374_v41, %s10704_s23  ;;  %v4385_v1 = vsel %vm1647_vm7, 0.0, %v4374_v41 }
 0xba3   :  { %v4322_v43 = vpop.f32.mrf.mxu0  ;;  %v4399_v53 = vsel %vm1697_vm8, %v4385_v1, 0.0  ;;  %v4363_v40 = vpop.f32.mrf.mxu1 }
 0xba4   :  { %v4323_v20 = vadd.f32 %v4322_v43, %v4274_v2  ;;  %v4449_v46 = vmul.f32 %v12320_v34, %v4399_v53  ;;  %v4408_v17 = vmul.f32 %v12352_v30, %v4399_v53 }
 0xba6   :  { %v12324_v57 = vadd.f32 %v4359_v60, %v4323_v20  ;;  %v4412_v49 = vadd.f32 %v4408_v17, %v12309_v35 }
 0xba8   :  { %v4375_v21 = vrot.slane %v12324_v57, 7 }
 0xbaa   :  { %4457 = vrot.lane.b32.xlu2 %v4449_v46, %s10705_s7  ;;  %v4376_v36 = vsel %vm1647_vm7, %v4374_v41, %v4375_v21 }
 0xbab   :  { %v4326_v39 = vpop.f32.mrf.mxu0  ;;  %4388 = vrot.lane.b32.xlu1 %v4376_v36, %s10704_s23  ;;  %v4450_v54 = vmul.f32 %v12320_v34, %v4376_v36  ;;  %v4367_v28 = vpop.f32.mrf.mxu1  ;;  %v4409_v7 = vmul.f32 %v12352_v30, %v4376_v36 }
 0xbac   :  { %v4327_v42 = vadd.f32 %v4326_v39, %v4280_v15 }
 0xbad   :  { %v4413_v20 = vadd.f32 %v4409_v7, %v12324_v57 }
 0xbae   :  { %v12331_v47 = vadd.f32 %v4363_v40, %v4327_v42 }
 0xbb0   :  { %v4377_v44 = vrot.slane %v12331_v47, 7 }
 0xbb2   :  { %4459 = vrot.lane.b32.xlu2 %v4450_v54, %s10705_s7  ;;  %v4378_v18 = vsel %vm1647_vm7, %v4375_v21, %v4377_v44 }
 0xbb3   :  { %v4330_v55 = vpop.f32.mrf.mxu0  ;;  %4390 = vrot.lane.b32.xlu0 %v4378_v18, %s10704_s23  ;;  %v4401_v27 = vsel %vm1697_vm8, %v4378_v18, 0.0 }
 0xbb4   :  { %v4331_v63 = vadd.f32 %v4330_v55, %v4286_v12  ;;  %v4410_v32 = vmul.f32 %v12352_v30, %v4401_v27 }
 0xbb6   :  { %v12338_v59 = vadd.f32 %v4367_v28, %v4331_v63  ;;  %v4414_v54 = vadd.f32 %v4410_v32, %v12331_v47 }
 0xbb8   :  { %v4379_v5 = vrot.slane %v12338_v59, 7 }
 0xbba   :  { %v12342_v19 = vsel %vm1647_vm7, %v4377_v44, %v4379_v5  ;;  %v4451_v44 = vmul.f32 %v12320_v34, %v4401_v27 }
 0xbbb   :  { %4392 = vrot.lane.b32.xlu2 %v12342_v19, %s10704_s23  ;;  %v4411_v15 = vmul.f32 %v12352_v30, %v12342_v19 }
 0xbbd   :  { %v4415_v42 = vadd.f32 %v4411_v15, %v12338_v59 }
 0xbfc   :  { %v4387_v9 = vpop.permute.xlu2 %4386 }
 0xbfd   :  { %v4398_v4 = vsel %vm1647_vm7, 0.0, %v4387_v9 }
 0xbfe   :  { %v4403_v13 = vsel %vm1697_vm8, %v4398_v4, 0.0 }
 0xbff   :  { %v4417_v45 = vmul.f32 %v12320_v34, %v4403_v13  ;;  %v4425_v16 = vmul.f32 %v12352_v30, %v4403_v13 }
 0xc01   :  { %v4421_v29 = vsub.f32 %v4412_v49, %v4417_v45  ;;  %4433 = vrot.lane.b32.xlu0 %v4425_v16, %s10705_s7 }
 0xc03   :  { %v4477_v61 = vrot.slane %v4421_v29, 6 }
 0xc04   :  { %v4458_v51 = vpop.permute.xlu2 %4457 }
 0xc05   :  { %v4488_v38 = vsel %vm1863_vm9, 0.0, %v4477_v61 }
 0xc06   :  { %v4513_v41 = vsel %vm1936_vm10, %v4488_v38, 0.0 }
 0xc07   :  { %v4522_v60 = vmul.f32 %v12363_v24, %v4513_v41 }
 0xc09   :  { %v12369_v2 = vadd.f32 %v4522_v60, %v4421_v29 }
 0xc0c   :  { %v4460_v1 = vpop.permute.xlu2 %4459 }
 0xc15   :  { %v4393_v46 = vpop.permute.xlu2 %4392 }
 0xc16   :  { %v4420_v40 = vmul.f32 %v12320_v34, %v4393_v46 }
 0xc18   :  { %v4424_v12 = vsub.f32 %v4415_v42, %v4420_v40 }
 0xc1a   :  { %v4482_v5 = vrot.slane %v4424_v12, 6 }
 0xc1d   :  { %v4389_v43 = vpop.permute.xlu1 %4388 }
 0xc1e   :  { %v4418_v53 = vmul.f32 %v12320_v34, %v4389_v43  ;;  %v4426_v0 = vmul.f32 %v12352_v30, %v4389_v43 }
 0xc20   :  { %v4422_v21 = vsub.f32 %v4413_v20, %v4418_v53  ;;  %4435 = vrot.lane.b32.xlu1 %v4426_v0, %s10705_s7 }
 0xc22   :  { %v4478_v36 = vrot.slane %v4422_v21, 6 }
 0xc24   :  { %v4479_v39 = vsel %vm1863_vm9, %v4477_v61, %v4478_v36 }
 0xc25   :  { %v4391_v37 = vpop.permute.xlu0 %4390  ;;  %v4523_v58 = vmul.f32 %v12363_v24, %v4479_v39 }
 0xc26   :  { %v4405_v50 = vsel %vm1697_vm8, %v4391_v37, 0.0 }
 0xc27   :  { %v4419_v18 = vmul.f32 %v12320_v34, %v4405_v50  ;;  %v4427_v55 = vmul.f32 %v12352_v30, %v4405_v50  ;;  %v4527_v63 = vadd.f32 %v4523_v58, %v4422_v21 }
 0xc28   :  { %4461 = vrot.lane.b32.xlu1 %v4451_v44, %s10705_s7  ;;  %v12433_v44 = vperm.slane %v12349_v26, 6 }
 0xc29   :  { %v4423_v28 = vsub.f32 %v4414_v54, %v4419_v18  ;;  %4437 = vrot.lane.b32.xlu0 %v4427_v55, %s10705_s7 }
 0xc2b   :  { %v4480_v17 = vrot.slane %v4423_v28, 6 }
 0xc2d   :  { %v4481_v9 = vsel %vm1863_vm9, %v4478_v36, %v4480_v17  ;;  %v12395_v4 = vsel %vm1863_vm9, %v4480_v17, %v4482_v5 }
 0xc2e   :  { %v4515_v13 = vsel %vm1936_vm10, %v4481_v9, 0.0  ;;  %v4525_v49 = vmul.f32 %v12363_v24, %v12395_v4 }
 0xc2f   :  { %v4524_v45 = vmul.f32 %v12363_v24, %v4515_v13 }
 0xc30   :  { %v12402_v16 = vadd.f32 %v4525_v49, %v4424_v12  ;;  %v4452_v12 = vmul.f32 %v12320_v34, %v12342_v19 }
 0xc31   :  { %v4528_v29 = vadd.f32 %v4524_v45, %v4423_v28 }
 0xc73   :  { %v4434_v61 = vpop.permute.xlu0 %4433 }
 0xc74   :  { %v4445_v38 = vadd.f32 %v4434_v61, %v12309_v35 }
 0xc76   :  { %v4469_v60 = vadd.f32 %v4458_v51, %v4445_v38  ;;  %v4428_v51 = vmul.f32 %v12352_v30, %v4393_v46 }
 0xc78   :  { %v4493_v7 = vrot.slane %v4469_v60, 6 }
 0xc7a   :  { %4500 = vrot.lane.b32.xlu0 %v4493_v7, %s10704_s23 }
 0xc92   :  { %v4436_v43 = vpop.permute.xlu1 %4435 }
 0xc93   :  { %v4446_v20 = vadd.f32 %v4436_v43, %v12324_v57 }
 0xc95   :  { %v12407_v53 = vadd.f32 %v4460_v1, %v4446_v20  ;;  %v12421_v1 = vperm.slane %v12315_v10, 1 }
 0xc97   :  { %v4494_v0 = vrot.slane %v12407_v53, 6  ;;  %v4563_v40 = vmul.f32 %v12421_v1, %v4513_v41  ;;  %v4565_v61 = vmul.f32 %v12421_v1, %v4515_v13 }
 0xc99   :  { %v4495_v27 = vsel %vm1863_vm9, %v4493_v7, %v4494_v0 }
 0xc9a   :  { %4502 = vrot.lane.b32.xlu0 %v4495_v27, %s10704_s23  ;;  %v4462_v32 = vpop.permute.xlu1 %4461 }
 0xc9b   :  { %v4438_v21 = vpop.permute.xlu0 %4437 }
 0xc9c   :  { %v4447_v15 = vadd.f32 %v4438_v21, %v12331_v47 }
 0xc9e   :  { %v12413_v35 = vadd.f32 %v4462_v32, %v4447_v15 }
 0xca0   :  { %v4496_v36 = vrot.slane %v12413_v35, 6 }
 0xca2   :  { %4439 = vrot.lane.b32.xlu0 %v4428_v51, %s10705_s7  ;;  %v4497_v57 = vsel %vm1863_vm9, %v4494_v0, %v4496_v36 }
 0xca3   :  { %4504 = vrot.lane.b32.xlu1 %v4497_v57, %s10704_s23 }
 0xcab   :  { %4571 = vrot.lane.b32.xlu1 %v4563_v40, %s10705_s7 }
 0xcec   :  { %v4501_v47 = vpop.permute.xlu0 %4500 }
 0xced   :  { %v4512_v42 = vsel %vm1863_vm9, 0.0, %v4501_v47 }
 0xcee   :  { %v4517_v30 = vsel %vm1936_vm10, %v4512_v42, 0.0 }
 0xcef   :  { %v4531_v46 = vmul.f32 %v12421_v1, %v4517_v30  ;;  %v4539_v37 = vmul.f32 %v12363_v24, %v4517_v30 }
 0xcf1   :  { %v4535_v58 = vsub.f32 %v12369_v2, %v4531_v46  ;;  %4547 = vrot.lane.b32.xlu2 %v4539_v37, %s10705_s7  ;;  %v4564_v2 = vmul.f32 %v12421_v1, %v4479_v39 }
 0xcf3   :  { %v4591_v54 = vrot.slane %v4535_v58, 4 }
 0xcf5   :  { %v4602_v41 = vsel %vm2102_vm11, 0.0, %v4591_v54 }
 0xcf6   :  { %v4627_v50 = vsel %vm2175_vm12, %v4602_v41, 0.0 }
 0xcf7   :  { %v4636_v18 = vmul.f32 %v12433_v44, %v4627_v50 }
 0xcf9   :  { %4463 = vrot.lane.b32.xlu2 %v4452_v12, %s10705_s7  ;;  %v12442_v55 = vadd.f32 %v4636_v18, %v4535_v58 }
 0xd01   :  { %4573 = vrot.lane.b32.xlu2 %v4564_v2, %s10705_s7 }
 0xd0c   :  { %v4503_v28 = vpop.permute.xlu0 %4502 }
 0xd0d   :  { %v4532_v5 = vmul.f32 %v12421_v1, %v4503_v28  ;;  %v4540_v17 = vmul.f32 %v12363_v24, %v4503_v28 }
 0xd0f   :  { %v4536_v9 = vsub.f32 %v4527_v63, %v4532_v5  ;;  %4549 = vrot.lane.b32.xlu1 %v4540_v17, %s10705_s7 }
 0xd11   :  { %v4592_v49 = vrot.slane %v4536_v9, 4 }
 0xd13   :  { %v4593_v34 = vsel %vm2102_vm11, %v4591_v54, %v4592_v49 }
 0xd14   :  { %v4637_v19 = vmul.f32 %v12433_v44, %v4593_v34  ;;  %v4440_v57 = vpop.permute.xlu0 %4439 }
 0xd15   :  { %v4505_v45 = vpop.permute.xlu1 %4504  ;;  %v4448_v47 = vadd.f32 %v4440_v57, %v12338_v59 }
 0xd16   :  { %v4519_v39 = vsel %vm1936_vm10, %v4505_v45, 0.0  ;;  %v12454_v38 = vadd.f32 %v4637_v19, %v4536_v9  ;;  %v4732_v45 = vld [vmem:[%s14380_s11 + $0x8] sm:$0xff] }
 0xd17   :  { %v4533_v7 = vmul.f32 %v12421_v1, %v4519_v39  ;;  %v4541_v43 = vmul.f32 %v12363_v24, %v4519_v39  ;;  %4575 = vrot.lane.b32.xlu1 %v4565_v61, %s10705_s7 }
 0xd19   :  { %v12459_v63 = vsub.f32 %v4528_v29, %v4533_v7  ;;  %4551 = vrot.lane.b32.xlu0 %v4541_v43, %s10705_s7  ;;  %v4764_v7 = vand.u32 4294901760, %v4732_v45  ;;  %v4731_v43 = vld [vmem:[%s14380_s11] sm:$0xff] }
 0xd1b   :  { %v4594_v20 = vrot.slane %v12459_v63, 4 }
 0xd1d   :  { %v4595_v13 = vsel %vm2102_vm11, %v4592_v49, %v4594_v20  ;;  %v4572_v32 = vpop.permute.xlu1 %4571 }
 0xd1e   :  { %v12468_v0 = vsel %vm2175_vm12, %v4595_v13, 0.0 }
 0xd1f   :  { %v4638_v27 = vmul.f32 %v12433_v44, %v12468_v0 }
 0xd21   :  { %v12473_v21 = vadd.f32 %v4638_v27, %v12459_v63 }
 0xd4b   :  { %v4548_v29 = vpop.permute.xlu2 %4547 }
 0xd4c   :  { %v4559_v15 = vadd.f32 %v4548_v29, %v4469_v60  ;;  %v12486_v60 = vperm.slane %v12315_v10, 2  ;;  %v4826_v29 = vsub.f32 %v4732_v45, %v4764_v7 }
 0xd4e   :  { %v12475_v51 = vadd.f32 %v4572_v32, %v4559_v15  ;;  %v4671_v58 = vmul.f32 %v12486_v60, %v4627_v50  ;;  %v4766_v15 = vand.u32 4294901760, %v4731_v43 }
 0xd50   :  { %v4607_v40 = vrot.slane %v12475_v51, 4 }
 0xd52   :  { %4614 = vrot.lane.b32.xlu0 %v4607_v40, %s10704_s23 }
 0xd53   :  { %v4464_v42 = vpop.permute.xlu2 %4463 }
 0xd54   :  { %v12480_v30 = vadd.f32 %v4464_v42, %v4448_v47  ;;  %v4832_v47 = vsub.f32 %v4731_v43, %v4766_v15 }
 0xd56   :  { %v4498_v46 = vrot.slane %v12480_v30, 6 }
 0xd58   :  { %v4499_v37 = vsel %vm1863_vm9, %v4496_v36, %v4498_v46 }
 0xd59   :  { %4506 = vrot.lane.b32.xlu2 %v4499_v37, %s10704_s23  ;;  %v4833_v37 = vand.u32 4294901760, %v4832_v47 }
 0xd5b   :  { %v4574_v41 = vpop.permute.xlu2 %4573 }
 0xd61   :  { %4677 = vrot.lane.b32.xlu2 %v4671_v58, %s10705_s7 }
 0xd81   :  { %v4550_v54 = vpop.permute.xlu1 %4549 }
 0xd82   :  { %v4560_v59 = vadd.f32 %v4550_v54, %v12407_v53  ;;  %v4734_v53 = vld [vmem:[%s14380_s11 + $0x18] sm:$0xff]  ;;  %v4834_v54 = vsub.f32 %v4832_v47, %v4833_v37 }
 0xd83   :  { %v4760_v49 = vand.u32 4294901760, %v4734_v53 }
 0xd84   :  { %v4584_v12 = vadd.f32 %v4574_v41, %v4560_v59  ;;  %v4835_v59 = vand.u32 4294901760, %v4834_v54 }
 0xd85   :  { %v4814_v34 = vsub.f32 %v4734_v53, %v4760_v49  ;;  %4912 = vmatpush.msra.mxu1 %v4760_v49  ;;  %4761 = vmatpush.msra.mxu2 %v4760_v49 }
 0xd86   :  { %v4608_v18 = vrot.slane %v4584_v12, 4 }
 0xd87   :  { %v4815_v61 = vand.u32 4294901760, %v4814_v34  ;;  %4868 = vmatpush.msra.mxu0 %v4814_v34 }
 0xd88   :  { %v12492_v2 = vsel %vm2102_vm11, %v4607_v40, %v4608_v18  ;;  %v4827_v40 = vand.u32 4294901760, %v4826_v29 }
 0xd89   :  { %v4576_v5 = vpop.permute.xlu1 %4575  ;;  %v4816_v13 = vsub.f32 %v4814_v34, %v4815_v61 }
 0xd8a   :  { %v4828_v46 = vsub.f32 %v4826_v29, %v4827_v40 }
 0xd8b   :  { %v4552_v28 = vpop.permute.xlu0 %4551  ;;  %v4817_v32 = vand.u32 4294901760, %v4816_v13 }
 0xd8c   :  { %v4561_v36 = vadd.f32 %v4552_v28, %v12413_v35  ;;  %v4733_v35 = vld [vmem:[%s14380_s11 + $0x10] sm:$0xff]  ;;  %v4829_v58 = vand.u32 4294901760, %v4828_v46  ;;  %v12523_v28 = vperm.slane %v12349_v26, 7 }
 0xd8d   :  { %v4762_v19 = vand.u32 4294901760, %v4733_v35  ;;  %4818 = vmatpush.msra.mxu3 %v4817_v32 }
 0xd8e   :  { %v12495_v17 = vadd.f32 %v4576_v5, %v4561_v36  ;;  %v12526_v5 = vperm.slane %v12315_v10, 3  ;;  %v4708_v53 = vmul.f32 0.0, %v12523_v28  ;;  %v4725_v10 = vld [vmem:[#allocation9] sm:$0xff] }
 0xd8f   :  { %v4820_v39 = vsub.f32 %v4733_v35, %v4762_v19  ;;  %4914 = vmatpush.msra.mxu1 %v4762_v19  ;;  %4763 = vmatpush.msra.mxu2 %v4762_v19 }
 0xd90   :  { %v4610_v9 = vrot.slane %v12495_v17, 4  ;;  %v4717_v35 = vmul.f32 0.0, %v12526_v5 }
 0xd91   :  { %v4821_v27 = vand.u32 4294901760, %v4820_v39  ;;  %4871 = vmatpush.msra.mxu0 %v4820_v39  ;;  %4916 = vmatpush.msra.mxu1 %v4764_v7 }
 0xd92   :  { %v4611_v50 = vsel %vm2102_vm11, %v4608_v18, %v4610_v9  ;;  %4765 = vmatpush.msra.mxu2 %v4764_v7  ;;  %v4673_v18 = vmul.f32 %v12486_v60, %v12468_v0 }
 0xd93   :  { %4618 = vrot.lane.b32.xlu1 %v4611_v50, %s10704_s23  ;;  %v4822_v57 = vsub.f32 %v4820_v39, %v4821_v27  ;;  %4874 = vmatpush.msra.mxu0 %v4826_v29  ;;  %v4566_v39 = vmul.f32 %v12421_v1, %v12395_v4 }
 0xd94   :  { %4918 = vmatpush.msra.mxu1 %v4766_v15  ;;  %4767 = vmatpush.msra.mxu2 %v4766_v15 }
 0xd95   :  { %v4823_v42 = vand.u32 4294901760, %v4822_v57  ;;  %4877 = vmatpush.msra.mxu0 %v4832_v47 }
 0xd96   :  { %4959 = vmatpush.msrb.mxu2 %v4815_v61 }
 0xd97   :  { %4824 = vmatpush.msra.mxu3 %v4823_v42 }
 0xd98   :  { %4963 = vmatpush.msrb.mxu2 %v4821_v27 }
 0xd99   :  { %4830 = vmatpush.msra.mxu3 %v4829_v58 }
 0xd9a   :  { %4967 = vmatpush.msrb.mxu2 %v4827_v40 }
 0xd9b   :  { %4836 = vmatpush.msra.mxu3 %v4835_v59 }
 0xd9c   :  { %4971 = vmatpush.msrb.mxu2 %v4833_v37 }
 0xd9d   :  { %5002 = vmatpush.msrb.mxu3 %v4760_v49 }
 0xd9f   :  { %5004 = vmatpush.msrb.mxu3 %v4762_v19 }
 0xda1   :  { %5006 = vmatpush.msrb.mxu3 %v4764_v7 }
 0xda3   :  { %5008 = vmatpush.msrb.mxu3 %v4766_v15 }
 0xdb3   :  { %v12514_v41 = vpop.permute.xlu2 %4506 }
 0xdb4   :  { %v4542_v12 = vmul.f32 %v12363_v24, %v12514_v41 }
 0xdb6   :  { %4553 = vrot.lane.b32.xlu1 %v4542_v12, %s10705_s7 }
 0xdbb   :  { %v4678_v58 = vpop.permute.xlu2 %4677 }
 0xdbe   :  { %4681 = vrot.lane.b32.xlu1 %v4673_v18, %s10705_s7 }
 0xdc4   :  { %v4615_v36 = vpop.permute.xlu0 %4614 }
 0xdc5   :  { %v4626_v24 = vsel %vm2102_vm11, 0.0, %v4615_v36 }
 0xdc6   :  { %v4631_v50 = vsel %vm2175_vm12, %v4626_v24, 0.0 }
 0xdc7   :  { %v4645_v49 = vmul.f32 %v12486_v60, %v4631_v50  ;;  %v4653_v0 = vmul.f32 %v12433_v44, %v4631_v50 }
 0xdc9   :  { %v4649_v34 = vsub.f32 %v12442_v55, %v4645_v49  ;;  %4659 = vrot.lane.b32.xlu0 %v4653_v0, %s10705_s7 }
 0xdcb   :  { %v4712_v19 = vadd.f32 %v4708_v53, %v4649_v34  ;;  %v4709_v49 = vmul.f32 %v12523_v28, %v4649_v34 }
 0xdcd   :  { %v4721_v45 = vsub.f32 %v4712_v19, %v4717_v35 }
 0xdcf   :  { %v4727_v61 = vadd.f32 %v4725_v10, %v4721_v45 }
 0xdd1   :  { %4577 = vrot.lane.b32.xlu0 %v4566_v39, %s10705_s7  ;;  %v4737_v7 = vsel %vm415_vm1, %v4727_v61, 0  ;;  %v4726_v61 = vld [vmem:[#allocation9 + $0x8] sm:$0xff] }
 0xdd2   :  { %v12541_v43 = vand.u32 4294901760, %v4737_v7 }
 0xdd4   :  { %4838 = vmatmul.f32.vlgmr.msra.gmra.mxu3 %v12541_v43  ;;  %v4769_v13 = vsub.f32 %v4737_v7, %v12541_v43 }
 0xdd6   :  { %4880 = vmatmul.f32.vlgmr.msra.gmra.mxu0 %v4769_v13  ;;  %v4770_v55 = vand.u32 4294901760, %v4769_v13 }
 0xdd8   :  { %4922 = vmatmul.f32.vlgmr.msra.gmra.mxu1 %v4770_v55  ;;  %v4771_v27 = vsub.f32 %v4769_v13, %v4770_v55 }
 0xdd9   :  { %4616 = vrot.lane.b32.xlu0 %v12492_v2, %s10704_s23 }
 0xdda   :  { %v4772_v29 = vand.u32 4294901760, %v4771_v27 }
 0xddc   :  { %4773 = vmatmul.f32.vlgmr.msra.gmra.mxu2 %v4772_v29 }
 0xe05   :  { %v4619_v4 = vpop.permute.xlu1 %4618 }
 0xe06   :  { %v4633_v15 = vsel %vm2175_vm12, %v4619_v4, 0.0 }
 0xe07   :  { %v4647_v32 = vmul.f32 %v12486_v60, %v4633_v15  ;;  %v4655_v57 = vmul.f32 %v12433_v44, %v4633_v15  ;;  %v4534_v15 = vmul.f32 %v12421_v1, %v12514_v41 }
 0xe09   :  { %v4651_v40 = vsub.f32 %v12473_v21, %v4647_v32  ;;  %4663 = vrot.lane.b32.xlu2 %v4655_v57, %s10705_s7 }
 0xe0b   :  { %v4714_v47 = vadd.f32 %v4708_v53, %v4651_v40 }
 0xe0d   :  { %v4723_v42 = vsub.f32 %v4714_v47, %v4717_v35  ;;  %v4538_v47 = vsub.f32 %v12402_v16, %v4534_v15 }
 0xe0f   :  { %v4729_v46 = vadd.f32 %v4725_v10, %v4723_v42 }
 0xe11   :  { %v4743_v13 = vsel %vm415_vm1, %v4729_v46, 0  ;;  %v4596_v46 = vrot.slane %v4538_v47, 4 }
 0xe12   :  { %v4784_v34 = vand.u32 4294901760, %v4743_v13 }
 0xe14   :  { %v4785_v29 = vsub.f32 %v4743_v13, %v4784_v34 }
 0xe16   :  { %v4786_v57 = vand.u32 4294901760, %v4785_v29 }
 0xe18   :  { %v4787_v42 = vsub.f32 %v4785_v29, %v4786_v57 }
 0xe28   :  { %v4554_v59 = vpop.permute.xlu1 %4553 }
 0xe29   :  { %v4562_v12 = vadd.f32 %v4554_v59, %v12480_v30  ;;  %v4711_v59 = vmul.f32 %v12523_v28, %v4651_v40  ;;  %v5033_v28 = vld [vmem:[#allocation8 + $0x18] sm:$0xff]  ;;  %v5032_v40 = vld [vmem:[#allocation8 + $0x10] sm:$0xff] }
 0xe30   :  { %v4682_v19 = vpop.permute.xlu1 %4681 }
 0xe3b   :  { %v4660_v37 = vpop.permute.xlu0 %4659 }
 0xe3c   :  { %v4668_v2 = vadd.f32 %v4660_v37, %v12475_v51  ;;  %v4788_v37 = vand.u32 4294901760, %v4787_v42 }
 0xe3e   :  { %v4686_v54 = vadd.f32 %v4678_v58, %v4668_v2  ;;  %v4597_v2 = vsel %vm2102_vm11, %v4594_v20, %v4596_v46  ;;  %v4735_v46 = vperm.slane %v12349_v26, 0 }
 0xe3f   :  { %v4639_v58 = vmul.f32 %v12433_v44, %v4597_v2 }
 0xe40   :  { %4692 = vrot.lane.b32.xlu2 %v4686_v54, %s10704_s23 }
 0xe41   :  { %v4643_v1 = vadd.f32 %v4639_v58, %v4538_v47 }
 0xe43   :  { %v4578_v18 = vpop.permute.xlu0 %4577 }
 0xe44   :  { %v4586_v36 = vadd.f32 %v4578_v18, %v4562_v12 }
 0xe46   :  { %v4612_v24 = vrot.slane %v4586_v36, 4 }
 0xe48   :  { %v4613_v21 = vsel %vm2102_vm11, %v4610_v9, %v4612_v24 }
 0xe49   :  { %4620 = vrot.lane.b32.xlu1 %v4613_v21, %s10704_s23 }
 0xe4b   :  { %v4617_v50 = vpop.permute.xlu0 %4616 }
 0xe4c   :  { %v4646_v53 = vmul.f32 %v12486_v60, %v4617_v50 }
 0xe4e   :  { %v4650_v51 = vsub.f32 %v12454_v38, %v4646_v53 }
 0xe50   :  { %v4713_v0 = vadd.f32 %v4709_v49, %v4650_v51 }
 0xe63   :  { %v4664_v35 = vpop.permute.xlu2 %4663 }
 0xe64   :  { %v4670_v30 = vadd.f32 %v4664_v35, %v12495_v17  ;;  %v5031_v35 = vld [vmem:[#allocation8 + $0x8] sm:$0xff] }
 0xe66   :  { %v4688_v10 = vadd.f32 %v4682_v19, %v4670_v30  ;;  %v4774_v30 = vpop.f32.mrf.mxu2 }
 0xe67   :  { %v4775_v58 = vadd.f32 %v4774_v30, %v4735_v46 }
 0xe68   :  { %4696 = vrot.lane.b32.xlu0 %v4688_v10, %s10704_s23 }
 0xe9a   :  { %v4693_v45 = vpop.permute.xlu2 %4692 }
 0xe9b   :  { %v4718_v9 = vmul.f32 %v12526_v5, %v4693_v45  ;;  %v5030_v45 = vld [vmem:[#allocation8] sm:$0xff] }
 0xe9c   :  { %v5065_v13 = vand.u32 4294901760, %v5030_v45 }
 0xe9d   :  { %v4722_v39 = vsub.f32 %v4713_v0, %v4718_v9  ;;  %v5061_v0 = vand.u32 4294901760, %v5032_v40 }
 0xe9f   :  { %v4728_v7 = vadd.f32 %v4726_v61, %v4722_v39  ;;  %v5119_v10 = vsub.f32 %v5032_v40, %v5061_v0 }
 0xea1   :  { %v4740_v38 = vsel %vm415_vm1, %v4728_v7, 0  ;;  %v5120_v39 = vand.u32 4294901760, %v5119_v10 }
 0xea2   :  { %v4776_v55 = vand.u32 4294901760, %v4740_v38 }
 0xea4   :  { %4842 = vmatmul.f32.gmra.mxu3 %v4776_v55  ;;  %v4777_v27 = vsub.f32 %v4740_v38, %v4776_v55 }
 0xea6   :  { %4885 = vmatmul.f32.gmra.mxu0 %v4777_v27  ;;  %v4778_v17 = vand.u32 4294901760, %v4777_v27 }
 0xea8   :  { %4928 = vmatmul.f32.gmra.mxu1 %v4778_v17  ;;  %v4779_v4 = vsub.f32 %v4777_v27, %v4778_v17  ;;  %v5131_v27 = vsub.f32 %v5030_v45, %v5065_v13 }
 0xeaa   :  { %v4780_v32 = vand.u32 4294901760, %v4779_v4  ;;  %v5132_v4 = vand.u32 4294901760, %v5131_v27 }
 0xeac   :  { %4781 = vmatmul.f32.gmra.mxu2 %v4780_v32  ;;  %4846 = vmatmul.f32.gmra.mxu3 %v4784_v34 }
 0xeae   :  { %4890 = vmatmul.f32.gmra.mxu0 %v4785_v29 }
 0xeb0   :  { %4934 = vmatmul.f32.gmra.mxu1 %v4786_v57  ;;  %v5133_v57 = vsub.f32 %v5131_v27, %v5132_v4 }
 0xeb2   :  { %v5134_v47 = vand.u32 4294901760, %v5133_v57 }
 0xeb4   :  { %4789 = vmatmul.f32.gmra.mxu2 %v4788_v37 }
 0xebb   :  { %v4621_v54 = vpop.permute.xlu1 %4620 }
 0xebc   :  { %v4648_v41 = vmul.f32 %v12486_v60, %v4621_v54  ;;  %v4839_v60 = vpop.f32.mrf.mxu3 }
 0xebd   :  { %v4840_v54 = vadd.f32 %v4839_v60, %v4775_v58 }
 0xebe   :  { %v4652_v12 = vsub.f32 %v4643_v1, %v4648_v41  ;;  %v4881_v1 = vpop.f32.mrf.mxu0 }
 0xec0   :  { %v4715_v16 = vadd.f32 %v4711_v59, %v4652_v12  ;;  %v4882_v12 = vadd.f32 %v4881_v1, %v4840_v54 }
 0xeda   :  { %v4697_v18 = vpop.permute.xlu0 %4696 }
 0xedb   :  { %v4720_v36 = vmul.f32 %v12526_v5, %v4697_v18  ;;  %v5059_v5 = vand.u32 4294901760, %v5033_v28 }
 0xedd   :  { %v4724_v24 = vsub.f32 %v4715_v16, %v4720_v36  ;;  %v5113_v49 = vsub.f32 %v5033_v28, %v5059_v5  ;;  %5211 = vmatpush.msra.mxu3 %v5059_v5  ;;  %5060 = vmatpush.msrb.mxu0 %v5059_v5  ;;  %v4923_v16 = vpop.f32.mrf.mxu1 }
 0xedf   :  { %v4730_v21 = vadd.f32 %v4726_v61, %v4724_v24  ;;  %v5114_v19 = vand.u32 4294901760, %v5113_v49  ;;  %5167 = vmatpush.msra.mxu2 %v5113_v49  ;;  %5213 = vmatpush.msra.mxu3 %v5061_v0  ;;  %v4924_v24 = vadd.f32 %v4923_v16, %v4882_v12 }
 0xee0   :  { %5062 = vmatpush.msrb.mxu0 %v5061_v0 }
 0xee1   :  { %v4746_v50 = vsel %vm415_vm1, %v4730_v21, 0  ;;  %v5115_v61 = vsub.f32 %v5113_v49, %v5114_v19  ;;  %5170 = vmatpush.msra.mxu2 %v5119_v10 }
 0xee2   :  { %v4792_v63 = vand.u32 4294901760, %v4746_v50 }
 0xee3   :  { %v5116_v38 = vand.u32 4294901760, %v5115_v61 }
 0xee4   :  { %4850 = vmatmul.f32.gmra.mxu3 %v4792_v63  ;;  %v4793_v20 = vsub.f32 %v4746_v50, %v4792_v63 }
 0xee5   :  { %5117 = vmatpush.msrb.mxu1 %v5116_v38 }
 0xee6   :  { %4895 = vmatmul.f32.gmra.mxu0 %v4793_v20  ;;  %v4794_v44 = vand.u32 4294901760, %v4793_v20 }
 0xee8   :  { %4940 = vmatmul.f32.gmra.mxu1 %v4794_v44  ;;  %v4795_v53 = vsub.f32 %v4793_v20, %v4794_v44 }
 0xeea   :  { %v4796_v51 = vand.u32 4294901760, %v4795_v53 }
 0xeec   :  { %4797 = vmatmul.f32.gmra.mxu2 %v4796_v51  ;;  %5010 = vmatmul.f32.vlgmr.msrb.gmra.mxu3 %v12541_v43 }
 0xef4   :  { %4973 = vmatmul.f32.vlgmr.msrb.gmra.mxu2 %v12541_v43  ;;  %5014 = vmatmul.f32.gmra.mxu3 %v4776_v55  ;;  %v5063_v43 = vand.u32 4294901760, %v5031_v35 }
 0xef6   :  { %v5125_v7 = vsub.f32 %v5031_v35, %v5063_v43  ;;  %5215 = vmatpush.msra.mxu3 %v5063_v43  ;;  %5064 = vmatpush.msrb.mxu0 %v5063_v43 }
 0xef8   :  { %5173 = vmatpush.msra.mxu2 %v5125_v7  ;;  %5217 = vmatpush.msra.mxu3 %v5065_v13 }
 0xef9   :  { %5066 = vmatpush.msrb.mxu0 %v5065_v13 }
 0xefa   :  { %5176 = vmatpush.msra.mxu2 %v5131_v27 }
 0xefb   :  { %5258 = vmatpush.msra.mxu0 %v5114_v19 }
 0xefc   :  { %4977 = vmatmul.f32.gmra.mxu2 %v4776_v55  ;;  %5018 = vmatmul.f32.gmra.mxu3 %v4784_v34  ;;  %v5121_v55 = vsub.f32 %v5119_v10, %v5120_v39 }
 0xefd   :  { %5262 = vmatpush.msra.mxu0 %v5120_v39 }
 0xefe   :  { %v5122_v17 = vand.u32 4294901760, %v5121_v55 }
 0xf00   :  { %5123 = vmatpush.msrb.mxu1 %v5122_v17 }
 0xf04   :  { %4981 = vmatmul.f32.gmra.mxu2 %v4784_v34  ;;  %5022 = vmatmul.f32.gmra.mxu3 %v4792_v63  ;;  %v5126_v34 = vand.u32 4294901760, %v5125_v7 }
 0xf06   :  { %v5127_v29 = vsub.f32 %v5125_v7, %v5126_v34  ;;  %5266 = vmatpush.msra.mxu0 %v5126_v34 }
 0xf08   :  { %v5128_v32 = vand.u32 4294901760, %v5127_v29  ;;  %5270 = vmatpush.msra.mxu0 %v5132_v4 }
 0xf0a   :  { %5129 = vmatpush.msrb.mxu1 %v5128_v32 }
 0xf0c   :  { %4985 = vmatmul.f32.gmra.mxu2 %v4792_v63  ;;  %5135 = vmatpush.msrb.mxu1 %v5134_v47 }
 0xf0e   :  { %5301 = vmatpush.msra.mxu1 %v5059_v5 }
 0xf10   :  { %5303 = vmatpush.msra.mxu1 %v5061_v0 }
 0xf12   :  { %5305 = vmatpush.msra.mxu1 %v5063_v43 }
 0xf14   :  { %5307 = vmatpush.msra.mxu1 %v5065_v13 }
 0xf23   :  { %v4886_v21 = vpop.f32.mrf.mxu0 }
 0xf25   :  { %v4929_v51 = vpop.f32.mrf.mxu1 }
 0xf27   :  { %v4843_v9 = vpop.f32.mrf.mxu3 }
 0xf2b   :  { %v4891_v19 = vpop.f32.mrf.mxu0 }
 0xf2d   :  { %v4935_v7 = vpop.f32.mrf.mxu1 }
 0xf2f   :  { %v4782_v15 = vpop.f32.mrf.mxu2  ;;  %v4847_v42 = vpop.f32.mrf.mxu3 }
 0xf30   :  { %v4783_v59 = vadd.f32 %v4782_v15, %v4735_v46 }
 0xf32   :  { %v4844_v36 = vadd.f32 %v4843_v9, %v4783_v59 }
 0xf34   :  { %v4887_v53 = vadd.f32 %v4886_v21, %v4844_v36 }
 0xf36   :  { %v4930_v49 = vadd.f32 %v4929_v51, %v4887_v53 }
 0xf37   :  { %v4790_v37 = vpop.f32.mrf.mxu2 }
 0xf38   :  { %v4791_v20 = vadd.f32 %v4790_v37, %v4735_v46 }
 0xf3a   :  { %v4848_v40 = vadd.f32 %v4847_v42, %v4791_v20 }
 0xf3c   :  { %v4892_v9 = vadd.f32 %v4891_v19, %v4848_v40 }
 0xf3e   :  { %v4936_v34 = vadd.f32 %v4935_v7, %v4892_v9 }
 0xf63   :  { %v4896_v32 = vpop.f32.mrf.mxu0 }
 0xf65   :  { %v4941_v58 = vpop.f32.mrf.mxu1 }
 0xf67   :  { %v4851_v2 = vpop.f32.mrf.mxu3 }
 0xf6f   :  { %v4798_v41 = vpop.f32.mrf.mxu2  ;;  %v5011_v18 = vpop.f32.mrf.mxu3 }
 0xf70   :  { %v4799_v43 = vadd.f32 %v4798_v41, %v4735_v46 }
 0xf72   :  { %v4852_v38 = vadd.f32 %v4851_v2, %v4799_v43 }
 0xf74   :  { %v4897_v42 = vadd.f32 %v4896_v32, %v4852_v38 }
 0xf76   :  { %v4942_v1 = vadd.f32 %v4941_v58, %v4897_v42 }
 0xf77   :  { %v4974_v50 = vpop.f32.mrf.mxu2  ;;  %v5015_v5 = vpop.f32.mrf.mxu3 }
 0xf78   :  { %v4975_v63 = vadd.f32 %v4974_v50, %v4924_v24 }
 0xf7a   :  { %v5012_v44 = vadd.f32 %v5011_v18, %v4975_v63 }
 0xf7c   :  { %v5026_v28 = vmax.f32 %v5012_v44, 0.0 }
 0xf7e   :  { %v5036_v60 = vsel %vm415_vm1, %v5026_v28, 0 }
 0xf7f   :  { %v12583_v0 = vand.u32 4294901760, %v5036_v60  ;;  %v4978_v35 = vpop.f32.mrf.mxu2  ;;  %v5019_v17 = vpop.f32.mrf.mxu3 }
 0xf80   :  { %v4979_v30 = vadd.f32 %v4978_v35, %v4930_v49 }
 0xf81   :  { %v5068_v10 = vsub.f32 %v5036_v60, %v12583_v0  ;;  %5137 = vmatmul.f32.vlgmr.msrb.gmra.mxu1 %v12583_v0 }
 0xf82   :  { %v5016_v45 = vadd.f32 %v5015_v5, %v4979_v30 }
 0xf83   :  { %v5069_v61 = vand.u32 4294901760, %v5068_v10  ;;  %5179 = vmatmul.f32.vlgmr.msra.gmra.mxu2 %v5068_v10 }
 0xf84   :  { %v5027_v39 = vmax.f32 %v5016_v45, 0.0 }
 0xf85   :  { %v5070_v13 = vsub.f32 %v5068_v10, %v5069_v61  ;;  %5221 = vmatmul.f32.vlgmr.msra.gmra.mxu3 %v5069_v61  ;;  %v5034_v10 = vperm.slane %v12349_v26, 1  ;;  %v5326_v26 = vstv %s10449_s3 }
 0xf86   :  { %v5039_v55 = vsel %vm415_vm1, %v5027_v39, 0 }
 0xf87   :  { %v5075_v27 = vand.u32 4294901760, %v5039_v55  ;;  %v4982_v29 = vpop.f32.mrf.mxu2  ;;  %v5071_v4 = vand.u32 4294901760, %v5070_v13  ;;  %v5023_v18 = vpop.f32.mrf.mxu3 }
 0xf88   :  { %v4983_v15 = vadd.f32 %v4982_v29, %v4936_v34 }
 0xf89   :  { %5072 = vmatmul.f32.vlgmr.msrb.gmra.mxu0 %v5071_v4  ;;  %5141 = vmatmul.f32.gmra.mxu1 %v5075_v27  ;;  %v5076_v57 = vsub.f32 %v5039_v55, %v5075_v27 }
 0xf8a   :  { %v5020_v47 = vadd.f32 %v5019_v17, %v4983_v15  ;;  %v5332_v15 = vstv %s5331_s18 }
 0xf8b   :  { %5184 = vmatmul.f32.gmra.mxu2 %v5076_v57  ;;  %v5077_v46 = vand.u32 4294901760, %v5076_v57 }
 0xf8c   :  { %v5028_v37 = vmax.f32 %v5020_v47, 0.0 }
 0xf8d   :  { %5227 = vmatmul.f32.gmra.mxu3 %v5077_v46  ;;  %v5078_v2 = vsub.f32 %v5076_v57, %v5077_v46  ;;  %v5333_v46 = vmul.f32 %v5332_v15, %v12287_v56 }
 0xf8e   :  { %v5042_v54 = vsel %vm415_vm1, %v5028_v37, 0 }
 0xf8f   :  { %v5083_v41 = vand.u32 4294901760, %v5042_v54  ;;  %v4986_v59 = vpop.f32.mrf.mxu2  ;;  %v5079_v12 = vand.u32 4294901760, %v5078_v2 }
 0xf90   :  { %v4987_v16 = vadd.f32 %v4986_v59, %v4942_v1 }
 0xf91   :  { %5080 = vmatmul.f32.gmra.mxu0 %v5079_v12  ;;  %5145 = vmatmul.f32.gmra.mxu1 %v5083_v41  ;;  %v5084_v36 = vsub.f32 %v5042_v54, %v5083_v41 }
 0xf92   :  { %v5024_v24 = vadd.f32 %v5023_v18, %v4987_v16 }
 0xf93   :  { %5189 = vmatmul.f32.gmra.mxu2 %v5084_v36  ;;  %v5085_v21 = vand.u32 4294901760, %v5084_v36 }
 0xf94   :  { %v5029_v50 = vmax.f32 %v5024_v24, 0.0 }
 0xf95   :  { %5233 = vmatmul.f32.gmra.mxu3 %v5085_v21  ;;  %v5086_v63 = vsub.f32 %v5084_v36, %v5085_v21 }
 0xf96   :  { %v5045_v20 = vsel %vm415_vm1, %v5029_v50, 0  ;;  %v5334_v50 = vmul.f32 %v5332_v15, %v12295_v14 }
 0xf97   :  { %v5091_v44 = vand.u32 4294901760, %v5045_v20  ;;  %v5087_v53 = vand.u32 4294901760, %v5086_v63 }
 0xf99   :  { %5088 = vmatmul.f32.gmra.mxu0 %v5087_v53  ;;  %5149 = vmatmul.f32.gmra.mxu1 %v5091_v44  ;;  %v5092_v51 = vsub.f32 %v5045_v20, %v5091_v44 }
 0xf9b   :  { %5194 = vmatmul.f32.gmra.mxu2 %v5092_v51  ;;  %v5093_v28 = vand.u32 4294901760, %v5092_v51 }
 0xf9d   :  { %5239 = vmatmul.f32.gmra.mxu3 %v5093_v28  ;;  %v5094_v5 = vsub.f32 %v5092_v51, %v5093_v28 }
 0xf9f   :  { %v5095_v40 = vand.u32 4294901760, %v5094_v5 }
 0xfa1   :  { %5096 = vmatmul.f32.gmra.mxu0 %v5095_v40  ;;  %5309 = vmatmul.f32.vlgmr.msra.gmra.mxu1 %v12583_v0 }
 0xfa9   :  { %5272 = vmatmul.f32.vlgmr.msra.gmra.mxu0 %v12583_v0  ;;  %5313 = vmatmul.f32.gmra.mxu1 %v5075_v27 }
 0xfb1   :  { %5276 = vmatmul.f32.gmra.mxu0 %v5075_v27  ;;  %5317 = vmatmul.f32.gmra.mxu1 %v5083_v41 }
 0xfb9   :  { %5280 = vmatmul.f32.gmra.mxu0 %v5083_v41  ;;  %5321 = vmatmul.f32.gmra.mxu1 %v5091_v44 }
 0xfc1   :  { %5284 = vmatmul.f32.gmra.mxu0 %v5091_v44 }
 0xffe   :  { %v5138_v60 = vpop.f32.mrf.mxu1 }
0x1006   :  { %v5073_v49 = vpop.f32.mrf.mxu0  ;;  %v5142_v35 = vpop.f32.mrf.mxu1 }
0x1007   :  { %v5074_v9 = vadd.f32 %v5073_v49, %v5034_v10  ;;  %v5180_v61 = vpop.f32.mrf.mxu2 }
0x1008   :  { %v5222_v0 = vpop.f32.mrf.mxu3 }
0x1009   :  { %v5139_v39 = vadd.f32 %v5138_v60, %v5074_v9 }
0x100b   :  { %v5181_v13 = vadd.f32 %v5180_v61, %v5139_v39 }
0x100d   :  { %v5223_v27 = vadd.f32 %v5222_v0, %v5181_v13  ;;  %v5336_v0 = vmul.f32 %v5332_v15, %v12303_v31 }
0x100e   :  { %v5081_v30 = vpop.f32.mrf.mxu0  ;;  %v5146_v19 = vpop.f32.mrf.mxu1 }
0x100f   :  { %v5082_v38 = vadd.f32 %v5081_v30, %v5034_v10  ;;  %v5185_v34 = vpop.f32.mrf.mxu2 }
0x1010   :  { %v5228_v32 = vpop.f32.mrf.mxu3 }
0x1011   :  { %v5143_v17 = vadd.f32 %v5142_v35, %v5082_v38  ;;  %v5335_v35 = vmul.f32 %v5332_v15, %v12299_v11 }
0x1013   :  { %v5186_v57 = vadd.f32 %v5185_v34, %v5143_v17 }
0x1015   :  { %v5229_v2 = vadd.f32 %v5228_v32, %v5186_v57 }
0x1016   :  { %v5089_v43 = vpop.f32.mrf.mxu0  ;;  %v5150_v45 = vpop.f32.mrf.mxu1 }
0x1017   :  { %v5090_v47 = vadd.f32 %v5089_v43, %v5034_v10  ;;  %v5190_v41 = vpop.f32.mrf.mxu2 }
0x1018   :  { %v5234_v21 = vpop.f32.mrf.mxu3 }
0x1019   :  { %v5147_v54 = vadd.f32 %v5146_v19, %v5090_v47 }
0x101b   :  { %v5191_v18 = vadd.f32 %v5190_v41, %v5147_v54 }
0x101d   :  { %v5235_v20 = vadd.f32 %v5234_v21, %v5191_v18 }
0x101e   :  { %v5097_v7 = vpop.f32.mrf.mxu0  ;;  %v5310_v55 = vpop.f32.mrf.mxu1 }
0x101f   :  { %v5098_v36 = vadd.f32 %v5097_v7, %v5034_v10  ;;  %v5195_v40 = vpop.f32.mrf.mxu2 }
0x1020   :  { %v5240_v19 = vpop.f32.mrf.mxu3 }
0x1021   :  { %v5151_v56 = vadd.f32 %v5150_v45, %v5098_v36 }
0x1023   :  { %v5196_v60 = vadd.f32 %v5195_v40, %v5151_v56 }
0x1025   :  { %v5241_v10 = vadd.f32 %v5240_v19, %v5196_v60 }
0x1026   :  { %v5273_v29 = vpop.f32.mrf.mxu0  ;;  %v5314_v58 = vpop.f32.mrf.mxu1 }
0x1027   :  { %v5274_v4 = vadd.f32 %v5273_v29, %v5223_v27 }
0x1029   :  { %v5311_v42 = vadd.f32 %v5310_v55, %v5274_v4  ;;  %v10706_v55 = vmov 32.0  }
0x102a   :  { %10539 = vrcp.f32 %v10706_v55 }
0x102b   :  { %v5327_v37 = vmul.f32 %v5326_v26, %v5311_v42 }
0x102d   :  { %v5337_v1 = vadd.f32 %v5333_v46, %v5327_v37 }
0x102e   :  { %v5277_v59 = vpop.f32.mrf.mxu0  ;;  %v5318_v53 = vpop.f32.mrf.mxu1 }
0x102f   :  { %v5278_v12 = vadd.f32 %v5277_v59, %v5229_v2  ;;  %v5341_v16 = vsel %vm415_vm1, %v5337_v1, 0.0 }
0x1030   :  { %5342 = vadd.xlane.f32.xlu1 %v5341_v16  ;;  %v10540_v11 = vpop.eup %10539 }
0x1031   :  { %v5315_v24 = vadd.f32 %v5314_v58, %v5278_v12  ;;  %v5354_v34 = vmul.f32 32.0, %v10540_v11  ;;  %vm5358_vm14 = vweird.f32 %v10540_v11 }
0x1033   :  { %v5328_v63 = vmul.f32 %v5326_v26, %v5315_v24  ;;  %v5355_v27 = vsub.f32 1.0, %v5354_v34 }
0x1035   :  { %v5338_v44 = vadd.f32 %v5334_v50, %v5328_v63  ;;  %v5356_v17 = vmul.f32 %v10540_v11, %v5355_v27 }
0x1036   :  { %v5281_v51 = vpop.f32.mrf.mxu0  ;;  %v5322_v61 = vpop.f32.mrf.mxu1 }
0x1037   :  { %v5282_v28 = vadd.f32 %v5281_v51, %v5235_v20  ;;  %v5344_v5 = vsel %vm415_vm1, %v5338_v44, 0.0  ;;  %v5357_v29 = vadd.f32 %v10540_v11, %v5356_v17 }
0x1038   :  { %5345 = vadd.xlane.f32.xlu2 %v5344_v5 }
0x1039   :  { %v5319_v49 = vadd.f32 %v5318_v53, %v5282_v28  ;;  %v12601_v4 = vsel %vm5358_vm14, %v10540_v11, %v5357_v29 }
0x103a   :  { %14502 = vst [vmem:[#allocation35_spill] sm:$0xff] %v12601_v4 }
0x103b   :  { %v5329_v30 = vmul.f32 %v5326_v26, %v5319_v49 }
0x103d   :  { %v5339_v43 = vadd.f32 %v5335_v35, %v5329_v30 }
0x103e   :  { %v5285_v14 = vpop.f32.mrf.mxu0 }
0x103f   :  { %v5286_v9 = vadd.f32 %v5285_v14, %v5241_v10  ;;  %v5347_v45 = vsel %vm415_vm1, %v5339_v43, 0.0 }
0x1040   :  { %5348 = vadd.xlane.f32.xlu2 %v5347_v45 }
0x1041   :  { %v5323_v39 = vadd.f32 %v5322_v61, %v5286_v9 }
0x1043   :  { %v5330_v7 = vmul.f32 %v5326_v26, %v5323_v39 }
0x1045   :  { %v5340_v13 = vadd.f32 %v5336_v0, %v5330_v7 }
0x1047   :  { %v5350_v38 = vsel %vm415_vm1, %v5340_v13, 0.0 }
0x1048   :  { %5351 = vadd.xlane.f32.xlu0 %v5350_v38 }
0x10a3   :  { %v5343_v32 = vpop.xlane.xlu1 %5342 }
0x10a4   :  { %v5360_v57 = vmul.f32 %v12601_v4, %v5343_v32 }
0x10a6   :  { %v5364_v47 = vsub.f32 %v5337_v1, %v5360_v57 }
0x10a8   :  { %v5368_v31 = vmul.f32 %v5364_v47, %v5364_v47 }
0x10aa   :  { %v5372_v15 = vsel %vm415_vm1, %v5368_v31, 0.0 }
0x10ab   :  { %v5346_v26 = vpop.xlane.xlu2 %5345  ;;  %5373 = vadd.xlane.f32.xlu0 %v5372_v15 }
0x10ac   :  { %v5361_v42 = vmul.f32 %v12601_v4, %v5346_v26 }
0x10ae   :  { %v5365_v46 = vsub.f32 %v5338_v44, %v5361_v42 }
0x10b0   :  { %v5369_v37 = vmul.f32 %v5365_v46, %v5365_v46 }
0x10b2   :  { %v5375_v58 = vsel %vm415_vm1, %v5369_v37, 0.0 }
0x10b3   :  { %v5349_v2 = vpop.xlane.xlu2 %5348  ;;  %5376 = vadd.xlane.f32.xlu1 %v5375_v58 }
0x10b4   :  { %v5362_v54 = vmul.f32 %v12601_v4, %v5349_v2 }
0x10b6   :  { %v12608_v41 = vsub.f32 %v5339_v43, %v5362_v54  ;;  %v10574_v43 = vld [vmem:[%s14382_s13] sm:$0xff] }
0x10b7   :  { %v12625_v14 = vperm.slane %v10574_v43, 2  ;;  %v12627_v39 = vperm.slane %v10574_v43, 3 }
0x10b8   :  { %v5370_v1 = vmul.f32 %v12608_v41, %v12608_v41 }
0x10ba   :  { %v5378_v59 = vsel %vm415_vm1, %v5370_v1, 0.0 }
0x10bb   :  { %5379 = vadd.xlane.f32.xlu1 %v5378_v59  ;;  %v5352_v12 = vpop.xlane.xlu0 %5351 }
0x10bc   :  { %v5363_v16 = vmul.f32 %v12601_v4, %v5352_v12 }
0x10be   :  { %v12614_v18 = vsub.f32 %v5340_v13, %v5363_v16 }
0x10c0   :  { %v5371_v36 = vmul.f32 %v12614_v18, %v12614_v18 }
0x10c2   :  { %v5381_v24 = vsel %vm415_vm1, %v5371_v36, 0.0 }
0x10c3   :  { %5382 = vadd.xlane.f32.xlu2 %v5381_v24 }
0x111e   :  { %v5374_v21 = vpop.xlane.xlu0 %5373 }
0x111f   :  { %v5384_v50 = vmul.f32 %v5374_v21, %v12601_v4 }
0x1121   :  { %v5388_v63 = vadd.f32 0.0001, %v5384_v50 }
0x1123   :  { %10541 = vrsqrt.f32 %v5388_v63  ;;  %vm5398_vm0 = vweird.f32 %v5388_v63 }
0x1126   :  { %v5377_v20 = vpop.xlane.xlu1 %5376 }
0x1127   :  { %v5385_v56 = vmul.f32 %v5377_v20, %v12601_v4 }
0x1129   :  { %v10542_v44 = vpop.eup %10541  ;;  %v5389_v53 = vadd.f32 0.0001, %v5385_v56 }
0x112a   :  { %v5393_v51 = vmul.f32 %v10542_v44, %v5388_v63  ;;  %vm5399_vm15 = vweird.f32 %v10542_v44 }
0x112b   :  { %10543 = vrsqrt.f32 %v5389_v53  ;;  %vm5400_vm2 = vmor %vm5398_vm0, %vm5399_vm15  ;;  %vm5408_vm4 = vweird.f32 %v5389_v53 }
0x112c   :  { %v5394_v28 = vmul.f32 %v10542_v44, %v5393_v51 }
0x112e   :  { %v5395_v5 = vmul.f32 0.5, %v5394_v28  ;;  %v5380_v40 = vpop.xlane.xlu1 %5379 }
0x112f   :  { %v5386_v60 = vmul.f32 %v5380_v40, %v12601_v4 }
0x1130   :  { %v5396_v49 = vsub.f32 1.5, %v5395_v5 }
0x1131   :  { %v10544_v35 = vpop.eup %10543  ;;  %v5390_v30 = vadd.f32 0.0001, %v5386_v60 }
0x1132   :  { %v5397_v19 = vmul.f32 %v10542_v44, %v5396_v49  ;;  %v5403_v10 = vmul.f32 %v10544_v35, %v5389_v53  ;;  %vm5409_vm3 = vweird.f32 %v10544_v35  ;;  %v14503_v49 = vld [vmem:[#allocation20_spill] sm:$0xff] }
0x1133   :  { %10545 = vrsqrt.f32 %v5390_v30  ;;  %vm5410_vm5 = vmor %vm5408_vm4, %vm5409_vm3  ;;  %vm5418_vm14 = vweird.f32 %v5390_v30 }
0x1134   :  { %v5401_v9 = vsel %vm5400_vm2, %v10542_v44, %v5397_v19  ;;  %v5404_v45 = vmul.f32 %v10544_v35, %v5403_v10  ;;  %v14505_v10 = vld [vmem:[#allocation15_spill] sm:$0xff] }
0x1135   :  { %v5432_v61 = vmul.f32 %v5401_v9, %v5364_v47 }
0x1136   :  { %v5405_v0 = vmul.f32 0.5, %v5404_v45  ;;  %v5383_v7 = vpop.xlane.xlu2 %5382 }
0x1137   :  { %v5387_v13 = vmul.f32 %v5383_v7, %v12601_v4  ;;  %v5437_v38 = vmul.f32 %v12625_v14, %v5432_v61  ;;  %v14506_v7 = vld [vmem:[#allocation24_spill] sm:$0xff] }
0x1138   :  { %v5406_v55 = vsub.f32 1.5, %v5405_v0 }
0x1139   :  { %v10546_v11 = vpop.eup %10545  ;;  %v5391_v34 = vadd.f32 0.0001, %v5387_v13  ;;  %v5442_v27 = vadd.f32 %v12627_v39, %v5437_v38  ;;  %v14507_v13 = vld [vmem:[#allocation21_spill] sm:$0xff]  ;;  %v14508_v38 = vld [vmem:[#allocation18_spill] sm:$0xff] }
0x113a   :  { %v5407_v17 = vmul.f32 %v10544_v35, %v5406_v55  ;;  %v5413_v29 = vmul.f32 %v10546_v11, %v5390_v30  ;;  %vm5419_vm13 = vweird.f32 %v10546_v11  ;;  %v14504_v30 = vld [vmem:[#allocation17_spill] sm:$0xff] }
0x113b   :  { %10547 = vrsqrt.f32 %v5391_v34  ;;  %v5450_v31 = vsel %vm415_vm1, %v5442_v27, 0  ;;  %vm5420_vm15 = vmor %vm5418_vm14, %vm5419_vm13  ;;  %vm5428_vm2 = vweird.f32 %v5391_v34 }
0x113c   :  { %v5411_v32 = vsel %vm5410_vm5, %v10544_v35, %v5407_v17  ;;  %v5414_v57 = vmul.f32 %v10546_v11, %v5413_v29  ;;  %v5471_v37 = vand.u32 4294901760, %v5450_v31  ;;  %v14509_v17 = vld [vmem:[#allocation27_spill] sm:$0xff]  ;;  %v14510_v29 = vld [vmem:[#allocation25_spill] sm:$0xff] }
0x113d   :  { %v5433_v47 = vmul.f32 %v5411_v32, %v5365_v46 }
0x113e   :  { %v5415_v15 = vmul.f32 0.5, %v5414_v57  ;;  %v5527_v36 = vsub.f32 %v5450_v31, %v5471_v37  ;;  %v14511_v57 = vld [vmem:[#allocation22_spill] sm:$0xff]  ;;  %v14513_v31 = vld [vmem:[#allocation19_spill] sm:$0xff] }
0x113f   :  { %v5438_v26 = vmul.f32 %v12625_v14, %v5433_v47  ;;  %v14512_v47 = vld [vmem:[#allocation29_spill] sm:$0xff] }
0x1140   :  { %v5416_v42 = vsub.f32 1.5, %v5415_v15  ;;  %v5528_v44 = vand.u32 4294901760, %v5527_v36  ;;  %v14514_v15 = vld [vmem:[#allocation26_spill] sm:$0xff] }
0x1141   :  { %v10548_v58 = vpop.eup %10547  ;;  %v5443_v2 = vadd.f32 %v12627_v39, %v5438_v26  ;;  %v14515_v26 = vld [vmem:[#allocation28_spill] sm:$0xff] }
0x1142   :  { %v5417_v54 = vmul.f32 %v10546_v11, %v5416_v42  ;;  %v5423_v1 = vmul.f32 %v10548_v58, %v5391_v34  ;;  %vm5429_vm0 = vweird.f32 %v10548_v58  ;;  %v5529_v40 = vsub.f32 %v5527_v36, %v5528_v44  ;;  %v14516_v42 = vld [vmem:[#allocation23_spill] sm:$0xff] }
0x1143   :  { %v5453_v59 = vsel %vm415_vm1, %v5443_v2, 0  ;;  %vm5430_vm3 = vmor %vm5428_vm2, %vm5429_vm0 }
0x1144   :  { %v5421_v12 = vsel %vm5420_vm15, %v10546_v11, %v5417_v54  ;;  %v5424_v16 = vmul.f32 %v10548_v58, %v5423_v1  ;;  %v5469_v46 = vand.u32 4294901760, %v5453_v59  ;;  %v5530_v43 = vand.u32 4294901760, %v5529_v40  ;;  %v10477_v54 = vld [vmem:[%s14374_s5 + $0x18] sm:$0xff] }
0x1145   :  { %v5434_v24 = vmul.f32 %v5421_v12, %v12608_v41  ;;  %v6006_v1 = vand.u32 4294901760, %v10477_v54  ;;  %v10476_v12 = vld [vmem:[%s14374_s5 + $0x10] sm:$0xff] }
0x1146   :  { %v5425_v21 = vmul.f32 0.5, %v5424_v16  ;;  %5470 = vmatpush.xpose.msrb.mxu2 %v5469_v46  ;;  %5605 = vmatpush.xpose.msrb.mxu1 %v5469_v46  ;;  %v5521_v50 = vsub.f32 %v5453_v59, %v5469_v46 }
0x1147   :  { %v5439_v63 = vmul.f32 %v12625_v14, %v5434_v24 }
0x1148   :  { %v5426_v20 = vsub.f32 1.5, %v5425_v21  ;;  %5565 = vmatpush.xpose.msrb.mxu0 %v5521_v50  ;;  %v5522_v56 = vand.u32 4294901760, %v5521_v50 }
0x1149   :  { %v5444_v53 = vadd.f32 %v12627_v39, %v5439_v63 }
0x114a   :  { %v5427_v51 = vmul.f32 %v10548_v58, %v5426_v20  ;;  %5472 = vmatpush.xpose.msrb.mxu2 %v5471_v37  ;;  %5607 = vmatpush.xpose.msrb.mxu1 %v5471_v37  ;;  %v5523_v28 = vsub.f32 %v5521_v50, %v5522_v56 }
0x114b   :  { %v5708_v35 = vsel %vm415_vm1, %v5444_v53, 0 }
0x114c   :  { %v5431_v41 = vsel %vm5430_vm3, %v10548_v58, %v5427_v51  ;;  %5568 = vmatpush.xpose.msrb.mxu0 %v5527_v36  ;;  %v5524_v5 = vand.u32 4294901760, %v5523_v28  ;;  %v5729_v9 = vand.u32 4294901760, %v5708_v35  ;;  %v6008_v36 = vand.u32 4294901760, %v10476_v12 }
0x114d   :  { %v5435_v60 = vmul.f32 %v5431_v41, %v12614_v18  ;;  %5478 = vmatmul.f32.vlgmr.msrb.gmra.mxu2 %v14503_v49  ;;  %5611 = vmatmul.f32.vlgmr.msrb.gmra.mxu1 %v14504_v30 }
0x114e   :  { %5650 = vmatpush.xpose.msra.mxu2 %v5522_v56  ;;  %5525 = vmatpush.xpose.msrb.mxu3 %v5524_v5  ;;  %v5785_v0 = vsub.f32 %v5708_v35, %v5729_v9  ;;  %v6096_v21 = vsub.f32 %v10476_v12, %v6008_v36 }
0x114f   :  { %v5440_v19 = vmul.f32 %v12625_v14, %v5435_v60  ;;  %5571 = vmatmul.f32.vlgmr.msrb.gmra.mxu0 %v14505_v10 }
0x1150   :  { %v5786_v55 = vand.u32 4294901760, %v5785_v0  ;;  %v6097_v56 = vand.u32 4294901760, %v6096_v21 }
0x1151   :  { %v5445_v45 = vadd.f32 %v12627_v39, %v5440_v19 }
0x1152   :  { %5654 = vmatpush.xpose.msra.mxu2 %v5528_v44  ;;  %5531 = vmatpush.xpose.msrb.mxu3 %v5530_v43  ;;  %v5787_v27 = vsub.f32 %v5785_v0, %v5786_v55  ;;  %v6098_v53 = vsub.f32 %v6096_v21, %v6097_v56 }
0x1153   :  { %v5711_v18 = vsel %vm415_vm1, %v5445_v45, 0 }
0x1154   :  { %v5727_v61 = vand.u32 4294901760, %v5711_v18  ;;  %v5788_v32 = vand.u32 4294901760, %v5787_v27  ;;  %v6099_v28 = vand.u32 4294901760, %v6098_v53 }
0x1155   :  { %5486 = vmatmul.f32.gmra.mxu2 %v14506_v7  ;;  %10452 = vmatmul.msk.f32.vlgmr.msrb.gmra.mxu3 %vm415_vm1, %v10867_v33 }
0x1156   :  { %5687 = vmatpush.xpose.msra.mxu3 %v5469_v46  ;;  %5728 = vmatpush.xpose.msra.mxu0 %v5727_v61  ;;  %v5779_v14 = vsub.f32 %v5711_v18, %v5727_v61  ;;  %v6090_v46 = vsub.f32 %v10477_v54, %v6006_v1 }
0x1157   :  { %5617 = vmatmul.f32.gmra.mxu1 %v14507_v13  ;;  %5576 = vmatmul.f32.gmra.mxu0 %v14508_v38 }
0x1158   :  { %5823 = vmatpush.xpose.msrb.mxu2 %v5779_v14  ;;  %v5780_v39 = vand.u32 4294901760, %v5779_v14  ;;  %v6091_v24 = vand.u32 4294901760, %v6090_v46 }
0x115a   :  { %5689 = vmatpush.xpose.msra.mxu3 %v5471_v37  ;;  %5730 = vmatpush.xpose.msra.mxu0 %v5729_v9  ;;  %v5781_v11 = vsub.f32 %v5779_v14, %v5780_v39  ;;  %v6092_v20 = vsub.f32 %v6090_v46, %v6091_v24 }
0x115c   :  { %5826 = vmatpush.xpose.msrb.mxu2 %v5785_v0  ;;  %v5782_v34 = vand.u32 4294901760, %v5781_v11  ;;  %v6093_v44 = vand.u32 4294901760, %v6092_v20 }
0x115d   :  { %5494 = vmatmul.f32.gmra.mxu2 %v14509_v17  ;;  %10453 = vmatmul.msk.f32.gmra.mxu3 %vm415_vm1, %v10877_v48 }
0x115e   :  { %5863 = vmatpush.xpose.msrb.mxu3 %v5727_v61  ;;  %5908 = vmatpush.xpose.msrb.mxu0 %v5780_v39 }
0x115f   :  { %5783 = vmatpush.xpose.msra.mxu1 %v5782_v34  ;;  %5581 = vmatmul.f32.gmra.mxu0 %v14511_v57 }
0x1160   :  { %5623 = vmatmul.f32.gmra.mxu1 %v14510_v29 }
0x1162   :  { %5865 = vmatpush.xpose.msrb.mxu3 %v5729_v9  ;;  %5912 = vmatpush.xpose.msrb.mxu0 %v5786_v55 }
0x1163   :  { %5789 = vmatpush.xpose.msra.mxu1 %v5788_v32 }
0x1165   :  { %5502 = vmatmul.f32.gmra.mxu2 %v14512_v47  ;;  %10454 = vmatmul.msk.f32.gmra.mxu3 %vm415_vm1, %v14513_v31 }
0x1167   :  { %5945 = vmatpush.xpose.msrb.mxu1 %v5727_v61  ;;  %5586 = vmatmul.f32.gmra.mxu0 %v14514_v15 }
0x1168   :  { %5629 = vmatmul.f32.gmra.mxu1 %v14515_v26 }
0x116b   :  { %5947 = vmatpush.xpose.msrb.mxu1 %v5729_v9 }
0x116d   :  { %10455 = vmatmul.msk.f32.gmra.mxu3 %vm415_vm1, %v14516_v42  ;;  %10456 = vmatmul.msk.f32.vlgmr.msra.gmra.mxu2 %vm415_vm1, %v10867_v33 }
0x116e   :  { %6007 = vmatpush.msra.mxu2 %v6006_v1 }
0x116f   :  { %5736 = vmatmul.f32.vlgmr.msra.gmra.mxu0 %v14503_v49 }
0x1170   :  { %10464 = vmatmul.msk.f32.vlgmr.msra.gmra.mxu1 %vm415_vm1, %v10867_v33  ;;  %6150 = vmatpush.msra.mxu0 %v6090_v46 }
0x1171   :  { %6210 = vmatpush.msra.mxu1 %v6006_v1  ;;  %6009 = vmatpush.msra.mxu2 %v6008_v36 }
0x1172   :  { %6153 = vmatpush.msra.mxu0 %v6096_v21 }
0x1173   :  { %6212 = vmatpush.msra.mxu1 %v6008_v36 }
0x1175   :  { %10457 = vmatmul.msk.f32.gmra.mxu2 %vm415_vm1, %v10877_v48  ;;  %10460 = vmatmul.msk.f32.vlgmr.msra.gmra.mxu3 %vm415_vm1, %v10867_v33 }
0x1176   :  { %6094 = vmatpush.msra.mxu3 %v6093_v44 }
0x1177   :  { %5744 = vmatmul.f32.gmra.mxu0 %v14506_v7 }
0x1178   :  { %10465 = vmatmul.msk.f32.gmra.mxu1 %vm415_vm1, %v10877_v48  ;;  %6100 = vmatpush.msra.mxu3 %v6099_v28 }
0x117d   :  { %10458 = vmatmul.msk.f32.gmra.mxu2 %vm415_vm1, %v14513_v31  ;;  %10461 = vmatmul.msk.f32.gmra.mxu3 %vm415_vm1, %v10877_v48 }
0x117f   :  { %5752 = vmatmul.f32.gmra.mxu0 %v14509_v17 }
0x1180   :  { %10466 = vmatmul.msk.f32.gmra.mxu1 %vm415_vm1, %v14513_v31 }
0x1185   :  { %10459 = vmatmul.msk.f32.gmra.mxu2 %vm415_vm1, %v14516_v42  ;;  %10462 = vmatmul.msk.f32.gmra.mxu3 %vm415_vm1, %v14513_v31 }
0x1187   :  { %5760 = vmatmul.f32.gmra.mxu0 %v14512_v47 }
0x1188   :  { %10467 = vmatmul.msk.f32.gmra.mxu1 %vm415_vm1, %v14516_v42 }
0x118d   :  { %10463 = vmatmul.msk.f32.gmra.mxu3 %vm415_vm1, %v14516_v42  ;;  %5829 = vmatmul.f32.vlgmr.msrb.gmra.mxu2 %v14505_v10 }
0x118e   :  { %6279 = vmatpush.msrb.mxu2 %v6091_v24 }
0x118f   :  { %10468 = vmatmul.msk.f32.vlgmr.msrb.gmra.mxu0 %vm415_vm1, %v10867_v33 }
0x1190   :  { %10472 = vmatmul.msk.f32.vlgmr.msrb.gmra.mxu1 %vm415_vm1, %v10867_v33  ;;  %6283 = vmatpush.msrb.mxu2 %v6097_v56 }
0x1195   :  { %5834 = vmatmul.f32.gmra.mxu2 %v14508_v38  ;;  %5869 = vmatmul.f32.vlgmr.msrb.gmra.mxu3 %v14504_v30 }
0x1196   :  { %6332 = vmatpush.msrb.mxu3 %v6006_v1 }
0x1197   :  { %10469 = vmatmul.msk.f32.gmra.mxu0 %vm415_vm1, %v10877_v48 }
0x1198   :  { %10473 = vmatmul.msk.f32.gmra.mxu1 %vm415_vm1, %v10877_v48  ;;  %6334 = vmatpush.msrb.mxu3 %v6008_v36 }
0x119d   :  { %5839 = vmatmul.f32.gmra.mxu2 %v14511_v57  ;;  %5875 = vmatmul.f32.gmra.mxu3 %v14507_v13 }
0x119f   :  { %10470 = vmatmul.msk.f32.gmra.mxu0 %vm415_vm1, %v14513_v31 }
0x11a0   :  { %10474 = vmatmul.msk.f32.gmra.mxu1 %vm415_vm1, %v14513_v31 }
0x11a5   :  { %5844 = vmatmul.f32.gmra.mxu2 %v14514_v15  ;;  %5881 = vmatmul.f32.gmra.mxu3 %v14510_v29 }
0x11a7   :  { %10471 = vmatmul.msk.f32.gmra.mxu0 %vm415_vm1, %v14516_v42 }
0x11a8   :  { %10475 = vmatmul.msk.f32.gmra.mxu1 %vm415_vm1, %v14516_v42 }
0x11ad   :  { %5887 = vmatmul.f32.gmra.mxu3 %v14515_v26 }
0x11ca   :  { %v5612_v37 = vpop.f32.mrf.mxu1 }
0x11cc   :  { %v5572_v58 = vpop.f32.mrf.mxu0 }
0x11d0   :  { %v5479_v2 = vpop.f32.mrf.mxu2 }
0x11d4   :  { %v5618_v59 = vpop.f32.mrf.mxu1  ;;  %v5577_v16 = vpop.f32.mrf.mxu0 }
0x11d8   :  { %v5487_v50 = vpop.f32.mrf.mxu2  ;;  %v5534_v63 = vpop.f32.mrf.mxu3 }
0x11d9   :  { %v5535_v19 = vadd.f32 %v5534_v63, %v5479_v2 }
0x11db   :  { %v5573_v18 = vadd.f32 %v5572_v58, %v5535_v19 }
0x11dc   :  { %v5582_v41 = vpop.f32.mrf.mxu0 }
0x11dd   :  { %v5624_v51 = vpop.f32.mrf.mxu1  ;;  %v5613_v61 = vadd.f32 %v5612_v37, %v5573_v18 }
0x11e0   :  { %v5495_v5 = vpop.f32.mrf.mxu2  ;;  %v5538_v40 = vpop.f32.mrf.mxu3 }
0x11e1   :  { %v5539_v0 = vadd.f32 %v5538_v40, %v5487_v50 }
0x11e3   :  { %v5578_v55 = vadd.f32 %v5577_v16, %v5539_v0 }
0x11e4   :  { %v5587_v60 = vpop.f32.mrf.mxu0 }
0x11e5   :  { %v5630_v49 = vpop.f32.mrf.mxu1  ;;  %v5619_v17 = vadd.f32 %v5618_v59, %v5578_v55 }
0x11e8   :  { %v5503_v35 = vpop.f32.mrf.mxu2  ;;  %v5542_v30 = vpop.f32.mrf.mxu3 }
0x11e9   :  { %v5543_v29 = vadd.f32 %v5542_v30, %v5495_v5 }
0x11eb   :  { %v5583_v42 = vadd.f32 %v5582_v41, %v5543_v29 }
0x11ec   :  { %v12722_v10 = vpop.f32.mrf.mxu0 }
0x11ed   :  { %v12724_v43 = vpop.f32.mrf.mxu1  ;;  %v5625_v12 = vadd.f32 %v5624_v51, %v5583_v42 }
0x11f0   :  { %v5546_v9 = vpop.f32.mrf.mxu3  ;;  %v5657_v45 = vpop.f32.mrf.mxu2 }
0x11f1   :  { %v5658_v14 = vadd.f32 %v5657_v45, %v5613_v61  ;;  %v5547_v16 = vadd.f32 %v5546_v9, %v5503_v35 }
0x11f3   :  { %v5588_v20 = vadd.f32 %v5587_v60, %v5547_v16 }
0x11f4   :  { %v12726_v7 = vpop.f32.mrf.mxu0 }
0x11f5   :  { %v12728_v13 = vpop.f32.mrf.mxu1  ;;  %v5631_v5 = vadd.f32 %v5630_v49, %v5588_v20 }
0x11f6   :  { %v5797_v42 = vadd.f32 %v12728_v13, %v12726_v7 }
0x11f8   :  { %v5661_v38 = vpop.f32.mrf.mxu2  ;;  %v5692_v39 = vpop.f32.mrf.mxu3 }
0x11f9   :  { %v12730_v11 = vadd.f32 %v5692_v39, %v5658_v14  ;;  %v5662_v47 = vadd.f32 %v5661_v38, %v5619_v17  ;;  %v5793_v38 = vadd.f32 %v12724_v43, %v12722_v10 }
0x11fb   :  { %v5969_v34 = vsel %vm1238_vm6, %v12730_v11, 0 }
0x11fc   :  { %v12734_v27 = vand.u32 4294901760, %v5969_v34  ;;  %v12736_v32 = vpop.f32.mrf.mxu0 }
0x11fd   :  { %v12742_v2 = vpop.f32.mrf.mxu1 }
0x11fe   :  { %v6011_v57 = vsub.f32 %v5969_v34, %v12734_v27  ;;  %6102 = vmatmul.f32.vlgmr.msra.gmra.mxu3 %v12734_v27  ;;  %v5801_v13 = vadd.f32 %v12742_v2, %v12736_v32 }
0x1200   :  { %v6012_v31 = vand.u32 4294901760, %v6011_v57  ;;  %v5665_v15 = vpop.f32.mrf.mxu2  ;;  %v5696_v26 = vpop.f32.mrf.mxu3  ;;  %6156 = vmatmul.f32.vlgmr.msra.gmra.mxu0 %v6011_v57 }
0x1201   :  { %v12740_v37 = vadd.f32 %v5696_v26, %v5662_v47  ;;  %v5666_v36 = vadd.f32 %v5665_v15, %v5625_v12 }
0x1202   :  { %v6013_v58 = vsub.f32 %v6011_v57, %v6012_v31  ;;  %6216 = vmatmul.f32.vlgmr.msra.gmra.mxu1 %v6012_v31 }
0x1203   :  { %v5972_v54 = vsel %vm1238_vm6, %v12740_v37, 0 }
0x1204   :  { %v6014_v1 = vand.u32 4294901760, %v6013_v58  ;;  %v12746_v59 = vand.u32 4294901760, %v5972_v54  ;;  %v12750_v24 = vpop.f32.mrf.mxu0 }
0x1205   :  { %v12758_v41 = vpop.f32.mrf.mxu1 }
0x1206   :  { %6015 = vmatmul.f32.vlgmr.msra.gmra.mxu2 %v6014_v1  ;;  %6106 = vmatmul.f32.gmra.mxu3 %v12746_v59  ;;  %v6019_v46 = vsub.f32 %v5972_v54, %v12746_v59  ;;  %v5805_v2 = vadd.f32 %v12758_v41, %v12750_v24 }
0x1208   :  { %v5669_v21 = vpop.f32.mrf.mxu2  ;;  %v5700_v50 = vpop.f32.mrf.mxu3  ;;  %6161 = vmatmul.f32.gmra.mxu0 %v6019_v46  ;;  %v6020_v63 = vand.u32 4294901760, %v6019_v46 }
0x1209   :  { %v12752_v56 = vadd.f32 %v5700_v50, %v5666_v36  ;;  %v5670_v35 = vadd.f32 %v5669_v21, %v5631_v5 }
0x120a   :  { %6222 = vmatmul.f32.gmra.mxu1 %v6020_v63  ;;  %v6021_v44 = vsub.f32 %v6019_v46, %v6020_v63 }
0x120b   :  { %v5975_v53 = vsel %vm1238_vm6, %v12752_v56, 0 }
0x120c   :  { %v12756_v51 = vand.u32 4294901760, %v5975_v53  ;;  %v6022_v28 = vand.u32 4294901760, %v6021_v44  ;;  %v5915_v18 = vpop.f32.mrf.mxu0 }
0x120d   :  { %v5950_v14 = vpop.f32.mrf.mxu1 }
0x120e   :  { %6023 = vmatmul.f32.gmra.mxu2 %v6022_v28  ;;  %6110 = vmatmul.f32.gmra.mxu3 %v12756_v51  ;;  %v6027_v40 = vsub.f32 %v5975_v53, %v12756_v51 }
0x1210   :  { %v5704_v60 = vpop.f32.mrf.mxu3  ;;  %v5830_v30 = vpop.f32.mrf.mxu2  ;;  %6166 = vmatmul.f32.gmra.mxu0 %v6027_v40  ;;  %v6028_v19 = vand.u32 4294901760, %v6027_v40 }
0x1211   :  { %v12762_v9 = vadd.f32 %v5704_v60, %v5670_v35  ;;  %v5831_v55 = vadd.f32 %v5830_v30, %v5793_v38 }
0x1212   :  { %6228 = vmatmul.f32.gmra.mxu1 %v6028_v19  ;;  %v6029_v45 = vsub.f32 %v6027_v40, %v6028_v19 }
0x1213   :  { %v5978_v61 = vsel %vm1238_vm6, %v12762_v9, 0 }
0x1214   :  { %v12766_v0 = vand.u32 4294901760, %v5978_v61  ;;  %v6030_v49 = vand.u32 4294901760, %v6029_v45  ;;  %v5919_v26 = vpop.f32.mrf.mxu0 }
0x1215   :  { %v5954_v43 = vpop.f32.mrf.mxu1 }
0x1216   :  { %6031 = vmatmul.f32.gmra.mxu2 %v6030_v49  ;;  %6114 = vmatmul.f32.gmra.mxu3 %v12766_v0  ;;  %v6035_v39 = vsub.f32 %v5978_v61, %v12766_v0 }
0x1218   :  { %v5835_v34 = vpop.f32.mrf.mxu2  ;;  %v5870_v17 = vpop.f32.mrf.mxu3  ;;  %6171 = vmatmul.f32.gmra.mxu0 %v6035_v39  ;;  %v6036_v29 = vand.u32 4294901760, %v6035_v39 }
0x1219   :  { %v5871_v57 = vadd.f32 %v5870_v17, %v5831_v55  ;;  %v5836_v58 = vadd.f32 %v5835_v34, %v5797_v42 }
0x121a   :  { %6234 = vmatmul.f32.gmra.mxu1 %v6036_v29  ;;  %v6037_v47 = vsub.f32 %v6035_v39, %v6036_v29 }
0x121b   :  { %v5916_v31 = vadd.f32 %v5915_v18, %v5871_v57 }
0x121c   :  { %v6038_v15 = vand.u32 4294901760, %v6037_v47  ;;  %v5923_v63 = vpop.f32.mrf.mxu0 }
0x121d   :  { %v12774_v10 = vadd.f32 %v5950_v14, %v5916_v31  ;;  %v5958_v35 = vpop.f32.mrf.mxu1 }
0x121e   :  { %6039 = vmatmul.f32.gmra.mxu2 %v6038_v15 }
0x121f   :  { %v5981_v54 = vsel %vm1238_vm6, %v12774_v10, 0 }
0x1220   :  { %v12778_v1 = vand.u32 4294901760, %v5981_v54  ;;  %v5876_v12 = vpop.f32.mrf.mxu3  ;;  %v5840_v46 = vpop.f32.mrf.mxu2 }
0x1221   :  { %v5877_v16 = vadd.f32 %v5876_v12, %v5836_v58  ;;  %v5841_v44 = vadd.f32 %v5840_v46, %v5801_v13 }
0x1222   :  { %6118 = vmatmul.f32.gmra.mxu3 %v12778_v1  ;;  %v6043_v36 = vsub.f32 %v5981_v54, %v12778_v1 }
0x1223   :  { %v5920_v21 = vadd.f32 %v5919_v26, %v5877_v16 }
0x1224   :  { %6176 = vmatmul.f32.gmra.mxu0 %v6043_v36  ;;  %v6044_v7 = vand.u32 4294901760, %v6043_v36  ;;  %v5927_v55 = vpop.f32.mrf.mxu0 }
0x1225   :  { %v12784_v50 = vadd.f32 %v5954_v43, %v5920_v21  ;;  %v5962_v29 = vpop.f32.mrf.mxu1 }
0x1226   :  { %6240 = vmatmul.f32.gmra.mxu1 %v6044_v7  ;;  %v6045_v20 = vsub.f32 %v6043_v36, %v6044_v7 }
0x1227   :  { %v5984_v53 = vsel %vm1238_vm6, %v12784_v50, 0 }
0x1228   :  { %v6050_v28 = vand.u32 4294901760, %v5984_v53  ;;  %v5882_v5 = vpop.f32.mrf.mxu3  ;;  %v6046_v40 = vand.u32 4294901760, %v6045_v20  ;;  %v5845_v45 = vpop.f32.mrf.mxu2 }
0x1229   :  { %v5883_v60 = vadd.f32 %v5882_v5, %v5841_v44  ;;  %v5846_v49 = vadd.f32 %v5845_v45, %v5805_v2 }
0x122a   :  { %6047 = vmatmul.f32.gmra.mxu2 %v6046_v40  ;;  %6122 = vmatmul.f32.gmra.mxu3 %v6050_v28  ;;  %v6051_v30 = vsub.f32 %v5984_v53, %v6050_v28 }
0x122b   :  { %v5924_v19 = vadd.f32 %v5923_v63, %v5883_v60 }
0x122c   :  { %6181 = vmatmul.f32.gmra.mxu0 %v6051_v30  ;;  %v6052_v32 = vand.u32 4294901760, %v6051_v30 }
0x122d   :  { %v12790_v18 = vadd.f32 %v5958_v35, %v5924_v19 }
0x122e   :  { %6246 = vmatmul.f32.gmra.mxu1 %v6052_v32  ;;  %v6053_v61 = vsub.f32 %v6051_v30, %v6052_v32 }
0x122f   :  { %v5987_v14 = vsel %vm1238_vm6, %v12790_v18, 0 }
0x1230   :  { %v6058_v38 = vand.u32 4294901760, %v5987_v14  ;;  %v5888_v39 = vpop.f32.mrf.mxu3  ;;  %v6054_v34 = vand.u32 4294901760, %v6053_v61 }
0x1231   :  { %v5889_v17 = vadd.f32 %v5888_v39, %v5846_v49 }
0x1232   :  { %6055 = vmatmul.f32.gmra.mxu2 %v6054_v34  ;;  %6126 = vmatmul.f32.gmra.mxu3 %v6058_v38  ;;  %v6059_v57 = vsub.f32 %v5987_v14, %v6058_v38 }
0x1233   :  { %v5928_v47 = vadd.f32 %v5927_v55, %v5889_v17 }
0x1234   :  { %6186 = vmatmul.f32.gmra.mxu0 %v6059_v57  ;;  %v6060_v24 = vand.u32 4294901760, %v6059_v57 }
0x1235   :  { %v12794_v41 = vadd.f32 %v5962_v29, %v5928_v47 }
0x1236   :  { %6252 = vmatmul.f32.gmra.mxu1 %v6060_v24  ;;  %v6061_v31 = vsub.f32 %v6059_v57, %v6060_v24 }
0x1237   :  { %v5990_v15 = vsel %vm1238_vm6, %v12794_v41, 0 }
0x1238   :  { %v6066_v26 = vand.u32 4294901760, %v5990_v15  ;;  %v6062_v42 = vand.u32 4294901760, %v6061_v31 }
0x123a   :  { %6063 = vmatmul.f32.gmra.mxu2 %v6062_v42  ;;  %6130 = vmatmul.f32.gmra.mxu3 %v6066_v26  ;;  %v6067_v43 = vsub.f32 %v5990_v15, %v6066_v26 }
0x123c   :  { %6191 = vmatmul.f32.gmra.mxu0 %v6067_v43  ;;  %v6068_v58 = vand.u32 4294901760, %v6067_v43 }
0x123e   :  { %6258 = vmatmul.f32.gmra.mxu1 %v6068_v58  ;;  %v6069_v54 = vsub.f32 %v6067_v43, %v6068_v58 }
0x1240   :  { %v6070_v12 = vand.u32 4294901760, %v6069_v54 }
0x1242   :  { %6071 = vmatmul.f32.gmra.mxu2 %v6070_v12  ;;  %6336 = vmatmul.f32.vlgmr.msrb.gmra.mxu3 %v12734_v27 }
0x124a   :  { %6285 = vmatmul.f32.vlgmr.msrb.gmra.mxu2 %v12734_v27  ;;  %6340 = vmatmul.f32.gmra.mxu3 %v12746_v59 }
0x1252   :  { %6289 = vmatmul.f32.gmra.mxu2 %v12746_v59  ;;  %6344 = vmatmul.f32.gmra.mxu3 %v12756_v51 }
0x125a   :  { %6293 = vmatmul.f32.gmra.mxu2 %v12756_v51  ;;  %6348 = vmatmul.f32.gmra.mxu3 %v12766_v0 }
0x1262   :  { %6297 = vmatmul.f32.gmra.mxu2 %v12766_v0  ;;  %6352 = vmatmul.f32.gmra.mxu3 %v12778_v1 }
0x126a   :  { %6301 = vmatmul.f32.gmra.mxu2 %v12778_v1  ;;  %6356 = vmatmul.f32.gmra.mxu3 %v6050_v28 }
0x1272   :  { %6305 = vmatmul.f32.gmra.mxu2 %v6050_v28  ;;  %6360 = vmatmul.f32.gmra.mxu3 %v6058_v38 }
0x127a   :  { %6309 = vmatmul.f32.gmra.mxu2 %v6058_v38  ;;  %6364 = vmatmul.f32.gmra.mxu3 %v6066_v26 }
0x127d   :  { %v6157_v28 = vpop.f32.mrf.mxu0 }
0x127f   :  { %v6217_v40 = vpop.f32.mrf.mxu1 }
0x1281   :  { %v6103_v27 = vpop.f32.mrf.mxu3 }
0x1282   :  { %6313 = vmatmul.f32.gmra.mxu2 %v6066_v26 }
0x1285   :  { %v6162_v19 = vpop.f32.mrf.mxu0 }
0x1287   :  { %v6223_v61 = vpop.f32.mrf.mxu1 }
0x1289   :  { %v6016_v59 = vpop.f32.mrf.mxu2  ;;  %v6107_v16 = vpop.f32.mrf.mxu3 }
0x128a   :  { %v6104_v5 = vadd.f32 %v6103_v27, %v6016_v59 }
0x128c   :  { %v6158_v30 = vadd.f32 %v6157_v28, %v6104_v5 }
0x128d   :  { %v6167_v17 = vpop.f32.mrf.mxu0 }
0x128e   :  { %v6218_v45 = vadd.f32 %v6217_v40, %v6158_v30 }
0x128f   :  { %v6229_v24 = vpop.f32.mrf.mxu1 }
0x1291   :  { %v6024_v46 = vpop.f32.mrf.mxu2  ;;  %v6111_v36 = vpop.f32.mrf.mxu3 }
0x1292   :  { %v6108_v49 = vadd.f32 %v6107_v16, %v6024_v46 }
0x1294   :  { %v6163_v55 = vadd.f32 %v6162_v19, %v6108_v49 }
0x1295   :  { %v6172_v12 = vpop.f32.mrf.mxu0 }
0x1296   :  { %v6224_v47 = vadd.f32 %v6223_v61, %v6163_v55 }
0x1299   :  { %v6032_v51 = vpop.f32.mrf.mxu2  ;;  %v6115_v21 = vpop.f32.mrf.mxu3 }
0x129a   :  { %v6112_v34 = vadd.f32 %v6111_v36, %v6032_v51  ;;  %v6235_v36 = vpop.f32.mrf.mxu1 }
0x129c   :  { %v6168_v57 = vadd.f32 %v6167_v17, %v6112_v34 }
0x129e   :  { %v6230_v42 = vadd.f32 %v6229_v24, %v6168_v57 }
0x12a1   :  { %v6040_v7 = vpop.f32.mrf.mxu2  ;;  %v6177_v19 = vpop.f32.mrf.mxu0 }
0x12a2   :  { %v6116_v26 = vadd.f32 %v6115_v21, %v6040_v7  ;;  %v12831_v21 = vld [vmem:[%s14377_s8 + $0x18] sm:$0x3f] }
0x12a3   :  { %v6241_v61 = vpop.f32.mrf.mxu1 }
0x12a4   :  { %v6173_v27 = vadd.f32 %v6172_v12, %v6116_v26 }
0x12a5   :  { %v6119_v13 = vpop.f32.mrf.mxu3 }
0x12a6   :  { %v6236_v28 = vadd.f32 %v6235_v36, %v6173_v27 }
0x12a9   :  { %v6182_v24 = vpop.f32.mrf.mxu0 }
0x12ad   :  { %v6048_v0 = vpop.f32.mrf.mxu2  ;;  %v12808_v63 = vpop.f32.mrf.mxu3 }
0x12ae   :  { %v6120_v51 = vadd.f32 %v6119_v13, %v6048_v0  ;;  %v12840_v13 = vperm.slane %v12831_v21, 1 }
0x12b0   :  { %v6178_v0 = vadd.f32 %v6177_v19, %v6120_v51 }
0x12b5   :  { %v6056_v20 = vpop.f32.mrf.mxu2  ;;  %v12810_v1 = vpop.f32.mrf.mxu3 }
0x12b6   :  { %v6124_v17 = vadd.f32 %v12808_v63, %v6056_v20 }
0x12bd   :  { %v12812_v44 = vpop.f32.mrf.mxu2  ;;  %v12814_v53 = vpop.f32.mrf.mxu3 }
0x12c5   :  { %v12816_v35 = vpop.f32.mrf.mxu2  ;;  %v6337_v60 = vpop.f32.mrf.mxu3 }
0x12cd   :  { %v6286_v32 = vpop.f32.mrf.mxu2  ;;  %v6341_v38 = vpop.f32.mrf.mxu3 }
0x12ce   :  { %v6287_v2 = vadd.f32 %v6286_v32, %v6218_v45 }
0x12d0   :  { %v12818_v14 = vadd.f32 %v6337_v60, %v6287_v2 }
0x12d2   :  { %v6376_v39 = vrot.slane %v12818_v14, 7 }
0x12d4   :  { %6400 = vrot.lane.b32.xlu0 %v6376_v39, %s10701_s21  ;;  %v6399_v5 = vsel %vm1647_vm7, 0.0, %v6376_v39 }
0x12d5   :  { %v6290_v29 = vpop.f32.mrf.mxu2  ;;  %v6345_v15 = vpop.f32.mrf.mxu3  ;;  %v6425_v32 = vsel %vm1697_vm8, %v6399_v5, 0.0 }
0x12d6   :  { %v6291_v31 = vadd.f32 %v6290_v29, %v6224_v47  ;;  %v6523_v49 = vmul.f32 %v12840_v13, %v6425_v32 }
0x12d8   :  { %v12822_v58 = vadd.f32 %v6341_v38, %v6291_v31  ;;  %v6242_v38 = vadd.f32 %v6241_v61, %v6178_v0  ;;  %v6183_v31 = vadd.f32 %v6182_v24, %v6124_v17 }
0x12da   :  { %v6377_v16 = vrot.slane %v12822_v58, 7 }
0x12dd   :  { %v6294_v43 = vpop.f32.mrf.mxu2  ;;  %v6349_v40 = vpop.f32.mrf.mxu3 }
0x12de   :  { %v6295_v54 = vadd.f32 %v6294_v43, %v6230_v42  ;;  %v12860_v42 = vsel %vm1647_vm7, %v6376_v39, %v6377_v16  ;;  %v6247_v43 = vpop.f32.mrf.mxu1 }
0x12df   :  { %v6248_v63 = vadd.f32 %v6247_v43, %v6183_v31  ;;  %v6524_v51 = vmul.f32 %v12840_v13, %v12860_v42 }
0x12e0   :  { %v12824_v59 = vadd.f32 %v6345_v15, %v6295_v54 }
0x12e2   :  { %v6379_v46 = vrot.slane %v12824_v59, 7 }
0x12e4   :  { %v12834_v7 = vsel %vm1647_vm7, %v6377_v16, %v6379_v46 }
0x12e5   :  { %v6298_v60 = vpop.f32.mrf.mxu2  ;;  %6404 = vrot.lane.b32.xlu0 %v12834_v7, %s10701_s21  ;;  %v6353_v57 = vpop.f32.mrf.mxu3 }
0x12e6   :  { %v6299_v30 = vadd.f32 %v6298_v60, %v6236_v28  ;;  %v12885_v28 = vld [vmem:[%s14377_s8 + $0x10] sm:$0xff] }
0x12e7   :  { %v12888_v5 = vperm.slane %v12885_v28, 4 }
0x12e8   :  { %v12842_v45 = vadd.f32 %v6349_v40, %v6299_v30 }
0x12e9   :  { %v6442_v40 = vmul.f32 %v12888_v5, %v6425_v32 }
0x12ea   :  { %v6381_v2 = vrot.slane %v12842_v45, 7 }
0x12eb   :  { %v6450_v0 = vadd.f32 %v6442_v40, %v12818_v14 }
0x12ec   :  { %v12849_v55 = vsel %vm1647_vm7, %v6379_v46, %v6381_v2 }
0x12ed   :  { %v6302_v34 = vpop.f32.mrf.mxu2  ;;  %6406 = vrot.lane.b32.xlu1 %v12849_v55, %s10701_s21  ;;  %6539 = vrot.lane.b32.xlu0 %v6523_v49, %s10702_s2  ;;  %v6357_v27 = vpop.f32.mrf.mxu3  ;;  %v6526_v40 = vmul.f32 %v12840_v13, %v12849_v55 }
0x12ee   :  { %v6303_v29 = vadd.f32 %v6302_v34, %v6242_v38  ;;  %v12903_v34 = vperm.slane %v12885_v28, 5 }
0x12f0   :  { %v12855_v47 = vadd.f32 %v6353_v57, %v6303_v29 }
0x12f2   :  { %v6383_v15 = vrot.slane %v12855_v47, 7 }
0x12f4   :  { %v6384_v26 = vsel %vm1647_vm7, %v6381_v2, %v6383_v15 }
0x12f5   :  { %v6306_v54 = vpop.f32.mrf.mxu2  ;;  %6408 = vrot.lane.b32.xlu2 %v6384_v26, %s10701_s21  ;;  %6402 = vrot.lane.b32.xlu0 %v12860_v42, %s10701_s21  ;;  %v6429_v12 = vsel %vm1697_vm8, %v6384_v26, 0.0 }
0x12f6   :  { %v6307_v20 = vadd.f32 %v6306_v54, %v6248_v63  ;;  %v6527_v46 = vmul.f32 %v12840_v13, %v6429_v12  ;;  %v6446_v38 = vmul.f32 %v12888_v5, %v6429_v12 }
0x12f8   :  { %v12868_v36 = vadd.f32 %v6357_v27, %v6307_v20  ;;  %v6454_v31 = vadd.f32 %v6446_v38, %v12855_v47  ;;  %v6444_v20 = vmul.f32 %v12888_v5, %v12834_v7 }
0x12fa   :  { %v6385_v39 = vrot.slane %v12868_v36, 7  ;;  %v6452_v27 = vadd.f32 %v6444_v20, %v12824_v59 }
0x12fc   :  { %v12875_v16 = vsel %vm1647_vm7, %v6383_v15, %v6385_v39 }
0x12fd   :  { %6547 = vrot.lane.b32.xlu0 %v6527_v46, %s10702_s2 }
0x1305   :  { %6410 = vrot.lane.b32.xlu0 %v12875_v16, %s10701_s21 }
0x130d   :  { %6541 = vrot.lane.b32.xlu0 %v6524_v51, %s10702_s2 }
0x1346   :  { %v6401_v60 = vpop.permute.xlu0 %6400 }
0x1347   :  { %v6424_v30 = vsel %vm1647_vm7, 0.0, %v6401_v60 }
0x1348   :  { %v6433_v19 = vsel %vm1697_vm8, %v6424_v30, 0.0  ;;  %v6128_v30 = vadd.f32 %v12810_v1, %v12812_v44  ;;  %v6443_v44 = vmul.f32 %v12888_v5, %v12860_v42  ;;  %v6525_v42 = vmul.f32 %v12840_v13, %v12834_v7 }
0x1349   :  { %v6459_v2 = vmul.f32 %v12840_v13, %v6433_v19  ;;  %v6475_v61 = vmul.f32 %v12888_v5, %v6433_v19  ;;  %v6445_v19 = vmul.f32 %v12888_v5, %v12849_v55 }
0x134b   :  { %v12897_v49 = vsub.f32 %v6450_v0, %v6459_v2  ;;  %6491 = vrot.lane.b32.xlu2 %v6475_v61, %s10702_s2  ;;  %v6187_v0 = vpop.f32.mrf.mxu0  ;;  %v6453_v38 = vadd.f32 %v6445_v19, %v12842_v45  ;;  %v6451_v19 = vadd.f32 %v6443_v44, %v12822_v58 }
0x134c   :  { %v6188_v2 = vadd.f32 %v6187_v0, %v6128_v30  ;;  %v6361_v30 = vpop.f32.mrf.mxu3 }
0x134d   :  { %v6579_v32 = vrot.slane %v12897_v49, 6 }
0x134f   :  { %v6602_v17 = vsel %vm1863_vm9, 0.0, %v6579_v32  ;;  %v6409_v29 = vpop.permute.xlu2 %6408 }
0x1350   :  { %v6437_v57 = vsel %vm1697_vm8, %v6409_v29, 0.0  ;;  %v12910_v24 = vsel %vm1936_vm10, %v6602_v17, 0.0 }
0x1351   :  { %v6463_v15 = vmul.f32 %v12840_v13, %v6437_v57  ;;  %v6479_v26 = vmul.f32 %v12888_v5, %v6437_v57  ;;  %v6668_v43 = vmul.f32 %v12903_v34, %v12910_v24  ;;  %v6253_v57 = vpop.f32.mrf.mxu1 }
0x1352   :  { %v6254_v1 = vadd.f32 %v6253_v57, %v6188_v2 }
0x1353   :  { %v12917_v54 = vsub.f32 %v6454_v31, %v6463_v15  ;;  %6499 = vrot.lane.b32.xlu2 %v6479_v26, %s10702_s2  ;;  %v12921_v63 = vadd.f32 %v6668_v43, %v12897_v49  ;;  %v6310_v31 = vpop.f32.mrf.mxu2 }
0x1354   :  { %v6311_v20 = vadd.f32 %v6310_v31, %v6254_v1 }
0x1355   :  { %v6586_v55 = vrot.slane %v12917_v54, 6 }
0x1357   :  { %v6405_v12 = vpop.permute.xlu0 %6404 }
0x1358   :  { %v6461_v46 = vmul.f32 %v12840_v13, %v6405_v12  ;;  %v6477_v51 = vmul.f32 %v12888_v5, %v6405_v12 }
0x135a   :  { %v6469_v60 = vsub.f32 %v6452_v27, %v6461_v46  ;;  %6495 = vrot.lane.b32.xlu1 %v6477_v51, %s10702_s2 }
0x135b   :  { %6545 = vrot.lane.b32.xlu2 %v6526_v40, %s10702_s2 }
0x135c   :  { %v6582_v26 = vrot.slane %v6469_v60, 6 }
0x135f   :  { %v6407_v61 = vpop.permute.xlu1 %6406  ;;  %v6540_v49 = vpop.permute.xlu0 %6539 }
0x1360   :  { %v6462_v17 = vmul.f32 %v12840_v13, %v6407_v61  ;;  %v6478_v29 = vmul.f32 %v12888_v5, %v6407_v61  ;;  %v12959_v61 = vadd.f32 %v6361_v30, %v6311_v20 }
0x1362   :  { %v6470_v15 = vsub.f32 %v6453_v38, %v6462_v17  ;;  %6497 = vrot.lane.b32.xlu1 %v6478_v29, %s10702_s2  ;;  %v14435_v7 = vrot.slane %v12959_v61, 7 }
0x1364   :  { %v6584_v43 = vrot.slane %v6470_v15, 6 }
0x1366   :  { %v12944_v12 = vsel %vm1863_vm9, %v6582_v26, %v6584_v43  ;;  %v6587_v27 = vsel %vm1863_vm9, %v6584_v43, %v6586_v55 }
0x1367   :  { %v6403_v46 = vpop.permute.xlu0 %6402  ;;  %v6671_v51 = vmul.f32 %v12903_v34, %v12944_v12  ;;  %v12951_v40 = vsel %vm1936_vm10, %v6587_v27, 0.0 }
0x1368   :  { %v6460_v0 = vmul.f32 %v12840_v13, %v6403_v46  ;;  %v6672_v2 = vmul.f32 %v12903_v34, %v12951_v40 }
0x1369   :  { %v12961_v38 = vadd.f32 %v6671_v51, %v6470_v15 }
0x136a   :  { %v6468_v17 = vsub.f32 %v6451_v19, %v6460_v0  ;;  %6543 = vrot.lane.b32.xlu1 %v6525_v42, %s10702_s2  ;;  %v12965_v29 = vadd.f32 %v6672_v2, %v12917_v54  ;;  %v6388_v54 = vsel %vm1647_vm7, %v6385_v39, %v14435_v7 }
0x136c   :  { %v6580_v57 = vrot.slane %v6468_v17, 6 }
0x136e   :  { %v12969_v31 = vsel %vm1863_vm9, %v6579_v32, %v6580_v57  ;;  %v12972_v1 = vsel %vm1863_vm9, %v6580_v57, %v6582_v26  ;;  %v6447_v26 = vmul.f32 %v12888_v5, %v12875_v16 }
0x136f   :  { %v6548_v44 = vpop.permute.xlu0 %6547  ;;  %v6669_v15 = vmul.f32 %v12903_v34, %v12969_v31  ;;  %v6670_v43 = vmul.f32 %v12903_v34, %v12972_v1 }
0x1370   :  { %v6455_v51 = vadd.f32 %v6447_v26, %v12868_v36 }
0x1371   :  { %v12983_v20 = vadd.f32 %v6669_v15, %v6468_v17  ;;  %v12985_v32 = vadd.f32 %v6670_v43, %v6469_v60  ;;  %v6476_v43 = vmul.f32 %v12888_v5, %v6403_v46 }
0x1372   :  { %6412 = vrot.lane.b32.xlu1 %v6388_v54, %s10701_s21 }
0x1377   :  { %v6411_v27 = vpop.permute.xlu0 %6410 }
0x1378   :  { %v6464_v42 = vmul.f32 %v12840_v13, %v6411_v27 }
0x137a   :  { %v6472_v30 = vsub.f32 %v6455_v51, %v6464_v42 }
0x137c   :  { %v6588_v19 = vrot.slane %v6472_v30, 6 }
0x137e   :  { %v12993_v0 = vsel %vm1863_vm9, %v6586_v55, %v6588_v19 }
0x137f   :  { %v6673_v39 = vmul.f32 %v12903_v34, %v12993_v0 }
0x1381   :  { %v12997_v60 = vadd.f32 %v6673_v39, %v6472_v30 }
0x13a5   :  { %v6492_v2 = vpop.permute.xlu2 %6491 }
0x13a6   :  { %v6515_v17 = vadd.f32 %v6492_v2, %v12818_v14 }
0x13a8   :  { %v13000_v57 = vadd.f32 %v6540_v49, %v6515_v17 }
0x13aa   :  { %v6611_v15 = vrot.slane %v13000_v57, 6 }
0x13ac   :  { %6626 = vrot.lane.b32.xlu2 %v6611_v15, %s10701_s21 }
0x13ad   :  { %v6500_v55 = vpop.permute.xlu2 %6499 }
0x13ae   :  { %v6519_v51 = vadd.f32 %v6500_v55, %v12855_v47  ;;  %v6448_v55 = vmul.f32 %v12888_v5, %v6388_v54 }
0x13b0   :  { %v13007_v30 = vadd.f32 %v6548_v44, %v6519_v51 }
0x13b2   :  { %v6618_v2 = vrot.slane %v13007_v30, 6 }
0x13b4   :  { %6493 = vrot.lane.b32.xlu2 %v6476_v43, %s10702_s2 }
0x13b5   :  { %v6546_v14 = vpop.permute.xlu2 %6545 }
0x13cc   :  { %v6496_v26 = vpop.permute.xlu1 %6495 }
0x13cd   :  { %v6517_v46 = vadd.f32 %v6496_v26, %v12824_v59 }
0x13d4   :  { %v6498_v42 = vpop.permute.xlu1 %6497 }
0x13d5   :  { %v6518_v39 = vadd.f32 %v6498_v42, %v12842_v45  ;;  %v13022_v45 = vperm.slane %v12831_v21, 2 }
0x13d7   :  { %v13010_v49 = vadd.f32 %v6546_v14, %v6518_v39  ;;  %v6749_v59 = vmul.f32 %v13022_v45, %v12910_v24  ;;  %v6480_v14 = vmul.f32 %v12888_v5, %v6411_v27  ;;  %v6529_v27 = vmul.f32 %v12840_v13, %v6388_v54 }
0x13d9   :  { %v6616_v17 = vrot.slane %v13010_v49, 6 }
0x13db   :  { %v6619_v43 = vsel %vm1863_vm9, %v6616_v17, %v6618_v2 }
0x13dc   :  { %v6544_v7 = vpop.permute.xlu1 %6543  ;;  %6634 = vrot.lane.b32.xlu1 %v6619_v43, %s10701_s21 }
0x13dd   :  { %v13019_v47 = vadd.f32 %v6544_v7, %v6517_v46  ;;  %v6456_v7 = vadd.f32 %v6448_v55, %v12959_v61 }
0x13df   :  { %v6614_v44 = vrot.slane %v13019_v47, 6 }
0x13e1   :  { %v6617_v51 = vsel %vm1863_vm9, %v6614_v44, %v6616_v17 }
0x13e2   :  { %6632 = vrot.lane.b32.xlu2 %v6617_v51, %s10701_s21 }
0x13e4   :  { %v6413_v26 = vpop.permute.xlu1 %6412  ;;  %6765 = vrot.lane.b32.xlu1 %v6749_v59, %s10702_s2 }
0x13e5   :  { %v6465_v42 = vmul.f32 %v12840_v13, %v6413_v26  ;;  %v6481_v17 = vmul.f32 %v12888_v5, %v6413_v26 }
0x13e7   :  { %v13033_v39 = vsub.f32 %v6456_v7, %v6465_v42 }
0x13e9   :  { %v6590_v46 = vrot.slane %v13033_v39, 6 }
0x13ea   :  { %6501 = vrot.lane.b32.xlu2 %v6480_v14, %s10702_s2 }
0x13eb   :  { %v13042_v24 = vsel %vm1863_vm9, %v6588_v19, %v6590_v46 }
0x13ec   :  { %6503 = vrot.lane.b32.xlu1 %v6481_v17, %s10702_s2  ;;  %v6674_v43 = vmul.f32 %v12903_v34, %v13042_v24  ;;  %v6542_v17 = vpop.permute.xlu0 %6541 }
0x13ee   :  { %v13048_v55 = vadd.f32 %v6674_v43, %v13033_v39  ;;  %v6528_v43 = vmul.f32 %v12840_v13, %v12875_v16 }
0x13f2   :  { %6551 = vrot.lane.b32.xlu2 %v6529_v27, %s10702_s2 }
0x1406   :  { %v6627_v51 = vpop.permute.xlu2 %6626 }
0x1407   :  { %v6650_v59 = vsel %vm1863_vm9, 0.0, %v6627_v51 }
0x1408   :  { %v6659_v26 = vsel %vm1936_vm10, %v6650_v59, 0.0 }
0x1409   :  { %v6685_v19 = vmul.f32 %v13022_v45, %v6659_v26  ;;  %v6701_v7 = vmul.f32 %v12903_v34, %v6659_v26  ;;  %v6752_v26 = vmul.f32 %v13022_v45, %v12944_v12  ;;  %v6132_v12 = vadd.f32 %v12814_v53, %v12816_v35 }
0x140b   :  { %v13058_v42 = vsub.f32 %v12921_v63, %v6685_v19  ;;  %6717 = vrot.lane.b32.xlu0 %v6701_v7, %s10702_s2 }
0x140e   :  { %v6494_v14 = vpop.permute.xlu2 %6493 }
0x140f   :  { %v6516_v54 = vadd.f32 %v6494_v14, %v12822_v58 }
0x1411   :  { %v13064_v27 = vadd.f32 %v6542_v17, %v6516_v54 }
0x1413   :  { %v6612_v51 = vrot.slane %v13064_v27, 6  ;;  %6549 = vrot.lane.b32.xlu0 %v6528_v43, %s10702_s2 }
0x1415   :  { %v6615_v59 = vsel %vm1863_vm9, %v6612_v51, %v6614_v44  ;;  %v6613_v63 = vsel %vm1863_vm9, %v6611_v15, %v6612_v51  ;;  %v6753_v15 = vmul.f32 %v13022_v45, %v12951_v40  ;;  %v6192_v44 = vpop.f32.mrf.mxu0  ;;  %v6259_v51 = vpop.f32.mrf.mxu1 }
0x1416   :  { %v6193_v54 = vadd.f32 %v6192_v44, %v6132_v12 }
0x1418   :  { %v6260_v40 = vadd.f32 %v6259_v51, %v6193_v54 }
0x141b   :  { %6628 = vrot.lane.b32.xlu0 %v6613_v63, %s10701_s21  ;;  %v6314_v63 = vpop.f32.mrf.mxu2 }
0x1423   :  { %6771 = vrot.lane.b32.xlu0 %v6752_v26, %s10702_s2 }
0x143c   :  { %v6633_v58 = vpop.permute.xlu2 %6632 }
0x143d   :  { %v6688_v16 = vmul.f32 %v13022_v45, %v6633_v58  ;;  %v6704_v19 = vmul.f32 %v12903_v34, %v6633_v58  ;;  %v6315_v58 = vadd.f32 %v6314_v63, %v6260_v40 }
0x143f   :  { %v13077_v7 = vsub.f32 %v12961_v38, %v6688_v16  ;;  %6723 = vrot.lane.b32.xlu1 %v6704_v19, %s10702_s2  ;;  %v13101_v19 = vperm.slane %v12885_v28, 6 }
0x1441   :  { %v14436_v53 = vrot.slane %v13077_v7, 4 }
0x1444   :  { %v6502_v63 = vpop.permute.xlu2 %6501 }
0x1447   :  { %6773 = vrot.lane.b32.xlu1 %v6753_v15, %s10702_s2  ;;  %v6365_v15 = vpop.f32.mrf.mxu3 }
0x1448   :  { %v13109_v44 = vadd.f32 %v6365_v15, %v6315_v58 }
0x144a   :  { %v6389_v54 = vrot.slane %v13109_v44, 7 }
0x144e   :  { %v6635_v14 = vpop.permute.xlu1 %6634 }
0x144f   :  { %v6663_v17 = vsel %vm1936_vm10, %v6635_v14, 0.0 }
0x1450   :  { %v6689_v43 = vmul.f32 %v13022_v45, %v6663_v17  ;;  %v6705_v38 = vmul.f32 %v12903_v34, %v6663_v17  ;;  %v14517_v17 = vrot.slane %v12959_v61, 7 }
0x1452   :  { %v13090_v26 = vsub.f32 %v12965_v29, %v6689_v43  ;;  %6725 = vrot.lane.b32.xlu2 %v6705_v38, %s10702_s2  ;;  %v13119_v43 = vsel %vm1647_vm7, %v14517_v17, %v6389_v54  ;;  %v6750_v38 = vmul.f32 %v13022_v45, %v12969_v31  ;;  %v6552_v31 = vpop.permute.xlu2 %6551  ;;  %v6520_v17 = vadd.f32 %v6502_v63, %v12868_v36 }
0x1454   :  { %v14440_v35 = vrot.slane %v13090_v26, 4 }
0x1456   :  { %v6813_v16 = vsel %vm2102_vm11, %v14436_v53, %v14440_v35  ;;  %v6766_v51 = vpop.permute.xlu1 %6765 }
0x1457   :  { %v13105_v29 = vsel %vm2175_vm12, %v6813_v16, 0.0 }
0x1458   :  { %v6898_v12 = vmul.f32 %v13101_v19, %v13105_v29 }
0x145a   :  { %6630 = vrot.lane.b32.xlu2 %v6615_v59, %s10701_s21  ;;  %v13113_v14 = vadd.f32 %v6898_v12, %v13090_v26  ;;  %v6751_v59 = vmul.f32 %v13022_v45, %v12972_v1 }
0x145e   :  { %v6504_v40 = vpop.permute.xlu1 %6503 }
0x145f   :  { %v6521_v15 = vadd.f32 %v6504_v40, %v12959_v61 }
0x1462   :  { %6414 = vrot.lane.b32.xlu2 %v13119_v43, %s10701_s21 }
0x146a   :  { %6767 = vrot.lane.b32.xlu2 %v6750_v38, %s10702_s2  ;;  %v13135_v38 = vadd.f32 %v6552_v31, %v6521_v15  ;;  %v6805_v15 = vrot.slane %v13058_v42, 4 }
0x146c   :  { %v6828_v53 = vsel %vm2102_vm11, 0.0, %v6805_v15 }
0x1472   :  { %6769 = vrot.lane.b32.xlu2 %v6751_v59, %s10702_s2 }
0x147d   :  { %v6718_v58 = vpop.permute.xlu0 %6717 }
0x147e   :  { %v6741_v16 = vadd.f32 %v6718_v58, %v13000_v57  ;;  %v14437_v57 = vrot.slane %v13135_v38, 6 }
0x1480   :  { %v13131_v12 = vadd.f32 %v6766_v51, %v6741_v16 }
0x1482   :  { %v14438_v54 = vrot.slane %v13131_v12, 4 }
0x1484   :  { %6852 = vrot.lane.b32.xlu0 %v14438_v54, %s10701_s21 }
0x1485   :  { %v6550_v1 = vpop.permute.xlu0 %6549 }
0x1486   :  { %v13140_v59 = vadd.f32 %v6550_v1, %v6520_v17 }
0x1488   :  { %v6620_v61 = vrot.slane %v13140_v59, 6 }
0x148a   :  { %v6621_v51 = vsel %vm1863_vm9, %v6618_v2, %v6620_v61  ;;  %v6623_v36 = vsel %vm1863_vm9, %v6620_v61, %v14437_v57 }
0x148b   :  { %6636 = vrot.lane.b32.xlu1 %v6621_v51, %s10701_s21 }
0x148c   :  { %6638 = vrot.lane.b32.xlu0 %v6623_v36, %s10701_s21 }
0x148d   :  { %v6629_v63 = vpop.permute.xlu0 %6628 }
0x148e   :  { %v6686_v40 = vmul.f32 %v13022_v45, %v6629_v63  ;;  %v6702_v16 = vmul.f32 %v12903_v34, %v6629_v63 }
0x1490   :  { %v6694_v58 = vsub.f32 %v12983_v20, %v6686_v40 }
0x1492   :  { %v6806_v31 = vrot.slane %v6694_v58, 4 }
0x1493   :  { %6719 = vrot.lane.b32.xlu1 %v6702_v16, %s10702_s2 }
0x1494   :  { %v13158_v2 = vsel %vm2102_vm11, %v6805_v15, %v6806_v31 }
0x1495   :  { %v6895_v17 = vmul.f32 %v13101_v19, %v13158_v2  ;;  %v6772_v16 = vpop.permute.xlu0 %6771 }
0x1497   :  { %v13162_v1 = vadd.f32 %v6895_v17, %v6694_v58 }
0x14ac   :  { %v6726_v61 = vpop.permute.xlu2 %6725 }
0x14ad   :  { %v6745_v58 = vadd.f32 %v6726_v61, %v13007_v30 }
0x14b1   :  { %v6724_v51 = vpop.permute.xlu1 %6723 }
0x14b2   :  { %v6744_v36 = vadd.f32 %v6724_v51, %v13010_v49  ;;  %v6449_v49 = vmul.f32 %v12888_v5, %v13119_v43 }
0x14b4   :  { %v6631_v20 = vpop.permute.xlu2 %6630  ;;  %v13173_v17 = vadd.f32 %v6772_v16, %v6744_v36 }
0x14b5   :  { %v6687_v63 = vmul.f32 %v13022_v45, %v6631_v20  ;;  %v6703_v40 = vmul.f32 %v12903_v34, %v6631_v20  ;;  %v13179_v20 = vperm.slane %v12831_v21, 3 }
0x14b6   :  { %v14443_v61 = vrot.slane %v13173_v17, 4 }
0x14b7   :  { %v13169_v57 = vsub.f32 %v12985_v32, %v6687_v63  ;;  %6721 = vrot.lane.b32.xlu1 %v6703_v40, %s10702_s2  ;;  %v6877_v32 = vsel %vm2175_vm12, %v6828_v53, 0.0  ;;  %v6973_v39 = vmul.f32 %v13179_v20, %v13105_v29 }
0x14b8   :  { %v6969_v53 = vmul.f32 %v13179_v20, %v6877_v32 }
0x14b9   :  { %v14439_v51 = vrot.slane %v13169_v57, 4  ;;  %v6774_v54 = vpop.permute.xlu1 %6773 }
0x14ba   :  { %v13181_v15 = vadd.f32 %v6774_v54, %v6745_v58  ;;  %v6457_v54 = vadd.f32 %v6449_v49, %v13109_v44 }
0x14bb   :  { %v13188_v30 = vsel %vm2102_vm11, %v6806_v31, %v14439_v51 }
0x14bc   :  { %v14444_v36 = vrot.slane %v13181_v15, 4  ;;  %v13192_v63 = vpop.permute.xlu2 %6414  ;;  %v6896_v40 = vmul.f32 %v13101_v19, %v13188_v30 }
0x14bd   :  { %v6466_v16 = vmul.f32 %v12840_v13, %v13192_v63 }
0x14be   :  { %v6845_v31 = vsel %vm2102_vm11, %v14443_v61, %v14444_v36  ;;  %v13206_v58 = vadd.f32 %v6896_v40, %v13169_v57  ;;  %v6754_v61 = vmul.f32 %v13022_v45, %v12993_v0  ;;  %v6755_v40 = vmul.f32 %v13022_v45, %v13042_v24 }
0x14bf   :  { %v6474_v51 = vsub.f32 %v6457_v54, %v6466_v16  ;;  %6983 = vrot.lane.b32.xlu1 %v6969_v53, %s10702_s2  ;;  %6860 = vrot.lane.b32.xlu0 %v6845_v31, %s10701_s21  ;;  %v7239_v16 = vld [vmem:[#allocation5 + $0x10] sm:$0xff] }
0x14c0   :  { %v7282_v31 = vand.u32 4294901760, %v7239_v16 }
0x14c1   :  { %v6592_v49 = vrot.slane %v6474_v51, 6 }
0x14c2   :  { %v7370_v0 = vsub.f32 %v7239_v16, %v7282_v31  ;;  %v13233_v16 = vperm.slane %v12831_v21, 4 }
0x14c3   :  { %v13213_v35 = vsel %vm1863_vm9, %v6590_v46, %v6592_v49  ;;  %v7240_v46 = vld [vmem:[#allocation5 + $0x18] sm:$0xff] }
0x14c4   :  { %v6675_v4 = vmul.f32 %v12903_v34, %v13213_v35  ;;  %v7280_v54 = vand.u32 4294901760, %v7240_v46 }
0x14c6   :  { %v13219_v36 = vadd.f32 %v6675_v4, %v6474_v51  ;;  %v7364_v53 = vsub.f32 %v7240_v46, %v7280_v54  ;;  %7484 = vmatpush.msra.mxu3 %v7280_v54  ;;  %7281 = vmatpush.msrb.mxu0 %v7280_v54  ;;  %v7371_v51 = vand.u32 4294901760, %v7370_v0 }
0x14c7   :  { %6775 = vrot.lane.b32.xlu1 %v6754_v61, %s10702_s2 }
0x14c8   :  { %v7365_v4 = vand.u32 4294901760, %v7364_v53  ;;  %7424 = vmatpush.msra.mxu2 %v7364_v53  ;;  %7486 = vmatpush.msra.mxu3 %v7282_v31  ;;  %v7372_v29 = vsub.f32 %v7370_v0, %v7371_v51 }
0x14c9   :  { %7283 = vmatpush.msrb.mxu0 %v7282_v31 }
0x14ca   :  { %v7366_v24 = vsub.f32 %v7364_v53, %v7365_v4  ;;  %7427 = vmatpush.msra.mxu2 %v7370_v0  ;;  %v7373_v49 = vand.u32 4294901760, %v7372_v29 }
0x14cb   :  { %7553 = vmatpush.msra.mxu0 %v7365_v4 }
0x14cc   :  { %v7367_v61 = vand.u32 4294901760, %v7366_v24 }
0x14cd   :  { %7557 = vmatpush.msra.mxu0 %v7371_v51  ;;  %v13251_v51 = vperm.slane %v12831_v21, 5 }
0x14ce   :  { %7368 = vmatpush.msrb.mxu1 %v7367_v61 }
0x14cf   :  { %6777 = vrot.lane.b32.xlu1 %v6755_v40, %s10702_s2  ;;  %v6894_v40 = vmul.f32 %v13101_v19, %v6877_v32 }
0x14d0   :  { %7374 = vmatpush.msrb.mxu1 %v7373_v49 }
0x14d1   :  { %v6902_v4 = vadd.f32 %v6894_v40, %v13058_v42 }
0x14d2   :  { %7606 = vmatpush.msra.mxu1 %v7280_v54  ;;  %v13243_v54 = vperm.slane %v12831_v21, 0 }
0x14d4   :  { %7608 = vmatpush.msra.mxu1 %v7282_v31  ;;  %v13248_v31 = vmul.f32 0.0, %v13233_v16  ;;  %v13257_v61 = vmul.f32 0.0, %v13243_v54 }
0x14d7   :  { %6991 = vrot.lane.b32.xlu1 %v6973_v39, %s10702_s2  ;;  %v13230_v39 = vperm.slane %v12885_v28, 7 }
0x14d9   :  { %v13240_v24 = vmul.f32 0.0, %v13230_v39 }
0x14f6   :  { %v6853_v46 = vpop.permute.xlu0 %6852 }
0x14f7   :  { %v6876_v53 = vsel %vm2102_vm11, 0.0, %v6853_v46 }
0x14f8   :  { %v6885_v0 = vsel %vm2175_vm12, %v6876_v53, 0.0 }
0x14f9   :  { %v6911_v28 = vmul.f32 %v13179_v20, %v6885_v0  ;;  %v6927_v32 = vmul.f32 %v13101_v19, %v6885_v0  ;;  %v13264_v0 = vmul.f32 0.0, %v13251_v51 }
0x14fb   :  { %v13253_v42 = vsub.f32 %v6902_v4, %v6911_v28  ;;  %6941 = vrot.lane.b32.xlu0 %v6927_v32, %s10702_s2  ;;  %v6482_v32 = vmul.f32 %v12888_v5, %v13192_v63 }
0x14fd   :  { %v7062_v29 = vadd.f32 %v13240_v24, %v13253_v42  ;;  %v6637_v49 = vpop.permute.xlu1 %6636 }
0x14fe   :  { %v6690_v40 = vmul.f32 %v13022_v45, %v6637_v49  ;;  %v6706_v46 = vmul.f32 %v12903_v34, %v6637_v49  ;;  %v6639_v53 = vpop.permute.xlu0 %6638 }
0x14ff   :  { %v13267_v21 = vsub.f32 %v7062_v29, %v13248_v31  ;;  %v6691_v4 = vmul.f32 %v13022_v45, %v6639_v53  ;;  %v10478_v29 = vld [vmem:[%s14378_s9 + $0x20] sm:$0xff] }
0x1500   :  { %v6698_v28 = vsub.f32 %v12997_v60, %v6690_v40  ;;  %6727 = vrot.lane.b32.xlu2 %v6706_v46, %s10702_s2  ;;  %v14518_v40 = vrot.slane %v13090_v26, 4 }
0x1501   :  { %v7201_v3 = vadd.f32 %v13257_v61, %v13267_v21  ;;  %v13277_v49 = vsub.f32 %v13048_v55, %v6691_v4 }
0x1502   :  { %v6814_v62 = vrot.slane %v6698_v28, 4 }
0x1503   :  { %v7217_v6 = vsub.f32 %v7201_v3, %v13264_v0  ;;  %v14457_v60 = vrot.slane %v13277_v49, 4  ;;  %6505 = vrot.lane.b32.xlu0 %v6482_v32, %s10702_s2  ;;  %v6530_v3 = vmul.f32 %v12840_v13, %v13119_v43  ;;  %v6707_v13 = vmul.f32 %v12903_v34, %v6639_v53 }
0x1504   :  { %v13288_v5 = vsel %vm2102_vm11, %v14518_v40, %v6814_v62  ;;  %v6768_v40 = vpop.permute.xlu2 %6767 }
0x1505   :  { %v6720_v63 = vpop.permute.xlu1 %6719  ;;  %v7230_v46 = vadd.f32 %v10478_v29, %v7217_v6  ;;  %v6899_v55 = vmul.f32 %v13101_v19, %v13288_v5  ;;  %v13295_v4 = vsel %vm2102_vm11, %v6814_v62, %v14457_v60 }
0x1506   :  { %v6742_v32 = vadd.f32 %v6720_v63, %v13064_v27  ;;  %v6900_v26 = vmul.f32 %v13101_v19, %v13295_v4 }
0x1507   :  { %v7243_v52 = vsel %vm1238_vm6, %v7230_v46, 0  ;;  %v13303_v6 = vadd.f32 %v6899_v55, %v6698_v28  ;;  %v14519_v46 = vrot.slane %v13131_v12, 4 }
0x1508   :  { %v13305_v48 = vadd.f32 %v6768_v40, %v6742_v32  ;;  %6553 = vrot.lane.b32.xlu2 %v6530_v3, %s10702_s2  ;;  %v13308_v8 = vand.u32 4294901760, %v7243_v52  ;;  %v13311_v62 = vadd.f32 %v6900_v26, %v13277_v49 }
0x150a   :  { %7376 = vmatmul.f32.vlgmr.msrb.gmra.mxu1 %v13308_v8  ;;  %v7285_v27 = vsub.f32 %v7243_v52, %v13308_v8  ;;  %v6838_v43 = vrot.slane %v13305_v48, 4 }
0x150b   :  { %6729 = vrot.lane.b32.xlu0 %v6707_v13, %s10702_s2 }
0x150c   :  { %7430 = vmatmul.f32.vlgmr.msra.gmra.mxu2 %v7285_v27  ;;  %v7286_v28 = vand.u32 4294901760, %v7285_v27  ;;  %v6839_v55 = vsel %vm2102_vm11, %v14519_v46, %v6838_v43  ;;  %v6770_v52 = vpop.permute.xlu2 %6769 }
0x150e   :  { %7490 = vmatmul.f32.vlgmr.msra.gmra.mxu3 %v7286_v28  ;;  %v7287_v63 = vsub.f32 %v7285_v27, %v7286_v28 }
0x1510   :  { %6854 = vrot.lane.b32.xlu2 %v6839_v55, %s10701_s21  ;;  %v7288_v3 = vand.u32 4294901760, %v7287_v63 }
0x1512   :  { %7289 = vmatmul.f32.vlgmr.msrb.gmra.mxu0 %v7288_v3 }
0x1529   :  { %v6722_v53 = vpop.permute.xlu1 %6721 }
0x152a   :  { %v6743_v32 = vadd.f32 %v6722_v53, %v13019_v47 }
0x152c   :  { %v13323_v26 = vadd.f32 %v6770_v52, %v6743_v32 }
0x152e   :  { %v14458_v40 = vrot.slane %v13323_v26, 4 }
0x1530   :  { %v6841_v13 = vsel %vm2102_vm11, %v6838_v43, %v14458_v40 }
0x1531   :  { %v6861_v27 = vpop.permute.xlu0 %6860  ;;  %6856 = vrot.lane.b32.xlu2 %v6841_v13, %s10701_s21  ;;  %v6984_v52 = vpop.permute.xlu1 %6983 }
0x1532   :  { %v6889_v28 = vsel %vm2175_vm12, %v6861_v27, 0.0 }
0x1533   :  { %v6915_v63 = vmul.f32 %v13179_v20, %v6889_v28  ;;  %v6931_v46 = vmul.f32 %v13101_v19, %v6889_v28 }
0x1535   :  { %v13335_v47 = vsub.f32 %v13113_v14, %v6915_v63  ;;  %6949 = vrot.lane.b32.xlu0 %v6931_v46, %s10702_s2  ;;  %v14520_v46 = vrot.slane %v13181_v15, 4 }
0x1537   :  { %v7066_v55 = vadd.f32 %v13240_v24, %v13335_v47 }
0x1539   :  { %v13341_v43 = vsub.f32 %v7066_v55, %v13248_v31  ;;  %v6776_v27 = vpop.permute.xlu1 %6775 }
0x153b   :  { %v7205_v3 = vadd.f32 %v13257_v61, %v13341_v43 }
0x153d   :  { %v7221_v53 = vsub.f32 %v7205_v3, %v13264_v0 }
0x153f   :  { %v13346_v32 = vadd.f32 %v10478_v29, %v7221_v53 }
0x155a   :  { %v6728_v13 = vpop.permute.xlu2 %6727 }
0x155b   :  { %v6746_v14 = vadd.f32 %v6728_v13, %v13140_v59  ;;  %v7055_v13 = vmul.f32 %v13230_v39, %v13253_v42 }
0x155d   :  { %v13349_v28 = vadd.f32 %v6776_v27, %v6746_v14 }
0x155f   :  { %v6846_v63 = vrot.slane %v13349_v28, 4 }
0x1561   :  { %v6847_v55 = vsel %vm2102_vm11, %v14520_v46, %v6846_v63 }
0x1562   :  { %6862 = vrot.lane.b32.xlu1 %v6847_v55, %s10701_s21  ;;  %v6554_v60 = vpop.permute.xlu2 %6553 }
0x156a   :  { %v6855_v40 = vpop.permute.xlu2 %6854 }
0x156b   :  { %v6912_v29 = vmul.f32 %v13179_v20, %v6855_v40  ;;  %v6928_v3 = vmul.f32 %v13101_v19, %v6855_v40 }
0x156d   :  { %v6920_v53 = vsub.f32 %v13162_v1, %v6912_v29  ;;  %v6942_v59 = vpop.permute.xlu0 %6941  ;;  %6943 = vrot.lane.b32.xlu1 %v6928_v3, %s10702_s2  ;;  %v6971_v3 = vmul.f32 %v13179_v20, %v13188_v30 }
0x156e   :  { %v6962_v14 = vadd.f32 %v6942_v59, %v13131_v12  ;;  %v14521_v12 = vrot.slane %v13135_v38, 6 }
0x156f   :  { %v7063_v27 = vadd.f32 %v7055_v13, %v6920_v53 }
0x1570   :  { %v13363_v46 = vadd.f32 %v6984_v52, %v6962_v14  ;;  %v6778_v14 = vpop.permute.xlu1 %6777 }
0x1572   :  { %7018 = vrot.lane.b32.xlu0 %v13363_v46, %s10701_s21 }
0x1575   :  { %v6506_v55 = vpop.permute.xlu0 %6505  ;;  %7098 = vrot.lane.b32.xlu1 %v13240_v24, %s10702_s2 }
0x1576   :  { %v6522_v1 = vadd.f32 %v6506_v55, %v13109_v44  ;;  %v6970_v55 = vmul.f32 %v13179_v20, %v13158_v2 }
0x1578   :  { %v13370_v40 = vadd.f32 %v6554_v60, %v6522_v1 }
0x157a   :  { %v6624_v29 = vrot.slane %v13370_v40, 6 }
0x157c   :  { %v6625_v52 = vsel %vm1863_vm9, %v14521_v12, %v6624_v29 }
0x157d   :  { %v6730_v59 = vpop.permute.xlu0 %6729  ;;  %6640 = vrot.lane.b32.xlu2 %v6625_v52, %s10701_s21  ;;  %6987 = vrot.lane.b32.xlu1 %v6971_v3, %s10702_s2  ;;  %v6992_v52 = vpop.permute.xlu1 %6991 }
0x157e   :  { %v6747_v13 = vadd.f32 %v6730_v59, %v13135_v38  ;;  %v7056_v38 = vmul.f32 %v13230_v39, %v6920_v53  ;;  %v6974_v53 = vmul.f32 %v13179_v20, %v13288_v5 }
0x1580   :  { %v13381_v44 = vadd.f32 %v6778_v14, %v6747_v13 }
0x1582   :  { %v6848_v60 = vrot.slane %v13381_v44, 4 }
0x1584   :  { %v6849_v30 = vsel %vm2102_vm11, %v6846_v63, %v6848_v60 }
0x1585   :  { %6864 = vrot.lane.b32.xlu0 %v6849_v30, %s10701_s21  ;;  %6985 = vrot.lane.b32.xlu2 %v6970_v55, %s10702_s2 }
0x158b   :  { %v6857_v1 = vpop.permute.xlu2 %6856 }
0x158c   :  { %v6913_v29 = vmul.f32 %v13179_v20, %v6857_v1  ;;  %v6929_v13 = vmul.f32 %v13101_v19, %v6857_v1  ;;  %v7059_v1 = vmul.f32 %v13230_v39, %v13335_v47 }
0x158d   :  { %7133 = vrot.lane.b32.xlu2 %v13248_v31, %s10702_s2 }
0x158e   :  { %v13396_v3 = vsub.f32 %v13206_v58, %v6913_v29  ;;  %v7122_v58 = vmul.f32 %v13233_v16, %v13253_v42 }
0x1590   :  { %v13399_v2 = vadd.f32 %v7056_v38, %v13396_v3 }
0x15a7   :  { %v6950_v12 = vpop.permute.xlu0 %6949 }
0x15a8   :  { %v6966_v63 = vadd.f32 %v6950_v12, %v13181_v15 }
0x15aa   :  { %v13402_v59 = vadd.f32 %v6992_v52, %v6966_v63 }
0x15ac   :  { %7026 = vrot.lane.b32.xlu0 %v13402_v59, %s10701_s21 }
0x15b4   :  { %6945 = vrot.lane.b32.xlu0 %v6929_v13, %s10702_s2 }
0x15bc   :  { %7135 = vrot.lane.b32.xlu0 %v7122_v58, %s10702_s2 }
0x15c4   :  { %6993 = vrot.lane.b32.xlu0 %v6974_v53, %s10702_s2 }
0x15cc   :  { %7141 = vrot.lane.b32.xlu0 %v13248_v31, %s10702_s2  ;;  %v6756_v31 = vmul.f32 %v13022_v45, %v13213_v35 }
0x15d4   :  { %v6863_v15 = vpop.permute.xlu1 %6862 }
0x15d5   :  { %v6916_v14 = vmul.f32 %v13179_v20, %v6863_v15  ;;  %v6932_v55 = vmul.f32 %v13101_v19, %v6863_v15 }
0x15d7   :  { %v6924_v30 = vsub.f32 %v13303_v6, %v6916_v14  ;;  %6951 = vrot.lane.b32.xlu1 %v6932_v55, %s10702_s2  ;;  %v6641_v42 = vpop.permute.xlu2 %6640  ;;  %v14523_v14 = vrot.slane %v13323_v26, 4 }
0x15d8   :  { %v6692_v5 = vmul.f32 %v13022_v45, %v6641_v42 }
0x15d9   :  { %v7067_v29 = vadd.f32 %v7059_v1, %v6924_v30 }
0x15da   :  { %v13424_v38 = vsub.f32 %v13219_v36, %v6692_v5  ;;  %v14522_v36 = vrot.slane %v13173_v17, 4 }
0x15dc   :  { %v6843_v55 = vsel %vm2102_vm11, %v14523_v14, %v14522_v36 }
0x15df   :  { %v6944_v12 = vpop.permute.xlu1 %6943  ;;  %6779 = vrot.lane.b32.xlu1 %v6756_v31, %s10702_s2  ;;  %v6986_v63 = vpop.permute.xlu2 %6985 }
0x15e0   :  { %v6963_v6 = vadd.f32 %v6944_v12, %v13305_v48  ;;  %v10479_v48 = vld [vmem:[%s14378_s9 + $0x28] sm:$0xff] }
0x15e2   :  { %v7005_v52 = vadd.f32 %v6986_v63, %v6963_v6 }
0x15e4   :  { %v7019_v13 = vpop.permute.xlu0 %7018  ;;  %7020 = vrot.lane.b32.xlu0 %v7005_v52, %s10701_s21 }
0x15e5   :  { %v7072_v58 = vmul.f32 %v13233_v16, %v7019_v13  ;;  %v7087_v53 = vmul.f32 %v13230_v39, %v7019_v13 }
0x15e7   :  { %v13433_v15 = vsub.f32 %v7063_v27, %v7072_v58  ;;  %7100 = vrot.lane.b32.xlu2 %v7087_v53, %s10702_s2  ;;  %v6708_v27 = vmul.f32 %v12903_v34, %v6641_v42  ;;  %v7060_v58 = vmul.f32 %v13230_v39, %v6924_v30  ;;  %v7099_v30 = vpop.permute.xlu1 %7098 }
0x15e9   :  { %v7202_v45 = vadd.f32 %v13257_v61, %v13433_v15 }
0x15eb   :  { %v7218_v35 = vsub.f32 %v7202_v45, %v13264_v0 }
0x15ec   :  { %6858 = vrot.lane.b32.xlu0 %v6843_v55, %s10701_s21 }
0x15ed   :  { %v7231_v1 = vadd.f32 %v10479_v48, %v7218_v35  ;;  %v6975_v35 = vmul.f32 %v13179_v20, %v13295_v4 }
0x15ef   :  { %6731 = vrot.lane.b32.xlu2 %v6708_v27, %s10702_s2  ;;  %v7246_v5 = vsel %vm1238_vm6, %v7231_v1, 0  ;;  %v7116_v27 = vadd.f32 %v7099_v30, %v13363_v46  ;;  %v7134_v1 = vpop.permute.xlu2 %7133 }
0x15f0   :  { %v13451_v31 = vand.u32 4294901760, %v7246_v5 }
0x15f2   :  { %7380 = vmatmul.f32.gmra.mxu1 %v13451_v31  ;;  %v7293_v12 = vsub.f32 %v7246_v5, %v13451_v31 }
0x15f4   :  { %7435 = vmatmul.f32.gmra.mxu2 %v7293_v12  ;;  %v7294_v17 = vand.u32 4294901760, %v7293_v12 }
0x15f6   :  { %7496 = vmatmul.f32.gmra.mxu3 %v7294_v17  ;;  %v7295_v6 = vsub.f32 %v7293_v12, %v7294_v17  ;;  %v7151_v12 = vadd.f32 %v7134_v1, %v7116_v27 }
0x15f7   :  { %v6865_v63 = vpop.permute.xlu0 %6864  ;;  %7106 = vrot.lane.b32.xlu2 %v13240_v24, %s10702_s2  ;;  %v7126_v24 = vmul.f32 %v13233_v16, %v13335_v47 }
0x15f8   :  { %v6917_v34 = vmul.f32 %v13179_v20, %v6865_v63  ;;  %v6933_v42 = vmul.f32 %v13101_v19, %v6865_v63  ;;  %v7296_v13 = vand.u32 4294901760, %v7295_v6  ;;  %v6988_v63 = vpop.permute.xlu1 %6987 }
0x15fa   :  { %v13461_v53 = vsub.f32 %v13311_v62, %v6917_v34  ;;  %7297 = vmatmul.f32.gmra.mxu0 %v7296_v13  ;;  %6953 = vrot.lane.b32.xlu1 %v6933_v42, %s10702_s2 }
0x15fc   :  { %v13465_v45 = vadd.f32 %v7060_v58, %v13461_v53 }
0x15ff   :  { %6995 = vrot.lane.b32.xlu2 %v6975_v35, %s10702_s2 }
0x1607   :  { %7143 = vrot.lane.b32.xlu2 %v7126_v24, %s10702_s2 }
0x161e   :  { %v7027_v36 = vpop.permute.xlu0 %7026 }
0x161f   :  { %v7076_v62 = vmul.f32 %v13233_v16, %v7027_v36  ;;  %v7091_v14 = vmul.f32 %v13230_v39, %v7027_v36 }
0x1621   :  { %v13475_v55 = vsub.f32 %v7067_v29, %v7076_v62  ;;  %7108 = vrot.lane.b32.xlu1 %v7091_v14, %s10702_s2 }
0x1623   :  { %v7206_v4 = vadd.f32 %v13257_v61, %v13475_v55 }
0x1625   :  { %v7222_v47 = vsub.f32 %v7206_v4, %v13264_v0 }
0x1626   :  { %v6946_v5 = vpop.permute.xlu0 %6945 }
0x1627   :  { %v13482_v17 = vadd.f32 %v10479_v48, %v7222_v47  ;;  %v6964_v6 = vadd.f32 %v6946_v5, %v13323_v26  ;;  %v14525_v47 = vrot.slane %v13169_v57, 4 }
0x1629   :  { %v7006_v34 = vadd.f32 %v6988_v63, %v6964_v6  ;;  %7163 = vrot.lane.b32.xlu1 %v7151_v12, %s10701_s21  ;;  %v7195_v12 = vmul.f32 %v13243_v54, %v13267_v21 }
0x162b   :  { %7022 = vrot.lane.b32.xlu2 %v7006_v34, %s10701_s21 }
0x162e   :  { %v7136_v29 = vpop.permute.xlu0 %7135 }
0x1636   :  { %v6994_v13 = vpop.permute.xlu0 %6993 }
0x163e   :  { %v7142_v24 = vpop.permute.xlu0 %7141 }
0x1641   :  { %v7101_v46 = vpop.permute.xlu2 %7100 }
0x1642   :  { %v7117_v42 = vadd.f32 %v7101_v46, %v7005_v52  ;;  %v7057_v46 = vmul.f32 %v13230_v39, %v13396_v3 }
0x1644   :  { %v7152_v61 = vadd.f32 %v7136_v29, %v7117_v42 }
0x1646   :  { %7165 = vrot.lane.b32.xlu0 %v7152_v61, %s10701_s21 }
0x1649   :  { %v6952_v0 = vpop.permute.xlu1 %6951  ;;  %v6732_v58 = vpop.permute.xlu2 %6731 }
0x164a   :  { %v6967_v48 = vadd.f32 %v6952_v0, %v13349_v28  ;;  %v6748_v26 = vadd.f32 %v6732_v58, %v13370_v40  ;;  %v14524_v40 = vrot.slane %v13077_v7, 4 }
0x164c   :  { %v7009_v35 = vadd.f32 %v6994_v13, %v6967_v48 }
0x164e   :  { %7028 = vrot.lane.b32.xlu1 %v7009_v35, %s10701_s21 }
0x1651   :  { %v7107_v30 = vpop.permute.xlu2 %7106  ;;  %v6780_v36 = vpop.permute.xlu1 %6779 }
0x1652   :  { %v7120_v62 = vadd.f32 %v7107_v30, %v13402_v59  ;;  %v6796_v14 = vadd.f32 %v6780_v36, %v6748_v26  ;;  %v6811_v59 = vsel %vm2102_vm11, %v14525_v47, %v14524_v40 }
0x1653   :  { %v6897_v6 = vmul.f32 %v13101_v19, %v6811_v59  ;;  %v14526_v59 = vrot.slane %v13277_v49, 4  ;;  %v10481_v49 = vld [vmem:[%s14378_s9 + $0x38] sm:$0xff] }
0x1654   :  { %v7155_v52 = vadd.f32 %v7142_v24, %v7120_v62  ;;  %v6850_v27 = vrot.slane %v6796_v14, 4  ;;  %v10480_v14 = vld [vmem:[%s14378_s9 + $0x30] sm:$0xff] }
0x1656   :  { %v7021_v4 = vpop.permute.xlu0 %7020  ;;  %7171 = vrot.lane.b32.xlu0 %v7155_v52, %s10701_s21  ;;  %v6851_v28 = vsel %vm2102_vm11, %v6848_v60, %v6850_v27  ;;  %v6905_v60 = vadd.f32 %v6897_v6, %v13077_v7  ;;  %v7196_v7 = vmul.f32 %v13243_v54, %v13433_v15 }
0x1657   :  { %v7073_v1 = vmul.f32 %v13233_v16, %v7021_v4  ;;  %6866 = vrot.lane.b32.xlu2 %v6851_v28, %s10701_s21 }
0x1659   :  { %v7081_v5 = vsub.f32 %v13399_v2, %v7073_v1  ;;  %v6996_v2 = vpop.permute.xlu2 %6995 }
0x165b   :  { %v7203_v63 = vadd.f32 %v7195_v12, %v7081_v5 }
0x165e   :  { %v6859_v34 = vpop.permute.xlu0 %6858 }
0x165f   :  { %v6914_v29 = vmul.f32 %v13179_v20, %v6859_v34 }
0x1661   :  { %v6922_v42 = vsub.f32 %v6905_v60, %v6914_v29  ;;  %v7144_v21 = vpop.permute.xlu2 %7143  ;;  %v7061_v60 = vmul.f32 %v13230_v39, %v13461_v53 }
0x1663   :  { %v7065_v57 = vadd.f32 %v7057_v46, %v6922_v42 }
0x166c   :  { %v6954_v13 = vpop.permute.xlu1 %6953 }
0x166d   :  { %v6968_v61 = vadd.f32 %v6954_v13, %v13381_v44 }
0x166f   :  { %v7010_v0 = vadd.f32 %v6996_v2, %v6968_v61 }
0x1671   :  { %7030 = vrot.lane.b32.xlu1 %v7010_v0, %s10701_s21 }
0x1685   :  { %v7023_v58 = vpop.permute.xlu2 %7022 }
0x1686   :  { %v7074_v48 = vmul.f32 %v13233_v16, %v7023_v58  ;;  %v7199_v58 = vmul.f32 %v13243_v54, %v13341_v43 }
0x1688   :  { %v7082_v24 = vsub.f32 %v7065_v57, %v7074_v48 }
0x168a   :  { %v7204_v26 = vadd.f32 %v7196_v7, %v7082_v24  ;;  %v7258_v24 = vsel %vm1238_vm6, %v13482_v17, 0 }
0x1693   :  { %v7109_v30 = vpop.permute.xlu1 %7108 }
0x1694   :  { %v7121_v3 = vadd.f32 %v7109_v30, %v7009_v35  ;;  %v6818_v35 = vrot.slane %v13424_v38, 4 }
0x1696   :  { %v7156_v36 = vadd.f32 %v7144_v21, %v7121_v3  ;;  %v6819_v5 = vsel %vm2102_vm11, %v14526_v59, %v6818_v35 }
0x1697   :  { %v6901_v12 = vmul.f32 %v13101_v19, %v6819_v5  ;;  %v7255_v19 = vsel %vm1238_vm6, %v13346_v32, 0 }
0x1698   :  { %7173 = vrot.lane.b32.xlu2 %v7156_v36, %s10701_s21  ;;  %v13544_v39 = vand.u32 4294901760, %v7255_v19 }
0x169a   :  { %v7317_v48 = vsub.f32 %v7255_v19, %v13544_v39 }
0x169b   :  { %v7164_v62 = vpop.permute.xlu1 %7163 }
0x169c   :  { %v7211_v44 = vmul.f32 %v13251_v51, %v7164_v62  ;;  %v7318_v36 = vand.u32 4294901760, %v7317_v48  ;;  %v7324_v62 = vand.u32 4294901760, %v7258_v24 }
0x169e   :  { %v7219_v52 = vsub.f32 %v7203_v63, %v7211_v44  ;;  %v6909_v63 = vadd.f32 %v6901_v12, %v13424_v38 }
0x16a0   :  { %v7232_v27 = vadd.f32 %v10480_v14, %v7219_v52  ;;  %v7325_v52 = vsub.f32 %v7258_v24, %v7324_v62 }
0x16a2   :  { %v7249_v4 = vsel %vm1238_vm6, %v7232_v27, 0 }
0x16a3   :  { %v13522_v28 = vand.u32 4294901760, %v7249_v4 }
0x16a5   :  { %7384 = vmatmul.f32.gmra.mxu1 %v13522_v28  ;;  %v7301_v15 = vsub.f32 %v7249_v4, %v13522_v28 }
0x16a7   :  { %7440 = vmatmul.f32.gmra.mxu2 %v7301_v15  ;;  %v7302_v1 = vand.u32 4294901760, %v7301_v15 }
0x16a9   :  { %7502 = vmatmul.f32.gmra.mxu3 %v7302_v1  ;;  %v7303_v40 = vsub.f32 %v7301_v15, %v7302_v1  ;;  %v7326_v15 = vand.u32 4294901760, %v7325_v52 }
0x16ab   :  { %v7304_v47 = vand.u32 4294901760, %v7303_v40  ;;  %v7327_v1 = vsub.f32 %v7325_v52, %v7326_v15 }
0x16ad   :  { %7305 = vmatmul.f32.gmra.mxu0 %v7304_v47  ;;  %v7328_v47 = vand.u32 4294901760, %v7327_v1 }
0x16b1   :  { %v6867_v6 = vpop.permute.xlu2 %6866 }
0x16b2   :  { %v6918_v34 = vmul.f32 %v13179_v20, %v6867_v6 }
0x16b4   :  { %v6926_v29 = vsub.f32 %v6909_v63, %v6918_v34  ;;  %v7200_v63 = vmul.f32 %v13243_v54, %v13475_v55  ;;  %v7290_v54 = vpop.f32.mrf.mxu0 }
0x16b6   :  { %v7069_v46 = vadd.f32 %v7061_v60, %v6926_v29 }
0x16b8   :  { %v7166_v42 = vpop.permute.xlu0 %7165 }
0x16b9   :  { %v7212_v57 = vmul.f32 %v13251_v51, %v7166_v42 }
0x16bb   :  { %v7220_v13 = vsub.f32 %v7204_v26, %v7212_v57 }
0x16bd   :  { %v7233_v61 = vadd.f32 %v10481_v49, %v7220_v13 }
0x16bf   :  { %v7252_v38 = vsel %vm1238_vm6, %v7233_v61, 0 }
0x16c0   :  { %v7029_v20 = vpop.permute.xlu1 %7028  ;;  %v13542_v2 = vand.u32 4294901760, %v7252_v38 }
0x16c1   :  { %v7077_v53 = vmul.f32 %v13233_v16, %v7029_v20 }
0x16c2   :  { %7388 = vmatmul.f32.gmra.mxu1 %v13542_v2  ;;  %v7309_v0 = vsub.f32 %v7252_v38, %v13542_v2 }
0x16c3   :  { %v7085_v21 = vsub.f32 %v13465_v45, %v7077_v53  ;;  %v7319_v45 = vsub.f32 %v7317_v48, %v7318_v36 }
0x16c4   :  { %7445 = vmatmul.f32.gmra.mxu2 %v7309_v0  ;;  %v7310_v32 = vand.u32 4294901760, %v7309_v0 }
0x16c5   :  { %v7207_v7 = vadd.f32 %v7199_v58, %v7085_v21  ;;  %v7320_v17 = vand.u32 4294901760, %v7319_v45 }
0x16c6   :  { %7508 = vmatmul.f32.gmra.mxu3 %v7310_v32  ;;  %v7311_v26 = vsub.f32 %v7309_v0, %v7310_v32  ;;  %v7651_v32 = vld [vmem:[#allocation6 + $0x10] sm:$0xff] }
0x16c8   :  { %v7172_v30 = vpop.permute.xlu0 %7171  ;;  %v7312_v3 = vand.u32 4294901760, %v7311_v26 }
0x16c9   :  { %v7215_v44 = vmul.f32 %v13251_v51, %v7172_v30 }
0x16ca   :  { %7313 = vmatmul.f32.gmra.mxu0 %v7312_v3  ;;  %7392 = vmatmul.f32.gmra.mxu1 %v13544_v39 }
0x16cb   :  { %v7223_v43 = vsub.f32 %v7207_v7, %v7215_v44  ;;  %v7694_v7 = vand.u32 4294901760, %v7651_v32 }
0x16cc   :  { %7450 = vmatmul.f32.gmra.mxu2 %v7317_v48 }
0x16cd   :  { %v7236_v27 = vadd.f32 %v10480_v14, %v7223_v43  ;;  %v7782_v26 = vsub.f32 %v7651_v32, %v7694_v7 }
0x16ce   :  { %7514 = vmatmul.f32.gmra.mxu3 %v7318_v36 }
0x16cf   :  { %v7261_v4 = vsel %vm1238_vm6, %v7236_v27, 0  ;;  %v7783_v3 = vand.u32 4294901760, %v7782_v26 }
0x16d0   :  { %v7332_v35 = vand.u32 4294901760, %v7261_v4 }
0x16d1   :  { %v7784_v44 = vsub.f32 %v7782_v26, %v7783_v3 }
0x16d2   :  { %7321 = vmatmul.f32.gmra.mxu0 %v7320_v17  ;;  %7396 = vmatmul.f32.gmra.mxu1 %v7324_v62  ;;  %v7333_v40 = vsub.f32 %v7261_v4, %v7332_v35 }
0x16d3   :  { %v7785_v45 = vand.u32 4294901760, %v7784_v44 }
0x16d4   :  { %7455 = vmatmul.f32.gmra.mxu2 %v7325_v52  ;;  %v7334_v59 = vand.u32 4294901760, %v7333_v40  ;;  %v13590_v52 = vld [vmem:[%s14377_s8 + $0x10] sm:$0xff]  ;;  %s10482_s8 = sld [smem:[#allocation2 + $0x2]] }
0x16d5   :  { %v13593_v27 = vperm.slane %v13590_v52, 0 }
0x16d6   :  { %7520 = vmatmul.f32.gmra.mxu3 %v7326_v15  ;;  %v7335_v5 = vsub.f32 %v7333_v40, %v7334_v59 }
0x16d7   :  { %v7291_v15 = vadd.f32 %v7290_v54, %v13593_v27 }
0x16d8   :  { %v7336_v14 = vand.u32 4294901760, %v7335_v5 }
0x16da   :  { %7329 = vmatmul.f32.gmra.mxu0 %v7328_v47  ;;  %7400 = vmatmul.f32.gmra.mxu1 %v7332_v35  ;;  %s8064_s6 = ssub.f32 1.0, %s10482_s8 }
0x16dc   :  { %7460 = vmatmul.f32.gmra.mxu2 %v7333_v40  ;;  %v7491_v40 = vpop.f32.mrf.mxu3 }
0x16de   :  { %7526 = vmatmul.f32.gmra.mxu3 %v7334_v59 }
0x16e2   :  { %7337 = vmatmul.f32.gmra.mxu0 %v7336_v14 }
0x16e3   :  { %v7031_v12 = vpop.permute.xlu1 %7030 }
0x16e4   :  { %v7078_v6 = vmul.f32 %v13233_v16, %v7031_v12 }
0x16e6   :  { %v7086_v34 = vsub.f32 %v7069_v46, %v7078_v6 }
0x16e8   :  { %v7208_v60 = vadd.f32 %v7200_v63, %v7086_v34  ;;  %v7497_v34 = vpop.f32.mrf.mxu3 }
0x16f2   :  { %v7174_v29 = vpop.permute.xlu2 %7173 }
0x16f3   :  { %v7216_v42 = vmul.f32 %v13251_v51, %v7174_v29 }
0x16f5   :  { %v7224_v57 = vsub.f32 %v7208_v60, %v7216_v42 }
0x16f7   :  { %v7237_v13 = vadd.f32 %v10481_v49, %v7224_v57 }
0x16f9   :  { %v7264_v61 = vsel %vm1238_vm6, %v7237_v13, 0 }
0x16fa   :  { %v7340_v19 = vand.u32 4294901760, %v7264_v61 }
0x16fc   :  { %7404 = vmatmul.f32.gmra.mxu1 %v7340_v19  ;;  %v7341_v38 = vsub.f32 %v7264_v61, %v7340_v19 }
0x16fe   :  { %7465 = vmatmul.f32.gmra.mxu2 %v7341_v38  ;;  %v7342_v20 = vand.u32 4294901760, %v7341_v38 }
0x1700   :  { %7532 = vmatmul.f32.gmra.mxu3 %v7342_v20  ;;  %v7343_v53 = vsub.f32 %v7341_v38, %v7342_v20 }
0x1702   :  { %v7344_v16 = vand.u32 4294901760, %v7343_v53 }
0x1704   :  { %7345 = vmatmul.f32.gmra.mxu0 %v7344_v16  ;;  %7610 = vmatmul.f32.vlgmr.msra.gmra.mxu1 %v13308_v8 }
0x170c   :  { %7559 = vmatmul.f32.vlgmr.msra.gmra.mxu0 %v13308_v8  ;;  %7614 = vmatmul.f32.gmra.mxu1 %v13451_v31  ;;  %v7377_v8 = vpop.f32.mrf.mxu1 }
0x170d   :  { %v7378_v1 = vadd.f32 %v7377_v8, %v7291_v15 }
0x1714   :  { %7563 = vmatmul.f32.gmra.mxu0 %v13451_v31  ;;  %7618 = vmatmul.f32.gmra.mxu1 %v13522_v28  ;;  %v7381_v51 = vpop.f32.mrf.mxu1  ;;  %v7298_v31 = vpop.f32.mrf.mxu0 }
0x1715   :  { %v7299_v14 = vadd.f32 %v7298_v31, %v13593_v27 }
0x1717   :  { %v7382_v63 = vadd.f32 %v7381_v51, %v7299_v14 }
0x171c   :  { %7567 = vmatmul.f32.gmra.mxu0 %v13522_v28  ;;  %7622 = vmatmul.f32.gmra.mxu1 %v13542_v2 }
0x1722   :  { %v7385_v55 = vpop.f32.mrf.mxu1 }
0x1724   :  { %7571 = vmatmul.f32.gmra.mxu0 %v13542_v2  ;;  %7626 = vmatmul.f32.gmra.mxu1 %v13544_v39 }
0x172a   :  { %v7306_v28 = vpop.f32.mrf.mxu0 }
0x172b   :  { %v7307_v13 = vadd.f32 %v7306_v28, %v13593_v27 }
0x172c   :  { %7575 = vmatmul.f32.gmra.mxu0 %v13544_v39  ;;  %7630 = vmatmul.f32.gmra.mxu1 %v7324_v62  ;;  %v7652_v39 = vld [vmem:[#allocation6 + $0x18] sm:$0xff]  ;;  %v7503_v8 = vpop.f32.mrf.mxu3 }
0x172d   :  { %v7692_v58 = vand.u32 4294901760, %v7652_v39  ;;  %v7386_v53 = vadd.f32 %v7385_v55, %v7307_v13 }
0x172f   :  { %7693 = vmatpush.msrb.mxu2 %v7692_v58  ;;  %v7776_v48 = vsub.f32 %v7652_v39, %v7692_v58  ;;  %7896 = vmatpush.msrb.mxu1 %v7692_v58 }
0x1731   :  { %v7777_v24 = vand.u32 4294901760, %v7776_v48  ;;  %7836 = vmatpush.msrb.mxu0 %v7776_v48  ;;  %7898 = vmatpush.msrb.mxu1 %v7694_v7 }
0x1732   :  { %7695 = vmatpush.msrb.mxu2 %v7694_v7 }
0x1733   :  { %v7778_v30 = vsub.f32 %v7776_v48, %v7777_v24  ;;  %7839 = vmatpush.msrb.mxu0 %v7782_v26 }
0x1734   :  { %7579 = vmatmul.f32.gmra.mxu0 %v7324_v62  ;;  %7634 = vmatmul.f32.gmra.mxu1 %v7332_v35 }
0x1735   :  { %7965 = vmatpush.msra.mxu2 %v7777_v24  ;;  %v7779_v62 = vand.u32 4294901760, %v7778_v30 }
0x1737   :  { %7969 = vmatpush.msra.mxu2 %v7783_v3  ;;  %7780 = vmatpush.msrb.mxu3 %v7779_v62 }
0x1739   :  { %7786 = vmatpush.msrb.mxu3 %v7785_v45 }
0x173b   :  { %8018 = vmatpush.msra.mxu3 %v7692_v58 }
0x173c   :  { %7583 = vmatmul.f32.gmra.mxu0 %v7332_v35  ;;  %7638 = vmatmul.f32.gmra.mxu1 %v7340_v19  ;;  %v7431_v35 = vpop.f32.mrf.mxu2 }
0x173d   :  { %8020 = vmatpush.msra.mxu3 %v7694_v7  ;;  %v7432_v5 = vadd.f32 %v7431_v35, %v7378_v1 }
0x173f   :  { %v13573_v46 = vpop.f32.mrf.mxu1  ;;  %v7492_v6 = vadd.f32 %v7491_v40, %v7432_v5 }
0x1744   :  { %7587 = vmatmul.f32.gmra.mxu0 %v7340_v19  ;;  %v7436_v12 = vpop.f32.mrf.mxu2 }
0x1745   :  { %v7437_v57 = vadd.f32 %v7436_v12, %v7382_v63 }
0x1747   :  { %v13575_v49 = vpop.f32.mrf.mxu0  ;;  %v13577_v2 = vpop.f32.mrf.mxu1  ;;  %v7498_v20 = vadd.f32 %v7497_v34, %v7437_v57 }
0x1748   :  { %v7315_v28 = vadd.f32 %v13575_v49, %v13593_v27 }
0x1749   :  { %v7509_v44 = vpop.f32.mrf.mxu3 }
0x174a   :  { %v7390_v3 = vadd.f32 %v13573_v46, %v7315_v28 }
0x174c   :  { %v7441_v19 = vpop.f32.mrf.mxu2 }
0x174d   :  { %v7442_v32 = vadd.f32 %v7441_v19, %v7386_v53 }
0x174f   :  { %v13579_v0 = vpop.f32.mrf.mxu0  ;;  %v13581_v21 = vpop.f32.mrf.mxu1  ;;  %v7504_v30 = vadd.f32 %v7503_v8, %v7442_v32 }
0x1750   :  { %v7323_v5 = vadd.f32 %v13579_v0, %v13593_v27 }
0x1751   :  { %v7515_v19 = vpop.f32.mrf.mxu3 }
0x1754   :  { %v7446_v7 = vpop.f32.mrf.mxu2 }
0x1757   :  { %v13583_v36 = vpop.f32.mrf.mxu0  ;;  %v13585_v43 = vpop.f32.mrf.mxu1 }
0x175f   :  { %v13595_v4 = vpop.f32.mrf.mxu0 }
0x1779   :  { %v13597_v17 = vpop.f32.mrf.mxu1 }
0x1781   :  { %v13600_v47 = vpop.f32.mrf.mxu0  ;;  %v7611_v59 = vpop.f32.mrf.mxu1 }
0x1789   :  { %v7560_v60 = vpop.f32.mrf.mxu0  ;;  %v7615_v42 = vpop.f32.mrf.mxu1 }
0x178a   :  { %v7561_v29 = vadd.f32 %v7560_v60, %v7492_v6  ;;  %v7451_v6 = vpop.f32.mrf.mxu2  ;;  %v7394_v60 = vadd.f32 %v13577_v2, %v7323_v5 }
0x178c   :  { %v7612_v61 = vadd.f32 %v7611_v59, %v7561_v29  ;;  %v7447_v59 = vadd.f32 %v7446_v7, %v7390_v3  ;;  %v7521_v3 = vpop.f32.mrf.mxu3 }
0x178e   :  { %v7642_v38 = vmax.f32 %v7612_v61, 0.0  ;;  %v7510_v34 = vadd.f32 %v7509_v44, %v7447_v59 }
0x1790   :  { %v7655_v16 = vsel %vm1238_vm6, %v7642_v38, 0  ;;  %v7452_v38 = vadd.f32 %v7451_v6, %v7394_v60  ;;  %v7347_v6 = vadd.f32 %v13600_v47, %v13593_v27 }
0x1791   :  { %v13605_v54 = vand.u32 4294901760, %v7655_v16  ;;  %v7564_v31 = vpop.f32.mrf.mxu0  ;;  %v7619_v51 = vpop.f32.mrf.mxu1 }
0x1792   :  { %v7565_v39 = vadd.f32 %v7564_v31, %v7498_v20  ;;  %v7331_v20 = vadd.f32 %v13583_v36, %v13593_v27  ;;  %v7456_v32 = vpop.f32.mrf.mxu2 }
0x1793   :  { %v7697_v58 = vsub.f32 %v7655_v16, %v13605_v54  ;;  %7788 = vmatmul.f32.vlgmr.msrb.gmra.mxu3 %v13605_v54 }
0x1794   :  { %v7616_v48 = vadd.f32 %v7615_v42, %v7565_v39  ;;  %v7516_v39 = vadd.f32 %v7515_v19, %v7452_v38  ;;  %v7527_v60 = vpop.f32.mrf.mxu3 }
0x1795   :  { %v7698_v24 = vand.u32 4294901760, %v7697_v58  ;;  %7842 = vmatmul.f32.vlgmr.msrb.gmra.mxu0 %v7697_v58 }
0x1796   :  { %v7643_v55 = vmax.f32 %v7616_v48, 0.0 }
0x1797   :  { %v7699_v26 = vsub.f32 %v7697_v58, %v7698_v24  ;;  %7902 = vmatmul.f32.vlgmr.msrb.gmra.mxu1 %v7698_v24 }
0x1798   :  { %v7658_v62 = vsel %vm1238_vm6, %v7643_v55, 0 }
0x1799   :  { %v13613_v45 = vand.u32 4294901760, %v7658_v62  ;;  %v7568_v15 = vpop.f32.mrf.mxu0  ;;  %v7700_v35 = vand.u32 4294901760, %v7699_v26  ;;  %v7623_v40 = vpop.f32.mrf.mxu1  ;;  %v7339_v26 = vadd.f32 %v13595_v4, %v13593_v27 }
0x179a   :  { %v7569_v1 = vadd.f32 %v7568_v15, %v7504_v30 }
0x179b   :  { %7701 = vmatmul.f32.vlgmr.msrb.gmra.mxu2 %v7700_v35  ;;  %7792 = vmatmul.f32.gmra.mxu3 %v13613_v45  ;;  %v7705_v49 = vsub.f32 %v7658_v62, %v13613_v45 }
0x179c   :  { %v7620_v14 = vadd.f32 %v7619_v51, %v7569_v1  ;;  %v7398_v51 = vadd.f32 %v13581_v21, %v7331_v20  ;;  %v7402_v1 = vadd.f32 %v13585_v43, %v7339_v26 }
0x179d   :  { %7847 = vmatmul.f32.gmra.mxu0 %v7705_v49  ;;  %v7706_v46 = vand.u32 4294901760, %v7705_v49 }
0x179e   :  { %v7644_v12 = vmax.f32 %v7620_v14, 0.0  ;;  %v7457_v55 = vadd.f32 %v7456_v32, %v7398_v51 }
0x179f   :  { %7908 = vmatmul.f32.gmra.mxu1 %v7706_v46  ;;  %v7707_v63 = vsub.f32 %v7705_v49, %v7706_v46  ;;  %v7461_v46 = vpop.f32.mrf.mxu2 }
0x17a0   :  { %v7661_v29 = vsel %vm1238_vm6, %v7644_v12, 0  ;;  %v7522_v35 = vadd.f32 %v7521_v3, %v7457_v55  ;;  %v7462_v12 = vadd.f32 %v7461_v46, %v7402_v1 }
0x17a1   :  { %v13621_v42 = vand.u32 4294901760, %v7661_v29  ;;  %v7572_v57 = vpop.f32.mrf.mxu0  ;;  %v7708_v13 = vand.u32 4294901760, %v7707_v63  ;;  %v7627_v16 = vpop.f32.mrf.mxu1 }
0x17a2   :  { %v7573_v61 = vadd.f32 %v7572_v57, %v7510_v34  ;;  %v7528_v57 = vadd.f32 %v7527_v60, %v7462_v12 }
0x17a3   :  { %7709 = vmatmul.f32.gmra.mxu2 %v7708_v13  ;;  %7796 = vmatmul.f32.gmra.mxu3 %v13621_v42  ;;  %v7713_v0 = vsub.f32 %v7661_v29, %v13621_v42  ;;  %v7406_v13 = vadd.f32 %v13597_v17, %v7347_v6 }
0x17a4   :  { %v7624_v53 = vadd.f32 %v7623_v40, %v7573_v61 }
0x17a5   :  { %7852 = vmatmul.f32.gmra.mxu0 %v7713_v0  ;;  %v7714_v2 = vand.u32 4294901760, %v7713_v0 }
0x17a6   :  { %v7645_v8 = vmax.f32 %v7624_v53, 0.0 }
0x17a7   :  { %7914 = vmatmul.f32.gmra.mxu1 %v7714_v2  ;;  %v7715_v31 = vsub.f32 %v7713_v0, %v7714_v2 }
0x17a8   :  { %v7664_v58 = vsel %vm1238_vm6, %v7645_v8, 0 }
0x17a9   :  { %v13629_v28 = vand.u32 4294901760, %v7664_v58  ;;  %v7576_v48 = vpop.f32.mrf.mxu0  ;;  %v7716_v7 = vand.u32 4294901760, %v7715_v31  ;;  %v7631_v44 = vpop.f32.mrf.mxu1 }
0x17aa   :  { %v7577_v24 = vadd.f32 %v7576_v48, %v7516_v39  ;;  %v7533_v39 = vpop.f32.mrf.mxu3 }
0x17ab   :  { %7717 = vmatmul.f32.gmra.mxu2 %v7716_v7  ;;  %7800 = vmatmul.f32.gmra.mxu3 %v13629_v28  ;;  %v7721_v36 = vsub.f32 %v7664_v58, %v13629_v28 }
0x17ac   :  { %v7628_v30 = vadd.f32 %v7627_v16, %v7577_v24  ;;  %v7466_v16 = vpop.f32.mrf.mxu2 }
0x17ad   :  { %7857 = vmatmul.f32.gmra.mxu0 %v7721_v36  ;;  %v7722_v21 = vand.u32 4294901760, %v7721_v36  ;;  %v7467_v47 = vadd.f32 %v7466_v16, %v7406_v13 }
0x17ae   :  { %v7646_v62 = vmax.f32 %v7628_v30, 0.0 }
0x17af   :  { %7920 = vmatmul.f32.gmra.mxu1 %v7722_v21  ;;  %v7723_v15 = vsub.f32 %v7721_v36, %v7722_v21  ;;  %v7534_v17 = vadd.f32 %v7533_v39, %v7467_v47 }
0x17b0   :  { %v7667_v40 = vsel %vm1238_vm6, %v7646_v62, 0 }
0x17b1   :  { %v13637_v49 = vand.u32 4294901760, %v7667_v40  ;;  %v7580_v59 = vpop.f32.mrf.mxu0  ;;  %v7724_v5 = vand.u32 4294901760, %v7723_v15  ;;  %v7635_v0 = vpop.f32.mrf.mxu1 }
0x17b2   :  { %v7581_v14 = vadd.f32 %v7580_v59, %v7522_v35 }
0x17b3   :  { %7725 = vmatmul.f32.gmra.mxu2 %v7724_v5  ;;  %7804 = vmatmul.f32.gmra.mxu3 %v13637_v49  ;;  %v7729_v4 = vsub.f32 %v7667_v40, %v13637_v49 }
0x17b4   :  { %v7632_v63 = vadd.f32 %v7631_v44, %v7581_v14 }
0x17b5   :  { %7862 = vmatmul.f32.gmra.mxu0 %v7729_v4  ;;  %v7730_v43 = vand.u32 4294901760, %v7729_v4 }
0x17b6   :  { %v7647_v34 = vmax.f32 %v7632_v63, 0.0 }
0x17b7   :  { %7926 = vmatmul.f32.gmra.mxu1 %v7730_v43  ;;  %v7731_v29 = vsub.f32 %v7729_v4, %v7730_v43 }
0x17b8   :  { %v7670_v61 = vsel %vm1238_vm6, %v7647_v34, 0 }
0x17b9   :  { %v7736_v19 = vand.u32 4294901760, %v7670_v61  ;;  %v7584_v38 = vpop.f32.mrf.mxu0  ;;  %v7732_v20 = vand.u32 4294901760, %v7731_v29  ;;  %v7639_v36 = vpop.f32.mrf.mxu1 }
0x17ba   :  { %v7585_v53 = vadd.f32 %v7584_v38, %v7528_v57 }
0x17bb   :  { %7733 = vmatmul.f32.gmra.mxu2 %v7732_v20  ;;  %7808 = vmatmul.f32.gmra.mxu3 %v7736_v19  ;;  %v7737_v27 = vsub.f32 %v7670_v61, %v7736_v19 }
0x17bc   :  { %v7636_v2 = vadd.f32 %v7635_v0, %v7585_v53  ;;  %v13672_v0 = vperm.slane %v13590_v52, 1 }
0x17bd   :  { %7867 = vmatmul.f32.gmra.mxu0 %v7737_v27  ;;  %v7738_v8 = vand.u32 4294901760, %v7737_v27 }
0x17be   :  { %v7648_v31 = vmax.f32 %v7636_v2, 0.0 }
0x17bf   :  { %7932 = vmatmul.f32.gmra.mxu1 %v7738_v8  ;;  %v7739_v51 = vsub.f32 %v7737_v27, %v7738_v8 }
0x17c0   :  { %v7673_v58 = vsel %vm1238_vm6, %v7648_v31, 0 }
0x17c1   :  { %v7744_v32 = vand.u32 4294901760, %v7673_v58  ;;  %v7588_v48 = vpop.f32.mrf.mxu0  ;;  %v7740_v7 = vand.u32 4294901760, %v7739_v51 }
0x17c2   :  { %v7589_v24 = vadd.f32 %v7588_v48, %v7534_v17 }
0x17c3   :  { %7741 = vmatmul.f32.gmra.mxu2 %v7740_v7  ;;  %7812 = vmatmul.f32.gmra.mxu3 %v7744_v32  ;;  %v7745_v55 = vsub.f32 %v7673_v58, %v7744_v32 }
0x17c4   :  { %v7640_v26 = vadd.f32 %v7639_v36, %v7589_v24 }
0x17c5   :  { %7872 = vmatmul.f32.gmra.mxu0 %v7745_v55  ;;  %v7746_v30 = vand.u32 4294901760, %v7745_v55 }
0x17c6   :  { %v7649_v3 = vmax.f32 %v7640_v26, 0.0  ;;  %v13678_v26 = vstv %s8064_s6 }
0x17c7   :  { %7938 = vmatmul.f32.gmra.mxu1 %v7746_v30  ;;  %v7747_v21 = vsub.f32 %v7745_v55, %v7746_v30  ;;  %v13680_v30 = vstv %s10482_s8 }
0x17c8   :  { %v7676_v62 = vsel %vm1238_vm6, %v7649_v3, 0  ;;  %v8067_v3 = vmul.f32 %v13678_v26, %v12740_v37  ;;  %v8068_v37 = vmul.f32 %v13678_v26, %v12752_v56  ;;  %v8069_v56 = vmul.f32 %v13678_v26, %v12762_v9 }
0x17c9   :  { %v7752_v44 = vand.u32 4294901760, %v7676_v62  ;;  %v7748_v15 = vand.u32 4294901760, %v7747_v21 }
0x17cb   :  { %7749 = vmatmul.f32.gmra.mxu2 %v7748_v15  ;;  %7816 = vmatmul.f32.gmra.mxu3 %v7752_v44  ;;  %v7753_v35 = vsub.f32 %v7676_v62, %v7752_v44 }
0x17cd   :  { %7877 = vmatmul.f32.gmra.mxu0 %v7753_v35  ;;  %v7754_v1 = vand.u32 4294901760, %v7753_v35 }
0x17cf   :  { %7944 = vmatmul.f32.gmra.mxu1 %v7754_v1  ;;  %v7755_v40 = vsub.f32 %v7753_v35, %v7754_v1 }
0x17d1   :  { %v7756_v59 = vand.u32 4294901760, %v7755_v40 }
0x17d3   :  { %7757 = vmatmul.f32.gmra.mxu2 %v7756_v59  ;;  %8022 = vmatmul.f32.vlgmr.msra.gmra.mxu3 %v13605_v54 }
0x17db   :  { %7971 = vmatmul.f32.vlgmr.msra.gmra.mxu2 %v13605_v54  ;;  %8026 = vmatmul.f32.gmra.mxu3 %v13613_v45 }
0x17e3   :  { %7975 = vmatmul.f32.gmra.mxu2 %v13613_v45  ;;  %8030 = vmatmul.f32.gmra.mxu3 %v13621_v42 }
0x17eb   :  { %7979 = vmatmul.f32.gmra.mxu2 %v13621_v42  ;;  %8034 = vmatmul.f32.gmra.mxu3 %v13629_v28 }
0x17f3   :  { %7983 = vmatmul.f32.gmra.mxu2 %v13629_v28  ;;  %8038 = vmatmul.f32.gmra.mxu3 %v13637_v49 }
0x17fb   :  { %7987 = vmatmul.f32.gmra.mxu2 %v13637_v49  ;;  %8042 = vmatmul.f32.gmra.mxu3 %v7736_v19 }
0x1803   :  { %7991 = vmatmul.f32.gmra.mxu2 %v7736_v19  ;;  %8046 = vmatmul.f32.gmra.mxu3 %v7744_v32 }
0x180b   :  { %7995 = vmatmul.f32.gmra.mxu2 %v7744_v32  ;;  %8050 = vmatmul.f32.gmra.mxu3 %v7752_v44 }
0x1812   :  { %v7843_v34 = vpop.f32.mrf.mxu0 }
0x1813   :  { %7999 = vmatmul.f32.gmra.mxu2 %v7752_v44 }
0x1814   :  { %v7903_v60 = vpop.f32.mrf.mxu1 }
0x1816   :  { %v7789_v54 = vpop.f32.mrf.mxu3 }
0x181a   :  { %v7848_v13 = vpop.f32.mrf.mxu0 }
0x181c   :  { %v7909_v38 = vpop.f32.mrf.mxu1 }
0x181e   :  { %v7702_v45 = vpop.f32.mrf.mxu2  ;;  %v7793_v5 = vpop.f32.mrf.mxu3 }
0x181f   :  { %v7703_v7 = vadd.f32 %v7702_v45, %v13672_v0 }
0x1821   :  { %v7790_v44 = vadd.f32 %v7789_v54, %v7703_v7  ;;  %v8066_v7 = vmul.f32 %v13678_v26, %v12730_v11 }
0x1822   :  { %v7853_v53 = vpop.f32.mrf.mxu0 }
0x1824   :  { %v7915_v31 = vpop.f32.mrf.mxu1 }
0x1826   :  { %v7710_v14 = vpop.f32.mrf.mxu2  ;;  %v7797_v46 = vpop.f32.mrf.mxu3 }
0x1827   :  { %v7711_v20 = vadd.f32 %v7710_v14, %v13672_v0  ;;  %v7844_v14 = vadd.f32 %v7843_v34, %v7790_v44 }
0x1829   :  { %v7794_v16 = vadd.f32 %v7793_v5, %v7711_v20 }
0x182a   :  { %v7858_v48 = vpop.f32.mrf.mxu0 }
0x182b   :  { %v7849_v8 = vadd.f32 %v7848_v13, %v7794_v16 }
0x182c   :  { %v7921_v62 = vpop.f32.mrf.mxu1 }
0x182d   :  { %v7910_v51 = vadd.f32 %v7909_v38, %v7849_v8 }
0x182e   :  { %v7718_v42 = vpop.f32.mrf.mxu2  ;;  %v7801_v4 = vpop.f32.mrf.mxu3 }
0x182f   :  { %v7719_v2 = vadd.f32 %v7718_v42, %v13672_v0 }
0x1831   :  { %v7798_v39 = vadd.f32 %v7797_v46, %v7719_v2 }
0x1833   :  { %v7854_v55 = vadd.f32 %v7853_v53, %v7798_v39 }
0x1834   :  { %v7927_v20 = vpop.f32.mrf.mxu1 }
0x1835   :  { %v7916_v35 = vadd.f32 %v7915_v31, %v7854_v55 }
0x1836   :  { %v7726_v12 = vpop.f32.mrf.mxu2  ;;  %v13657_v6 = vpop.f32.mrf.mxu3 }
0x1837   :  { %v7727_v24 = vadd.f32 %v7726_v12, %v13672_v0  ;;  %v7863_v12 = vpop.f32.mrf.mxu0 }
0x1839   :  { %v7802_v15 = vadd.f32 %v7801_v4, %v7727_v24  ;;  %v7904_v4 = vadd.f32 %v7903_v60, %v7844_v14 }
0x183b   :  { %v7859_v42 = vadd.f32 %v7858_v48, %v7802_v15 }
0x183d   :  { %v7922_v13 = vadd.f32 %v7921_v62, %v7859_v42 }
0x183e   :  { %v13659_v28 = vpop.f32.mrf.mxu2  ;;  %v13661_v63 = vpop.f32.mrf.mxu3 }
0x183f   :  { %v7735_v11 = vadd.f32 %v13659_v28, %v13672_v0 }
0x1846   :  { %v7742_v49 = vpop.f32.mrf.mxu2  ;;  %v13663_v43 = vpop.f32.mrf.mxu3 }
0x1847   :  { %v7743_v34 = vadd.f32 %v7742_v49, %v13672_v0  ;;  %v7933_v49 = vpop.f32.mrf.mxu1 }
0x184e   :  { %v13665_v29 = vpop.f32.mrf.mxu2  ;;  %v13667_v57 = vpop.f32.mrf.mxu3 }
0x184f   :  { %v7751_v9 = vadd.f32 %v13665_v29, %v13672_v0 }
0x1856   :  { %v13669_v61 = vpop.f32.mrf.mxu2  ;;  %v8023_v19 = vpop.f32.mrf.mxu3 }
0x1857   :  { %v7759_v29 = vadd.f32 %v13669_v61, %v13672_v0 }
0x185e   :  { %v7972_v27 = vpop.f32.mrf.mxu2  ;;  %v8027_v47 = vpop.f32.mrf.mxu3 }
0x185f   :  { %v7973_v16 = vadd.f32 %v7972_v27, %v7904_v4 }
0x1861   :  { %v8024_v39 = vadd.f32 %v8023_v19, %v7973_v16 }
0x1863   :  { %v8056_v48 = vmul.f32 %v13680_v30, %v8024_v39 }
0x1865   :  { %v13710_v24 = vadd.f32 %v8066_v7, %v8056_v48 }
0x1866   :  { %v7976_v17 = vpop.f32.mrf.mxu2  ;;  %v8031_v58 = vpop.f32.mrf.mxu3 }
0x1867   :  { %v7977_v32 = vadd.f32 %v7976_v17, %v7910_v51  ;;  %v7868_v51 = vpop.f32.mrf.mxu0  ;;  %v7810_v17 = vadd.f32 %v13661_v63, %v7743_v34  ;;  %v8082_v44 = vsel %vm1238_vm6, %v13710_v24, 0.0 }
0x1869   :  { %v8028_v36 = vadd.f32 %v8027_v47, %v7977_v32  ;;  %v7869_v19 = vadd.f32 %v7868_v51, %v7810_v17 }
0x186b   :  { %v8057_v21 = vmul.f32 %v13680_v30, %v8028_v36  ;;  %v7814_v36 = vadd.f32 %v13663_v43, %v7751_v9  ;;  %v7934_v55 = vadd.f32 %v7933_v49, %v7869_v19  ;;  %v8071_v43 = vmul.f32 %v13678_v26, %v12784_v50 }
0x186c   :  { %v8072_v50 = vmul.f32 %v13678_v26, %v12790_v18 }
0x186d   :  { %v13685_v1 = vadd.f32 %v8067_v3, %v8057_v21 }
0x186e   :  { %v7980_v40 = vpop.f32.mrf.mxu2  ;;  %v8035_v5 = vpop.f32.mrf.mxu3 }
0x186f   :  { %v7981_v59 = vadd.f32 %v7980_v40, %v7916_v35  ;;  %v8085_v45 = vsel %vm1238_vm6, %v13685_v1, 0.0  ;;  %v7873_v3 = vpop.f32.mrf.mxu0  ;;  %v7939_v40 = vpop.f32.mrf.mxu1 }
0x1870   :  { %8086 = vadd.xlane.f32.xlu2 %v8085_v45  ;;  %v7874_v35 = vadd.f32 %v7873_v3, %v7814_v36  ;;  %v7806_v45 = vadd.f32 %v13657_v6, %v7735_v11 }
0x1871   :  { %v8032_v46 = vadd.f32 %v8031_v58, %v7981_v59 }
0x1872   :  { %v7940_v14 = vadd.f32 %v7939_v40, %v7874_v35  ;;  %v7864_v0 = vadd.f32 %v7863_v12, %v7806_v45  ;;  %v8073_v12 = vmul.f32 %v13678_v26, %v12794_v41 }
0x1873   :  { %v8058_v54 = vmul.f32 %v13680_v30, %v8032_v46 }
0x1874   :  { %v7928_v16 = vadd.f32 %v7927_v20, %v7864_v0 }
0x1875   :  { %v13692_v38 = vadd.f32 %v8068_v37, %v8058_v54 }
0x1876   :  { %v7984_v53 = vpop.f32.mrf.mxu2  ;;  %v8039_v31 = vpop.f32.mrf.mxu3 }
0x1877   :  { %v7985_v47 = vadd.f32 %v7984_v53, %v7922_v13  ;;  %v8088_v2 = vsel %vm1238_vm6, %v13692_v38, 0.0  ;;  %v7878_v61 = vpop.f32.mrf.mxu0  ;;  %v7945_v6 = vpop.f32.mrf.mxu1 }
0x1878   :  { %8089 = vadd.xlane.f32.xlu1 %v8088_v2 }
0x1879   :  { %v8036_v8 = vadd.f32 %v8035_v5, %v7985_v47  ;;  %v7818_v5 = vadd.f32 %v13667_v57, %v7759_v29 }
0x187b   :  { %v8059_v60 = vmul.f32 %v13680_v30, %v8036_v8  ;;  %v7879_v13 = vadd.f32 %v7878_v61, %v7818_v5 }
0x187d   :  { %v13701_v58 = vadd.f32 %v8069_v56, %v8059_v60  ;;  %v7946_v57 = vadd.f32 %v7945_v6, %v7879_v13 }
0x187e   :  { %v7988_v27 = vpop.f32.mrf.mxu2  ;;  %v8043_v63 = vpop.f32.mrf.mxu3 }
0x187f   :  { %v8091_v32 = vsel %vm1238_vm6, %v13701_v58, 0.0  ;;  %v7989_v34 = vadd.f32 %v7988_v27, %v7928_v16  ;;  %v8070_v27 = vmul.f32 %v13678_v26, %v12774_v10 }
0x1880   :  { %8092 = vadd.xlane.f32.xlu0 %v8091_v32 }
0x1881   :  { %v8040_v51 = vadd.f32 %v8039_v31, %v7989_v34 }
0x1883   :  { %v8060_v20 = vmul.f32 %v13680_v30, %v8040_v51 }
0x1885   :  { %v8078_v48 = vadd.f32 %v8070_v27, %v8060_v20 }
0x1886   :  { %v7992_v21 = vpop.f32.mrf.mxu2  ;;  %v8047_v42 = vpop.f32.mrf.mxu3 }
0x1887   :  { %v7993_v62 = vadd.f32 %v7992_v21, %v7934_v55  ;;  %v8094_v49 = vsel %vm1238_vm6, %v8078_v48, 0.0 }
0x1888   :  { %8083 = vadd.xlane.f32.xlu0 %v8082_v44 }
0x1889   :  { %v8044_v15 = vadd.f32 %v8043_v63, %v7993_v62 }
0x188b   :  { %v8061_v59 = vmul.f32 %v13680_v30, %v8044_v15 }
0x188d   :  { %v8079_v46 = vadd.f32 %v8071_v43, %v8061_v59 }
0x188e   :  { %v7996_v37 = vpop.f32.mrf.mxu2  ;;  %v8051_v39 = vpop.f32.mrf.mxu3 }
0x188f   :  { %v7997_v28 = vadd.f32 %v7996_v37, %v7940_v14  ;;  %v8097_v54 = vsel %vm1238_vm6, %v8079_v46, 0.0 }
0x1890   :  { %8098 = vadd.xlane.f32.xlu0 %v8097_v54 }
0x1891   :  { %v8048_v4 = vadd.f32 %v8047_v42, %v7997_v28 }
0x1893   :  { %v8062_v53 = vmul.f32 %v13680_v30, %v8048_v4 }
0x1895   :  { %v8080_v47 = vadd.f32 %v8072_v50, %v8062_v53 }
0x1896   :  { %v8000_v2 = vpop.f32.mrf.mxu2 }
0x1897   :  { %v8001_v8 = vadd.f32 %v8000_v2, %v7946_v57  ;;  %v8100_v56 = vsel %vm1238_vm6, %v8080_v47, 0.0 }
0x1898   :  { %8101 = vadd.xlane.f32.xlu2 %v8100_v56 }
0x1899   :  { %v8052_v60 = vadd.f32 %v8051_v39, %v8001_v8 }
0x189b   :  { %v8063_v18 = vmul.f32 %v13680_v30, %v8052_v60 }
0x189d   :  { %v8081_v17 = vadd.f32 %v8073_v12, %v8063_v18 }
0x189f   :  { %v8103_v32 = vsel %vm1238_vm6, %v8081_v17, 0.0 }
0x18a0   :  { %8104 = vadd.xlane.f32.xlu1 %v8103_v32 }
0x18a8   :  { %8095 = vadd.xlane.f32.xlu1 %v8094_v49 }
0x18e3   :  { %v8087_v7 = vpop.xlane.xlu2 %8086 }
0x18e4   :  { %v8107_v9 = vmul.f32 %v8087_v7, %v12052_v25 }
0x18e6   :  { %v13739_v41 = vsub.f32 %v13685_v1, %v8107_v9 }
0x18e8   :  { %v8123_v31 = vmul.f32 %v13739_v41, %v13739_v41 }
0x18ea   :  { %v8133_v19 = vsel %vm1238_vm6, %v8123_v31, 0.0 }
0x18eb   :  { %v8090_v30 = vpop.xlane.xlu1 %8089  ;;  %8134 = vadd.xlane.f32.xlu1 %v8133_v19 }
0x18ec   :  { %v8108_v63 = vmul.f32 %v8090_v30, %v12052_v25 }
0x18ee   :  { %v13746_v10 = vsub.f32 %v13692_v38, %v8108_v63 }
0x18f0   :  { %v8124_v26 = vmul.f32 %v13746_v10, %v13746_v10 }
0x18f2   :  { %v8136_v36 = vsel %vm1238_vm6, %v8124_v26, 0.0 }
0x18f3   :  { %v8093_v55 = vpop.xlane.xlu0 %8092  ;;  %8137 = vadd.xlane.f32.xlu0 %v8136_v36 }
0x18f4   :  { %v8109_v1 = vmul.f32 %v8093_v55, %v12052_v25  ;;  %v13794_v55 = vperm.slane %v13590_v52, 2 }
0x18f6   :  { %v13753_v3 = vsub.f32 %v13701_v58, %v8109_v1 }
0x18f8   :  { %v8125_v21 = vmul.f32 %v13753_v3, %v13753_v3 }
0x18fa   :  { %v8139_v62 = vsel %vm1238_vm6, %v8125_v21, 0.0 }
0x18fb   :  { %8140 = vadd.xlane.f32.xlu2 %v8139_v62  ;;  %v8084_v38 = vpop.xlane.xlu0 %8083 }
0x18fc   :  { %v8106_v44 = vmul.f32 %v8084_v38, %v12052_v25 }
0x18fe   :  { %v13760_v11 = vsub.f32 %v13710_v24, %v8106_v44 }
0x1900   :  { %v8122_v29 = vmul.f32 %v13760_v11, %v13760_v11 }
0x1902   :  { %v8130_v15 = vsel %vm1238_vm6, %v8122_v29, 0.0 }
0x1903   :  { %8131 = vadd.xlane.f32.xlu2 %v8130_v15  ;;  %v8099_v58 = vpop.xlane.xlu0 %8098 }
0x1904   :  { %v8111_v35 = vmul.f32 %v8099_v58, %v12052_v25 }
0x1906   :  { %v13766_v40 = vsub.f32 %v8079_v46, %v8111_v35  ;;  %v13801_v35 = vperm.slane %v13590_v52, 3 }
0x1908   :  { %v8127_v43 = vmul.f32 %v13766_v40, %v13766_v40 }
0x190a   :  { %v8145_v59 = vsel %vm1238_vm6, %v8127_v43, 0.0 }
0x190b   :  { %v8102_v45 = vpop.xlane.xlu2 %8101  ;;  %8146 = vadd.xlane.f32.xlu2 %v8145_v59 }
0x190c   :  { %v8112_v24 = vmul.f32 %v8102_v45, %v12052_v25 }
0x190e   :  { %v13772_v5 = vsub.f32 %v8080_v47, %v8112_v24 }
0x1910   :  { %v8128_v14 = vmul.f32 %v13772_v5, %v13772_v5 }
0x1912   :  { %v8148_v42 = vsel %vm1238_vm6, %v8128_v14, 0.0 }
0x1913   :  { %8149 = vadd.xlane.f32.xlu1 %v8148_v42  ;;  %v8105_v37 = vpop.xlane.xlu1 %8104 }
0x1914   :  { %v8113_v46 = vmul.f32 %v8105_v37, %v12052_v25 }
0x1916   :  { %v13778_v28 = vsub.f32 %v8081_v17, %v8113_v46 }
0x1918   :  { %v8129_v54 = vmul.f32 %v13778_v28, %v13778_v28 }
0x191a   :  { %v8151_v61 = vsel %vm1238_vm6, %v8129_v54, 0.0 }
0x191b   :  { %8152 = vadd.xlane.f32.xlu0 %v8151_v61  ;;  %v8096_v0 = vpop.xlane.xlu1 %8095 }
0x191c   :  { %v8110_v4 = vmul.f32 %v8096_v0, %v12052_v25 }
0x191e   :  { %v13784_v13 = vsub.f32 %v8078_v48, %v8110_v4 }
0x1920   :  { %v8126_v50 = vmul.f32 %v13784_v13, %v13784_v13 }
0x1922   :  { %v8142_v53 = vsel %vm1238_vm6, %v8126_v50, 0.0 }
0x1923   :  { %8143 = vadd.xlane.f32.xlu0 %v8142_v53 }
0x195e   :  { %v8135_v6 = vpop.xlane.xlu1 %8134 }
0x195f   :  { %v8155_v16 = vmul.f32 %v8135_v6, %v12052_v25 }
0x1961   :  { %v8163_v57 = vadd.f32 0.0001, %v8155_v16 }
0x1963   :  { %10549 = vrsqrt.f32 %v8163_v57  ;;  %vm8186_vm5 = vweird.f32 %v8163_v57 }
0x1966   :  { %v8138_v47 = vpop.xlane.xlu0 %8137 }
0x1967   :  { %v8156_v2 = vmul.f32 %v8138_v47, %v12052_v25 }
0x1969   :  { %v10550_v34 = vpop.eup %10549  ;;  %v8164_v8 = vadd.f32 0.0001, %v8156_v2 }
0x196a   :  { %v8181_v56 = vmul.f32 %v10550_v34, %v8163_v57  ;;  %vm8187_vm4 = vweird.f32 %v10550_v34 }
0x196b   :  { %10551 = vrsqrt.f32 %v8164_v8  ;;  %vm8188_vm13 = vmor %vm8186_vm5, %vm8187_vm4  ;;  %vm8196_vm15 = vweird.f32 %v8164_v8 }
0x196c   :  { %v8182_v39 = vmul.f32 %v10550_v34, %v8181_v56 }
0x196e   :  { %v8183_v60 = vmul.f32 0.5, %v8182_v39  ;;  %v8141_v12 = vpop.xlane.xlu2 %8140 }
0x196f   :  { %v8157_v51 = vmul.f32 %v8141_v12, %v12052_v25 }
0x1970   :  { %v8184_v17 = vsub.f32 1.5, %v8183_v60 }
0x1971   :  { %v10552_v18 = vpop.eup %10551  ;;  %v8165_v32 = vadd.f32 0.0001, %v8157_v51 }
0x1972   :  { %v8191_v20 = vmul.f32 %v10552_v18, %v8164_v8  ;;  %v8185_v48 = vmul.f32 %v10550_v34, %v8184_v17  ;;  %vm8197_vm14 = vweird.f32 %v10552_v18 }
0x1973   :  { %10553 = vrsqrt.f32 %v8165_v32  ;;  %vm8198_vm0 = vmor %vm8196_vm15, %vm8197_vm14  ;;  %vm8206_vm3 = vweird.f32 %v8165_v32 }
0x1974   :  { %v8192_v27 = vmul.f32 %v10552_v18, %v8191_v20  ;;  %v8189_v30 = vsel %vm8188_vm13, %v10550_v34, %v8185_v48 }
0x1975   :  { %v8251_v1 = vmul.f32 %v8189_v30, %v13739_v41 }
0x1976   :  { %v8193_v49 = vmul.f32 0.5, %v8192_v27  ;;  %v8132_v7 = vpop.xlane.xlu2 %8131 }
0x1977   :  { %v8154_v9 = vmul.f32 %v8132_v7, %v12052_v25  ;;  %v8260_v43 = vmul.f32 %v13794_v55, %v8251_v1 }
0x1978   :  { %v8194_v31 = vsub.f32 1.5, %v8193_v49 }
0x1979   :  { %v10554_v19 = vpop.eup %10553  ;;  %v8162_v63 = vadd.f32 0.0001, %v8154_v9  ;;  %v8269_v52 = vadd.f32 %v13801_v35, %v8260_v43 }
0x197a   :  { %v8195_v26 = vmul.f32 %v10552_v18, %v8194_v31  ;;  %v8201_v36 = vmul.f32 %v10554_v19, %v8165_v32  ;;  %vm8207_vm2 = vweird.f32 %v10554_v19 }
0x197b   :  { %10555 = vrsqrt.f32 %v8162_v63  ;;  %vm8208_vm4 = vmor %vm8206_vm3, %vm8207_vm2  ;;  %v8280_v16 = vsel %vm1238_vm6, %v8269_v52, 0  ;;  %vm8176_vm13 = vweird.f32 %v8162_v63 }
0x197c   :  { %v8199_v21 = vsel %vm8198_vm0, %v10552_v18, %v8195_v26  ;;  %v8202_v62 = vmul.f32 %v10554_v19, %v8201_v36  ;;  %v13822_v56 = vand.u32 4294901760, %v8280_v16 }
0x197d   :  { %v8252_v38 = vmul.f32 %v8199_v21, %v13746_v10 }
0x197e   :  { %v8203_v44 = vmul.f32 0.5, %v8202_v62  ;;  %v8147_v29 = vpop.xlane.xlu2 %8146  ;;  %v13838_v49 = vsub.f32 %v8280_v16, %v13822_v56 }
0x197f   :  { %v8261_v15 = vmul.f32 %v13794_v55, %v8252_v38  ;;  %v8159_v58 = vmul.f32 %v8147_v29, %v12052_v25 }
0x1980   :  { %v8204_v59 = vsub.f32 1.5, %v8203_v44  ;;  %v8351_v1 = vand.u32 4294901760, %v13838_v49 }
0x1981   :  { %v10556_v45 = vpop.eup %10555  ;;  %v13804_v24 = vadd.f32 0.0001, %v8159_v58  ;;  %v8270_v41 = vadd.f32 %v13801_v35, %v8261_v15 }
0x1982   :  { %v8205_v14 = vmul.f32 %v10554_v19, %v8204_v59  ;;  %v8171_v10 = vmul.f32 %v10556_v45, %v8162_v63  ;;  %vm8177_vm5 = vweird.f32 %v10556_v45 }
0x1983   :  { %10557 = vrsqrt.f32 %v13804_v24  ;;  %v8283_v54 = vsel %vm1238_vm6, %v8270_v41, 0  ;;  %vm8178_vm14 = vmor %vm8176_vm13, %vm8177_vm5  ;;  %vm8226_vm0 = vweird.f32 %v13804_v24 }
0x1984   :  { %v8209_v42 = vsel %vm8208_vm4, %v10554_v19, %v8205_v14  ;;  %v8172_v37 = vmul.f32 %v10556_v45, %v8171_v10  ;;  %v13813_v6 = vand.u32 4294901760, %v8283_v54 }
0x1985   :  { %v8253_v46 = vmul.f32 %v8209_v42, %v13753_v3 }
0x1986   :  { %v8173_v61 = vmul.f32 0.5, %v8172_v37  ;;  %v8150_v0 = vpop.xlane.xlu1 %8149  ;;  %v13828_v51 = vsub.f32 %v8283_v54, %v13813_v6 }
0x1987   :  { %v8262_v4 = vmul.f32 %v13794_v55, %v8253_v46  ;;  %v8160_v50 = vmul.f32 %v8150_v0, %v12052_v25 }
0x1988   :  { %v8174_v53 = vsub.f32 1.5, %v8173_v61  ;;  %v8345_v9 = vand.u32 4294901760, %v13828_v51 }
0x1989   :  { %v13816_v57 = vpop.eup %10557  ;;  %v8168_v47 = vadd.f32 0.0001, %v8160_v50  ;;  %v8271_v2 = vadd.f32 %v13801_v35, %v8262_v4 }
0x198a   :  { %v8175_v3 = vmul.f32 %v10556_v45, %v8174_v53  ;;  %v8221_v34 = vmul.f32 %v13816_v57, %v13804_v24  ;;  %v8346_v44 = vsub.f32 %v13828_v51, %v8345_v9  ;;  %vm8227_vm15 = vweird.f32 %v13816_v57 }
0x198b   :  { %10559 = vrsqrt.f32 %v8168_v47  ;;  %v8286_v8 = vsel %vm1238_vm6, %v8271_v2, 0  ;;  %vm8228_vm3 = vmor %vm8226_vm0, %vm8227_vm15  ;;  %vm8236_vm4 = vweird.f32 %v8168_v47 }
0x198c   :  { %v8179_v39 = vsel %vm8178_vm14, %v10556_v45, %v8175_v3  ;;  %v8222_v60 = vmul.f32 %v13816_v57, %v8221_v34  ;;  %v13825_v12 = vand.u32 4294901760, %v8286_v8  ;;  %v8352_v45 = vsub.f32 %v13838_v49, %v8351_v1 }
0x198d   :  { %v8250_v18 = vmul.f32 %v8179_v39, %v13760_v11  ;;  %v8347_v14 = vand.u32 4294901760, %v8346_v44  ;;  %v14529_v44 = vld [vmem:[#allocation30_spill] sm:$0xff] }
0x198e   :  { %v8223_v17 = vmul.f32 0.5, %v8222_v60  ;;  %8301 = vmatpush.xpose.msra.mxu0 %v13825_v12  ;;  %v13833_v32 = vsub.f32 %v8286_v8, %v13825_v12  ;;  %v8153_v20 = vpop.xlane.xlu0 %8152  ;;  %v8353_v61 = vand.u32 4294901760, %v8352_v45 }
0x198f   :  { %v8259_v27 = vmul.f32 %v13794_v55, %v8250_v18  ;;  %v8161_v48 = vmul.f32 %v8153_v20, %v12052_v25  ;;  %v14527_v18 = vld [vmem:[#allocation34_spill] sm:$0xff] }
0x1990   :  { %v8339_v7 = vand.u32 4294901760, %v13833_v32  ;;  %v8224_v30 = vsub.f32 1.5, %v8223_v17 }
0x1991   :  { %v10560_v31 = vpop.eup %10559  ;;  %v8169_v11 = vadd.f32 0.0001, %v8161_v48  ;;  %v8268_v19 = vadd.f32 %v13801_v35, %v8259_v27 }
0x1992   :  { %v8231_v63 = vmul.f32 %v10560_v31, %v8168_v47  ;;  %8303 = vmatpush.xpose.msra.mxu0 %v13813_v6  ;;  %v8340_v26 = vsub.f32 %v13833_v32, %v8339_v7  ;;  %v8225_v29 = vmul.f32 %v13816_v57, %v8224_v30  ;;  %vm8237_vm2 = vweird.f32 %v10560_v31 }
0x1993   :  { %10561 = vrsqrt.f32 %v8169_v11  ;;  %v8277_v36 = vsel %vm1238_vm6, %v8268_v19, 0  ;;  %vm8238_vm5 = vmor %vm8236_vm4, %vm8237_vm2  ;;  %vm8246_vm14 = vweird.f32 %v8169_v11 }
0x1994   :  { %v8232_v21 = vmul.f32 %v10560_v31, %v8231_v63  ;;  %v8341_v62 = vand.u32 4294901760, %v8340_v26  ;;  %v13849_v38 = vand.u32 4294901760, %v8277_v36  ;;  %v8229_v52 = vsel %vm8228_vm3, %v13816_v57, %v8225_v29 }
0x1995   :  { %v8255_v4 = vmul.f32 %v8229_v52, %v13766_v40  ;;  %v14532_v52 = vld [vmem:[#allocation33_spill] sm:$0xff] }
0x1996   :  { %v8233_v15 = vmul.f32 0.5, %v8232_v21  ;;  %8342 = vmatpush.xpose.msra.mxu1 %v8341_v62  ;;  %v8144_v58 = vpop.xlane.xlu0 %8143  ;;  %8305 = vmatpush.xpose.msra.mxu0 %v13822_v56  ;;  %v13858_v43 = vsub.f32 %v8277_v36, %v13849_v38  ;;  %v14528_v62 = vld [vmem:[#allocation16_spill] sm:$0xff] }
0x1997   :  { %v8158_v59 = vmul.f32 %v8144_v58, %v12052_v25  ;;  %v8264_v3 = vmul.f32 %v13794_v55, %v8255_v4 }
0x1998   :  { %v8234_v41 = vsub.f32 1.5, %v8233_v15  ;;  %v8357_v10 = vand.u32 4294901760, %v13858_v43 }
0x1999   :  { %v10562_v42 = vpop.eup %10561  ;;  %v8166_v37 = vadd.f32 0.0001, %v8158_v59  ;;  %v8273_v20 = vadd.f32 %v13801_v35, %v8264_v3 }
0x199a   :  { %v8235_v46 = vmul.f32 %v10560_v31, %v8234_v41  ;;  %v8241_v54 = vmul.f32 %v10562_v42, %v8169_v11  ;;  %8307 = vmatpush.xpose.msra.mxu0 %v13849_v38  ;;  %8348 = vmatpush.xpose.msra.mxu1 %v8347_v14  ;;  %v8358_v0 = vsub.f32 %v13858_v43, %v8357_v10  ;;  %vm8247_vm13 = vweird.f32 %v10562_v42  ;;  %v14531_v14 = vld [vmem:[#allocation32_spill] sm:$0xff] }
0x199b   :  { %10563 = vrsqrt.f32 %v8166_v37  ;;  %vm8248_vm15 = vmor %vm8246_vm14, %vm8247_vm13  ;;  %v8508_v19 = vsel %vm1238_vm6, %v8273_v20, 0  ;;  %vm8216_vm2 = vweird.f32 %v8166_v37 }
0x199c   :  { %v8239_v25 = vsel %vm8238_vm5, %v10560_v31, %v8235_v46  ;;  %v8242_v24 = vmul.f32 %v10562_v42, %v8241_v54  ;;  %v8359_v47 = vand.u32 4294901760, %v8358_v0 }
0x199d   :  { %v8256_v50 = vmul.f32 %v8239_v25, %v13772_v5  ;;  %8313 = vmatmul.f32.vlgmr.msra.gmra.mxu0 %v12183_v22 }
0x199e   :  { %8384 = vmatpush.xpose.msrb.mxu0 %v13833_v32  ;;  %v8243_v53 = vmul.f32 0.5, %v8242_v24  ;;  %8354 = vmatpush.xpose.msra.mxu1 %v8353_v61  ;;  %v8532_v32 = vand.u32 4294901760, %v8508_v19  ;;  %v10498_v24 = vld [vmem:[%s14379_s10 + $0x28] sm:$0xff] }
0x199f   :  { %v8265_v16 = vmul.f32 %v13794_v55, %v8256_v50  ;;  %v8768_v4 = vand.u32 4294901760, %v10498_v24  ;;  %v10497_v50 = vld [vmem:[%s14379_s10 + $0x20] sm:$0xff] }
0x19a0   :  { %v8244_v57 = vsub.f32 1.5, %v8243_v53  ;;  %v8578_v58 = vsub.f32 %v8508_v19, %v8532_v32 }
0x19a1   :  { %v10564_v2 = vpop.eup %10563  ;;  %v8274_v34 = vadd.f32 %v13801_v35, %v8265_v16 }
0x19a2   :  { %8387 = vmatpush.xpose.msrb.mxu0 %v13828_v51  ;;  %v8245_v8 = vmul.f32 %v10562_v42, %v8244_v57  ;;  %v8211_v40 = vmul.f32 %v10564_v2, %v8166_v37  ;;  %8360 = vmatpush.xpose.msra.mxu1 %v8359_v47  ;;  %vm8217_vm0 = vweird.f32 %v10564_v2  ;;  %v8579_v41 = vand.u32 4294901760, %v8578_v58 }
0x19a3   :  { %v8511_v17 = vsel %vm1238_vm6, %v8274_v34, 0  ;;  %vm8218_vm3 = vmor %vm8216_vm2, %vm8217_vm0  ;;  %v8830_v57 = vsub.f32 %v10498_v24, %v8768_v4  ;;  %v8770_v47 = vand.u32 4294901760, %v10497_v50 }
0x19a4   :  { %v8249_v5 = vsel %vm8248_vm15, %v10562_v42, %v8245_v8  ;;  %v8212_v39 = vmul.f32 %v10564_v2, %v8211_v40  ;;  %v8580_v37 = vsub.f32 %v8578_v58, %v8579_v41 }
0x19a5   :  { %v8257_v60 = vmul.f32 %v8249_v5, %v13778_v28  ;;  %10483 = vmatmul.msk.f32.vlgmr.msra.gmra.mxu1 %vm1238_vm6, %v10867_v33  ;;  %8321 = vmatmul.f32.gmra.mxu0 %v14527_v18  ;;  %v13892_v28 = vand.u32 4294901760, %v8511_v17  ;;  %v8831_v40 = vand.u32 4294901760, %v8830_v57  ;;  %v8836_v5 = vsub.f32 %v10497_v50, %v8770_v47 }
0x19a6   :  { %8390 = vmatpush.xpose.msrb.mxu0 %v13838_v49  ;;  %8418 = vmatpush.xpose.msrb.mxu1 %v13825_v12  ;;  %v8213_v27 = vmul.f32 0.5, %v8212_v39 }
0x19a7   :  { %v8266_v48 = vmul.f32 %v13794_v55, %v8257_v60  ;;  %v8832_v60 = vsub.f32 %v8830_v57, %v8831_v40 }
0x19a8   :  { %v8214_v31 = vsub.f32 1.5, %v8213_v27 }
0x19a9   :  { %v8275_v11 = vadd.f32 %v13801_v35, %v8266_v48 }
0x19aa   :  { %8393 = vmatpush.xpose.msrb.mxu0 %v13858_v43  ;;  %8420 = vmatpush.xpose.msrb.mxu1 %v13813_v6  ;;  %v8215_v30 = vmul.f32 %v10564_v2, %v8214_v31 }
0x19ab   :  { %v8514_v63 = vsel %vm1238_vm6, %v8275_v11, 0 }
0x19ac   :  { %v8219_v26 = vsel %vm8218_vm3, %v10564_v2, %v8215_v30  ;;  %v8528_v36 = vand.u32 4294901760, %v8514_v63 }
0x19ad   :  { %v8254_v21 = vmul.f32 %v8219_v26, %v13784_v13  ;;  %10484 = vmatmul.msk.f32.gmra.mxu1 %vm1238_vm6, %v14528_v62  ;;  %8396 = vmatmul.f32.vlgmr.msrb.gmra.mxu0 %v14529_v44 }
0x19ae   :  { %8453 = vmatpush.xpose.msra.mxu0 %v8339_v7  ;;  %8422 = vmatpush.xpose.msrb.mxu1 %v13822_v56  ;;  %v8572_v7 = vsub.f32 %v8511_v17, %v13892_v28  ;;  %v8566_v29 = vsub.f32 %v8514_v63, %v8528_v36  ;;  %v8833_v17 = vand.u32 4294901760, %v8832_v60 }
0x19af   :  { %8529 = vmatpush.xpose.msrb.mxu2 %v8528_v36  ;;  %v8263_v15 = vmul.f32 %v13794_v55, %v8254_v21 }
0x19b0   :  { %v8567_v51 = vand.u32 4294901760, %v8566_v29 }
0x19b1   :  { %v8272_v13 = vadd.f32 %v13801_v35, %v8263_v15 }
0x19b2   :  { %8457 = vmatpush.xpose.msra.mxu0 %v8345_v9  ;;  %8424 = vmatpush.xpose.msrb.mxu1 %v13849_v38  ;;  %v8573_v9 = vand.u32 4294901760, %v8572_v7  ;;  %v8568_v59 = vsub.f32 %v8566_v29, %v8567_v51 }
0x19b3   :  { %8531 = vmatpush.xpose.msrb.mxu2 %v13892_v28  ;;  %v8505_v45 = vsel %vm1238_vm6, %v8272_v13, 0 }
0x19b4   :  { %v8569_v55 = vand.u32 4294901760, %v8568_v59  ;;  %v8534_v49 = vand.u32 4294901760, %v8505_v45 }
0x19b5   :  { %8401 = vmatmul.f32.gmra.mxu0 %v14531_v14 }
0x19b6   :  { %8461 = vmatpush.xpose.msra.mxu0 %v8351_v1  ;;  %8488 = vmatpush.xpose.msra.mxu1 %v13825_v12  ;;  %v8574_v1 = vsub.f32 %v8572_v7, %v8573_v9  ;;  %v14530_v12 = vld [vmem:[#allocation31_spill] sm:$0xff]  ;;  %v8584_v35 = vsub.f32 %v8505_v45, %v8534_v49 }
0x19b7   :  { %8428 = vmatmul.f32.vlgmr.msrb.gmra.mxu1 %v14530_v12  ;;  %8533 = vmatpush.xpose.msrb.mxu2 %v8532_v32 }
0x19b8   :  { %8570 = vmatpush.xpose.msrb.mxu3 %v8569_v55  ;;  %v8575_v42 = vand.u32 4294901760, %v8574_v1  ;;  %v8585_v43 = vand.u32 4294901760, %v8584_v35 }
0x19ba   :  { %8465 = vmatpush.xpose.msra.mxu0 %v8357_v10  ;;  %8490 = vmatpush.xpose.msra.mxu1 %v13813_v6  ;;  %v8581_v6 = vand.u32 4294901760, %v8580_v37  ;;  %v8586_v10 = vsub.f32 %v8584_v35, %v8585_v43 }
0x19bb   :  { %8535 = vmatpush.xpose.msrb.mxu2 %v8534_v49 }
0x19bc   :  { %8576 = vmatpush.xpose.msrb.mxu3 %v8575_v42 }
0x19bd   :  { %10485 = vmatmul.msk.f32.vlgmr.msra.gmra.mxu0 %vm1238_vm6, %v10867_v33 }
0x19be   :  { %8612 = vmatpush.xpose.msrb.mxu0 %v8566_v29  ;;  %8492 = vmatpush.xpose.msra.mxu1 %v13822_v56  ;;  %v8587_v56 = vand.u32 4294901760, %v8586_v10 }
0x19bf   :  { %8681 = vmatpush.xpose.msra.mxu2 %v8567_v51  ;;  %8434 = vmatmul.f32.gmra.mxu1 %v14532_v52 }
0x19c0   :  { %8582 = vmatpush.xpose.msrb.mxu3 %v8581_v6  ;;  %8541 = vmatmul.f32.vlgmr.msrb.gmra.mxu2 %v12183_v22  ;;  %v10500_v22 = vld [vmem:[%s14379_s10 + $0x38] sm:$0xff] }
0x19c1   :  { %v8764_v46 = vand.u32 4294901760, %v10500_v22 }
0x19c2   :  { %8615 = vmatpush.xpose.msrb.mxu0 %v8572_v7  ;;  %8494 = vmatpush.xpose.msra.mxu1 %v13849_v38 }
0x19c3   :  { %8685 = vmatpush.xpose.msra.mxu2 %v8573_v9  ;;  %v8818_v54 = vsub.f32 %v10500_v22, %v8764_v46 }
0x19c4   :  { %8588 = vmatpush.xpose.msrb.mxu3 %v8587_v56 }
0x19c5   :  { %10486 = vmatmul.msk.f32.gmra.mxu0 %vm1238_vm6, %v14528_v62  ;;  %v8819_v61 = vand.u32 4294901760, %v8818_v54 }
0x19c6   :  { %8618 = vmatpush.xpose.msrb.mxu0 %v8578_v58  ;;  %8646 = vmatpush.xpose.msrb.mxu1 %v8528_v36 }
0x19c7   :  { %8689 = vmatpush.xpose.msra.mxu2 %v8579_v41  ;;  %10489 = vmatmul.msk.f32.vlgmr.msrb.gmra.mxu3 %vm1238_vm6, %v10867_v33  ;;  %v8820_v53 = vsub.f32 %v8818_v54, %v8819_v61 }
0x19c8   :  { %8716 = vmatpush.xpose.msra.mxu3 %v8528_v36  ;;  %10487 = vmatmul.msk.f32.vlgmr.msra.gmra.mxu1 %vm1238_vm6, %v10867_v33 }
0x19c9   :  { %8549 = vmatmul.f32.gmra.mxu2 %v14527_v18  ;;  %v8821_v34 = vand.u32 4294901760, %v8820_v53  ;;  %v8837_v18 = vand.u32 4294901760, %v8836_v5 }
0x19ca   :  { %8621 = vmatpush.xpose.msrb.mxu0 %v8584_v35  ;;  %8648 = vmatpush.xpose.msrb.mxu1 %v13892_v28 }
0x19cb   :  { %8693 = vmatpush.xpose.msra.mxu2 %v8585_v43  ;;  %v8838_v20 = vsub.f32 %v8836_v5, %v8837_v18 }
0x19cc   :  { %8718 = vmatpush.xpose.msra.mxu3 %v13892_v28 }
0x19cd   :  { %8624 = vmatmul.f32.vlgmr.msrb.gmra.mxu0 %v14529_v44  ;;  %v8839_v27 = vand.u32 4294901760, %v8838_v20 }
0x19ce   :  { %8650 = vmatpush.xpose.msrb.mxu1 %v8532_v32  ;;  %8765 = vmatpush.msra.mxu0 %v8764_v46 }
0x19cf   :  { %10490 = vmatmul.msk.f32.gmra.mxu3 %vm1238_vm6, %v14528_v62  ;;  %8872 = vmatpush.msrb.mxu2 %v8818_v54 }
0x19d0   :  { %8720 = vmatpush.xpose.msra.mxu3 %v8532_v32  ;;  %10488 = vmatmul.msk.f32.gmra.mxu1 %vm1238_vm6, %v14528_v62 }
0x19d1   :  { %10491 = vmatmul.msk.f32.vlgmr.msra.gmra.mxu2 %vm1238_vm6, %v10867_v33 }
0x19d2   :  { %8652 = vmatpush.xpose.msrb.mxu1 %v8534_v49 }
0x19d4   :  { %8722 = vmatpush.xpose.msra.mxu3 %v8534_v49 }
0x19d5   :  { %8629 = vmatmul.f32.gmra.mxu0 %v14531_v14 }
0x19d6   :  { %8822 = vmatpush.msra.mxu1 %v8821_v34 }
0x19d7   :  { %10493 = vmatmul.msk.f32.vlgmr.msra.gmra.mxu3 %vm1238_vm6, %v10867_v33  ;;  %v10499_v33 = vld [vmem:[%s14379_s10 + $0x30] sm:$0xff] }
0x19d8   :  { %8656 = vmatmul.f32.vlgmr.msrb.gmra.mxu1 %v14530_v12  ;;  %v8766_v25 = vand.u32 4294901760, %v10499_v33  ;;  %8916 = vmatpush.msrb.mxu3 %v8764_v46 }
0x19d9   :  { %10492 = vmatmul.msk.f32.gmra.mxu2 %vm1238_vm6, %v14528_v62 }
0x19da   :  { %v8824_v0 = vsub.f32 %v10499_v33, %v8766_v25  ;;  %8767 = vmatpush.msra.mxu0 %v8766_v25  ;;  %8918 = vmatpush.msrb.mxu3 %v8766_v25 }
0x19dc   :  { %v8825_v16 = vand.u32 4294901760, %v8824_v0  ;;  %8769 = vmatpush.msra.mxu0 %v8768_v4  ;;  %8875 = vmatpush.msrb.mxu2 %v8824_v0 }
0x19dd   :  { %8920 = vmatpush.msrb.mxu3 %v8768_v4 }
0x19de   :  { %v8826_v8 = vsub.f32 %v8824_v0, %v8825_v16  ;;  %8771 = vmatpush.msra.mxu0 %v8770_v47  ;;  %8878 = vmatpush.msrb.mxu2 %v8830_v57 }
0x19df   :  { %10494 = vmatmul.msk.f32.gmra.mxu3 %vm1238_vm6, %v14528_v62 }
0x19e0   :  { %8662 = vmatmul.f32.gmra.mxu1 %v14532_v52  ;;  %8922 = vmatpush.msrb.mxu3 %v8770_v47  ;;  %v8827_v39 = vand.u32 4294901760, %v8826_v8 }
0x19e1   :  { %8963 = vmatpush.msrb.mxu0 %v8819_v61  ;;  %8881 = vmatpush.msrb.mxu2 %v8836_v5 }
0x19e2   :  { %8828 = vmatpush.msra.mxu1 %v8827_v39 }
0x19e3   :  { %8967 = vmatpush.msrb.mxu0 %v8825_v16 }
0x19e4   :  { %8834 = vmatpush.msra.mxu1 %v8833_v17 }
0x19e5   :  { %8971 = vmatpush.msrb.mxu0 %v8831_v40 }
0x19e6   :  { %8840 = vmatpush.msra.mxu1 %v8839_v27 }
0x19e7   :  { %8975 = vmatpush.msrb.mxu0 %v8837_v18 }
0x19e8   :  { %9006 = vmatpush.msrb.mxu1 %v8764_v46 }
0x19ea   :  { %9008 = vmatpush.msrb.mxu1 %v8766_v25 }
0x19ec   :  { %9010 = vmatpush.msrb.mxu1 %v8768_v4 }
0x19ee   :  { %9012 = vmatpush.msrb.mxu1 %v8770_v47 }
0x1a1a   :  { %v8314_v38 = vpop.f32.mrf.mxu0 }
0x1a22   :  { %v8363_v2 = vpop.f32.mrf.mxu1  ;;  %v8322_v3 = vpop.f32.mrf.mxu0 }
0x1a23   :  { %v8364_v30 = vadd.f32 %v8363_v2, %v8314_v38 }
0x1a2a   :  { %v8367_v48 = vpop.f32.mrf.mxu1  ;;  %v8397_v31 = vpop.f32.mrf.mxu0 }
0x1a2b   :  { %v8398_v26 = vadd.f32 %v8397_v31, %v8364_v30  ;;  %v8368_v62 = vadd.f32 %v8367_v48, %v8322_v3 }
0x1a32   :  { %v8402_v11 = vpop.f32.mrf.mxu0 }
0x1a33   :  { %v8403_v15 = vadd.f32 %v8402_v11, %v8368_v62 }
0x1a34   :  { %v8429_v28 = vpop.f32.mrf.mxu1 }
0x1a35   :  { %v8430_v36 = vadd.f32 %v8429_v28, %v8398_v26 }
0x1a3a   :  { %v8468_v63 = vpop.f32.mrf.mxu0 }
0x1a3b   :  { %v8469_v32 = vadd.f32 %v8468_v63, %v8430_v36 }
0x1a3c   :  { %v8435_v19 = vpop.f32.mrf.mxu1 }
0x1a3d   :  { %v8436_v58 = vadd.f32 %v8435_v19, %v8403_v15 }
0x1a42   :  { %v8472_v29 = vpop.f32.mrf.mxu0 }
0x1a43   :  { %v8542_v21 = vpop.f32.mrf.mxu2  ;;  %v8473_v45 = vadd.f32 %v8472_v29, %v8436_v58 }
0x1a45   :  { %v8497_v7 = vpop.f32.mrf.mxu1 }
0x1a46   :  { %v13961_v44 = vadd.f32 %v8497_v7, %v8469_v32 }
0x1a48   :  { %v8741_v51 = vsel %vm415_vm1, %v13961_v44, 0 }
0x1a49   :  { %v13965_v9 = vand.u32 4294901760, %v8741_v51 }
0x1a4a   :  { %v8591_v13 = vpop.f32.mrf.mxu3  ;;  %v8625_v35 = vpop.f32.mrf.mxu0 }
0x1a4b   :  { %v8773_v59 = vsub.f32 %v8741_v51, %v13965_v9  ;;  %8842 = vmatmul.f32.vlgmr.msra.gmra.mxu1 %v13965_v9  ;;  %v8592_v14 = vadd.f32 %v8591_v13, %v8542_v21 }
0x1a4c   :  { %v8550_v1 = vpop.f32.mrf.mxu2 }
0x1a4d   :  { %v8774_v55 = vand.u32 4294901760, %v8773_v59  ;;  %v8501_v49 = vpop.f32.mrf.mxu1  ;;  %8884 = vmatmul.f32.vlgmr.msrb.gmra.mxu2 %v8773_v59  ;;  %v8626_v52 = vadd.f32 %v8625_v35, %v8592_v14 }
0x1a4e   :  { %v13969_v41 = vadd.f32 %v8501_v49, %v8473_v45 }
0x1a4f   :  { %v8775_v12 = vsub.f32 %v8773_v59, %v8774_v55  ;;  %8926 = vmatmul.f32.vlgmr.msrb.gmra.mxu3 %v8774_v55 }
0x1a50   :  { %v8744_v42 = vsel %vm415_vm1, %v13969_v41, 0 }
0x1a51   :  { %v8776_v37 = vand.u32 4294901760, %v8775_v12  ;;  %v8780_v43 = vand.u32 4294901760, %v8744_v42 }
0x1a52   :  { %v8595_v6 = vpop.f32.mrf.mxu3  ;;  %v8630_v24 = vpop.f32.mrf.mxu0 }
0x1a53   :  { %v8781_v10 = vsub.f32 %v8744_v42, %v8780_v43  ;;  %8777 = vmatmul.f32.vlgmr.msra.gmra.mxu0 %v8776_v37  ;;  %8846 = vmatmul.f32.gmra.mxu1 %v8780_v43  ;;  %v8596_v54 = vadd.f32 %v8595_v6, %v8550_v1 }
0x1a54   :  { %v8696_v22 = vpop.f32.mrf.mxu2 }
0x1a55   :  { %v8657_v56 = vpop.f32.mrf.mxu1  ;;  %v8782_v38 = vand.u32 4294901760, %v8781_v10  ;;  %8889 = vmatmul.f32.gmra.mxu2 %v8781_v10  ;;  %v8631_v50 = vadd.f32 %v8630_v24, %v8596_v54 }
0x1a56   :  { %v8658_v46 = vadd.f32 %v8657_v56, %v8626_v52 }
0x1a57   :  { %v8783_v33 = vsub.f32 %v8781_v10, %v8782_v38  ;;  %8932 = vmatmul.f32.gmra.mxu3 %v8782_v38  ;;  %v13993_v38 = vld [vmem:[%s14382_s13 + $0x18] sm:$0xf] }
0x1a58   :  { %v8697_v25 = vadd.f32 %v8696_v22, %v8658_v46 }
0x1a59   :  { %v8784_v61 = vand.u32 4294901760, %v8783_v33 }
0x1a5a   :  { %v8725_v0 = vpop.f32.mrf.mxu3 }
0x1a5b   :  { %v13973_v4 = vadd.f32 %v8725_v0, %v8697_v25  ;;  %8785 = vmatmul.f32.gmra.mxu0 %v8784_v61  ;;  %v13999_v0 = vperm.slane %v13993_v38, 0 }
0x1a5c   :  { %v8700_v2 = vpop.f32.mrf.mxu2 }
0x1a5d   :  { %v8747_v53 = vsel %vm415_vm1, %v13973_v4, 0  ;;  %v8663_v16 = vpop.f32.mrf.mxu1 }
0x1a5e   :  { %v8788_v57 = vand.u32 4294901760, %v8747_v53  ;;  %v8664_v47 = vadd.f32 %v8663_v16, %v8631_v50 }
0x1a60   :  { %v8789_v3 = vsub.f32 %v8747_v53, %v8788_v57  ;;  %8850 = vmatmul.f32.gmra.mxu1 %v8788_v57  ;;  %v8701_v34 = vadd.f32 %v8700_v2, %v8664_v47 }
0x1a62   :  { %v8729_v8 = vpop.f32.mrf.mxu3  ;;  %v8790_v40 = vand.u32 4294901760, %v8789_v3  ;;  %8894 = vmatmul.f32.gmra.mxu2 %v8789_v3 }
0x1a63   :  { %v13977_v5 = vadd.f32 %v8729_v8, %v8701_v34 }
0x1a64   :  { %v8791_v39 = vsub.f32 %v8789_v3, %v8790_v40  ;;  %8938 = vmatmul.f32.gmra.mxu3 %v8790_v40 }
0x1a65   :  { %v8750_v60 = vsel %vm415_vm1, %v13977_v5, 0 }
0x1a66   :  { %v8796_v18 = vand.u32 4294901760, %v8750_v60  ;;  %v8792_v17 = vand.u32 4294901760, %v8791_v39 }
0x1a68   :  { %v8797_v20 = vsub.f32 %v8750_v60, %v8796_v18  ;;  %8793 = vmatmul.f32.gmra.mxu0 %v8792_v17  ;;  %8854 = vmatmul.f32.gmra.mxu1 %v8796_v18 }
0x1a6a   :  { %v8798_v27 = vand.u32 4294901760, %v8797_v20  ;;  %8899 = vmatmul.f32.gmra.mxu2 %v8797_v20 }
0x1a6c   :  { %v8799_v48 = vsub.f32 %v8797_v20, %v8798_v27  ;;  %8944 = vmatmul.f32.gmra.mxu3 %v8798_v27 }
0x1a6e   :  { %v8800_v31 = vand.u32 4294901760, %v8799_v48  ;;  %v14023_v48 = vld [vmem:[%s14382_s13 + $0x10] sm:$0xff] }
0x1a70   :  { %8801 = vmatmul.f32.gmra.mxu0 %v8800_v31  ;;  %9014 = vmatmul.f32.vlgmr.msrb.gmra.mxu1 %v13965_v9 }
0x1a78   :  { %8977 = vmatmul.f32.vlgmr.msrb.gmra.mxu0 %v13965_v9  ;;  %9018 = vmatmul.f32.gmra.mxu1 %v8780_v43 }
0x1a80   :  { %8981 = vmatmul.f32.gmra.mxu0 %v8780_v43  ;;  %9022 = vmatmul.f32.gmra.mxu1 %v8788_v57 }
0x1a88   :  { %8985 = vmatmul.f32.gmra.mxu0 %v8788_v57  ;;  %9026 = vmatmul.f32.gmra.mxu1 %v8796_v18 }
0x1a90   :  { %8989 = vmatmul.f32.gmra.mxu0 %v8796_v18 }
0x1ac8   :  { %v8843_v28 = vpop.f32.mrf.mxu1 }
0x1ad0   :  { %v8778_v11 = vpop.f32.mrf.mxu0  ;;  %v8847_v19 = vpop.f32.mrf.mxu1 }
0x1ad1   :  { %v8844_v32 = vadd.f32 %v8843_v28, %v8778_v11  ;;  %v8885_v7 = vpop.f32.mrf.mxu2  ;;  %v14028_v28 = vperm.slane %v14023_v48, 4 }
0x1ad2   :  { %v8927_v29 = vpop.f32.mrf.mxu3 }
0x1ad3   :  { %v8886_v62 = vadd.f32 %v8885_v7, %v8844_v32 }
0x1ad5   :  { %v8928_v9 = vadd.f32 %v8927_v29, %v8886_v62 }
0x1ad8   :  { %v8786_v30 = vpop.f32.mrf.mxu0 }
0x1ad9   :  { %v8848_v51 = vadd.f32 %v8847_v19, %v8786_v30  ;;  %v8890_v59 = vpop.f32.mrf.mxu2 }
0x1ada   :  { %v8933_v1 = vpop.f32.mrf.mxu3 }
0x1adb   :  { %v8891_v45 = vadd.f32 %v8890_v59, %v8848_v51  ;;  %v14045_v59 = vperm.slane %v14023_v48, 5 }
0x1add   :  { %v8851_v63 = vpop.f32.mrf.mxu1  ;;  %v8934_v35 = vadd.f32 %v8933_v1, %v8891_v45 }
0x1ae5   :  { %v8794_v26 = vpop.f32.mrf.mxu0  ;;  %v8855_v36 = vpop.f32.mrf.mxu1 }
0x1ae6   :  { %v8852_v12 = vadd.f32 %v8851_v63, %v8794_v26  ;;  %v8895_v43 = vpop.f32.mrf.mxu2 }
0x1ae7   :  { %v8939_v56 = vpop.f32.mrf.mxu3 }
0x1ae8   :  { %v8896_v10 = vadd.f32 %v8895_v43, %v8852_v12 }
0x1aea   :  { %v8940_v22 = vadd.f32 %v8939_v56, %v8896_v10 }
0x1aed   :  { %v8802_v21 = vpop.f32.mrf.mxu0  ;;  %v9015_v15 = vpop.f32.mrf.mxu1 }
0x1aee   :  { %v8856_v25 = vadd.f32 %v8855_v36, %v8802_v21  ;;  %v8900_v16 = vpop.f32.mrf.mxu2 }
0x1aef   :  { %v8945_v34 = vpop.f32.mrf.mxu3 }
0x1af0   :  { %v8901_v47 = vadd.f32 %v8900_v16, %v8856_v25 }
0x1af2   :  { %v8946_v40 = vadd.f32 %v8945_v34, %v8901_v47 }
0x1af5   :  { %v8978_v58 = vpop.f32.mrf.mxu0  ;;  %v9019_v14 = vpop.f32.mrf.mxu1 }
0x1af6   :  { %v8979_v13 = vadd.f32 %v8978_v58, %v8928_v9 }
0x1af8   :  { %v13983_v55 = vadd.f32 %v9015_v15, %v8979_v13 }
0x1afa   :  { %v9034_v49 = vrot.slane %v13983_v55, 7 }
0x1afc   :  { %9046 = vrot.lane.b32.xlu1 %v9034_v49, %s10704_s23  ;;  %v9045_v54 = vsel %vm1647_vm7, 0.0, %v9034_v49 }
0x1afd   :  { %v8982_v42 = vpop.f32.mrf.mxu0  ;;  %v9023_v61 = vpop.f32.mrf.mxu1  ;;  %v9059_v53 = vsel %vm1697_vm8, %v9045_v54, 0.0 }
0x1afe   :  { %v8983_v37 = vadd.f32 %v8982_v42, %v8934_v35  ;;  %v9109_v2 = vmul.f32 %v13999_v0, %v9059_v53  ;;  %v9068_v32 = vmul.f32 %v14028_v28, %v9059_v53 }
0x1b00   :  { %v13987_v6 = vadd.f32 %v9019_v14, %v8983_v37  ;;  %v9072_v29 = vadd.f32 %v9068_v32, %v13983_v55 }
0x1b02   :  { %v9035_v52 = vrot.slane %v13987_v6, 7 }
0x1b04   :  { %v9036_v46 = vsel %vm1647_vm7, %v9034_v49, %v9035_v52 }
0x1b05   :  { %v8986_v33 = vpop.f32.mrf.mxu0  ;;  %9048 = vrot.lane.b32.xlu0 %v9036_v46, %s10704_s23  ;;  %v9110_v60 = vmul.f32 %v13999_v0, %v9036_v46  ;;  %v9027_v18 = vpop.f32.mrf.mxu1  ;;  %v9069_v58 = vmul.f32 %v14028_v28, %v9036_v46 }
0x1b06   :  { %v8987_v24 = vadd.f32 %v8986_v33, %v8940_v22 }
0x1b07   :  { %v9073_v1 = vadd.f32 %v9069_v58, %v13987_v6 }
0x1b08   :  { %v14001_v50 = vadd.f32 %v9023_v61, %v8987_v24 }
0x1b0a   :  { %v9037_v57 = vrot.slane %v14001_v50, 7 }
0x1b0c   :  { %v9038_v3 = vsel %vm1647_vm7, %v9035_v52, %v9037_v57 }
0x1b0d   :  { %v8990_v8 = vpop.f32.mrf.mxu0  ;;  %9050 = vrot.lane.b32.xlu2 %v9038_v3, %s10704_s23  ;;  %9117 = vrot.lane.b32.xlu0 %v9109_v2, %s10705_s7  ;;  %v9061_v31 = vsel %vm1697_vm8, %v9038_v3, 0.0 }
0x1b0e   :  { %v8991_v39 = vadd.f32 %v8990_v8, %v8946_v40  ;;  %v9070_v11 = vmul.f32 %v14028_v28, %v9061_v31  ;;  %v9111_v24 = vmul.f32 %v13999_v0, %v9061_v31 }
0x1b10   :  { %v14011_v17 = vadd.f32 %v9027_v18, %v8991_v39  ;;  %v9074_v63 = vadd.f32 %v9070_v11, %v14001_v50 }
0x1b12   :  { %v9039_v20 = vrot.slane %v14011_v17, 7 }
0x1b14   :  { %v14016_v27 = vsel %vm1647_vm7, %v9037_v57, %v9039_v20 }
0x1b15   :  { %9119 = vrot.lane.b32.xlu0 %v9110_v60, %s10705_s7  ;;  %v9071_v47 = vmul.f32 %v14028_v28, %v14016_v27 }
0x1b17   :  { %v9075_v3 = vadd.f32 %v9071_v47, %v14011_v17 }
0x1b1d   :  { %9052 = vrot.lane.b32.xlu0 %v14016_v27, %s10704_s23 }
0x1b67   :  { %v9051_v19 = vpop.permute.xlu2 %9050 }
0x1b68   :  { %v9065_v30 = vsel %vm1697_vm8, %v9051_v19, 0.0 }
0x1b69   :  { %v9079_v26 = vmul.f32 %v13999_v0, %v9065_v30  ;;  %v9087_v42 = vmul.f32 %v14028_v28, %v9065_v30 }
0x1b6b   :  { %v9083_v36 = vsub.f32 %v9074_v63, %v9079_v26 }
0x1b6d   :  { %v9140_v52 = vrot.slane %v9083_v36, 6 }
0x1b6e   :  { %v9047_v7 = vpop.permute.xlu1 %9046 }
0x1b6f   :  { %v9058_v21 = vsel %vm1647_vm7, 0.0, %v9047_v7 }
0x1b70   :  { %v9063_v62 = vsel %vm1697_vm8, %v9058_v21, 0.0 }
0x1b71   :  { %v9077_v15 = vmul.f32 %v13999_v0, %v9063_v62  ;;  %v9085_v51 = vmul.f32 %v14028_v28, %v9063_v62 }
0x1b73   :  { %v9081_v9 = vsub.f32 %v9072_v29, %v9077_v15  ;;  %9093 = vrot.lane.b32.xlu1 %v9085_v51, %s10705_s7  ;;  %v14099_v15 = vperm.slane %v13993_v38, 1 }
0x1b75   :  { %v9137_v13 = vrot.slane %v9081_v9, 6 }
0x1b77   :  { %v9148_v45 = vsel %vm1863_vm9, 0.0, %v9137_v13  ;;  %v9049_v49 = vpop.permute.xlu0 %9048 }
0x1b78   :  { %v9078_v12 = vmul.f32 %v13999_v0, %v9049_v49  ;;  %v9086_v35 = vmul.f32 %v14028_v28, %v9049_v49  ;;  %v9173_v14 = vsel %vm1936_vm10, %v9148_v45, 0.0 }
0x1b79   :  { %v9182_v37 = vmul.f32 %v14045_v59, %v9173_v14  ;;  %v9223_v51 = vmul.f32 %v14099_v15, %v9173_v14 }
0x1b7a   :  { %v9082_v43 = vsub.f32 %v9073_v1, %v9078_v12  ;;  %9095 = vrot.lane.b32.xlu2 %v9086_v35, %s10705_s7 }
0x1b7b   :  { %9097 = vrot.lane.b32.xlu1 %v9087_v42, %s10705_s7  ;;  %v9186_v10 = vadd.f32 %v9182_v37, %v9081_v9 }
0x1b7c   :  { %v9138_v56 = vrot.slane %v9082_v43, 6 }
0x1b7e   :  { %v9141_v22 = vsel %vm1863_vm9, %v9138_v56, %v9140_v52  ;;  %v14059_v46 = vsel %vm1863_vm9, %v9137_v13, %v9138_v56 }
0x1b7f   :  { %v9118_v33 = vpop.permute.xlu0 %9117  ;;  %v14063_v54 = vsel %vm1936_vm10, %v9141_v22, 0.0  ;;  %v9183_v25 = vmul.f32 %v14045_v59, %v14059_v46 }
0x1b80   :  { %v9184_v61 = vmul.f32 %v14045_v59, %v14063_v54 }
0x1b81   :  { %v9187_v53 = vadd.f32 %v9183_v25, %v9082_v43  ;;  %v14119_v43 = vperm.slane %v14023_v48, 6 }
0x1b82   :  { %9121 = vrot.lane.b32.xlu2 %v9111_v24, %s10705_s7  ;;  %v9188_v16 = vadd.f32 %v9184_v61, %v9083_v36  ;;  %v9112_v24 = vmul.f32 %v13999_v0, %v14016_v27 }
0x1b87   :  { %v9120_v57 = vpop.permute.xlu0 %9119 }
0x1b8f   :  { %v9053_v2 = vpop.permute.xlu0 %9052 }
0x1b90   :  { %v9080_v34 = vmul.f32 %v13999_v0, %v9053_v2 }
0x1b92   :  { %v9084_v8 = vsub.f32 %v9075_v3, %v9080_v34 }
0x1b94   :  { %v9142_v40 = vrot.slane %v9084_v8, 6 }
0x1b96   :  { %v14076_v39 = vsel %vm1863_vm9, %v9140_v52, %v9142_v40  ;;  %v9224_v40 = vmul.f32 %v14099_v15, %v14059_v46 }
0x1b97   :  { %v9185_v60 = vmul.f32 %v14045_v59, %v14076_v39 }
0x1b99   :  { %v14080_v18 = vadd.f32 %v9185_v60, %v9084_v8 }
0x1bd4   :  { %v9096_v20 = vpop.permute.xlu2 %9095 }
0x1bd5   :  { %v9106_v30 = vadd.f32 %v9096_v20, %v13987_v6 }
0x1bd7   :  { %v14085_v26 = vadd.f32 %v9120_v57, %v9106_v30 }
0x1bd9   :  { %v9154_v62 = vrot.slane %v14085_v26, 6 }
0x1bdc   :  { %v9122_v7 = vpop.permute.xlu2 %9121 }
0x1be5   :  { %v9094_v31 = vpop.permute.xlu1 %9093 }
0x1be6   :  { %v9105_v11 = vadd.f32 %v9094_v31, %v13983_v55 }
0x1be8   :  { %v9129_v19 = vadd.f32 %v9118_v33, %v9105_v11 }
0x1bea   :  { %v9153_v63 = vrot.slane %v9129_v19, 6 }
0x1bec   :  { %9160 = vrot.lane.b32.xlu1 %v9153_v63, %s10704_s23  ;;  %v9155_v55 = vsel %vm1863_vm9, %v9153_v63, %v9154_v62 }
0x1bed   :  { %v9098_v36 = vpop.permute.xlu1 %9097 }
0x1bee   :  { %v9107_v32 = vadd.f32 %v9098_v36, %v14001_v50  ;;  %v9088_v50 = vmul.f32 %v14028_v28, %v9053_v2 }
0x1bf0   :  { %v14088_v21 = vadd.f32 %v9122_v7, %v9107_v32 }
0x1bf2   :  { %v9156_v29 = vrot.slane %v14088_v21, 6 }
0x1bf4   :  { %9162 = vrot.lane.b32.xlu1 %v9155_v55, %s10704_s23  ;;  %v9157_v6 = vsel %vm1863_vm9, %v9154_v62, %v9156_v29 }
0x1bf5   :  { %9164 = vrot.lane.b32.xlu2 %v9157_v6, %s10704_s23 }
0x1bfc   :  { %9099 = vrot.lane.b32.xlu1 %v9088_v50, %s10705_s7 }
0x1bfd   :  { %9231 = vrot.lane.b32.xlu2 %v9223_v51, %s10705_s7 }
0x1c4f   :  { %v9165_v9 = vpop.permute.xlu2 %9164 }
0x1c50   :  { %v9179_v58 = vsel %vm1936_vm10, %v9165_v9, 0.0 }
0x1c51   :  { %v9193_v13 = vmul.f32 %v14099_v15, %v9179_v58  ;;  %v9201_v45 = vmul.f32 %v14045_v59, %v9179_v58  ;;  %v14173_v58 = vperm.slane %v13993_v38, 2 }
0x1c53   :  { %v14109_v49 = vsub.f32 %v9188_v16, %v9193_v13  ;;  %9211 = vrot.lane.b32.xlu1 %v9201_v45, %s10705_s7 }
0x1c55   :  { %v9254_v16 = vrot.slane %v14109_v49, 4 }
0x1c57   :  { %v9232_v20 = vpop.permute.xlu2 %9231 }
0x1c5e   :  { %v9161_v1 = vpop.permute.xlu1 %9160 }
0x1c5f   :  { %v9172_v28 = vsel %vm1863_vm9, 0.0, %v9161_v1 }
0x1c60   :  { %v9177_v12 = vsel %vm1936_vm10, %v9172_v28, 0.0 }
0x1c61   :  { %v9191_v35 = vmul.f32 %v14099_v15, %v9177_v12  ;;  %v9199_v14 = vmul.f32 %v14045_v59, %v9177_v12 }
0x1c63   :  { %v9195_v42 = vsub.f32 %v9186_v10, %v9191_v35  ;;  %9207 = vrot.lane.b32.xlu0 %v9199_v14, %s10705_s7  ;;  %v10503_v35 = vld [vmem:[%s14380_s11 + $0x30] sm:$0xff] }
0x1c65   :  { %v9251_v37 = vrot.slane %v9195_v42, 4 }
0x1c66   :  { %v9163_v52 = vpop.permute.xlu1 %9162 }
0x1c67   :  { %v9262_v56 = vsel %vm2102_vm11, 0.0, %v9251_v37  ;;  %v9192_v22 = vmul.f32 %v14099_v15, %v9163_v52  ;;  %v9200_v33 = vmul.f32 %v14045_v59, %v9163_v52 }
0x1c68   :  { %v9287_v25 = vsel %vm2175_vm12, %v9262_v56, 0.0 }
0x1c69   :  { %v9196_v10 = vsub.f32 %v9187_v53, %v9192_v22  ;;  %9209 = vrot.lane.b32.xlu2 %v9200_v33, %s10705_s7  ;;  %v9296_v61 = vmul.f32 %v14119_v43, %v9287_v25  ;;  %v9225_v53 = vmul.f32 %v14099_v15, %v14063_v54  ;;  %v9331_v28 = vmul.f32 %v14173_v58, %v9287_v25  ;;  %v10501_v33 = vld [vmem:[%s14380_s11 + $0x20] sm:$0xff] }
0x1c6b   :  { %v9252_v57 = vrot.slane %v9196_v10, 4  ;;  %9123 = vrot.lane.b32.xlu0 %v9112_v24, %s10705_s7  ;;  %v14132_v47 = vadd.f32 %v9296_v61, %v9195_v42  ;;  %v9424_v42 = vand.u32 4294901760, %v10503_v35  ;;  %v9428_v61 = vand.u32 4294901760, %v10501_v33 }
0x1c6d   :  { %v9255_v2 = vsel %vm2102_vm11, %v9252_v57, %v9254_v16  ;;  %v9253_v3 = vsel %vm2102_vm11, %v9251_v37, %v9252_v57  ;;  %v10502_v37 = vld [vmem:[%s14380_s11 + $0x28] sm:$0xff]  ;;  %v9482_v56 = vsub.f32 %v10503_v35, %v9424_v42 }
0x1c6e   :  { %v14140_v0 = vsel %vm2175_vm12, %v9255_v2, 0.0  ;;  %v9297_v27 = vmul.f32 %v14119_v43, %v9253_v3  ;;  %v9100_v30 = vpop.permute.xlu1 %9099  ;;  %v9426_v22 = vand.u32 4294901760, %v10502_v37 }
0x1c6f   :  { %v9298_v34 = vmul.f32 %v14119_v43, %v14140_v0  ;;  %v9108_v32 = vadd.f32 %v9100_v30, %v14011_v17  ;;  %v9483_v24 = vand.u32 4294901760, %v9482_v56  ;;  %v14198_v30 = vperm.slane %v14023_v48, 7 }
0x1c70   :  { %v14147_v8 = vadd.f32 %v9297_v27, %v9196_v10  ;;  %v9488_v10 = vsub.f32 %v10502_v37, %v9426_v22  ;;  %v9494_v27 = vsub.f32 %v10501_v33, %v9428_v61 }
0x1c71   :  { %9235 = vrot.lane.b32.xlu2 %v9225_v53, %s10705_s7  ;;  %v14153_v60 = vadd.f32 %v9298_v34, %v14109_v49  ;;  %v9484_v2 = vsub.f32 %v9482_v56, %v9483_v24 }
0x1c72   :  { %v9489_v3 = vand.u32 4294901760, %v9488_v10 }
0x1c73   :  { %9233 = vrot.lane.b32.xlu0 %v9224_v40, %s10705_s7  ;;  %v9485_v53 = vand.u32 4294901760, %v9484_v2  ;;  %v9495_v40 = vand.u32 4294901760, %v9494_v27 }
0x1c74   :  { %v9490_v34 = vsub.f32 %v9488_v10, %v9489_v3 }
0x1cc3   :  { %v9210_v54 = vpop.permute.xlu2 %9209 }
0x1cc4   :  { %v9220_v51 = vadd.f32 %v9210_v54, %v14085_v26  ;;  %v10504_v26 = vld [vmem:[%s14380_s11 + $0x38] sm:$0xff]  ;;  %v14201_v54 = vperm.slane %v13993_v38, 3  ;;  %s10505_s11 = sld [smem:[#allocation2 + $0x3]] }
0x1cc5   :  { %v9212_v62 = vpop.permute.xlu1 %9211  ;;  %v9422_v12 = vand.u32 4294901760, %v10504_v26 }
0x1cc6   :  { %v9221_v50 = vadd.f32 %v9212_v62, %v14088_v21 }
0x1cc7   :  { %v9476_v14 = vsub.f32 %v10504_v26, %v9422_v12  ;;  %9574 = vmatpush.msra.mxu1 %v9422_v12  ;;  %9423 = vmatpush.msra.mxu2 %v9422_v12 }
0x1cc9   :  { %v9477_v52 = vand.u32 4294901760, %v9476_v14  ;;  %9530 = vmatpush.msra.mxu0 %v9476_v14  ;;  %9576 = vmatpush.msra.mxu1 %v9424_v42 }
0x1cca   :  { %9425 = vmatpush.msra.mxu2 %v9424_v42 }
0x1ccb   :  { %v9236_v6 = vpop.permute.xlu2 %9235  ;;  %v9478_v25 = vsub.f32 %v9476_v14, %v9477_v52  ;;  %9533 = vmatpush.msra.mxu0 %v9482_v56  ;;  %9578 = vmatpush.msra.mxu1 %v9426_v22  ;;  %v9226_v56 = vmul.f32 %v14099_v15, %v14076_v39 }
0x1ccc   :  { %v14170_v17 = vadd.f32 %v9236_v6, %v9221_v50  ;;  %9427 = vmatpush.msra.mxu2 %v9426_v22  ;;  %v9377_v6 = vmul.f32 0.0, %v14201_v54 }
0x1ccd   :  { %v9479_v57 = vand.u32 4294901760, %v9478_v25  ;;  %9536 = vmatpush.msra.mxu0 %v9488_v10  ;;  %9580 = vmatpush.msra.mxu1 %v9428_v61 }
0x1cce   :  { %v9270_v45 = vrot.slane %v14170_v17, 4  ;;  %9429 = vmatpush.msra.mxu2 %v9428_v61 }
0x1ccf   :  { %9480 = vmatpush.msra.mxu3 %v9479_v57  ;;  %9539 = vmatpush.msra.mxu0 %v9494_v27 }
0x1cd0   :  { %9621 = vmatpush.msrb.mxu2 %v9477_v52 }
0x1cd1   :  { %9486 = vmatpush.msra.mxu3 %v9485_v53 }
0x1cd2   :  { %9625 = vmatpush.msrb.mxu2 %v9483_v24 }
0x1cd4   :  { %9629 = vmatpush.msrb.mxu2 %v9489_v3 }
0x1cd5   :  { %v9208_v31 = vpop.permute.xlu0 %9207 }
0x1cd6   :  { %v9219_v11 = vadd.f32 %v9208_v31, %v9129_v19  ;;  %v9496_v31 = vsub.f32 %v9494_v27, %v9495_v40  ;;  %9633 = vmatpush.msrb.mxu2 %v9495_v40 }
0x1cd8   :  { %v14156_v63 = vadd.f32 %v9232_v20, %v9219_v11  ;;  %v9491_v20 = vand.u32 4294901760, %v9490_v34  ;;  %v9497_v11 = vand.u32 4294901760, %v9496_v31 }
0x1cda   :  { %v9267_v36 = vrot.slane %v14156_v63, 4  ;;  %9492 = vmatpush.msra.mxu3 %v9491_v20 }
0x1cdc   :  { %9274 = vrot.lane.b32.xlu1 %v9267_v36, %s10704_s23  ;;  %9498 = vmatpush.msra.mxu3 %v9497_v11 }
0x1cdd   :  { %v9124_v7 = vpop.permute.xlu0 %9123 }
0x1cde   :  { %v14161_v46 = vadd.f32 %v9124_v7, %v9108_v32  ;;  %9664 = vmatpush.msrb.mxu3 %v9422_v12  ;;  %v9368_v7 = vmul.f32 0.0, %v14198_v30 }
0x1ce0   :  { %v9158_v55 = vrot.slane %v14161_v46, 6  ;;  %9666 = vmatpush.msrb.mxu3 %v9424_v42 }
0x1ce2   :  { %v9159_v19 = vsel %vm1863_vm9, %v9156_v29, %v9158_v55  ;;  %9668 = vmatpush.msrb.mxu3 %v9426_v22 }
0x1ce3   :  { %9166 = vrot.lane.b32.xlu0 %v9159_v19, %s10704_s23  ;;  %v9386_v19 = vld [vmem:[#allocation9 + $0x10] sm:$0xff] }
0x1ce4   :  { %9670 = vmatpush.msrb.mxu3 %v9428_v61 }
0x1ce5   :  { %v9234_v9 = vpop.permute.xlu0 %9233 }
0x1ce6   :  { %v9244_v13 = vadd.f32 %v9234_v9, %v9220_v51 }
0x1ce8   :  { %v9268_v1 = vrot.slane %v9244_v13, 4 }
0x1cea   :  { %v9271_v21 = vsel %vm2102_vm11, %v9268_v1, %v9270_v45  ;;  %v14181_v29 = vsel %vm2102_vm11, %v9267_v36, %v9268_v1 }
0x1ceb   :  { %9337 = vrot.lane.b32.xlu0 %v9331_v28, %s10705_s7  ;;  %9278 = vrot.lane.b32.xlu2 %v9271_v21, %s10704_s23 }
0x1d45   :  { %v9279_v36 = vpop.permute.xlu2 %9278 }
0x1d46   :  { %v9293_v32 = vsel %vm2175_vm12, %v9279_v36, 0.0 }
0x1d47   :  { %v9307_v62 = vmul.f32 %v14173_v58, %v9293_v32  ;;  %v9315_v55 = vmul.f32 %v14119_v43, %v9293_v32 }
0x1d49   :  { %v14210_v50 = vsub.f32 %v14153_v60, %v9307_v62  ;;  %9323 = vrot.lane.b32.xlu0 %v9315_v55, %s10705_s7 }
0x1d4b   :  { %v9374_v38 = vadd.f32 %v9368_v7, %v14210_v50 }
0x1d4d   :  { %v9383_v51 = vsub.f32 %v9374_v38, %v9377_v6 }
0x1d4e   :  { %v9275_v9 = vpop.permute.xlu1 %9274 }
0x1d4f   :  { %v14214_v13 = vadd.f32 %v9386_v19, %v9383_v51  ;;  %v9286_v1 = vsel %vm2102_vm11, 0.0, %v9275_v9 }
0x1d50   :  { %v9291_v28 = vsel %vm2175_vm12, %v9286_v1, 0.0 }
0x1d51   :  { %v9305_v21 = vmul.f32 %v14173_v58, %v9291_v28  ;;  %v9313_v26 = vmul.f32 %v14119_v43, %v9291_v28  ;;  %v9387_v28 = vld [vmem:[#allocation9 + $0x18] sm:$0xff] }
0x1d53   :  { %v9309_v60 = vsub.f32 %v14132_v47, %v9305_v21  ;;  %9319 = vrot.lane.b32.xlu1 %v9313_v26, %s10705_s7 }
0x1d55   :  { %v9372_v12 = vadd.f32 %v9368_v7, %v9309_v60  ;;  %v9167_v35 = vpop.permute.xlu0 %9166 }
0x1d56   :  { %v9194_v14 = vmul.f32 %v14099_v15, %v9167_v35  ;;  %v9202_v42 = vmul.f32 %v14045_v59, %v9167_v35  ;;  %v9333_v59 = vmul.f32 %v14173_v58, %v14140_v0 }
0x1d57   :  { %v9381_v37 = vsub.f32 %v9372_v12, %v9377_v6  ;;  %v9371_v6 = vmul.f32 %v14198_v30, %v14210_v50 }
0x1d58   :  { %v9198_v52 = vsub.f32 %v14080_v18, %v9194_v14  ;;  %9213 = vrot.lane.b32.xlu2 %v9202_v42, %s10705_s7 }
0x1d59   :  { %v9388_v23 = vadd.f32 %v9386_v19, %v9381_v37 }
0x1d5a   :  { %v9256_v7 = vrot.slane %v9198_v52, 4 }
0x1d5b   :  { %v9399_v22 = vsel %vm415_vm1, %v9388_v23, 0  ;;  %9237 = vrot.lane.b32.xlu1 %v9226_v56, %s10705_s7 }
0x1d5c   :  { %v14231_v47 = vand.u32 4294901760, %v9399_v22 }
0x1d5d   :  { %v9338_v15 = vpop.permute.xlu0 %9337 }
0x1d5e   :  { %9500 = vmatmul.f32.vlgmr.msra.gmra.mxu3 %v14231_v47  ;;  %v9431_v33 = vsub.f32 %v9399_v22, %v14231_v47 }
0x1d60   :  { %9542 = vmatmul.f32.vlgmr.msra.gmra.mxu0 %v9431_v33  ;;  %9341 = vrot.lane.b32.xlu2 %v9333_v59, %s10705_s7  ;;  %v9432_v18 = vand.u32 4294901760, %v9431_v33 }
0x1d62   :  { %9584 = vmatmul.f32.vlgmr.msra.gmra.mxu1 %v9432_v18  ;;  %v9433_v25 = vsub.f32 %v9431_v33, %v9432_v18 }
0x1d63   :  { %9276 = vrot.lane.b32.xlu1 %v14181_v29, %s10704_s23 }
0x1d64   :  { %v9434_v39 = vand.u32 4294901760, %v9433_v25  ;;  %v9696_v25 = vld [vmem:[#allocation8 + $0x38] sm:$0xff] }
0x1d66   :  { %9435 = vmatmul.f32.vlgmr.msra.gmra.mxu2 %v9434_v39  ;;  %v9722_v39 = vand.u32 4294901760, %v9696_v25 }
0x1d68   :  { %9874 = vmatpush.msra.mxu3 %v9722_v39  ;;  %9723 = vmatpush.msrb.mxu0 %v9722_v39 }
0x1db2   :  { %v9214_v24 = vpop.permute.xlu2 %9213 }
0x1db3   :  { %v9222_v53 = vadd.f32 %v9214_v24, %v14161_v46  ;;  %v9257_v46 = vsel %vm2102_vm11, %v9254_v16, %v9256_v7  ;;  %v9776_v24 = vsub.f32 %v9696_v25, %v9722_v39 }
0x1db4   :  { %v9299_v62 = vmul.f32 %v14119_v43, %v9257_v46  ;;  %v9405_v43 = vsel %vm415_vm1, %v14214_v13, 0 }
0x1db5   :  { %9830 = vmatpush.msra.mxu2 %v9776_v24 }
0x1db6   :  { %v9303_v55 = vadd.f32 %v9299_v62, %v9198_v52 }
0x1dba   :  { %v9342_v57 = vpop.permute.xlu2 %9341 }
0x1dbb   :  { %v9324_v10 = vpop.permute.xlu0 %9323 }
0x1dbc   :  { %v9330_v61 = vadd.f32 %v9324_v10, %v14170_v17 }
0x1dbe   :  { %v9348_v2 = vadd.f32 %v9342_v57, %v9330_v61  ;;  %v9694_v61 = vld [vmem:[#allocation8 + $0x28] sm:$0xff] }
0x1dc0   :  { %9356 = vrot.lane.b32.xlu1 %v9348_v2, %s10704_s23 }
0x1dc5   :  { %v9320_v0 = vpop.permute.xlu1 %9319 }
0x1dc6   :  { %v9328_v3 = vadd.f32 %v9320_v0, %v14156_v63  ;;  %v9369_v63 = vmul.f32 %v14198_v30, %v9309_v60  ;;  %v9446_v60 = vand.u32 4294901760, %v9405_v43  ;;  %v9777_v0 = vand.u32 4294901760, %v9776_v24 }
0x1dc8   :  { %v9346_v27 = vadd.f32 %v9338_v15, %v9328_v3  ;;  %v9447_v35 = vsub.f32 %v9405_v43, %v9446_v60  ;;  %v9695_v15 = vld [vmem:[#allocation8 + $0x30] sm:$0xff] }
0x1dc9   :  { %v9724_v10 = vand.u32 4294901760, %v9695_v15 }
0x1dca   :  { %9352 = vrot.lane.b32.xlu0 %v9346_v27, %s10704_s23  ;;  %v9448_v37 = vand.u32 4294901760, %v9447_v35  ;;  %v9693_v27 = vld [vmem:[#allocation8 + $0x20] sm:$0xff] }
0x1dcb   :  { %v9782_v3 = vsub.f32 %v9695_v15, %v9724_v10  ;;  %9876 = vmatpush.msra.mxu3 %v9724_v10  ;;  %9725 = vmatpush.msrb.mxu0 %v9724_v10 }
0x1dcc   :  { %v9449_v13 = vsub.f32 %v9447_v35, %v9448_v37 }
0x1dcd   :  { %v9238_v29 = vpop.permute.xlu1 %9237  ;;  %9833 = vmatpush.msra.mxu2 %v9782_v3 }
0x1dce   :  { %v9246_v34 = vadd.f32 %v9238_v29, %v9222_v53  ;;  %v9450_v56 = vand.u32 4294901760, %v9449_v13  ;;  %v9778_v53 = vsub.f32 %v9776_v24, %v9777_v0  ;;  %v9783_v29 = vand.u32 4294901760, %v9782_v3 }
0x1dd0   :  { %v9272_v40 = vrot.slane %v9246_v34, 4 }
0x1dd2   :  { %v9273_v20 = vsel %vm2102_vm11, %v9270_v45, %v9272_v40  ;;  %v9728_v40 = vand.u32 4294901760, %v9693_v27 }
0x1dd3   :  { %9280 = vrot.lane.b32.xlu2 %v9273_v20, %s10704_s23  ;;  %v9779_v20 = vand.u32 4294901760, %v9778_v53  ;;  %s9994_s23 = ssub.f32 1.0, %s10505_s11 }
0x1dd5   :  { %v9277_v31 = vpop.permute.xlu1 %9276  ;;  %9780 = vmatpush.msrb.mxu1 %v9779_v20 }
0x1dd6   :  { %v9306_v11 = vmul.f32 %v14173_v58, %v9277_v31  ;;  %v9784_v31 = vsub.f32 %v9782_v3, %v9783_v29 }
0x1dd8   :  { %v9310_v36 = vsub.f32 %v14147_v8, %v9306_v11 }
0x1dda   :  { %v9373_v32 = vadd.f32 %v9369_v63, %v9310_v36  ;;  %v9794_v36 = vsub.f32 %v9693_v27, %v9728_v40  ;;  %v9785_v63 = vand.u32 4294901760, %v9784_v31 }
0x1ddc   :  { %v9795_v7 = vand.u32 4294901760, %v9794_v36  ;;  %9786 = vmatpush.msrb.mxu1 %v9785_v63 }
0x1de1   :  { %v9501_v18 = vpop.f32.mrf.mxu3 }
0x1de9   :  { %v9436_v57 = vpop.f32.mrf.mxu2 }
0x1e2d   :  { %v9281_v17 = vpop.permute.xlu2 %9280 }
0x1e2e   :  { %v9308_v45 = vmul.f32 %v14173_v58, %v9281_v17 }
0x1e30   :  { %v9312_v38 = vsub.f32 %v9303_v55, %v9308_v45  ;;  %v9796_v55 = vsub.f32 %v9794_v36, %v9795_v7 }
0x1e32   :  { %v9375_v19 = vadd.f32 %v9371_v6, %v9312_v38  ;;  %v9357_v8 = vpop.permute.xlu1 %9356  ;;  %v9797_v45 = vand.u32 4294901760, %v9796_v55  ;;  %v9397_v6 = vperm.slane %v14023_v48, 0 }
0x1e33   :  { %v9380_v9 = vmul.f32 %v14201_v54, %v9357_v8 }
0x1e34   :  { %v9437_v8 = vadd.f32 %v9436_v57, %v9397_v6 }
0x1e35   :  { %v9384_v16 = vsub.f32 %v9375_v19, %v9380_v9 }
0x1e36   :  { %v9502_v9 = vadd.f32 %v9501_v18, %v9437_v8 }
0x1e37   :  { %v9391_v30 = vadd.f32 %v9387_v28, %v9384_v16 }
0x1e39   :  { %v9408_v14 = vsel %vm415_vm1, %v9391_v30, 0 }
0x1e3a   :  { %v9454_v52 = vand.u32 4294901760, %v9408_v14 }
0x1e3c   :  { %v9353_v51 = vpop.permute.xlu0 %9352  ;;  %v9455_v23 = vsub.f32 %v9408_v14, %v9454_v52 }
0x1e3d   :  { %v9378_v1 = vmul.f32 %v14201_v54, %v9353_v51  ;;  %v9543_v51 = vpop.f32.mrf.mxu0 }
0x1e3e   :  { %v9456_v22 = vand.u32 4294901760, %v9455_v23  ;;  %v9544_v16 = vadd.f32 %v9543_v51, %v9502_v9 }
0x1e3f   :  { %v9382_v49 = vsub.f32 %v9373_v32, %v9378_v1 }
0x1e40   :  { %v9457_v33 = vsub.f32 %v9455_v23, %v9456_v22 }
0x1e41   :  { %v9389_v21 = vadd.f32 %v9387_v28, %v9382_v49  ;;  %v9585_v49 = vpop.f32.mrf.mxu1 }
0x1e42   :  { %v9458_v59 = vand.u32 4294901760, %v9457_v33 }
0x1e43   :  { %v9402_v58 = vsel %vm415_vm1, %v9389_v21, 0 }
0x1e44   :  { %v9438_v26 = vand.u32 4294901760, %v9402_v58 }
0x1e46   :  { %9504 = vmatmul.f32.gmra.mxu3 %v9438_v26  ;;  %v9439_v50 = vsub.f32 %v9402_v58, %v9438_v26 }
0x1e48   :  { %9547 = vmatmul.f32.gmra.mxu0 %v9439_v50  ;;  %v9440_v12 = vand.u32 4294901760, %v9439_v50 }
0x1e4a   :  { %9590 = vmatmul.f32.gmra.mxu1 %v9440_v12  ;;  %v9441_v54 = vsub.f32 %v9439_v50, %v9440_v12 }
0x1e4c   :  { %v9442_v42 = vand.u32 4294901760, %v9441_v54 }
0x1e4e   :  { %9443 = vmatmul.f32.gmra.mxu2 %v9442_v42  ;;  %9508 = vmatmul.f32.gmra.mxu3 %v9446_v60 }
0x1e50   :  { %9552 = vmatmul.f32.gmra.mxu0 %v9447_v35 }
0x1e52   :  { %9596 = vmatmul.f32.gmra.mxu1 %v9448_v37 }
0x1e56   :  { %9451 = vmatmul.f32.gmra.mxu2 %v9450_v56  ;;  %9512 = vmatmul.f32.gmra.mxu3 %v9454_v52 }
0x1e58   :  { %9557 = vmatmul.f32.gmra.mxu0 %v9455_v23 }
0x1e5a   :  { %9602 = vmatmul.f32.gmra.mxu1 %v9456_v22 }
0x1e5e   :  { %9459 = vmatmul.f32.gmra.mxu2 %v9458_v59  ;;  %9672 = vmatmul.f32.vlgmr.msrb.gmra.mxu3 %v14231_v47 }
0x1e66   :  { %9635 = vmatmul.f32.vlgmr.msrb.gmra.mxu2 %v14231_v47  ;;  %9676 = vmatmul.f32.gmra.mxu3 %v9438_v26  ;;  %v9726_v47 = vand.u32 4294901760, %v9694_v61 }
0x1e68   :  { %v9788_v34 = vsub.f32 %v9694_v61, %v9726_v47  ;;  %9878 = vmatpush.msra.mxu3 %v9726_v47  ;;  %9727 = vmatpush.msrb.mxu0 %v9726_v47 }
0x1e6a   :  { %v9789_v11 = vand.u32 4294901760, %v9788_v34  ;;  %9836 = vmatpush.msra.mxu2 %v9788_v34  ;;  %9880 = vmatpush.msra.mxu3 %v9728_v40 }
0x1e6b   :  { %9729 = vmatpush.msrb.mxu0 %v9728_v40 }
0x1e6c   :  { %v9790_v32 = vsub.f32 %v9788_v34, %v9789_v11  ;;  %9839 = vmatpush.msra.mxu2 %v9794_v36 }
0x1e6d   :  { %9921 = vmatpush.msra.mxu0 %v9777_v0 }
0x1e6e   :  { %9639 = vmatmul.f32.gmra.mxu2 %v9438_v26  ;;  %9680 = vmatmul.f32.gmra.mxu3 %v9446_v60  ;;  %v9791_v17 = vand.u32 4294901760, %v9790_v32  ;;  %v9586_v26 = vadd.f32 %v9585_v49, %v9544_v16 }
0x1e6f   :  { %9925 = vmatpush.msra.mxu0 %v9783_v29 }
0x1e70   :  { %9792 = vmatpush.msrb.mxu1 %v9791_v17 }
0x1e71   :  { %9929 = vmatpush.msra.mxu0 %v9789_v11 }
0x1e72   :  { %9798 = vmatpush.msrb.mxu1 %v9797_v45 }
0x1e73   :  { %9933 = vmatpush.msra.mxu0 %v9795_v7 }
0x1e74   :  { %9964 = vmatpush.msra.mxu1 %v9722_v39 }
0x1e76   :  { %9643 = vmatmul.f32.gmra.mxu2 %v9446_v60  ;;  %9684 = vmatmul.f32.gmra.mxu3 %v9454_v52 }
0x1e77   :  { %9966 = vmatpush.msra.mxu1 %v9724_v10 }
0x1e79   :  { %9968 = vmatpush.msra.mxu1 %v9726_v47 }
0x1e7b   :  { %9970 = vmatpush.msra.mxu1 %v9728_v40 }
0x1e7e   :  { %9647 = vmatmul.f32.gmra.mxu2 %v9454_v52 }
0x1ec5   :  { %v9548_v43 = vpop.f32.mrf.mxu0 }
0x1ec7   :  { %v9591_v50 = vpop.f32.mrf.mxu1 }
0x1ec9   :  { %v9505_v2 = vpop.f32.mrf.mxu3 }
0x1ecd   :  { %v9553_v23 = vpop.f32.mrf.mxu0 }
0x1ecf   :  { %v9597_v15 = vpop.f32.mrf.mxu1 }
0x1ed1   :  { %v9444_v46 = vpop.f32.mrf.mxu2  ;;  %v9509_v62 = vpop.f32.mrf.mxu3 }
0x1ed2   :  { %v9445_v28 = vadd.f32 %v9444_v46, %v9397_v6 }
0x1ed4   :  { %v9506_v58 = vadd.f32 %v9505_v2, %v9445_v28 }
0x1ed5   :  { %v9558_v34 = vpop.f32.mrf.mxu0 }
0x1ed6   :  { %v9549_v14 = vadd.f32 %v9548_v43, %v9506_v58 }
0x1ed7   :  { %v9603_v63 = vpop.f32.mrf.mxu1 }
0x1ed8   :  { %v9592_v13 = vadd.f32 %v9591_v50, %v9549_v14 }
0x1ed9   :  { %v9452_v38 = vpop.f32.mrf.mxu2  ;;  %v9513_v19 = vpop.f32.mrf.mxu3 }
0x1eda   :  { %v9453_v12 = vadd.f32 %v9452_v38, %v9397_v6 }
0x1edc   :  { %v9510_v37 = vadd.f32 %v9509_v62, %v9453_v12 }
0x1ede   :  { %v9554_v39 = vadd.f32 %v9553_v23, %v9510_v37 }
0x1ee0   :  { %v9598_v0 = vadd.f32 %v9597_v15, %v9554_v39 }
0x1ee1   :  { %v9460_v1 = vpop.f32.mrf.mxu2  ;;  %v9673_v21 = vpop.f32.mrf.mxu3 }
0x1ee2   :  { %v9461_v18 = vadd.f32 %v9460_v1, %v9397_v6 }
0x1ee4   :  { %v9514_v57 = vadd.f32 %v9513_v19, %v9461_v18 }
0x1ee6   :  { %v9559_v31 = vadd.f32 %v9558_v34, %v9514_v57 }
0x1ee8   :  { %v9604_v46 = vadd.f32 %v9603_v63, %v9559_v31 }
0x1ee9   :  { %v9636_v60 = vpop.f32.mrf.mxu2  ;;  %v9677_v42 = vpop.f32.mrf.mxu3 }
0x1eea   :  { %v9637_v30 = vadd.f32 %v9636_v60, %v9586_v26 }
0x1eec   :  { %v9674_v35 = vadd.f32 %v9673_v21, %v9637_v30 }
0x1eee   :  { %v9688_v54 = vmax.f32 %v9674_v35, 0.0  ;;  %v9697_v35 = vperm.slane %v14023_v48, 1  ;;  %v9989_v48 = vstv %s10505_s11 }
0x1ef0   :  { %v9699_v52 = vsel %vm415_vm1, %v9688_v54, 0 }
0x1ef1   :  { %v9730_v56 = vand.u32 4294901760, %v9699_v52  ;;  %v9640_v22 = vpop.f32.mrf.mxu2  ;;  %v9681_v27 = vpop.f32.mrf.mxu3 }
0x1ef2   :  { %v9641_v33 = vadd.f32 %v9640_v22, %v9592_v13 }
0x1ef3   :  { %v9731_v59 = vsub.f32 %v9699_v52, %v9730_v56  ;;  %9800 = vmatmul.f32.vlgmr.msrb.gmra.mxu1 %v9730_v56 }
0x1ef4   :  { %v9678_v25 = vadd.f32 %v9677_v42, %v9641_v33 }
0x1ef5   :  { %v9732_v24 = vand.u32 4294901760, %v9731_v59  ;;  %9842 = vmatmul.f32.vlgmr.msra.gmra.mxu2 %v9731_v59 }
0x1ef6   :  { %v9689_v10 = vmax.f32 %v9678_v25, 0.0 }
0x1ef7   :  { %v9733_v61 = vsub.f32 %v9731_v59, %v9732_v24  ;;  %9884 = vmatmul.f32.vlgmr.msra.gmra.mxu3 %v9732_v24  ;;  %v9995_v24 = vstv %s9994_s23 }
0x1ef8   :  { %v9702_v2 = vsel %vm415_vm1, %v9689_v10, 0 }
0x1ef9   :  { %v9734_v3 = vand.u32 4294901760, %v9733_v61  ;;  %v9738_v47 = vand.u32 4294901760, %v9702_v2  ;;  %v9644_v53 = vpop.f32.mrf.mxu2  ;;  %v9685_v6 = vpop.f32.mrf.mxu3 }
0x1efa   :  { %v9645_v29 = vadd.f32 %v9644_v53, %v9598_v0  ;;  %v9996_v0 = vmul.f32 %v9995_v24, %v13961_v44 }
0x1efb   :  { %9735 = vmatmul.f32.vlgmr.msrb.gmra.mxu0 %v9734_v3  ;;  %9804 = vmatmul.f32.gmra.mxu1 %v9738_v47  ;;  %v9739_v40 = vsub.f32 %v9702_v2, %v9738_v47 }
0x1efc   :  { %v9682_v20 = vadd.f32 %v9681_v27, %v9645_v29 }
0x1efd   :  { %9847 = vmatmul.f32.gmra.mxu2 %v9739_v40  ;;  %v9740_v11 = vand.u32 4294901760, %v9739_v40 }
0x1efe   :  { %v9690_v36 = vmax.f32 %v9682_v20, 0.0 }
0x1eff   :  { %9890 = vmatmul.f32.gmra.mxu3 %v9740_v11  ;;  %v9741_v32 = vsub.f32 %v9739_v40, %v9740_v11 }
0x1f00   :  { %v9705_v7 = vsel %vm415_vm1, %v9690_v36, 0 }
0x1f01   :  { %v9746_v62 = vand.u32 4294901760, %v9705_v7  ;;  %v9648_v17 = vpop.f32.mrf.mxu2  ;;  %v9742_v55 = vand.u32 4294901760, %v9741_v32 }
0x1f02   :  { %v9649_v45 = vadd.f32 %v9648_v17, %v9604_v46 }
0x1f03   :  { %9743 = vmatmul.f32.gmra.mxu0 %v9742_v55  ;;  %9808 = vmatmul.f32.gmra.mxu1 %v9746_v62  ;;  %v9747_v38 = vsub.f32 %v9705_v7, %v9746_v62  ;;  %v9997_v7 = vmul.f32 %v9995_v24, %v13969_v41 }
0x1f04   :  { %v9686_v19 = vadd.f32 %v9685_v6, %v9649_v45 }
0x1f05   :  { %9852 = vmatmul.f32.gmra.mxu2 %v9747_v38  ;;  %v9748_v8 = vand.u32 4294901760, %v9747_v38 }
0x1f06   :  { %v9691_v51 = vmax.f32 %v9686_v19, 0.0 }
0x1f07   :  { %9896 = vmatmul.f32.gmra.mxu3 %v9748_v8  ;;  %v9749_v9 = vsub.f32 %v9747_v38, %v9748_v8 }
0x1f08   :  { %v9708_v1 = vsel %vm415_vm1, %v9691_v51, 0 }
0x1f09   :  { %v9754_v49 = vand.u32 4294901760, %v9708_v1  ;;  %v9750_v28 = vand.u32 4294901760, %v9749_v9  ;;  %v9998_v9 = vmul.f32 %v9995_v24, %v13973_v4  ;;  %v14533_v4 = vld [vmem:[#allocation35_spill] sm:$0xff] }
0x1f0b   :  { %9751 = vmatmul.f32.gmra.mxu0 %v9750_v28  ;;  %9812 = vmatmul.f32.gmra.mxu1 %v9754_v49  ;;  %v9755_v16 = vsub.f32 %v9708_v1, %v9754_v49 }
0x1f0d   :  { %9857 = vmatmul.f32.gmra.mxu2 %v9755_v16  ;;  %v9756_v21 = vand.u32 4294901760, %v9755_v16 }
0x1f0f   :  { %9902 = vmatmul.f32.gmra.mxu3 %v9756_v21  ;;  %v9757_v43 = vsub.f32 %v9755_v16, %v9756_v21 }
0x1f11   :  { %v9758_v58 = vand.u32 4294901760, %v9757_v43 }
0x1f13   :  { %9759 = vmatmul.f32.gmra.mxu0 %v9758_v58  ;;  %9972 = vmatmul.f32.vlgmr.msra.gmra.mxu1 %v9730_v56 }
0x1f1b   :  { %9935 = vmatmul.f32.vlgmr.msra.gmra.mxu0 %v9730_v56  ;;  %9976 = vmatmul.f32.gmra.mxu1 %v9738_v47 }
0x1f23   :  { %9939 = vmatmul.f32.gmra.mxu0 %v9738_v47  ;;  %9980 = vmatmul.f32.gmra.mxu1 %v9746_v62 }
0x1f2b   :  { %9943 = vmatmul.f32.gmra.mxu0 %v9746_v62  ;;  %9984 = vmatmul.f32.gmra.mxu1 %v9754_v49 }
0x1f33   :  { %9947 = vmatmul.f32.gmra.mxu0 %v9754_v49 }
0x1f70   :  { %v9801_v26 = vpop.f32.mrf.mxu1 }
0x1f78   :  { %v9736_v60 = vpop.f32.mrf.mxu0  ;;  %v9805_v30 = vpop.f32.mrf.mxu1 }
0x1f79   :  { %v9737_v42 = vadd.f32 %v9736_v60, %v9697_v35  ;;  %v9843_v37 = vpop.f32.mrf.mxu2  ;;  %v9999_v60 = vmul.f32 %v9995_v24, %v13977_v5 }
0x1f7a   :  { %v9885_v13 = vpop.f32.mrf.mxu3 }
0x1f7b   :  { %v9802_v52 = vadd.f32 %v9801_v26, %v9737_v42 }
0x1f7d   :  { %v9844_v56 = vadd.f32 %v9843_v37, %v9802_v52 }
0x1f7f   :  { %v9886_v18 = vadd.f32 %v9885_v13, %v9844_v56 }
0x1f80   :  { %v9744_v50 = vpop.f32.mrf.mxu0  ;;  %v9809_v12 = vpop.f32.mrf.mxu1 }
0x1f81   :  { %v9745_v22 = vadd.f32 %v9744_v50, %v9697_v35  ;;  %v9848_v59 = vpop.f32.mrf.mxu2 }
0x1f82   :  { %v9891_v10 = vpop.f32.mrf.mxu3 }
0x1f83   :  { %v9806_v25 = vadd.f32 %v9805_v30, %v9745_v22 }
0x1f85   :  { %v9849_v61 = vadd.f32 %v9848_v59, %v9806_v25 }
0x1f87   :  { %v9892_v27 = vadd.f32 %v9891_v10, %v9849_v61  ;;  %v10105_v61 = vld [vmem:[%s14384_s15 + $0x18] sm:$0xff] }
0x1f88   :  { %v9752_v14 = vpop.f32.mrf.mxu0  ;;  %v9813_v54 = vpop.f32.mrf.mxu1 }
0x1f89   :  { %v9753_v57 = vadd.f32 %v9752_v14, %v9697_v35  ;;  %v9853_v34 = vpop.f32.mrf.mxu2 }
0x1f8a   :  { %v9897_v32 = vpop.f32.mrf.mxu3 }
0x1f8b   :  { %v9810_v53 = vadd.f32 %v9809_v12, %v9753_v57  ;;  %v10134_v57 = vand.u32 4294901760, %v10105_v61 }
0x1f8d   :  { %v9854_v11 = vadd.f32 %v9853_v34, %v9810_v53  ;;  %10286 = vmatpush.msrb.mxu1 %v10134_v57  ;;  %10135 = vmatpush.msrb.mxu2 %v10134_v57  ;;  %v10102_v34 = vld [vmem:[%s14384_s15] sm:$0xff] }
0x1f8f   :  { %v9898_v62 = vadd.f32 %v9897_v32, %v9854_v11  ;;  %v10140_v11 = vand.u32 4294901760, %v10102_v34 }
0x1f90   :  { %v9760_v23 = vpop.f32.mrf.mxu0  ;;  %v9973_v33 = vpop.f32.mrf.mxu1 }
0x1f91   :  { %v9761_v36 = vadd.f32 %v9760_v23, %v9697_v35  ;;  %v9858_v19 = vpop.f32.mrf.mxu2 }
0x1f92   :  { %v9903_v49 = vpop.f32.mrf.mxu3 }
0x1f93   :  { %v9814_v44 = vadd.f32 %v9813_v54, %v9761_v36 }
0x1f95   :  { %v9859_v8 = vadd.f32 %v9858_v19, %v9814_v44 }
0x1f97   :  { %v9904_v28 = vadd.f32 %v9903_v49, %v9859_v8 }
0x1f98   :  { %v9936_v39 = vpop.f32.mrf.mxu0  ;;  %v9977_v47 = vpop.f32.mrf.mxu1 }
0x1f99   :  { %v9937_v15 = vadd.f32 %v9936_v39, %v9886_v18 }
0x1f9b   :  { %v9974_v2 = vadd.f32 %v9973_v33, %v9937_v15 }
0x1f9d   :  { %v9990_v3 = vmul.f32 %v9989_v48, %v9974_v2  ;;  %v10104_v2 = vld [vmem:[%s14384_s15 + $0x10] sm:$0xff] }
0x1f9f   :  { %v10000_v29 = vadd.f32 %v9996_v0, %v9990_v3  ;;  %v10188_v0 = vsub.f32 %v10105_v61, %v10134_v57  ;;  %v10136_v3 = vand.u32 4294901760, %v10104_v2 }
0x1fa0   :  { %v9940_v40 = vpop.f32.mrf.mxu0  ;;  %v9981_v55 = vpop.f32.mrf.mxu1 }
0x1fa1   :  { %v9941_v20 = vadd.f32 %v9940_v40, %v9892_v27  ;;  %v10004_v31 = vsel %vm415_vm1, %v10000_v29, 0.0  ;;  %v10189_v27 = vand.u32 4294901760, %v10188_v0  ;;  %v10194_v53 = vsub.f32 %v10104_v2, %v10136_v3  ;;  %10242 = vmatpush.msrb.mxu0 %v10188_v0  ;;  %10288 = vmatpush.msrb.mxu1 %v10136_v3 }
0x1fa2   :  { %10005 = vadd.xlane.f32.xlu0 %v10004_v31  ;;  %10137 = vmatpush.msrb.mxu2 %v10136_v3 }
0x1fa3   :  { %v9978_v63 = vadd.f32 %v9977_v47, %v9941_v20  ;;  %v10103_v47 = vld [vmem:[%s14384_s15 + $0x8] sm:$0xff]  ;;  %v10190_v40 = vsub.f32 %v10188_v0, %v10189_v27  ;;  %v10195_v20 = vand.u32 4294901760, %v10194_v53  ;;  %10245 = vmatpush.msrb.mxu0 %v10194_v53 }
0x1fa5   :  { %v9991_v46 = vmul.f32 %v9989_v48, %v9978_v63  ;;  %v10191_v36 = vand.u32 4294901760, %v10190_v40  ;;  %v10196_v63 = vsub.f32 %v10194_v53, %v10195_v20 }
0x1fa7   :  { %v10001_v17 = vadd.f32 %v9997_v7, %v9991_v46  ;;  %v10206_v7 = vsub.f32 %v10102_v34, %v10140_v11  ;;  %10192 = vmatpush.msrb.mxu3 %v10191_v36  ;;  %v10197_v46 = vand.u32 4294901760, %v10196_v63 }
0x1fa8   :  { %v9944_v45 = vpop.f32.mrf.mxu0  ;;  %v9985_v58 = vpop.f32.mrf.mxu1 }
0x1fa9   :  { %v9945_v6 = vadd.f32 %v9944_v45, %v9898_v62  ;;  %v10007_v38 = vsel %vm415_vm1, %v10001_v17, 0.0  ;;  %v10207_v44 = vand.u32 4294901760, %v10206_v7  ;;  %10198 = vmatpush.msrb.mxu3 %v10197_v46 }
0x1faa   :  { %10008 = vadd.xlane.f32.xlu2 %v10007_v38 }
0x1fab   :  { %v9982_v51 = vadd.f32 %v9981_v55, %v9945_v6  ;;  %v10208_v55 = vsub.f32 %v10206_v7, %v10207_v44 }
0x1fad   :  { %v9992_v1 = vmul.f32 %v9989_v48, %v9982_v51  ;;  %v10209_v6 = vand.u32 4294901760, %v10208_v55 }
0x1faf   :  { %v10002_v16 = vadd.f32 %v9998_v9, %v9992_v1 }
0x1fb0   :  { %v9948_v41 = vpop.f32.mrf.mxu0 }
0x1fb1   :  { %v9949_v21 = vadd.f32 %v9948_v41, %v9904_v28  ;;  %v10010_v43 = vsel %vm415_vm1, %v10002_v16, 0.0 }
0x1fb2   :  { %10011 = vadd.xlane.f32.xlu1 %v10010_v43 }
0x1fb3   :  { %v9986_v26 = vadd.f32 %v9985_v58, %v9949_v21 }
0x1fb5   :  { %v9993_v30 = vmul.f32 %v9989_v48, %v9986_v26 }
0x1fb7   :  { %v10003_v50 = vadd.f32 %v9999_v60, %v9993_v30 }
0x1fb9   :  { %v10013_v12 = vsel %vm415_vm1, %v10003_v50, 0.0 }
0x1fba   :  { %10014 = vadd.xlane.f32.xlu0 %v10013_v12 }
0x2015   :  { %v10006_v35 = vpop.xlane.xlu0 %10005 }
0x2016   :  { %v10016_v14 = vmul.f32 %v10006_v35, %v14533_v4 }
0x2018   :  { %v14282_v54 = vsub.f32 %v10000_v29, %v10016_v14  ;;  %v10138_v29 = vand.u32 4294901760, %v10103_v47 }
0x201a   :  { %v10024_v42 = vmul.f32 %v14282_v54, %v14282_v54  ;;  %v10200_v31 = vsub.f32 %v10103_v47, %v10138_v29  ;;  %10290 = vmatpush.msrb.mxu1 %v10138_v29  ;;  %10139 = vmatpush.msrb.mxu2 %v10138_v29 }
0x201c   :  { %v10028_v37 = vsel %vm415_vm1, %v10024_v42, 0.0  ;;  %v10201_v32 = vand.u32 4294901760, %v10200_v31  ;;  %10248 = vmatpush.msrb.mxu0 %v10200_v31  ;;  %10292 = vmatpush.msrb.mxu1 %v10140_v11 }
0x201d   :  { %v10009_v52 = vpop.xlane.xlu2 %10008  ;;  %10029 = vadd.xlane.f32.xlu2 %v10028_v37  ;;  %10141 = vmatpush.msrb.mxu2 %v10140_v11 }
0x201e   :  { %v10017_v13 = vmul.f32 %v10009_v52, %v14533_v4  ;;  %v10202_v62 = vsub.f32 %v10200_v31, %v10201_v32  ;;  %10251 = vmatpush.msrb.mxu0 %v10206_v7 }
0x201f   :  { %10333 = vmatpush.msra.mxu2 %v10189_v27 }
0x2020   :  { %v14288_v5 = vsub.f32 %v10001_v17, %v10017_v13  ;;  %v10203_v17 = vand.u32 4294901760, %v10202_v62 }
0x2021   :  { %10337 = vmatpush.msra.mxu2 %v10195_v20 }
0x2022   :  { %v10025_v23 = vmul.f32 %v14288_v5, %v14288_v5  ;;  %10204 = vmatpush.msrb.mxu3 %v10203_v17 }
0x2023   :  { %10341 = vmatpush.msra.mxu2 %v10201_v32 }
0x2024   :  { %v10031_v56 = vsel %vm415_vm1, %v10025_v23, 0.0  ;;  %10210 = vmatpush.msrb.mxu3 %v10209_v6 }
0x2025   :  { %v10012_v22 = vpop.xlane.xlu1 %10011  ;;  %10032 = vadd.xlane.f32.xlu1 %v10031_v56  ;;  %10345 = vmatpush.msra.mxu2 %v10207_v44 }
0x2026   :  { %v10018_v33 = vmul.f32 %v10012_v22, %v14533_v4  ;;  %10376 = vmatpush.msra.mxu3 %v10134_v57 }
0x2028   :  { %v14294_v59 = vsub.f32 %v10002_v16, %v10018_v33  ;;  %10378 = vmatpush.msra.mxu3 %v10136_v3 }
0x202a   :  { %v10026_v18 = vmul.f32 %v14294_v59, %v14294_v59  ;;  %10380 = vmatpush.msra.mxu3 %v10138_v29 }
0x202c   :  { %v10034_v25 = vsel %vm415_vm1, %v10026_v18, 0.0  ;;  %10382 = vmatpush.msra.mxu3 %v10140_v11 }
0x202d   :  { %10035 = vadd.xlane.f32.xlu0 %v10034_v25  ;;  %v10015_v39 = vpop.xlane.xlu0 %10014 }
0x202e   :  { %v10019_v15 = vmul.f32 %v10015_v39, %v14533_v4 }
0x2030   :  { %v14300_v24 = vsub.f32 %v10003_v50, %v10019_v15  ;;  %v10576_v50 = vld [vmem:[%s14382_s13 + $0x10] sm:$0xff] }
0x2031   :  { %v14323_v12 = vperm.slane %v10576_v50, 2  ;;  %v14325_v42 = vperm.slane %v10576_v50, 3 }
0x2032   :  { %v10027_v10 = vmul.f32 %v14300_v24, %v14300_v24 }
0x2034   :  { %v10037_v48 = vsel %vm415_vm1, %v10027_v10, 0.0 }
0x2035   :  { %10038 = vadd.xlane.f32.xlu2 %v10037_v48 }
0x2090   :  { %v10030_v45 = vpop.xlane.xlu2 %10029 }
0x2091   :  { %v10040_v38 = vmul.f32 %v10030_v45, %v14533_v4 }
0x2093   :  { %v10044_v19 = vadd.f32 0.0001, %v10040_v38 }
0x2095   :  { %10565 = vrsqrt.f32 %v10044_v19  ;;  %vm10054_vm7 = vweird.f32 %v10044_v19 }
0x2098   :  { %v10033_v8 = vpop.xlane.xlu1 %10032 }
0x2099   :  { %v10041_v51 = vmul.f32 %v10033_v8, %v14533_v4 }
0x209b   :  { %v10566_v9 = vpop.eup %10565  ;;  %v10045_v1 = vadd.f32 0.0001, %v10041_v51 }
0x209c   :  { %v10049_v49 = vmul.f32 %v10566_v9, %v10044_v19  ;;  %vm10055_vm6 = vweird.f32 %v10566_v9 }
0x209d   :  { %10567 = vrsqrt.f32 %v10045_v1  ;;  %vm10056_vm8 = vmor %vm10054_vm7, %vm10055_vm6  ;;  %vm10064_vm10 = vweird.f32 %v10045_v1 }
0x209e   :  { %v10050_v28 = vmul.f32 %v10566_v9, %v10049_v49 }
0x20a0   :  { %v10051_v16 = vmul.f32 0.5, %v10050_v28  ;;  %v10036_v41 = vpop.xlane.xlu0 %10035 }
0x20a1   :  { %v10042_v21 = vmul.f32 %v10036_v41, %v14533_v4 }
0x20a2   :  { %v10052_v43 = vsub.f32 1.5, %v10051_v16 }
0x20a3   :  { %v10568_v58 = vpop.eup %10567  ;;  %v10046_v26 = vadd.f32 0.0001, %v10042_v21 }
0x20a4   :  { %v10053_v60 = vmul.f32 %v10566_v9, %v10052_v43  ;;  %v10059_v30 = vmul.f32 %v10568_v58, %v10045_v1  ;;  %vm10065_vm9 = vweird.f32 %v10568_v58 }
0x20a5   :  { %10569 = vrsqrt.f32 %v10046_v26  ;;  %vm10066_vm11 = vmor %vm10064_vm10, %vm10065_vm9  ;;  %vm10074_vm4 = vweird.f32 %v10046_v26 }
0x20a6   :  { %v10057_v35 = vsel %vm10056_vm8, %v10566_v9, %v10053_v60  ;;  %v10060_v14 = vmul.f32 %v10568_v58, %v10059_v30 }
0x20a7   :  { %v10088_v37 = vmul.f32 %v10057_v35, %v14282_v54 }
0x20a8   :  { %v10061_v52 = vmul.f32 0.5, %v10060_v14  ;;  %v10039_v13 = vpop.xlane.xlu2 %10038  ;;  %v10520_v14 = vld [vmem:[%s14385_s16] ss:$0 sm:$0xff] }
0x20a9   :  { %v10093_v23 = vmul.f32 %v14323_v12, %v10088_v37  ;;  %v10043_v56 = vmul.f32 %v10039_v13, %v14533_v4 }
0x20aa   :  { %v10062_v22 = vsub.f32 1.5, %v10061_v52 }
0x20ab   :  { %v10570_v33 = vpop.eup %10569  ;;  %v10098_v18 = vadd.f32 %v14325_v42, %v10093_v23  ;;  %v10047_v25 = vadd.f32 0.0001, %v10043_v56 }
0x20ac   :  { %v10063_v39 = vmul.f32 %v10568_v58, %v10062_v22  ;;  %v10069_v15 = vmul.f32 %v10570_v33, %v10046_v26  ;;  %vm10075_vm12 = vweird.f32 %v10570_v33 }
0x20ad   :  { %10571 = vrsqrt.f32 %v10047_v25  ;;  %v10111_v10 = vsel %vm415_vm1, %v10098_v18, 0  ;;  %vm10076_vm5 = vmor %vm10074_vm4, %vm10075_vm12  ;;  %vm10084_vm14 = vweird.f32 %v10047_v25 }
0x20ae   :  { %v10067_v54 = vsel %vm10066_vm11, %v10568_v58, %v10063_v39  ;;  %v10070_v48 = vmul.f32 %v10570_v33, %v10069_v15  ;;  %v14332_v61 = vand.u32 4294901760, %v10111_v10 }
0x20af   :  { %v10089_v57 = vmul.f32 %v10067_v54, %v14288_v5 }
0x20b0   :  { %v10071_v4 = vmul.f32 0.5, %v10070_v48  ;;  %10212 = vmatmul.f32.vlgmr.msrb.gmra.mxu3 %v14332_v61  ;;  %v10143_v2 = vsub.f32 %v10111_v10, %v14332_v61 }
0x20b1   :  { %v10094_v0 = vmul.f32 %v14323_v12, %v10089_v57 }
0x20b2   :  { %v10072_v3 = vsub.f32 1.5, %v10071_v4  ;;  %10254 = vmatmul.f32.vlgmr.msrb.gmra.mxu0 %v10143_v2  ;;  %v10144_v47 = vand.u32 4294901760, %v10143_v2 }
0x20b3   :  { %v10572_v27 = vpop.eup %10571  ;;  %v10099_v53 = vadd.f32 %v14325_v42, %v10094_v0 }
0x20b4   :  { %v10073_v29 = vmul.f32 %v10570_v33, %v10072_v3  ;;  %v10079_v34 = vmul.f32 %v10572_v27, %v10047_v25  ;;  %10296 = vmatmul.f32.vlgmr.msrb.gmra.mxu1 %v10144_v47  ;;  %v10145_v40 = vsub.f32 %v10143_v2, %v10144_v47  ;;  %vm10085_vm13 = vweird.f32 %v10572_v27 }
0x20b5   :  { %v10114_v5 = vsel %vm415_vm1, %v10099_v53, 0  ;;  %vm10086_vm15 = vmor %vm10084_vm14, %vm10085_vm13 }
0x20b6   :  { %v10077_v20 = vsel %vm10076_vm5, %v10570_v33, %v10073_v29  ;;  %v10080_v31 = vmul.f32 %v10572_v27, %v10079_v34  ;;  %v10146_v11 = vand.u32 4294901760, %v10145_v40  ;;  %v10150_v36 = vand.u32 4294901760, %v10114_v5 }
0x20b7   :  { %v10090_v63 = vmul.f32 %v10077_v20, %v14294_v59 }
0x20b8   :  { %v10081_v32 = vmul.f32 0.5, %v10080_v31  ;;  %10147 = vmatmul.f32.vlgmr.msrb.gmra.mxu2 %v10146_v11  ;;  %10216 = vmatmul.f32.gmra.mxu3 %v10150_v36  ;;  %v10151_v7 = vsub.f32 %v10114_v5, %v10150_v36 }
0x20b9   :  { %v10095_v46 = vmul.f32 %v14323_v12, %v10090_v63 }
0x20ba   :  { %v10082_v62 = vsub.f32 1.5, %v10081_v32  ;;  %10259 = vmatmul.f32.gmra.mxu0 %v10151_v7  ;;  %v10152_v44 = vand.u32 4294901760, %v10151_v7 }
0x20bb   :  { %v10100_v17 = vadd.f32 %v14325_v42, %v10095_v46 }
0x20bc   :  { %v10083_v55 = vmul.f32 %v10572_v27, %v10082_v62  ;;  %10302 = vmatmul.f32.gmra.mxu1 %v10152_v44  ;;  %v10153_v45 = vsub.f32 %v10151_v7, %v10152_v44 }
0x20bd   :  { %v10117_v6 = vsel %vm415_vm1, %v10100_v17, 0 }
0x20be   :  { %v10087_v59 = vsel %vm10086_vm15, %v10572_v27, %v10083_v55  ;;  %v10154_v38 = vand.u32 4294901760, %v10153_v45  ;;  %v10158_v19 = vand.u32 4294901760, %v10117_v6 }
0x20bf   :  { %v10091_v8 = vmul.f32 %v10087_v59, %v14300_v24 }
0x20c0   :  { %10155 = vmatmul.f32.gmra.mxu2 %v10154_v38  ;;  %10220 = vmatmul.f32.gmra.mxu3 %v10158_v19  ;;  %v10159_v51 = vsub.f32 %v10117_v6, %v10158_v19 }
0x20c1   :  { %v10096_v9 = vmul.f32 %v14323_v12, %v10091_v8 }
0x20c2   :  { %10264 = vmatmul.f32.gmra.mxu0 %v10159_v51  ;;  %v10160_v1 = vand.u32 4294901760, %v10159_v51 }
0x20c3   :  { %v10101_v49 = vadd.f32 %v14325_v42, %v10096_v9 }
0x20c4   :  { %10308 = vmatmul.f32.gmra.mxu1 %v10160_v1  ;;  %v10161_v28 = vsub.f32 %v10159_v51, %v10160_v1 }
0x20c5   :  { %v10120_v16 = vsel %vm415_vm1, %v10101_v49, 0  ;;  %vm10400_vm1 = vcmask 31744  }
0x20c6   :  { %v10162_v41 = vand.u32 4294901760, %v10161_v28  ;;  %v10166_v21 = vand.u32 4294901760, %v10120_v16 }
0x20c8   :  { %10163 = vmatmul.f32.gmra.mxu2 %v10162_v41  ;;  %10224 = vmatmul.f32.gmra.mxu3 %v10166_v21  ;;  %v10167_v43 = vsub.f32 %v10120_v16, %v10166_v21 }
0x20ca   :  { %10269 = vmatmul.f32.gmra.mxu0 %v10167_v43  ;;  %v10168_v24 = vand.u32 4294901760, %v10167_v43 }
0x20cc   :  { %10314 = vmatmul.f32.gmra.mxu1 %v10168_v24  ;;  %v10169_v58 = vsub.f32 %v10167_v43, %v10168_v24 }
0x20ce   :  { %v10170_v26 = vand.u32 4294901760, %v10169_v58 }
0x20d0   :  { %10171 = vmatmul.f32.gmra.mxu2 %v10170_v26  ;;  %10384 = vmatmul.f32.vlgmr.msra.gmra.mxu3 %v14332_v61 }
0x20d8   :  { %10347 = vmatmul.f32.vlgmr.msra.gmra.mxu2 %v14332_v61  ;;  %10388 = vmatmul.f32.gmra.mxu3 %v10150_v36 }
0x20e0   :  { %10351 = vmatmul.f32.gmra.mxu2 %v10150_v36  ;;  %10392 = vmatmul.f32.gmra.mxu3 %v10158_v19 }
0x20e8   :  { %10355 = vmatmul.f32.gmra.mxu2 %v10158_v19  ;;  %10396 = vmatmul.f32.gmra.mxu3 %v10166_v21 }
0x20f0   :  { %10359 = vmatmul.f32.gmra.mxu2 %v10166_v21 }
0x212f   :  { %v10255_v13 = vpop.f32.mrf.mxu0 }
0x2131   :  { %v10297_v56 = vpop.f32.mrf.mxu1 }
0x2133   :  { %v10213_v60 = vpop.f32.mrf.mxu3 }
0x2137   :  { %v10260_v39 = vpop.f32.mrf.mxu0 }
0x2139   :  { %v10303_v61 = vpop.f32.mrf.mxu1 }
0x213b   :  { %v10148_v30 = vpop.f32.mrf.mxu2  ;;  %v10217_v50 = vpop.f32.mrf.mxu3 }
0x213c   :  { %v10149_v52 = vadd.f32 %v10520_v14, %v10148_v30 }
0x213e   :  { %v10214_v23 = vadd.f32 %v10213_v60, %v10149_v52 }
0x213f   :  { %v10265_v27 = vpop.f32.mrf.mxu0 }
0x2140   :  { %v10256_v18 = vadd.f32 %v10255_v13, %v10214_v23 }
0x2141   :  { %v10309_v20 = vpop.f32.mrf.mxu1 }
0x2142   :  { %v10298_v10 = vadd.f32 %v10297_v56, %v10256_v18 }
0x2143   :  { %v10156_v12 = vpop.f32.mrf.mxu2  ;;  %v10221_v35 = vpop.f32.mrf.mxu3 }
0x2144   :  { %v10157_v33 = vadd.f32 %v10520_v14, %v10156_v12 }
0x2146   :  { %v10218_v15 = vadd.f32 %v10217_v50, %v10157_v33 }
0x2147   :  { %v10270_v7 = vpop.f32.mrf.mxu0 }
0x2148   :  { %v10261_v2 = vadd.f32 %v10260_v39, %v10218_v15 }
0x2149   :  { %v10315_v44 = vpop.f32.mrf.mxu1 }
0x214a   :  { %v10304_v47 = vadd.f32 %v10303_v61, %v10261_v2 }
0x214b   :  { %v10164_v42 = vpop.f32.mrf.mxu2  ;;  %v10225_v37 = vpop.f32.mrf.mxu3 }
0x214c   :  { %v10165_v57 = vadd.f32 %v10520_v14, %v10164_v42 }
0x214e   :  { %v10222_v3 = vadd.f32 %v10221_v35, %v10165_v57 }
0x2150   :  { %v10266_v5 = vadd.f32 %v10265_v27, %v10222_v3 }
0x2152   :  { %v10310_v11 = vadd.f32 %v10309_v20, %v10266_v5 }
0x2153   :  { %v10172_v22 = vpop.f32.mrf.mxu2  ;;  %v10385_v25 = vpop.f32.mrf.mxu3 }
0x2154   :  { %v10173_v34 = vadd.f32 %v10520_v14, %v10172_v22 }
0x2156   :  { %v10226_v31 = vadd.f32 %v10225_v37, %v10173_v34 }
0x2158   :  { %v10271_v62 = vadd.f32 %v10270_v7, %v10226_v31 }
0x215a   :  { %v10316_v17 = vadd.f32 %v10315_v44, %v10271_v62 }
0x215b   :  { %v10348_v54 = vpop.f32.mrf.mxu2  ;;  %v10389_v0 = vpop.f32.mrf.mxu3 }
0x215c   :  { %v10349_v48 = vadd.f32 %v10348_v54, %v10298_v10 }
0x215e   :  { %v10386_v4 = vadd.f32 %v10385_v25, %v10349_v48 }
0x2160   :  { %10401 = vst.msk [vmem:[%s14534_s17] sm:$0xff] %vm10400_vm1, %v10386_v4 }
0x2163   :  { %v10352_v53 = vpop.f32.mrf.mxu2  ;;  %v10393_v36 = vpop.f32.mrf.mxu3 }
0x2164   :  { %v10353_v29 = vadd.f32 %v10352_v53, %v10304_v47 }
0x2166   :  { %v10390_v40 = vadd.f32 %v10389_v0, %v10353_v29 }
0x2168   :  { %10402 = vst.msk [vmem:[%s14534_s17 + $0x8] sm:$0xff] %vm10400_vm1, %v10390_v40 }
0x216b   :  { %v10356_v63 = vpop.f32.mrf.mxu2  ;;  %v10397_v6 = vpop.f32.mrf.mxu3 }
0x216c   :  { %v10357_v32 = vadd.f32 %v10356_v63, %v10310_v11 }
0x216e   :  { %v10394_v46 = vadd.f32 %v10393_v36, %v10357_v32 }
0x2170   :  { %10403 = vst.msk [vmem:[%s14534_s17 + $0x10] sm:$0xff] %vm10400_vm1, %v10394_v46 }
0x2173   :  { %v10360_v55 = vpop.f32.mrf.mxu2 }
0x2174   :  { %v10361_v45 = vadd.f32 %v10360_v55, %v10316_v17 }
0x2176   :  { %v10398_v59 = vadd.f32 %v10397_v6, %v10361_v45 }
0x2178   :  { %10404 = vst.msk [vmem:[%s14534_s17 + $0x18] sm:$0xff] %vm10400_vm1, %v10398_v59 }
0x2179   :  { %10409 = vsyncpa [#allocation3], 1 }
0x217a   :  { %10410 = vsyncpa [#allocation7], 1 }
0x217b   :  { %10411 = vsyncpa [#allocation10], 1 }
0x217c   :  { %10412 = vsyncpa [#allocation4], 1 }

</bundles_post_ra>
